<compile_context>
chip_gen: v6e
topology: v6e:2x2x1
jax: 0.10.0
libtpu: 0.0.40
codegen_flags: <defaults>
</compile_context>

<pallas_src>
import math
import jax
import jax.numpy as jnp
from jax import lax
from jax.experimental import pallas as pl
from jax.experimental.pallas import tpu as pltpu

LANE = 128


def _round_up(v, m):
    return (v + m - 1) // m * m


def _const_block_spec(shape):
    """BlockSpec for a grid-invariant operand; single-buffered when supported."""
    index_map = lambda n: (0,) * len(shape)
    try:
        return pl.BlockSpec(shape, index_map, pipeline_mode=pl.Buffered(1))
    except (TypeError, AttributeError):
        # Older JAX without pipeline_mode / Buffered: fall back to default
        # double buffering (costs ~0.6 MiB extra VMEM at Cp=128, still fine).
        return pl.BlockSpec(shape, index_map)


def _basic_block_kernel(xp_ref, id_ref, w1_ref, s1_ref, b1_ref,
                        w2_ref, s2_ref, b2_ref, o_ref,
                        pad2_ref, col_ref, acc_ref):
    """Fused BasicBlock for a block of `bb` images; channels padded to Cp=128.

    xp_ref  : (bb, H+2, W+2, Cp) bf16  spatially pre-padded input
    id_ref  : (bb, H*W, Cp)      f32   lane-aligned residual identity
    w*_ref  : (9*Cp, Cp)         bf16  im2col-packed conv weights (dy,dx,cin)xcout
    s*/b*   : (1, Cp)            f32   folded BatchNorm scale / bias
    o_ref   : (bb, H*W, Cp)      f32   output slab
    pad2_ref: (H+2, W+2, Cp)     bf16  scratch: zero-haloed conv2 input
    col_ref : (H, W, 3*Cp)       bf16  scratch: per-dy im2col staging (reused 3x)
    acc_ref : (H*W, Cp)          f32   scratch: MXU accumulator
    """
    bb = xp_ref.shape[0]
    Hp2, Wp2, Cp = pad2_ref.shape
    H, W = Hp2 - 2, Wp2 - 2
    Kd = 3 * Cp  # contraction depth per dy-slab

    def conv3x3(load_tap, w_ref):
        # Per-dy im2col: pack the 3 dx taps (already bf16, lane-dense, no casts)
        # into col_ref, then one K=3*Cp MXU matmul per dy, f32-accumulated.
        for dy in range(3):
            for dx in range(3):
                col_ref[:, :, dx * Cp:(dx + 1) * Cp] = load_tap(dy, dx)
            part = jnp.dot(col_ref[...].reshape(H * W, Kd),
                           w_ref[dy * Kd:(dy + 1) * Kd, :],
                           preferred_element_type=jnp.float32)
            if dy == 0:
                acc_ref[...] = part
            else:
                acc_ref[...] += part

    # Zero only the four thin border slabs of the conv2 staging buffer (the
    # interior is fully overwritten for every image).  Doing this every step
    # (not at program_id==0) keeps it safe when the "parallel" batch axis is
    # split across TensorCores.
    zrow = jnp.zeros((1, Wp2, Cp), jnp.bfloat16)
    zcol = jnp.zeros((Hp2, 1, Cp), jnp.bfloat16)
    pad2_ref[0:1, :, :] = zrow
    pad2_ref[H + 1:H + 2, :, :] = zrow
    pad2_ref[:, 0:1, :] = zcol
    pad2_ref[:, W + 1:W + 2, :] = zcol

    for i in range(bb):  # static unroll over the batch block
        # ---- conv1 -> bn1 -> hardtanh(0, 20) ----
        conv3x3(lambda dy, dx: xp_ref[i, dy:dy + H, dx:dx + W, :], w1_ref)
        y1 = jnp.clip(acc_ref[...] * s1_ref[...] + b1_ref[...], 0.0, 20.0)
        # Stage conv2 input (interior of the zero-haloed buffer), bf16 for MXU.
        pad2_ref[1:H + 1, 1:W + 1, :] = y1.reshape(H, W, Cp).astype(jnp.bfloat16)

        # ---- conv2 -> bn2 -> +identity -> hardtanh(0, 20) ----
        conv3x3(lambda dy, dx: pad2_ref[dy:dy + H, dx:dx + W, :], w2_ref)
        y2 = jnp.clip(acc_ref[...] * s2_ref[...] + b2_ref[...] + id_ref[i],
                      0.0, 20.0)
        o_ref[i, :, :] = y2.astype(o_ref.dtype)


def basic_block_forward(x_nchw, params, eps=1e-5, batch_block=None):
    """Runs the fused BasicBlock kernel.  x_nchw: (N, C, H, W) float32."""
    N, C, H, W = x_nchw.shape
    Cp = _round_up(max(C, LANE), LANE)   # lane-dense channel padding
    K = 9 * Cp

    # Batch block size: amortizes per-step pipeline overhead for larger N while
    # still leaving >=2 grid steps so both cores / the pipeline get work.
    if batch_block is None:
        batch_block = 1
        for cand in (4, 2):
            if N % cand == 0 and (N // cand) >= 2:
                batch_block = cand
                break
    assert N % batch_block == 0, "batch_block must divide N"
    bb = batch_block

    # Layout work (done once per call; in a full network keep activations in
    # channel-padded NHWC between blocks and pre-pack weights at init).
    x = jnp.transpose(x_nchw, (0, 2, 3, 1)).astype(jnp.float32)     # NHWC
    xc = jnp.pad(x, ((0, 0), (0, 0), (0, 0), (0, Cp - C)))          # (N,H,W,Cp) f32
    ident = xc.reshape(N, H * W, Cp)                                 # aligned f32 residual
    xp = jnp.pad(xc, ((0, 0), (1, 1), (1, 1), (0, 0))).astype(jnp.bfloat16)

    # OIHW -> im2col layout (dy, dx, cin, cout) -> (9*Cp, Cp), bf16 for the MXU.
    # Zero padding of the extra cin/cout rows/cols keeps padded channels inert.
    def pack_w(w):
        w = jnp.transpose(w, (2, 3, 1, 0)).astype(jnp.float32)       # (3,3,C,C)
        w = jnp.pad(w, ((0, 0), (0, 0), (0, Cp - C), (0, Cp - C)))   # (3,3,Cp,Cp)
        return w.reshape(K, Cp).astype(jnp.bfloat16)

    w1 = pack_w(params["w1"])
    w2 = pack_w(params["w2"])

    # Fold BatchNorm (inference semantics) into scale/bias, kept in f32;
    # padded channels get scale=0, bias=0.
    def fold_bn(gamma, beta, mean, var):
        scale = gamma / jnp.sqrt(var + eps)
        bias = beta - mean * scale
        scale = jnp.pad(scale.astype(jnp.float32), (0, Cp - C)).reshape(1, Cp)
        bias = jnp.pad(bias.astype(jnp.float32), (0, Cp - C)).reshape(1, Cp)
        return scale, bias

    s1, b1 = fold_bn(params["g1"], params["b1"], params["m1"], params["v1"])
    s2, b2 = fold_bn(params["g2"], params["b2"], params["m2"], params["v2"])

    out_flat = pl.pallas_call(
        _basic_block_kernel,
        out_shape=jax.ShapeDtypeStruct((N, H * W, Cp), jnp.float32),
        grid_spec=pltpu.PrefetchScalarGridSpec(
            num_scalar_prefetch=0,
            grid=(N // bb,),
            in_specs=[
                pl.BlockSpec((bb, H + 2, W + 2, Cp), lambda n: (n, 0, 0, 0)),
                pl.BlockSpec((bb, H * W, Cp), lambda n: (n, 0, 0)),
                _const_block_spec((K, Cp)),      # w1
                _const_block_spec((1, Cp)),      # s1
                _const_block_spec((1, Cp)),      # b1
                _const_block_spec((K, Cp)),      # w2
                _const_block_spec((1, Cp)),      # s2
                _const_block_spec((1, Cp)),      # b2
            ],
            out_specs=pl.BlockSpec((bb, H * W, Cp), lambda n: (n, 0, 0)),
            scratch_shapes=[
                pltpu.VMEM((H + 2, W + 2, Cp), jnp.bfloat16),   # conv2 halo buf
                pltpu.VMEM((H, W, 3 * Cp), jnp.bfloat16),       # per-dy im2col
                pltpu.VMEM((H * W, Cp), jnp.float32),           # MXU accumulator
            ],
        ),
        compiler_params=pltpu.CompilerParams(
            dimension_semantics=("parallel",),
            vmem_limit_bytes=32 * 1024 * 1024,
        ),
    )(xp, ident, w1, s1, b1, w2, s2, b2)

    # Drop channel padding; (N, H*W, Cp) -> NHWC -> NCHW.
    out = out_flat.reshape(N, H, W, Cp)[..., :C]
    return jnp.transpose(out, (0, 3, 1, 2))


def _reference(x, params, eps=1e-5):
    """Pure-JAX f32 reference mirroring the PyTorch forward (BN in eval mode)."""
    def conv(inp, w):
        dn = lax.conv_dimension_numbers(inp.shape, w.shape,
                                        ("NCHW", "OIHW", "NCHW"))
        return lax.conv_general_dilated(inp, w, (1, 1), [(1, 1), (1, 1)],
                                        dimension_numbers=dn)

    def bn(inp, g, b, m, v):
        g, b, m, v = (a[None, :, None, None] for a in (g, b, m, v))
        return (inp - m) / jnp.sqrt(v + eps) * g + b

    out = conv(x, params["w1"])
    out = bn(out, params["g1"], params["b1"], params["m1"], params["v1"])
    out = jnp.clip(out, 0.0, 20.0)
    out = conv(out, params["w2"])
    out = bn(out, params["g2"], params["b2"], params["m2"], params["v2"])
    out = out + x
    return jnp.clip(out, 0.0, 20.0)


if __name__ == "__main__":
    # Small shapes: batch=2, inplanes=planes=4, spatial=16x16 (stride=1, no downsample).
    N, C, H, W = 2, 4, 16, 16

    key = jax.random.PRNGKey(0)
    ks = jax.random.split(key, 11)

    fan_in = C * 3 * 3
    std = math.sqrt(2.0 / fan_in)  # kaiming-normal-like init
    params = {
        "w1": jax.random.normal(ks[0], (C, C, 3, 3), jnp.float32) * std,
        "w2": jax.random.normal(ks[1], (C, C, 3, 3), jnp.float32) * std,
        "g1": jax.random.uniform(ks[2], (C,), jnp.float32, 0.5, 1.5),
        "b1": jax.random.normal(ks[3], (C,), jnp.float32) * 0.1,
        "m1": jax.random.normal(ks[4], (C,), jnp.float32) * 0.1,
        "v1": jax.random.uniform(ks[5], (C,), jnp.float32, 0.5, 1.5),
        "g2": jax.random.uniform(ks[6], (C,), jnp.float32, 0.5, 1.5),
        "b2": jax.random.normal(ks[7], (C,), jnp.float32) * 0.1,
        "m2": jax.random.normal(ks[8], (C,), jnp.float32) * 0.1,
        "v2": jax.random.uniform(ks[9], (C,), jnp.float32, 0.5, 1.5),
    }
    x = jax.random.normal(ks[10], (N, C, H, W), jnp.float32)

    out = basic_block_forward(x, params)
    out = jax.block_until_ready(out)

    ref = jax.block_until_ready(_reference(x, params))
    assert out.shape == (N, C, H, W)
    # Conv inputs / y1 are bf16 on the MXU (f32 accumulation; BN, residual and
    # clip in f32; identity exact f32), so the tolerance is looser than pure f32.
    assert jnp.allclose(out, ref, atol=0.15, rtol=0.05), (
        f"max abs err = {jnp.max(jnp.abs(out - ref))}")

    print("KERNEL_OK")
</pallas_src>

<mosaic_0001>
module attributes {stable_mosaic.version = 11 : i64} {
  func.func @_basic_block_kernel(%arg0: i32, %arg1: memref<1x18x18x128xbf16, #tpu.memory_space<vmem>>, %arg2: memref<1x256x128xf32, #tpu.memory_space<vmem>>, %arg3: memref<1152x128xbf16, #tpu.memory_space<vmem>>, %arg4: memref<1x128xf32, #tpu.memory_space<vmem>>, %arg5: memref<1x128xf32, #tpu.memory_space<vmem>>, %arg6: memref<1152x128xbf16, #tpu.memory_space<vmem>>, %arg7: memref<1x128xf32, #tpu.memory_space<vmem>>, %arg8: memref<1x128xf32, #tpu.memory_space<vmem>>, %arg9: memref<1x256x128xf32, #tpu.memory_space<vmem>>, %arg10: memref<18x18x128xbf16, #tpu.memory_space<vmem>>, %arg11: memref<16x16x384xbf16, #tpu.memory_space<vmem>>, %arg12: memref<256x128xf32, #tpu.memory_space<vmem>>) attributes {dimension_semantics = [#tpu.dimension_semantics<parallel>], iteration_bounds = array<i64: 2>, scalar_prefetch = 0 : i64, scratch_operands = 3 : i64, tpu.core_type = #tpu.core_type<tc>, window_params = [{transform_indices = @transform_0, window_bounds = array<i64: 1, 18, 18, 128>}, {transform_indices = @transform_1, window_bounds = array<i64: 1, 256, 128>}, {pipeline_mode = #tpu.pipeline_mode<synchronous>, transform_indices = @transform_2, window_bounds = array<i64: 1152, 128>}, {pipeline_mode = #tpu.pipeline_mode<synchronous>, transform_indices = @transform_3, window_bounds = array<i64: 1, 128>}, {pipeline_mode = #tpu.pipeline_mode<synchronous>, transform_indices = @transform_4, window_bounds = array<i64: 1, 128>}, {pipeline_mode = #tpu.pipeline_mode<synchronous>, transform_indices = @transform_5, window_bounds = array<i64: 1152, 128>}, {pipeline_mode = #tpu.pipeline_mode<synchronous>, transform_indices = @transform_6, window_bounds = array<i64: 1, 128>}, {pipeline_mode = #tpu.pipeline_mode<synchronous>, transform_indices = @transform_7, window_bounds = array<i64: 1, 128>}, {transform_indices = @transform_8, window_bounds = array<i64: 1, 256, 128>}]} {
    %cst = arith.constant 0.000000e+00 : bf16
    %0 = vector.broadcast %cst : bf16 to vector<1x18x128xbf16>
    %cst_0 = arith.constant 0.000000e+00 : bf16
    %1 = vector.broadcast %cst_0 : bf16 to vector<18x1x128xbf16>
    %c0 = arith.constant 0 : index
    %c0_1 = arith.constant 0 : index
    %c0_2 = arith.constant 0 : index
    %2 = vector.load %arg10[%c0, %c0_1, %c0_2] : memref<18x18x128xbf16, #tpu.memory_space<vmem>>, vector<1x18x128xbf16>
    tpu.vector_store %arg10[%c0, %c0_1, %c0_2], %0 {strides = array<i32>} : memref<18x18x128xbf16, #tpu.memory_space<vmem>>, vector<1x18x128xbf16>,
    %c17 = arith.constant 17 : index
    %c0_3 = arith.constant 0 : index
    %c0_4 = arith.constant 0 : index
    %3 = vector.load %arg10[%c17, %c0_3, %c0_4] : memref<18x18x128xbf16, #tpu.memory_space<vmem>>, vector<1x18x128xbf16>
    tpu.vector_store %arg10[%c17, %c0_3, %c0_4], %0 {strides = array<i32>} : memref<18x18x128xbf16, #tpu.memory_space<vmem>>, vector<1x18x128xbf16>,
    %c0_5 = arith.constant 0 : index
    %c0_6 = arith.constant 0 : index
    %c0_7 = arith.constant 0 : index
    %4 = vector.load %arg10[%c0_5, %c0_6, %c0_7] : memref<18x18x128xbf16, #tpu.memory_space<vmem>>, vector<18x1x128xbf16>
    tpu.vector_store %arg10[%c0_5, %c0_6, %c0_7], %1 {strides = array<i32>} : memref<18x18x128xbf16, #tpu.memory_space<vmem>>, vector<18x1x128xbf16>,
    %c0_8 = arith.constant 0 : index
    %c17_9 = arith.constant 17 : index
    %c0_10 = arith.constant 0 : index
    %5 = vector.load %arg10[%c0_8, %c17_9, %c0_10] : memref<18x18x128xbf16, #tpu.memory_space<vmem>>, vector<18x1x128xbf16>
    tpu.vector_store %arg10[%c0_8, %c17_9, %c0_10], %1 {strides = array<i32>} : memref<18x18x128xbf16, #tpu.memory_space<vmem>>, vector<18x1x128xbf16>,
    %c0_11 = arith.constant 0 : index
    %c0_12 = arith.constant 0 : index
    %c0_13 = arith.constant 0 : index
    %c0_14 = arith.constant 0 : index
    %6 = vector.load %arg1[%c0_11, %c0_12, %c0_13, %c0_14] : memref<1x18x18x128xbf16, #tpu.memory_space<vmem>>, vector<1x16x16x128xbf16>
    %7 = vector.shape_cast %6 : vector<1x16x16x128xbf16> to vector<16x16x128xbf16>
    %c0_15 = arith.constant 0 : index
    %c0_16 = arith.constant 0 : index
    %c0_17 = arith.constant 0 : index
    %8 = vector.load %arg11[%c0_15, %c0_16, %c0_17] : memref<16x16x384xbf16, #tpu.memory_space<vmem>>, vector<16x16x128xbf16>
    tpu.vector_store %arg11[%c0_15, %c0_16, %c0_17], %7 {strides = array<i32>} : memref<16x16x384xbf16, #tpu.memory_space<vmem>>, vector<16x16x128xbf16>,
    %c0_18 = arith.constant 0 : index
    %c0_19 = arith.constant 0 : index
    %c1 = arith.constant 1 : index
    %c0_20 = arith.constant 0 : index
    %9 = vector.load %arg1[%c0_18, %c0_19, %c1, %c0_20] : memref<1x18x18x128xbf16, #tpu.memory_space<vmem>>, vector<1x16x16x128xbf16>
    %10 = vector.shape_cast %9 : vector<1x16x16x128xbf16> to vector<16x16x128xbf16>
    %c0_21 = arith.constant 0 : index
    %c0_22 = arith.constant 0 : index
    %c128 = arith.constant 128 : index
    %11 = vector.load %arg11[%c0_21, %c0_22, %c128] : memref<16x16x384xbf16, #tpu.memory_space<vmem>>, vector<16x16x128xbf16>
    tpu.vector_store %arg11[%c0_21, %c0_22, %c128], %10 {strides = array<i32>} : memref<16x16x384xbf16, #tpu.memory_space<vmem>>, vector<16x16x128xbf16>,
    %c0_23 = arith.constant 0 : index
    %c0_24 = arith.constant 0 : index
    %c2 = arith.constant 2 : index
    %c0_25 = arith.constant 0 : index
    %12 = vector.load %arg1[%c0_23, %c0_24, %c2, %c0_25] : memref<1x18x18x128xbf16, #tpu.memory_space<vmem>>, vector<1x16x16x128xbf16>
    %13 = vector.shape_cast %12 : vector<1x16x16x128xbf16> to vector<16x16x128xbf16>
    %c0_26 = arith.constant 0 : index
    %c0_27 = arith.constant 0 : index
    %c256 = arith.constant 256 : index
    %14 = vector.load %arg11[%c0_26, %c0_27, %c256] : memref<16x16x384xbf16, #tpu.memory_space<vmem>>, vector<16x16x128xbf16>
    tpu.vector_store %arg11[%c0_26, %c0_27, %c256], %13 {strides = array<i32>} : memref<16x16x384xbf16, #tpu.memory_space<vmem>>, vector<16x16x128xbf16>,
    %c0_28 = arith.constant 0 : index
    %c0_29 = arith.constant 0 : index
    %c0_30 = arith.constant 0 : index
    %15 = vector.load %arg11[%c0_28, %c0_29, %c0_30] : memref<16x16x384xbf16, #tpu.memory_space<vmem>>, vector<16x16x384xbf16>
    %16 = vector.shape_cast %15 : vector<16x16x384xbf16> to vector<256x384xbf16>
    %c0_31 = arith.constant 0 : index
    %c0_32 = arith.constant 0 : index
    %17 = vector.load %arg3[%c0_31, %c0_32] : memref<1152x128xbf16, #tpu.memory_space<vmem>>, vector<384x128xbf16>
    %cst_33 = arith.constant dense<0.000000e+00> : vector<256x128xf32>
    %18 = tpu.matmul %16, %17, %cst_33 {dimension_numbers = #tpu.dot_dimension_numbers<[1], [0], [0], [1], [0, 0, 1, 1], [], []>} : vector<256x384xbf16>, vector<384x128xbf16>, vector<256x128xf32> -> vector<256x128xf32>
    %c0_34 = arith.constant 0 : index
    %c0_35 = arith.constant 0 : index
    %19 = vector.load %arg12[%c0_34, %c0_35] : memref<256x128xf32, #tpu.memory_space<vmem>>, vector<256x128xf32>
    tpu.vector_store %arg12[%c0_34, %c0_35], %18 {strides = array<i32>} : memref<256x128xf32, #tpu.memory_space<vmem>>, vector<256x128xf32>,
    %c0_36 = arith.constant 0 : index
    %c1_37 = arith.constant 1 : index
    %c0_38 = arith.constant 0 : index
    %c0_39 = arith.constant 0 : index
    %20 = vector.load %arg1[%c0_36, %c1_37, %c0_38, %c0_39] : memref<1x18x18x128xbf16, #tpu.memory_space<vmem>>, vector<1x16x16x128xbf16>
    %21 = vector.shape_cast %20 : vector<1x16x16x128xbf16> to vector<16x16x128xbf16>
    %c0_40 = arith.constant 0 : index
    %c0_41 = arith.constant 0 : index
    %c0_42 = arith.constant 0 : index
    %22 = vector.load %arg11[%c0_40, %c0_41, %c0_42] : memref<16x16x384xbf16, #tpu.memory_space<vmem>>, vector<16x16x128xbf16>
    tpu.vector_store %arg11[%c0_40, %c0_41, %c0_42], %21 {strides = array<i32>} : memref<16x16x384xbf16, #tpu.memory_space<vmem>>, vector<16x16x128xbf16>,
    %c0_43 = arith.constant 0 : index
    %c1_44 = arith.constant 1 : index
    %c1_45 = arith.constant 1 : index
    %c0_46 = arith.constant 0 : index
    %23 = vector.load %arg1[%c0_43, %c1_44, %c1_45, %c0_46] : memref<1x18x18x128xbf16, #tpu.memory_space<vmem>>, vector<1x16x16x128xbf16>
    %24 = vector.shape_cast %23 : vector<1x16x16x128xbf16> to vector<16x16x128xbf16>
    %c0_47 = arith.constant 0 : index
    %c0_48 = arith.constant 0 : index
    %c128_49 = arith.constant 128 : index
    %25 = vector.load %arg11[%c0_47, %c0_48, %c128_49] : memref<16x16x384xbf16, #tpu.memory_space<vmem>>, vector<16x16x128xbf16>
    tpu.vector_store %arg11[%c0_47, %c0_48, %c128_49], %24 {strides = array<i32>} : memref<16x16x384xbf16, #tpu.memory_space<vmem>>, vector<16x16x128xbf16>,
    %c0_50 = arith.constant 0 : index
    %c1_51 = arith.constant 1 : index
    %c2_52 = arith.constant 2 : index
    %c0_53 = arith.constant 0 : index
    %26 = vector.load %arg1[%c0_50, %c1_51, %c2_52, %c0_53] : memref<1x18x18x128xbf16, #tpu.memory_space<vmem>>, vector<1x16x16x128xbf16>
    %27 = vector.shape_cast %26 : vector<1x16x16x128xbf16> to vector<16x16x128xbf16>
    %c0_54 = arith.constant 0 : index
    %c0_55 = arith.constant 0 : index
    %c256_56 = arith.constant 256 : index
    %28 = vector.load %arg11[%c0_54, %c0_55, %c256_56] : memref<16x16x384xbf16, #tpu.memory_space<vmem>>, vector<16x16x128xbf16>
    tpu.vector_store %arg11[%c0_54, %c0_55, %c256_56], %27 {strides = array<i32>} : memref<16x16x384xbf16, #tpu.memory_space<vmem>>, vector<16x16x128xbf16>,
    %c0_57 = arith.constant 0 : index
    %c0_58 = arith.constant 0 : index
    %c0_59 = arith.constant 0 : index
    %29 = vector.load %arg11[%c0_57, %c0_58, %c0_59] : memref<16x16x384xbf16, #tpu.memory_space<vmem>>, vector<16x16x384xbf16>
    %30 = vector.shape_cast %29 : vector<16x16x384xbf16> to vector<256x384xbf16>
    %c384 = arith.constant 384 : index
    %c0_60 = arith.constant 0 : index
    %31 = vector.load %arg3[%c384, %c0_60] : memref<1152x128xbf16, #tpu.memory_space<vmem>>, vector<384x128xbf16>
    %cst_61 = arith.constant dense<0.000000e+00> : vector<256x128xf32>
    %32 = tpu.matmul %30, %31, %cst_61 {dimension_numbers = #tpu.dot_dimension_numbers<[1], [0], [0], [1], [0, 0, 1, 1], [], []>} : vector<256x384xbf16>, vector<384x128xbf16>, vector<256x128xf32> -> vector<256x128xf32>
    %c0_62 = arith.constant 0 : index
    %c0_63 = arith.constant 0 : index
    %33 = vector.load %arg12[%c0_62, %c0_63] : memref<256x128xf32, #tpu.memory_space<vmem>>, vector<256x128xf32>
    %34 = arith.addf %33, %32 : vector<256x128xf32>
    %c0_64 = arith.constant 0 : index
    %c0_65 = arith.constant 0 : index
    %35 = vector.load %arg12[%c0_64, %c0_65] : memref<256x128xf32, #tpu.memory_space<vmem>>, vector<256x128xf32>
    tpu.vector_store %arg12[%c0_64, %c0_65], %34 {strides = array<i32>} : memref<256x128xf32, #tpu.memory_space<vmem>>, vector<256x128xf32>,
    %c0_66 = arith.constant 0 : index
    %c2_67 = arith.constant 2 : index
    %c0_68 = arith.constant 0 : index
    %c0_69 = arith.constant 0 : index
    %36 = vector.load %arg1[%c0_66, %c2_67, %c0_68, %c0_69] : memref<1x18x18x128xbf16, #tpu.memory_space<vmem>>, vector<1x16x16x128xbf16>
    %37 = vector.shape_cast %36 : vector<1x16x16x128xbf16> to vector<16x16x128xbf16>
    %c0_70 = arith.constant 0 : index
    %c0_71 = arith.constant 0 : index
    %c0_72 = arith.constant 0 : index
    %38 = vector.load %arg11[%c0_70, %c0_71, %c0_72] : memref<16x16x384xbf16, #tpu.memory_space<vmem>>, vector<16x16x128xbf16>
    tpu.vector_store %arg11[%c0_70, %c0_71, %c0_72], %37 {strides = array<i32>} : memref<16x16x384xbf16, #tpu.memory_space<vmem>>, vector<16x16x128xbf16>,
    %c0_73 = arith.constant 0 : index
    %c2_74 = arith.constant 2 : index
    %c1_75 = arith.constant 1 : index
    %c0_76 = arith.constant 0 : index
    %39 = vector.load %arg1[%c0_73, %c2_74, %c1_75, %c0_76] : memref<1x18x18x128xbf16, #tpu.memory_space<vmem>>, vector<1x16x16x128xbf16>
    %40 = vector.shape_cast %39 : vector<1x16x16x128xbf16> to vector<16x16x128xbf16>
    %c0_77 = arith.constant 0 : index
    %c0_78 = arith.constant 0 : index
    %c128_79 = arith.constant 128 : index
    %41 = vector.load %arg11[%c0_77, %c0_78, %c128_79] : memref<16x16x384xbf16, #tpu.memory_space<vmem>>, vector<16x16x128xbf16>
    tpu.vector_store %arg11[%c0_77, %c0_78, %c128_79], %40 {strides = array<i32>} : memref<16x16x384xbf16, #tpu.memory_space<vmem>>, vector<16x16x128xbf16>,
    %c0_80 = arith.constant 0 : index
    %c2_81 = arith.constant 2 : index
    %c2_82 = arith.constant 2 : index
    %c0_83 = arith.constant 0 : index
    %42 = vector.load %arg1[%c0_80, %c2_81, %c2_82, %c0_83] : memref<1x18x18x128xbf16, #tpu.memory_space<vmem>>, vector<1x16x16x128xbf16>
    %43 = vector.shape_cast %42 : vector<1x16x16x128xbf16> to vector<16x16x128xbf16>
    %c0_84 = arith.constant 0 : index
    %c0_85 = arith.constant 0 : index
    %c256_86 = arith.constant 256 : index
    %44 = vector.load %arg11[%c0_84, %c0_85, %c256_86] : memref<16x16x384xbf16, #tpu.memory_space<vmem>>, vector<16x16x128xbf16>
    tpu.vector_store %arg11[%c0_84, %c0_85, %c256_86], %43 {strides = array<i32>} : memref<16x16x384xbf16, #tpu.memory_space<vmem>>, vector<16x16x128xbf16>,
    %c0_87 = arith.constant 0 : index
    %c0_88 = arith.constant 0 : index
    %c0_89 = arith.constant 0 : index
    %45 = vector.load %arg11[%c0_87, %c0_88, %c0_89] : memref<16x16x384xbf16, #tpu.memory_space<vmem>>, vector<16x16x384xbf16>
    %46 = vector.shape_cast %45 : vector<16x16x384xbf16> to vector<256x384xbf16>
    %c768 = arith.constant 768 : index
    %c0_90 = arith.constant 0 : index
    %47 = vector.load %arg3[%c768, %c0_90] : memref<1152x128xbf16, #tpu.memory_space<vmem>>, vector<384x128xbf16>
    %cst_91 = arith.constant dense<0.000000e+00> : vector<256x128xf32>
    %48 = tpu.matmul %46, %47, %cst_91 {dimension_numbers = #tpu.dot_dimension_numbers<[1], [0], [0], [1], [0, 0, 1, 1], [], []>} : vector<256x384xbf16>, vector<384x128xbf16>, vector<256x128xf32> -> vector<256x128xf32>
    %c0_92 = arith.constant 0 : index
    %c0_93 = arith.constant 0 : index
    %49 = vector.load %arg12[%c0_92, %c0_93] : memref<256x128xf32, #tpu.memory_space<vmem>>, vector<256x128xf32>
    %50 = arith.addf %49, %48 : vector<256x128xf32>
    %c0_94 = arith.constant 0 : index
    %c0_95 = arith.constant 0 : index
    %51 = vector.load %arg12[%c0_94, %c0_95] : memref<256x128xf32, #tpu.memory_space<vmem>>, vector<256x128xf32>
    tpu.vector_store %arg12[%c0_94, %c0_95], %50 {strides = array<i32>} : memref<256x128xf32, #tpu.memory_space<vmem>>, vector<256x128xf32>,
    %c0_96 = arith.constant 0 : index
    %c0_97 = arith.constant 0 : index
    %52 = vector.load %arg12[%c0_96, %c0_97] : memref<256x128xf32, #tpu.memory_space<vmem>>, vector<256x128xf32>
    %c0_98 = arith.constant 0 : index
    %c0_99 = arith.constant 0 : index
    %53 = vector.load %arg4[%c0_98, %c0_99] : memref<1x128xf32, #tpu.memory_space<vmem>>, vector<1x128xf32>
    %54 = vector.broadcast %53 : vector<1x128xf32> to vector<256x128xf32>
    %55 = arith.mulf %52, %54 : vector<256x128xf32>
    %c0_100 = arith.constant 0 : index
    %c0_101 = arith.constant 0 : index
    %56 = vector.load %arg5[%c0_100, %c0_101] : memref<1x128xf32, #tpu.memory_space<vmem>>, vector<1x128xf32>
    %57 = vector.broadcast %56 : vector<1x128xf32> to vector<256x128xf32>
    %58 = arith.addf %55, %57 : vector<256x128xf32>
    %cst_102 = arith.constant 0.000000e+00 : f32
    %cst_103 = arith.constant 2.000000e+01 : f32
    %59 = vector.broadcast %cst_102 : f32 to vector<256x128xf32>
    %60 = arith.maximumf %59, %58 : vector<256x128xf32>
    %61 = vector.broadcast %cst_103 : f32 to vector<256x128xf32>
    %62 = arith.minimumf %61, %60 : vector<256x128xf32>
    %63 = vector.shape_cast %62 : vector<256x128xf32> to vector<16x16x128xf32>
    %64 = arith.truncf %63 : vector<16x16x128xf32> to vector<16x16x128xbf16>
    %c1_104 = arith.constant 1 : index
    %c1_105 = arith.constant 1 : index
    %c0_106 = arith.constant 0 : index
    %65 = vector.load %arg10[%c1_104, %c1_105, %c0_106] : memref<18x18x128xbf16, #tpu.memory_space<vmem>>, vector<16x16x128xbf16>
    tpu.vector_store %arg10[%c1_104, %c1_105, %c0_106], %64 {strides = array<i32>} : memref<18x18x128xbf16, #tpu.memory_space<vmem>>, vector<16x16x128xbf16>,
    %c0_107 = arith.constant 0 : index
    %c0_108 = arith.constant 0 : index
    %c0_109 = arith.constant 0 : index
    %66 = vector.load %arg10[%c0_107, %c0_108, %c0_109] : memref<18x18x128xbf16, #tpu.memory_space<vmem>>, vector<16x16x128xbf16>
    %c0_110 = arith.constant 0 : index
    %c0_111 = arith.constant 0 : index
    %c0_112 = arith.constant 0 : index
    %67 = vector.load %arg11[%c0_110, %c0_111, %c0_112] : memref<16x16x384xbf16, #tpu.memory_space<vmem>>, vector<16x16x128xbf16>
    tpu.vector_store %arg11[%c0_110, %c0_111, %c0_112], %66 {strides = array<i32>} : memref<16x16x384xbf16, #tpu.memory_space<vmem>>, vector<16x16x128xbf16>,
    %c0_113 = arith.constant 0 : index
    %c1_114 = arith.constant 1 : index
    %c0_115 = arith.constant 0 : index
    %68 = vector.load %arg10[%c0_113, %c1_114, %c0_115] : memref<18x18x128xbf16, #tpu.memory_space<vmem>>, vector<16x16x128xbf16>
    %c0_116 = arith.constant 0 : index
    %c0_117 = arith.constant 0 : index
    %c128_118 = arith.constant 128 : index
    %69 = vector.load %arg11[%c0_116, %c0_117, %c128_118] : memref<16x16x384xbf16, #tpu.memory_space<vmem>>, vector<16x16x128xbf16>
    tpu.vector_store %arg11[%c0_116, %c0_117, %c128_118], %68 {strides = array<i32>} : memref<16x16x384xbf16, #tpu.memory_space<vmem>>, vector<16x16x128xbf16>,
    %c0_119 = arith.constant 0 : index
    %c2_120 = arith.constant 2 : index
    %c0_121 = arith.constant 0 : index
    %70 = vector.load %arg10[%c0_119, %c2_120, %c0_121] : memref<18x18x128xbf16, #tpu.memory_space<vmem>>, vector<16x16x128xbf16>
    %c0_122 = arith.constant 0 : index
    %c0_123 = arith.constant 0 : index
    %c256_124 = arith.constant 256 : index
    %71 = vector.load %arg11[%c0_122, %c0_123, %c256_124] : memref<16x16x384xbf16, #tpu.memory_space<vmem>>, vector<16x16x128xbf16>
    tpu.vector_store %arg11[%c0_122, %c0_123, %c256_124], %70 {strides = array<i32>} : memref<16x16x384xbf16, #tpu.memory_space<vmem>>, vector<16x16x128xbf16>,
    %c0_125 = arith.constant 0 : index
    %c0_126 = arith.constant 0 : index
    %c0_127 = arith.constant 0 : index
    %72 = vector.load %arg11[%c0_125, %c0_126, %c0_127] : memref<16x16x384xbf16, #tpu.memory_space<vmem>>, vector<16x16x384xbf16>
    %73 = vector.shape_cast %72 : vector<16x16x384xbf16> to vector<256x384xbf16>
    %c0_128 = arith.constant 0 : index
    %c0_129 = arith.constant 0 : index
    %74 = vector.load %arg6[%c0_128, %c0_129] : memref<1152x128xbf16, #tpu.memory_space<vmem>>, vector<384x128xbf16>
    %cst_130 = arith.constant dense<0.000000e+00> : vector<256x128xf32>
    %75 = tpu.matmul %73, %74, %cst_130 {dimension_numbers = #tpu.dot_dimension_numbers<[1], [0], [0], [1], [0, 0, 1, 1], [], []>} : vector<256x384xbf16>, vector<384x128xbf16>, vector<256x128xf32> -> vector<256x128xf32>
    %c0_131 = arith.constant 0 : index
    %c0_132 = arith.constant 0 : index
    %76 = vector.load %arg12[%c0_131, %c0_132] : memref<256x128xf32, #tpu.memory_space<vmem>>, vector<256x128xf32>
    tpu.vector_store %arg12[%c0_131, %c0_132], %75 {strides = array<i32>} : memref<256x128xf32, #tpu.memory_space<vmem>>, vector<256x128xf32>,
    %c1_133 = arith.constant 1 : index
    %c0_134 = arith.constant 0 : index
    %c0_135 = arith.constant 0 : index
    %77 = vector.load %arg10[%c1_133, %c0_134, %c0_135] : memref<18x18x128xbf16, #tpu.memory_space<vmem>>, vector<16x16x128xbf16>
    %c0_136 = arith.constant 0 : index
    %c0_137 = arith.constant 0 : index
    %c0_138 = arith.constant 0 : index
    %78 = vector.load %arg11[%c0_136, %c0_137, %c0_138] : memref<16x16x384xbf16, #tpu.memory_space<vmem>>, vector<16x16x128xbf16>
    tpu.vector_store %arg11[%c0_136, %c0_137, %c0_138], %77 {strides = array<i32>} : memref<16x16x384xbf16, #tpu.memory_space<vmem>>, vector<16x16x128xbf16>,
    %c1_139 = arith.constant 1 : index
    %c1_140 = arith.constant 1 : index
    %c0_141 = arith.constant 0 : index
    %79 = vector.load %arg10[%c1_139, %c1_140, %c0_141] : memref<18x18x128xbf16, #tpu.memory_space<vmem>>, vector<16x16x128xbf16>
    %c0_142 = arith.constant 0 : index
    %c0_143 = arith.constant 0 : index
    %c128_144 = arith.constant 128 : index
    %80 = vector.load %arg11[%c0_142, %c0_143, %c128_144] : memref<16x16x384xbf16, #tpu.memory_space<vmem>>, vector<16x16x128xbf16>
    tpu.vector_store %arg11[%c0_142, %c0_143, %c128_144], %79 {strides = array<i32>} : memref<16x16x384xbf16, #tpu.memory_space<vmem>>, vector<16x16x128xbf16>,
    %c1_145 = arith.constant 1 : index
    %c2_146 = arith.constant 2 : index
    %c0_147 = arith.constant 0 : index
    %81 = vector.load %arg10[%c1_145, %c2_146, %c0_147] : memref<18x18x128xbf16, #tpu.memory_space<vmem>>, vector<16x16x128xbf16>
    %c0_148 = arith.constant 0 : index
    %c0_149 = arith.constant 0 : index
    %c256_150 = arith.constant 256 : index
    %82 = vector.load %arg11[%c0_148, %c0_149, %c256_150] : memref<16x16x384xbf16, #tpu.memory_space<vmem>>, vector<16x16x128xbf16>
    tpu.vector_store %arg11[%c0_148, %c0_149, %c256_150], %81 {strides = array<i32>} : memref<16x16x384xbf16, #tpu.memory_space<vmem>>, vector<16x16x128xbf16>,
    %c0_151 = arith.constant 0 : index
    %c0_152 = arith.constant 0 : index
    %c0_153 = arith.constant 0 : index
    %83 = vector.load %arg11[%c0_151, %c0_152, %c0_153] : memref<16x16x384xbf16, #tpu.memory_space<vmem>>, vector<16x16x384xbf16>
    %84 = vector.shape_cast %83 : vector<16x16x384xbf16> to vector<256x384xbf16>
    %c384_154 = arith.constant 384 : index
    %c0_155 = arith.constant 0 : index
    %85 = vector.load %arg6[%c384_154, %c0_155] : memref<1152x128xbf16, #tpu.memory_space<vmem>>, vector<384x128xbf16>
    %cst_156 = arith.constant dense<0.000000e+00> : vector<256x128xf32>
    %86 = tpu.matmul %84, %85, %cst_156 {dimension_numbers = #tpu.dot_dimension_numbers<[1], [0], [0], [1], [0, 0, 1, 1], [], []>} : vector<256x384xbf16>, vector<384x128xbf16>, vector<256x128xf32> -> vector<256x128xf32>
    %c0_157 = arith.constant 0 : index
    %c0_158 = arith.constant 0 : index
    %87 = vector.load %arg12[%c0_157, %c0_158] : memref<256x128xf32, #tpu.memory_space<vmem>>, vector<256x128xf32>
    %88 = arith.addf %87, %86 : vector<256x128xf32>
    %c0_159 = arith.constant 0 : index
    %c0_160 = arith.constant 0 : index
    %89 = vector.load %arg12[%c0_159, %c0_160] : memref<256x128xf32, #tpu.memory_space<vmem>>, vector<256x128xf32>
    tpu.vector_store %arg12[%c0_159, %c0_160], %88 {strides = array<i32>} : memref<256x128xf32, #tpu.memory_space<vmem>>, vector<256x128xf32>,
    %c2_161 = arith.constant 2 : index
    %c0_162 = arith.constant 0 : index
    %c0_163 = arith.constant 0 : index
    %90 = vector.load %arg10[%c2_161, %c0_162, %c0_163] : memref<18x18x128xbf16, #tpu.memory_space<vmem>>, vector<16x16x128xbf16>
    %c0_164 = arith.constant 0 : index
    %c0_165 = arith.constant 0 : index
    %c0_166 = arith.constant 0 : index
    %91 = vector.load %arg11[%c0_164, %c0_165, %c0_166] : memref<16x16x384xbf16, #tpu.memory_space<vmem>>, vector<16x16x128xbf16>
    tpu.vector_store %arg11[%c0_164, %c0_165, %c0_166], %90 {strides = array<i32>} : memref<16x16x384xbf16, #tpu.memory_space<vmem>>, vector<16x16x128xbf16>,
    %c2_167 = arith.constant 2 : index
    %c1_168 = arith.constant 1 : index
    %c0_169 = arith.constant 0 : index
    %92 = vector.load %arg10[%c2_167, %c1_168, %c0_169] : memref<18x18x128xbf16, #tpu.memory_space<vmem>>, vector<16x16x128xbf16>
    %c0_170 = arith.constant 0 : index
    %c0_171 = arith.constant 0 : index
    %c128_172 = arith.constant 128 : index
    %93 = vector.load %arg11[%c0_170, %c0_171, %c128_172] : memref<16x16x384xbf16, #tpu.memory_space<vmem>>, vector<16x16x128xbf16>
    tpu.vector_store %arg11[%c0_170, %c0_171, %c128_172], %92 {strides = array<i32>} : memref<16x16x384xbf16, #tpu.memory_space<vmem>>, vector<16x16x128xbf16>,
    %c2_173 = arith.constant 2 : index
    %c2_174 = arith.constant 2 : index
    %c0_175 = arith.constant 0 : index
    %94 = vector.load %arg10[%c2_173, %c2_174, %c0_175] : memref<18x18x128xbf16, #tpu.memory_space<vmem>>, vector<16x16x128xbf16>
    %c0_176 = arith.constant 0 : index
    %c0_177 = arith.constant 0 : index
    %c256_178 = arith.constant 256 : index
    %95 = vector.load %arg11[%c0_176, %c0_177, %c256_178] : memref<16x16x384xbf16, #tpu.memory_space<vmem>>, vector<16x16x128xbf16>
    tpu.vector_store %arg11[%c0_176, %c0_177, %c256_178], %94 {strides = array<i32>} : memref<16x16x384xbf16, #tpu.memory_space<vmem>>, vector<16x16x128xbf16>,
    %c0_179 = arith.constant 0 : index
    %c0_180 = arith.constant 0 : index
    %c0_181 = arith.constant 0 : index
    %96 = vector.load %arg11[%c0_179, %c0_180, %c0_181] : memref<16x16x384xbf16, #tpu.memory_space<vmem>>, vector<16x16x384xbf16>
    %97 = vector.shape_cast %96 : vector<16x16x384xbf16> to vector<256x384xbf16>
    %c768_182 = arith.constant 768 : index
    %c0_183 = arith.constant 0 : index
    %98 = vector.load %arg6[%c768_182, %c0_183] : memref<1152x128xbf16, #tpu.memory_space<vmem>>, vector<384x128xbf16>
    %cst_184 = arith.constant dense<0.000000e+00> : vector<256x128xf32>
    %99 = tpu.matmul %97, %98, %cst_184 {dimension_numbers = #tpu.dot_dimension_numbers<[1], [0], [0], [1], [0, 0, 1, 1], [], []>} : vector<256x384xbf16>, vector<384x128xbf16>, vector<256x128xf32> -> vector<256x128xf32>
    %c0_185 = arith.constant 0 : index
    %c0_186 = arith.constant 0 : index
    %100 = vector.load %arg12[%c0_185, %c0_186] : memref<256x128xf32, #tpu.memory_space<vmem>>, vector<256x128xf32>
    %101 = arith.addf %100, %99 : vector<256x128xf32>
    %c0_187 = arith.constant 0 : index
    %c0_188 = arith.constant 0 : index
    %102 = vector.load %arg12[%c0_187, %c0_188] : memref<256x128xf32, #tpu.memory_space<vmem>>, vector<256x128xf32>
    tpu.vector_store %arg12[%c0_187, %c0_188], %101 {strides = array<i32>} : memref<256x128xf32, #tpu.memory_space<vmem>>, vector<256x128xf32>,
    %c0_189 = arith.constant 0 : index
    %c0_190 = arith.constant 0 : index
    %103 = vector.load %arg12[%c0_189, %c0_190] : memref<256x128xf32, #tpu.memory_space<vmem>>, vector<256x128xf32>
    %c0_191 = arith.constant 0 : index
    %c0_192 = arith.constant 0 : index
    %104 = vector.load %arg7[%c0_191, %c0_192] : memref<1x128xf32, #tpu.memory_space<vmem>>, vector<1x128xf32>
    %105 = vector.broadcast %104 : vector<1x128xf32> to vector<256x128xf32>
    %106 = arith.mulf %103, %105 : vector<256x128xf32>
    %c0_193 = arith.constant 0 : index
    %c0_194 = arith.constant 0 : index
    %107 = vector.load %arg8[%c0_193, %c0_194] : memref<1x128xf32, #tpu.memory_space<vmem>>, vector<1x128xf32>
    %108 = vector.broadcast %107 : vector<1x128xf32> to vector<256x128xf32>
    %109 = arith.addf %106, %108 : vector<256x128xf32>
    %c0_195 = arith.constant 0 : index
    %c0_196 = arith.constant 0 : index
    %c0_197 = arith.constant 0 : index
    %110 = vector.load %arg2[%c0_195, %c0_196, %c0_197] : memref<1x256x128xf32, #tpu.memory_space<vmem>>, vector<1x256x128xf32>
    %111 = vector.shape_cast %110 : vector<1x256x128xf32> to vector<256x128xf32>
    %112 = arith.addf %109, %111 : vector<256x128xf32>
    %cst_198 = arith.constant 0.000000e+00 : f32
    %cst_199 = arith.constant 2.000000e+01 : f32
    %113 = vector.broadcast %cst_198 : f32 to vector<256x128xf32>
    %114 = arith.maximumf %113, %112 : vector<256x128xf32>
    %115 = vector.broadcast %cst_199 : f32 to vector<256x128xf32>
    %116 = arith.minimumf %115, %114 : vector<256x128xf32>
    %c0_200 = arith.constant 0 : index
    %c0_201 = arith.constant 0 : index
    %c0_202 = arith.constant 0 : index
    %117 = vector.load %arg9[%c0_200, %c0_201, %c0_202] : memref<1x256x128xf32, #tpu.memory_space<vmem>>, vector<1x256x128xf32>
    %118 = vector.shape_cast %117 : vector<1x256x128xf32> to vector<256x128xf32>
    %119 = vector.shape_cast %116 : vector<256x128xf32> to vector<1x256x128xf32>
    tpu.vector_store %arg9[%c0_200, %c0_201, %c0_202], %119 {strides = array<i32>} : memref<1x256x128xf32, #tpu.memory_space<vmem>>, vector<1x256x128xf32>,
    return
  }
  func.func @transform_0(%arg0: i32) -> (i32, i32, i32, i32) {
    %c0_i32 = arith.constant 0 : i32
    %c0_i32_0 = arith.constant 0 : i32
    %c0_i32_1 = arith.constant 0 : i32
    %c0_i32_2 = arith.constant 0 : i32
    return %arg0, %c0_i32, %c0_i32_0, %c0_i32_1 : i32, i32, i32, i32
  }
  func.func @transform_1(%arg0: i32) -> (i32, i32, i32) {
    %c0_i32 = arith.constant 0 : i32
    %c0_i32_0 = arith.constant 0 : i32
    %c0_i32_1 = arith.constant 0 : i32
    return %arg0, %c0_i32, %c0_i32_0 : i32, i32, i32
  }
  func.func @transform_2(%arg0: i32) -> (i32, i32) {
    %c0_i32 = arith.constant 0 : i32
    %c0_i32_0 = arith.constant 0 : i32
    %c0_i32_1 = arith.constant 0 : i32
    return %c0_i32, %c0_i32_0 : i32, i32
  }
  func.func @transform_3(%arg0: i32) -> (i32, i32) {
    %c0_i32 = arith.constant 0 : i32
    %c0_i32_0 = arith.constant 0 : i32
    %c0_i32_1 = arith.constant 0 : i32
    return %c0_i32, %c0_i32_0 : i32, i32
  }
  func.func @transform_4(%arg0: i32) -> (i32, i32) {
    %c0_i32 = arith.constant 0 : i32
    %c0_i32_0 = arith.constant 0 : i32
    %c0_i32_1 = arith.constant 0 : i32
    return %c0_i32, %c0_i32_0 : i32, i32
  }
  func.func @transform_5(%arg0: i32) -> (i32, i32) {
    %c0_i32 = arith.constant 0 : i32
    %c0_i32_0 = arith.constant 0 : i32
    %c0_i32_1 = arith.constant 0 : i32
    return %c0_i32, %c0_i32_0 : i32, i32
  }
  func.func @transform_6(%arg0: i32) -> (i32, i32) {
    %c0_i32 = arith.constant 0 : i32
    %c0_i32_0 = arith.constant 0 : i32
    %c0_i32_1 = arith.constant 0 : i32
    return %c0_i32, %c0_i32_0 : i32, i32
  }
  func.func @transform_7(%arg0: i32) -> (i32, i32) {
    %c0_i32 = arith.constant 0 : i32
    %c0_i32_0 = arith.constant 0 : i32
    %c0_i32_1 = arith.constant 0 : i32
    return %c0_i32, %c0_i32_0 : i32, i32
  }
  func.func @transform_8(%arg0: i32) -> (i32, i32, i32) {
    %c0_i32 = arith.constant 0 : i32
    %c0_i32_0 = arith.constant 0 : i32
    %c0_i32_1 = arith.constant 0 : i32
    return %arg0, %c0_i32, %c0_i32_0 : i32, i32, i32
  }
}

</mosaic_0001>

<bundles_post_ra>
// kernel: tpu_custom_call.1
= control target key start
LH: loop header
LB: loop body
LE: loop exit
PB: predicated region body
PF: predicated region fallthrough
CT: control target
= control target key end

     0   :  { %s18266_s0 = inlined_call_operand.vmem [shape: bf16[2,18,18,128], index: 0, kind: input, shape index: {}]   ;;  %s18267_s1 = inlined_call_operand.hbm [shape: f32[2,256,128], index: 1, kind: input, shape index: {}]   ;;  %s18268_s2 = inlined_call_operand.vmem [shape: bf16[1152,128], index: 2, kind: input, shape index: {}]   ;;  %s18269_s3 = inlined_call_operand.vmem [shape: f32[1,128], index: 3, kind: input, shape index: {}]   ;;  %s18270_s4 = inlined_call_operand.vmem [shape: f32[1,128], index: 4, kind: input, shape index: {}]   ;;  %s18271_s5 = inlined_call_operand.hbm [shape: bf16[1152,128], index: 5, kind: input, shape index: {}]   ;;  %s18272_s6 = inlined_call_operand.vmem [shape: f32[1,128], index: 6, kind: input, shape index: {}]   ;;  %s18273_s7 = inlined_call_operand.vmem [shape: f32[1,128], index: 7, kind: input, shape index: {}]   ;;  %s18274_s8 = inlined_call_operand.hbm [shape: f32[2,256,128], index: 8, kind: output, shape index: {}]  }
   0x1   :  { %18283 = sst [smem:[#allocation64_spill]] %s18271_s5 }
   0x2   :  { %13 = vsyncpa [#allocation6], 0 }
   0x3   :  { %15 = vsyncpa [#allocation6 + $0x1], 0 }
   0x4   :  { %16 = vsyncpa [#allocation9], 0 }
   0x5   :  { %17 = vsyncpa [#allocation7], 0 }
   0x6   :  { %19 = vsyncpa [#allocation7 + $0x1], 0  ;;  %s14739_s27 = smov 0   ;;  %s14741_s28 = smov 0  }
   0x7   :  { %s14743_s29 = smov 0   ;;  %s14745_s30 = smov 0  }
   0x8 LB: > { %s14760_s9 = sadd.s32 4294967295, %s14682_s30   ;;  %s12019_s10 = sadd.s32 4294967294, %s14682_s30   ;;  %s14682_s30 = sphi %s14745_s30, %s18467_s30   ;;  %s14678_s29 = sphi %s14743_s29, %s18470_s29   ;;  %s14674_s28 = sphi %s14741_s28, %s18469_s28   ;;  %s14670_s27 = sphi %s14739_s27, %s18468_s27  }
   0x9   : > { %p71_p0 = scmp.ne.s32.totalorder %s14674_s28, %s14670_s27  ;;  %p18277_p1 = scmp.eq.s32.totalorder %s14760_s9, 0 }
   0xa   : > { %p227_p3 = scmp.eq.s32.totalorder %s12019_s10, 1  ;;  %p12020_p5 = scmp.ge.s32.totalorder %s14682_s30, 1 }
   0xb   : > { %p14769_p4 = por %p18277_p1, %p71_p0  ;;  %p234_p7 = scmp.lt.s32.totalorder %s14682_s30, 3 }
   0xc   : > { %p14774_p6 = por %p227_p3, %p71_p0  ;;  %s14684_s14 = smov [#allocation8]  }
   0xd   : > { %s18284_s11 = scalar_select %p14769_p4, 1, 0 }
   0xe   : > { %s18285_s12 = scalar_select %p14774_p6, 1, 0 }
   0xf   : > { %p14779_p8 = pnand %p12020_p5, %p234_p7  ;;  %s255_s15 = sshll.u32 %s14684_s14, 4  ;;  %s256_s15 = int_to_ptr.vmem [resolvable:$true] %s255_s15 }
  0x10   : > { %s14793_s17 = sadd.s32 1, %s14682_s30   ;;  %s58_s18 = sadd.s32 1, %s14678_s29 }
  0x11   : > { %s18286_s13 = scalar_select %p14779_p8, 1, 0 }
  0x12   : > { %p14003_p9 = pneg %p14779_p8  ;;  %18288 = sst [smem:[#allocation14_spill]] %s14793_s17 }
  0x13   : > { %s55_s19 = ssub.s32 %s14682_s30, %s14793_s17  ;;  %s14571_s20 = scalar_lea.vmem %s256_s15, 9216 }
  0x14   : > { %p14788_p11 = pnand %p14003_p9, %p18277_p1  ;;  %p14572_p13 = scmp.ne.s32.totalorder %s256_s15, %s14571_s20 }
  0x15   : > { %p14579_p5 = scmp.lt.s32.totalorder %s256_s15, %s256_s15  ;;  %p14580_p7 = scmp.lt.s32.totalorder %s14571_s20, %s14571_s20 }
  0x16   : > { %p14562_p12 = pneg %p14788_p11 }
  0x17   : > { %p14581_p10 = por %p14580_p7, %p14579_p5 }
  0x18   : > { %p14574_p0 = pnand %p14572_p13, %p14562_p12 }
  0x1a   : > { %p14575_p3 = pneg %p14574_p0 }
  0x1c   : > { %p14582_p2 = pnand %p14581_p10, %p14575_p3 }
  0x1e   : > { %14585 = shalt.err (!%p14582_p2)
}
  0x1f   : > { %s14685_s21 = smov 64   ;;  %s14686_s22 = smov 4  }
  0x20   : > { %s18289_s5 = sld [smem:[#allocation64_spill]]  ;;  %p56_p9 = scmp.eq.s32.totalorder %s55_s19, 0 }
  0x21   : > { %p65_p12 = scmp.ne.s32.totalorder %s14678_s29, %s14674_s28  ;;  %p66_p10 = scmp.eq.s32.totalorder %s14682_s30, 0 }
  0x22   : > { %p14016_p2 = scmp.lt.s32.totalorder %s14682_s30, 2  ;;  %p18290_p0 = scmp.eq.s32.totalorder %s14760_s9, 1 }
  0x23   : > { %s14810_s25 = scalar_select %p56_p9, %s14678_s29, %s58_s18  }
  0x24   : > { %p67_p13 = por %p66_p10, %p65_p12  ;;  %p14814_p3 = por %p18290_p0, %p65_p12 }
  0x25   : > { %s283_s10 = sand.u32 1, %s14678_s29   ;;  %s12856_s14 = sshll.u32 %s14682_s30, 12 }
  0x26   : > { %14006 = dma.hbm_to_vmem [thread:$0]  (!%p14788_p11), %s18289_s5, 9216, %s256_s15, [#allocation9], %s14685_s21, %s14685_s21, %s14686_s22  }
  0x27   : > { %s18291_s26 = scalar_select %p14814_p3, 1, 0 }
  0x28   : > { %s12023_s20 = sshll.u32 %s283_s10, 8  ;;  %s14823_s23 = scalar_lea.hbm %s18267_s1, %s12856_s14 }
  0x29   : > { %s287_s15 = scalar_lea.vmem [#allocation5], %s12023_s20  ;;  %p14825_p11 = pnand %p14016_p2, %p67_p13 }
  0x2a   : > { %s294_s18 = sshll.u32 %s287_s15, 4  ;;  %s14831_s21 = scalar_lea.sflag [#allocation6], %s283_s10  ;;  %s14829_s18 = int_to_ptr.vmem [resolvable:$true] %s294_s18 }
  0x2b   : > { %s14586_s22 = scalar_lea.hbm %s14823_s23, 4096  ;;  %p14588_p7 = pneg %p14825_p11 }
  0x2c   : > { %p14587_p5 = scmp.ne.s32.totalorder %s14823_s23, %s14586_s22  ;;  %s14591_s14 = scalar_lea.hbm %s18267_s1, 8192 }
  0x2d   : > { %p14592_p10 = scmp.lt.s32.totalorder %s14823_s23, %s18267_s1  ;;  %p14593_p2 = scmp.lt.s32.totalorder %s14591_s14, %s14586_s22 }
  0x2e   : > { %p14589_p9 = pnand %p14588_p7, %p14587_p5 }
  0x2f   : > { %p14594_p13 = por %p14593_p2, %p14592_p10 }
  0x30   : > { %p14590_p12 = pneg %p14589_p9 }
  0x32   : > { %p14595_p0 = pnand %p14594_p13, %p14590_p12 }
  0x34   : > { %14598 = shalt.err (!%p14595_p0)
}
  0x35   : > { %s14599_s10 = scalar_lea.vmem %s14829_s18, 4096  ;;  %s14687_s15 = smov [#allocation5]  }
  0x36   : > { %p14600_p1 = scmp.ne.s32.totalorder %s14829_s18, %s14599_s10  ;;  %s14604_s5 = sshll.u32 %s14687_s15, 4  ;;  %s14605_s5 = int_to_ptr.vmem [resolvable:$false] %s14604_s5 }
  0x37   : > { %s14606_s17 = scalar_lea.vmem %s14605_s5, 8192  ;;  %p14607_p9 = scmp.lt.s32.totalorder %s14829_s18, %s14605_s5 }
  0x38   : > { %p14602_p6 = pnand %p14600_p1, %p14588_p7  ;;  %p14608_p3 = scmp.lt.s32.totalorder %s14606_s17, %s14599_s10 }
  0x3a   : > { %p14603_p5 = pneg %p14602_p6  ;;  %p14609_p4 = por %p14608_p3, %p14607_p9 }
  0x3c   : > { %p14610_p8 = pnand %p14609_p4, %p14603_p5 }
  0x3e   : > { %14613 = shalt.err (!%p14610_p8)
}
  0x3f   : > { %s14688_s22 = smov 128   ;;  %s14689_s24 = smov 8  }
  0x40   : > { %14010 = dma.hbm_to_vmem [thread:$0]  (!%p14825_p11), %s14823_s23, 4096, %s14829_s18, %s14831_s21, %s14688_s22, %s14688_s22, %s14689_s24  }
  0x41   : > { %p18293_p1 = scmp.ne.s32.totalorder %s18286_s13, 0 }
  0x43   : > { %306 = sbr.rel (%p18293_p1) target bundleno = 1465 (0x5b9), region = 52 }
  0x48   : > { %s14855_s14 = sand.u32 1, %s14674_s28   ;;  %p18294_p4 = scmp.ne.s32.totalorder %s18284_s11, 0 }
  0x49   : > { %s12027_s5 = sshll.u32 %s14855_s14, 8  ;;  %s309_s20 = scalar_lea.sflag [#allocation6], %s14855_s14 }
  0x4a   : > { %s14861_s16 = scalar_lea.vmem [#allocation5], %s12027_s5 }
  0x4b   : > { %14657 = dma.done.wait (%p18294_p4), %s309_s20, 4096  }
  0x4c   : > { %14659 = vsyncadd (%p18294_p4), %s309_s20, 4294963200  ;;  %p18295_p6 = scmp.eq.s32.totalorder %s14760_s9, 0 }
  0x4e   : > { %14661 = dma.done.wait (%p18295_p6), [#allocation9], 9216   ;;  %p18296_p8 = pmov %p18295_p6 }
  0x4f   : > { %v14059_v0 = vld [vmem:[%s18268_s2 + $0x78] sm:$0xff]   ;;  %v14062_v3 = vld [vmem:[%s18268_s2 + $0x70] sm:$0xff]   ;;  %v14065_v6 = vld [vmem:[%s18268_s2 + $0x68] sm:$0xff]   ;;  %p354_p3 = scmp.lt.s32.totalorder %s14760_s9, 1  ;;  %vm592_vm0 = vsmask.f32 3328 }
  0x50   : > { %14663 = vsyncadd (%p18296_p8), [#allocation9], 4294958080  ;;  %v14060_v1 = vld [vmem:[%s18268_s2 + $0xb8] sm:$0xff]   ;;  %12890 = vmatprep.subr.bf16.mxu0 %v14059_v0  ;;  %v14063_v4 = vld [vmem:[%s18268_s2 + $0xb0] sm:$0xff]   ;;  %vm593_vm1 = vsmask.f32 7440 }
  0x51   : > { %v14061_v2 = vld [vmem:[%s18268_s2 + $0x38] sm:$0xff]   ;;  %13706 = vmatprep.subr.bf16.mxu1 %v14060_v1  ;;  %v14064_v5 = vld [vmem:[%s18268_s2 + $0x30] sm:$0xff]   ;;  %v14066_v7 = vld [vmem:[%s18268_s2 + $0xa8] sm:$0xff]   ;;  %s355_s21 = scalar_select %p354_p3, %s14760_s9, 1  ;;  %vm1139_vm2 = vcmask 1042432   ;;  %vm1140_vm3 = vcmask 1046532  }
  0x52   : > { %12891 = vmatpush3.bf16.msra.mxu0 %v14061_v2  ;;  %13707 = vmatpush3.bf16.msra.mxu1 %v14060_v1  ;;  %v14067_v8 = vld [vmem:[%s18268_s2 + $0x28] sm:$0xff]   ;;  %v14068_v9 = vld [vmem:[%s18268_s2 + $0x60] sm:$0xff]   ;;  %v14071_v12 = vld [vmem:[%s18268_s2 + $0x58] sm:$0xff]   ;;  %v18297_v42 = vmov 0  ;;  %vm367_vm6 = vcmask 1040384   ;;  %vm6303_vm11 = vcmask 1043456  }
  0x53   : > { %12892 = vmatprep.subr.bf16.mxu0 %v14062_v3  ;;  %13708 = vmatprep.subr.bf16.mxu1 %v14063_v4  ;;  %v14069_v10 = vld [vmem:[%s18268_s2 + $0xa0] sm:$0xff]   ;;  %v14072_v13 = vld [vmem:[%s18268_s2 + $0x98] sm:$0xff]   ;;  %v14074_v15 = vld [vmem:[%s18268_s2 + $0x50] sm:$0xff]   ;;  %s13994_s20 = smul.u32 216, %s355_s21  ;;  %vm368_vm7 = vsmask.f32 256 }
  0x54   : > { %v14070_v11 = vld [vmem:[%s18268_s2 + $0x20] sm:$0xff]   ;;  %v14073_v14 = vld [vmem:[%s18268_s2 + $0x18] sm:$0xff]   ;;  %v14075_v16 = vld [vmem:[%s18268_s2 + $0x90] sm:$0xff]   ;;  %vm424_vm9 = vsmask.f32 7938  ;;  %s18035_s21 = scalar_lea.vmem [#allocation10], %s12027_s5 }
  0x55   : > { %v14076_v17 = vld [vmem:[%s18268_s2 + $0x10] sm:$0xff]   ;;  %v14077_v18 = vld [vmem:[%s18268_s2 + $0x48] sm:$0xff]   ;;  %s14936_s17 = scalar_lea.vmem %s18266_s0, %s13994_s20  ;;  %v14080_v21 = vld [vmem:[%s18268_s2 + $0x40] sm:$0xff]   ;;  %vm5980_vm13 = vsmask.f32 4368  ;;  %s12889_s5 = sshll.u32 %s14760_s9, 12 }
  0x56   : > { %12893 = vmatpush3.bf16.msra.mxu0 %v14064_v5  ;;  %13709 = vmatpush3.bf16.msra.mxu1 %v14063_v4  ;;  %v14078_v19 = vld [vmem:[%s18268_s2 + $0x88] sm:$0xff]   ;;  %v14081_v22 = vld [vmem:[%s18268_s2 + $0x80] sm:$0xff]   ;;  %vm14960_vm4 = vmor %vm1139_vm2, %vm1140_vm3  ;;  %s11924_s22 = sshll.u32 %s18035_s21, 4  ;;  %s18220_s23 = scalar_lea.hbm %s18274_s8, %s12889_s5  ;;  %s18222_s22 = int_to_ptr.vmem [resolvable:$true] %s11924_s22 }
  0x57   : > { %12894 = vmatprep.subr.bf16.mxu0 %v14065_v6  ;;  %13710 = vmatprep.subr.bf16.mxu1 %v14066_v7  ;;  %v14079_v20 = vld [vmem:[%s18268_s2 + $0x8] sm:$0xff]   ;;  %v480_v23 = vld [vmem:[%s14936_s17] sm:$0xf]  ;;  %v481_v24 = vld [vmem:[%s14936_s17 + $0x4] sm:$0xf]  ;;  %v18298_v42 = vsel %vm14960_vm4, 4294967295, %v18297_v42 }
  0x58   : > { %v544_v25 = vld [vmem:[%s14936_s17] sm:$0xf]  ;;  %512 = vst [vmem:[#allocation3] sm:$0xf] %v480_v23  ;;  %513 = vst [vmem:[#allocation3 + $0xc] sm:$0xf] %v481_v24 }
  0x59   : > { %v545_v26 = vld [vmem:[%s14936_s17 + $0x4] sm:$0xf]  ;;  %v546_v27 = vld [vmem:[%s14936_s17 + $0x8] sm:$0x1]  ;;  %v596_v28 = vshrl.u32 %v544_v25, 16  ;;  %v599_v29 = vshll.u32 %v544_v25, 16  ;;  %vm14971_vm5 = vmor %vm592_vm0, %vm593_vm1 }
  0x5a   : > { %12895 = vmatpush3.bf16.msra.mxu0 %v14067_v8  ;;  %13711 = vmatpush3.bf16.msra.mxu1 %v14066_v7  ;;  %v605_v30 = vshll.u32 %v545_v26, 16  ;;  %v609_v31 = vshrl.u32 %v545_v26, 16  ;;  %v615_v32 = vshll.u32 %v546_v27, 16  ;;  %v1043_v33 = vld [vmem:[%s14936_s17] sm:$0xe]  ;;  %18299 = vst [vmem:[#allocation15_spill] sm:$0xff] %v18298_v42  ;;  %vm15826_vm8 = vmand %vm367_vm6, %vm368_vm7 }
  0x5b   : > { %12896 = vmatprep.subr.bf16.mxu0 %v14068_v9  ;;  %13712 = vmatprep.subr.bf16.mxu1 %v14069_v10  ;;  %v598_v34 = vrot.slane %v596_v28, 4  ;;  %v601_v35 = vrot.slane %v599_v29, 5  ;;  %v1044_v36 = vld [vmem:[%s14936_s17 + $0x4] sm:$0xf]  ;;  %v1045_v37 = vld [vmem:[%s14936_s17 + $0x8] sm:$0x1]  ;;  %vm15834_vm10 = vmand %vm367_vm6, %vm424_vm9 }
  0x5c   : > { %v14082_v38 = vld [vmem:[%s18268_s2] sm:$0xff]   ;;  %v607_v39 = vrot.slane %v605_v30, 5  ;;  %v611_v40 = vrot.slane %v609_v31, 4  ;;  %v617_v41 = vrot.slane %v615_v32, 5  ;;  %v12031_v43 = vrot.slane %v1043_v33, 9  ;;  %v14967_v44 = vld [vmem:[%s18268_s2 + $0x178] sm:$0xff]   ;;  %vm16360_vm12 = vmand %vm6303_vm11, %vm424_vm9 }
  0x5d   : > { %v602_v46 = vor.u32 %v601_v35, %v598_v34  ;;  %v1144_v47 = vrot.slane %v1044_v36, 5  ;;  %v1147_v48 = vrot.slane %v1045_v37, 5  ;;  %v12199_v49 = vld [vmem:[%s14936_s17 + $0xc] sm:$0xe]  ;;  %v12200_v50 = vld [vmem:[%s14936_s17 + $0x10] sm:$0xf]  ;;  %vm16374_vm14 = vmor %vm368_vm7, %vm5980_vm13 }
  0x5e   : > { %12897 = vmatpush3.bf16.msra.mxu0 %v14070_v11  ;;  %13713 = vmatpush3.bf16.msra.mxu1 %v14069_v10  ;;  %v612_v51 = vor.u32 %v611_v40, %v607_v39  ;;  %v12201_v52 = vld [vmem:[%s14936_s17 + $0x14] sm:$0x1]  ;;  %v2843_v53 = vrot.slane %v12200_v50, 5  ;;  %v1046_v54 = vld [vmem:[%s14936_s17 + $0xc] sm:$0xe]  ;;  %v14088_v55 = vld [vmem:[%s18268_s2 + $0x138] sm:$0xff]  }
  0x5f   : > { %12898 = vmatprep.subr.bf16.mxu0 %v14071_v12  ;;  %13714 = vmatprep.subr.bf16.mxu1 %v14072_v13  ;;  %v603_v56 = vrot.slane %v602_v46, 4  ;;  %v1145_v57 = vsel %vm14960_vm4, %v12031_v43, %v1144_v47  ;;  %v1146_v58 = vrot.slane %v1144_v47, 4  ;;  %v1047_v59 = vld [vmem:[%s14936_s17 + $0x10] sm:$0xf]  ;;  %v1048_v60 = vld [vmem:[%s14936_s17 + $0x14] sm:$0x1] }
  0x60   : > { %v613_v61 = vrot.slane %v612_v51, 4  ;;  %1286 = vst [vmem:[#allocation3 + $0x8] sm:$0xf] %v1145_v57  ;;  %v12247_v62 = vrot.slane %v12199_v49, 9  ;;  %v12032_v63 = vrot.slane %v1046_v54, 9  ;;  %v1151_v3 = vrot.slane %v1047_v59, 5 }
  0x61   : > { %v12202_v0 = vld [vmem:[%s14936_s17 + $0x18] sm:$0xe]  ;;  %v608_v1 = vsel %vm14971_vm5, %v603_v56, %v607_v39  ;;  %v1148_v2 = vsel %vm14960_vm4, %v1146_v58, %v1147_v48  ;;  %v1154_v4 = vrot.slane %v1048_v60, 5  ;;  %v12203_v5 = vld [vmem:[%s14936_s17 + $0x1c] sm:$0xf]  ;;  %v2845_v8 = vrot.slane %v2843_v53, 4 }
  0x62   : > { %12899 = vmatpush3.bf16.msra.mxu0 %v14073_v14  ;;  %13715 = vmatpush3.bf16.msra.mxu1 %v14072_v13  ;;  %v12204_v6 = vld [vmem:[%s14936_s17 + $0x20] sm:$0x1]  ;;  %v618_v7 = vsel %vm14971_vm5, %v613_v61, %v617_v41  ;;  %1011 = vst [vmem:[#allocation3 + $0x4] sm:$0xf] %v608_v1  ;;  %1287 = vst [vmem:[#allocation3 + $0x14] sm:$0xf] %v1148_v2  ;;  %v1152_v10 = vsel %vm14960_vm4, %v12032_v63, %v1151_v3 }
  0x63   : > { %12900 = vmatprep.subr.bf16.mxu0 %v14074_v15  ;;  %13716 = vmatprep.subr.bf16.mxu1 %v14075_v16  ;;  %v2846_v9 = vrot.slane %v12201_v52, 5  ;;  %1012 = vst [vmem:[#allocation3 + $0x10] sm:$0xf] %v618_v7  ;;  %v1153_v11 = vrot.slane %v1151_v3, 4  ;;  %v2850_v12 = vrot.slane %v12203_v5, 5  ;;  %v12248_v13 = vrot.slane %v12202_v0, 9 }
  0x64   : > { %1288 = vst [vmem:[#allocation3 + $0x20] sm:$0xf] %v1152_v10  ;;  %v2853_v14 = vrot.slane %v12204_v6, 5  ;;  %v1049_v31 = vld [vmem:[%s14936_s17 + $0x18] sm:$0xe]  ;;  %v14095_v51 = vld [vmem:[%s18268_s2 + $0x130] sm:$0xff]  }
  0x65   : > { %v1155_v15 = vsel %vm14960_vm4, %v1153_v11, %v1154_v4  ;;  %v2852_v25 = vrot.slane %v2850_v12, 4  ;;  %v1050_v32 = vld [vmem:[%s14936_s17 + $0x1c] sm:$0xf]  ;;  %v12033_v43 = vrot.slane %v1049_v31, 9  ;;  %v2851_v47 = vsel %vm14960_vm4, %v12248_v13, %v2850_v12  ;;  %v1051_v49 = vld [vmem:[%s14936_s17 + $0x20] sm:$0x1] }
  0x66   : > { %12901 = vmatpush3.bf16.msra.mxu0 %v14076_v17  ;;  %13717 = vmatpush3.bf16.msra.mxu1 %v14075_v16  ;;  %v482_v16 = vld [vmem:[%s14936_s17 + $0xc] sm:$0xf]  ;;  %v483_v17 = vld [vmem:[%s14936_s17 + $0x10] sm:$0xf]  ;;  %1289 = vst [vmem:[#allocation3 + $0x2c] sm:$0xf] %v1155_v15 }
  0x67   : > { %12902 = vmatprep.subr.bf16.mxu0 %v14077_v18  ;;  %13718 = vmatprep.subr.bf16.mxu1 %v14078_v19  ;;  %v547_v18 = vld [vmem:[%s14936_s17 + $0xc] sm:$0xf]  ;;  %514 = vst [vmem:[#allocation3 + $0x18] sm:$0xf] %v482_v16  ;;  %515 = vst [vmem:[#allocation3 + $0x24] sm:$0xf] %v483_v17  ;;  %v2854_v48 = vsel %vm14960_vm4, %v2852_v25, %v2853_v14 }
  0x68   : > { %v620_v23 = vshrl.u32 %v547_v18, 16  ;;  %v623_v24 = vshll.u32 %v547_v18, 16  ;;  %v1158_v50 = vrot.slane %v1050_v32, 5  ;;  %v14102_v52 = vld [vmem:[%s18268_s2 + $0x170] sm:$0xff]   ;;  %v12205_v56 = vld [vmem:[%s14936_s17 + $0x24] sm:$0xe] }
  0x69   : > { %v1318_v33 = vld [vmem:[#allocation3] sm:$0xff]  ;;  %v14085_v34 = vld [vmem:[#allocation3 + $0x8] ss:$12 sps:$4 sm:$0xff]   ;;  %v12206_v57 = vld [vmem:[%s14936_s17 + $0x28] sm:$0xf]  ;;  %v12249_v61 = vrot.slane %v12205_v56, 9 }
  0x6a   : > { %12903 = vmatpush3.bf16.msra.mxu0 %v14079_v20  ;;  %13719 = vmatpush3.bf16.msra.mxu1 %v14078_v19  ;;  %v2844_v19 = vsel %vm14960_vm4, %v12247_v62, %v2843_v53  ;;  %v2847_v20 = vsel %vm14960_vm4, %v2845_v8, %v2846_v9  ;;  %v622_v29 = vrot.slane %v620_v23, 4  ;;  %v625_v30 = vrot.slane %v623_v24, 5  ;;  %v1320_v36 = vld [vmem:[#allocation3 + $0xc] sm:$0xff]  ;;  %v12207_v0 = vld [vmem:[%s14936_s17 + $0x2c] sm:$0x1]  ;;  %v14096_v3 = vld [vmem:[%s18268_s2 + $0xf0] sm:$0xff]  }
  0x6b   : > { %12904 = vmatprep.subr.bf16.mxu0 %v14080_v21  ;;  %13720 = vmatprep.subr.bf16.mxu1 %v14081_v22  ;;  %v548_v21 = vld [vmem:[%s14936_s17 + $0x10] sm:$0xf]  ;;  %v14083_v37 = vld [vmem:[#allocation3 + $0x4] ss:$12 sps:$4 sm:$0xff]   ;;  %2985 = vst [vmem:[#allocation3 + $0x8] sm:$0xf] %v2844_v19  ;;  %v12047_v46 = vcombine.low %v1318_v33, %v1320_v36  ;;  %v1159_v59 = vsel %vm14960_vm4, %v12033_v43, %v1158_v50 }
  0x6c   : > { %v629_v26 = vshll.u32 %v548_v21, 16  ;;  %v633_v27 = vshrl.u32 %v548_v21, 16  ;;  %2986 = vst [vmem:[#allocation3 + $0x14] sm:$0xf] %v2847_v20  ;;  %v626_v39 = vor.u32 %v625_v30, %v622_v29  ;;  %13722 = vmatprep.mubr.bf16.mxu1 %v14085_v34  ;;  %1862 = vmatprep.mubr.bf16.mxu0 %v14083_v37  ;;  %v1160_v60 = vrot.slane %v1158_v50, 4  ;;  %v14103_v17 = vld [vmem:[%s18268_s2 + $0x128] sm:$0xff]  }
  0x6d   : > { %v14086_v58 = vld [vmem:[#allocation3 + $0x20] ss:$12 sps:$4 sm:$0xff]   ;;  %1290 = vst [vmem:[#allocation3 + $0x38] sm:$0xf] %v1159_v59  ;;  %v2857_v1 = vrot.slane %v12206_v57, 5  ;;  %v2860_v4 = vrot.slane %v12207_v0, 5 }
  0x6e   : > { %12905 = vmatpush3.bf16.msra.mxu0 %v14082_v38  ;;  %13721 = vmatpush3.bf16.msra.mxu1 %v14081_v22  ;;  %v549_v22 = vld [vmem:[%s14936_s17 + $0x14] sm:$0x1]  ;;  %v631_v35 = vrot.slane %v629_v26, 5  ;;  %v14089_v38 = vld [vmem:[%s18268_s2 + $0xf8] sm:$0xff]   ;;  %v635_v40 = vrot.slane %v633_v27, 4  ;;  %v627_v53 = vrot.slane %v626_v39, 4 }
  0x6f   : > { %13754 = vmatprep.subr.bf16.mxu0 %v14967_v44  ;;  %13026 = vmatprep.subr.bf16.mxu1 %v14088_v55  ;;  %v639_v28 = vshll.u32 %v549_v22, 16  ;;  %v1161_v55 = vrot.slane %v1051_v49, 5  ;;  %2987 = vst [vmem:[#allocation3 + $0x20] sm:$0xf] %v2851_v47  ;;  %2988 = vst [vmem:[#allocation3 + $0x2c] sm:$0xf] %v2854_v48  ;;  %v2858_v27 = vsel %vm14960_vm4, %v12249_v61, %v2857_v1 }
  0x70   : > { %v636_v54 = vor.u32 %v635_v40, %v631_v35  ;;  %v632_v62 = vsel %vm14971_vm5, %v627_v53, %v631_v35  ;;  %v1052_v2 = vld [vmem:[%s14936_s17 + $0x24] sm:$0xe]  ;;  %v1053_v5 = vld [vmem:[%s14936_s17 + $0x28] sm:$0xf]  ;;  %v1054_v6 = vld [vmem:[%s14936_s17 + $0x2c] sm:$0x1] }
  0x71   : > { %v641_v41 = vrot.slane %v639_v28, 5  ;;  %1863 = vmatmul.mubr.bf16.vlgmr.msra.gmra.mxu0 %v12047_v46  ;;  %13723 = vmatmul.mubr.bf16.vlgmr.msra.gmra.mxu1 %v14086_v58  ;;  %1013 = vst [vmem:[#allocation3 + $0x1c] sm:$0xf] %v632_v62  ;;  %v12034_v7 = vrot.slane %v1052_v2, 9  ;;  %v2859_v9 = vrot.slane %v2857_v1, 4  ;;  %v1165_v10 = vrot.slane %v1053_v5, 5 }
  0x72   : > { %13755 = vmatpush3.bf16.msra.mxu0 %v14967_v44  ;;  %v637_v63 = vrot.slane %v636_v54, 4  ;;  %v1162_v44 = vsel %vm14960_vm4, %v1160_v60, %v1161_v55  ;;  %13027 = vmatpush3.bf16.msra.mxu1 %v14089_v38  ;;  %v12208_v11 = vld [vmem:[%s14936_s17 + $0x30] sm:$0xe]  ;;  %v12209_v12 = vld [vmem:[%s14936_s17 + $0x34] sm:$0xf]  ;;  %v1168_v13 = vrot.slane %v1054_v6, 5 }
  0x73   : > { %13756 = vmatprep.subr.bf16.mxu0 %v14102_v52  ;;  %1291 = vst [vmem:[#allocation3 + $0x44] sm:$0xf] %v1162_v44  ;;  %v12210_v14 = vld [vmem:[%s14936_s17 + $0x38] sm:$0x1]  ;;  %v12250_v15 = vrot.slane %v12208_v11, 9  ;;  %v2864_v16 = vrot.slane %v12209_v12, 5  ;;  %13028 = vmatprep.subr.bf16.mxu1 %v14095_v51  ;;  %v1166_v18 = vsel %vm14960_vm4, %v12034_v7, %v1165_v10  ;;  %v2861_v28 = vsel %vm14960_vm4, %v2859_v9, %v2860_v4 }
  0x74   : > { %v642_v8 = vsel %vm14971_vm5, %v637_v63, %v641_v41  ;;  %v1167_v19 = vrot.slane %v1165_v10, 4  ;;  %v2867_v20 = vrot.slane %v12210_v14, 5  ;;  %1292 = vst [vmem:[#allocation3 + $0x50] sm:$0xf] %v1166_v18  ;;  %v14104_v22 = vld [vmem:[%s18268_s2 + $0xe8] sm:$0xff]   ;;  %v14110_v35 = vld [vmem:[%s18268_s2 + $0x120] sm:$0xff]  }
  0x75   : > { %1014 = vst [vmem:[#allocation3 + $0x28] sm:$0xf] %v642_v8  ;;  %v2866_v21 = vrot.slane %v2864_v16, 4  ;;  %v484_v24 = vld [vmem:[%s14936_s17 + $0x18] sm:$0xf]  ;;  %v14111_v38 = vld [vmem:[%s18268_s2 + $0xe0] sm:$0xff]   ;;  %v2865_v50 = vsel %vm14960_vm4, %v12250_v15, %v2864_v16 }
  0x76   : > { %13757 = vmatpush3.bf16.msra.mxu0 %v14102_v52  ;;  %v1169_v23 = vsel %vm14960_vm4, %v1167_v19, %v1168_v13  ;;  %13029 = vmatpush3.bf16.msra.mxu1 %v14096_v3  ;;  %v485_v25 = vld [vmem:[%s14936_s17 + $0x1c] sm:$0xf]  ;;  %v550_v26 = vld [vmem:[%s14936_s17 + $0x18] sm:$0xf]  ;;  %516 = vst [vmem:[#allocation3 + $0x30] sm:$0xf] %v484_v24 }
  0x77   : > { %1293 = vst [vmem:[#allocation3 + $0x5c] sm:$0xf] %v1169_v23  ;;  %517 = vst [vmem:[#allocation3 + $0x3c] sm:$0xf] %v485_v25  ;;  %v551_v29 = vld [vmem:[%s14936_s17 + $0x1c] sm:$0xf]  ;;  %13030 = vmatprep.subr.bf16.mxu1 %v14103_v17  ;;  %v2868_v51 = vsel %vm14960_vm4, %v2866_v21, %v2867_v20 }
  0x78   : > { %v552_v30 = vld [vmem:[%s14936_s17 + $0x20] sm:$0x1]  ;;  %v644_v31 = vshrl.u32 %v550_v26, 16  ;;  %v647_v32 = vshll.u32 %v550_v26, 16  ;;  %v653_v33 = vshll.u32 %v551_v29, 16  ;;  %v657_v34 = vshrl.u32 %v551_v29, 16 }
  0x79   : > { %v663_v37 = vshll.u32 %v552_v30, 16  ;;  %v14093_v40 = vld [vmem:[#allocation3 + $0x18] ss:$12 sps:$4 sm:$0xff]   ;;  %v1056_v52 = vld [vmem:[%s14936_s17 + $0x34] sm:$0xf]  ;;  %v14117_v44 = vld [vmem:[%s18268_s2 + $0x168] sm:$0xff]  }
  0x7a   : > { %v14092_v36 = vld [vmem:[#allocation3 + $0x38] ss:$12 sps:$4 sm:$0xff]   ;;  %v646_v41 = vrot.slane %v644_v31, 4  ;;  %13031 = vmatpush3.bf16.msra.mxu1 %v14104_v22  ;;  %v649_v43 = vrot.slane %v647_v32, 5  ;;  %v655_v46 = vrot.slane %v653_v33, 5  ;;  %v659_v47 = vrot.slane %v657_v34, 4  ;;  %13758 = vmatprep.subr.bf16.mxu0 %v14117_v44 }
  0x7b   : > { %2989 = vst [vmem:[#allocation3 + $0x38] sm:$0xf] %v2858_v27  ;;  %2990 = vst [vmem:[#allocation3 + $0x44] sm:$0xf] %v2861_v28  ;;  %13726 = vmatprep.mubr.bf16.mxu1 %v14092_v36  ;;  %v665_v48 = vrot.slane %v663_v37, 5  ;;  %13032 = vmatprep.subr.bf16.mxu1 %v14110_v35  ;;  %v1172_v57 = vrot.slane %v1056_v52, 5 }
  0x7c   : > { %v14090_v39 = vld [vmem:[#allocation3 + $0x1c] ss:$12 sps:$4 sm:$0xff]   ;;  %v1055_v49 = vld [vmem:[%s14936_s17 + $0x30] sm:$0xe]  ;;  %v1057_v53 = vld [vmem:[%s14936_s17 + $0x38] sm:$0x1]  ;;  %v650_v54 = vor.u32 %v649_v43, %v646_v41  ;;  %v660_v55 = vor.u32 %v659_v47, %v655_v46  ;;  %13759 = vmatpush3.bf16.msra.mxu0 %v14117_v44 }
  0x7d   : > { %1870 = vmatprep.mubr.bf16.mxu0 %v14090_v39  ;;  %v12035_v56 = vrot.slane %v1055_v49, 9  ;;  %v12211_v58 = vld [vmem:[%s14936_s17 + $0x3c] sm:$0xe]  ;;  %v12212_v59 = vld [vmem:[%s14936_s17 + $0x40] sm:$0xf]  ;;  %v1175_v61 = vrot.slane %v1057_v53, 5 }
  0x7e   : > { %1871 = vmatmul.mubr.bf16.gmra.mxu0 %v14093_v40  ;;  %v14094_v60 = vld [vmem:[#allocation3 + $0x50] ss:$12 sps:$4 sm:$0xff]   ;;  %v12251_v62 = vrot.slane %v12211_v58, 9  ;;  %13033 = vmatpush3.bf16.msra.mxu1 %v14111_v38  ;;  %v651_v63 = vrot.slane %v650_v54, 4  ;;  %v661_v0 = vrot.slane %v660_v55, 4  ;;  %v1174_v2 = vrot.slane %v1172_v57, 4 }
  0x7f   : > { %2991 = vst [vmem:[#allocation3 + $0x50] sm:$0xf] %v2865_v50  ;;  %2992 = vst [vmem:[#allocation3 + $0x5c] sm:$0xf] %v2868_v51  ;;  %v1173_v1 = vsel %vm14960_vm4, %v12035_v56, %v1172_v57  ;;  %v12213_v3 = vld [vmem:[%s14936_s17 + $0x44] sm:$0x1]  ;;  %13727 = vmatmul.mubr.bf16.gmra.mxu1 %v14094_v60 }
  0x80   : > { %1294 = vst [vmem:[#allocation3 + $0x68] sm:$0xf] %v1173_v1  ;;  %v2871_v4 = vrot.slane %v12212_v59, 5  ;;  %v2874_v5 = vrot.slane %v12213_v3, 5  ;;  %v1058_v6 = vld [vmem:[%s14936_s17 + $0x3c] sm:$0xe]  ;;  %v656_v8 = vsel %vm14971_vm5, %v651_v63, %v655_v46  ;;  %v666_v9 = vsel %vm14971_vm5, %v661_v0, %v665_v48 }
  0x81   : > { %v1059_v7 = vld [vmem:[%s14936_s17 + $0x40] sm:$0xf]  ;;  %v1176_v10 = vsel %vm14960_vm4, %v1174_v2, %v1175_v61  ;;  %v1060_v11 = vld [vmem:[%s14936_s17 + $0x44] sm:$0x1]  ;;  %v12036_v12 = vrot.slane %v1058_v6, 9  ;;  %v14118_v14 = vld [vmem:[%s18268_s2 + $0x118] sm:$0xff]  }
  0x82   : > { %v12214_v13 = vld [vmem:[%s14936_s17 + $0x48] sm:$0xe]  ;;  %1015 = vst [vmem:[#allocation3 + $0x34] sm:$0xf] %v656_v8  ;;  %1016 = vst [vmem:[#allocation3 + $0x40] sm:$0xf] %v666_v9  ;;  %13034 = vmatprep.subr.bf16.mxu1 %v14118_v14  ;;  %v2872_v31 = vsel %vm14960_vm4, %v12251_v62, %v2871_v4 }
  0x83   : > { %1295 = vst [vmem:[#allocation3 + $0x74] sm:$0xf] %v1176_v10  ;;  %v2873_v15 = vrot.slane %v2871_v4, 4  ;;  %v1179_v16 = vrot.slane %v1059_v7, 5  ;;  %v1182_v17 = vrot.slane %v1060_v11, 5  ;;  %v14119_v19 = vld [vmem:[%s18268_s2 + $0xd8] sm:$0xff]  }
  0x84   : > { %v12215_v18 = vld [vmem:[%s14936_s17 + $0x4c] sm:$0xf]  ;;  %v12216_v20 = vld [vmem:[%s14936_s17 + $0x50] sm:$0x1]  ;;  %v12252_v21 = vrot.slane %v12214_v13, 9  ;;  %13035 = vmatpush3.bf16.msra.mxu1 %v14119_v19  ;;  %v14132_v6 = vld [vmem:[%s18268_s2 + $0x160] sm:$0xff]  }
  0x85   : > { %v2878_v22 = vrot.slane %v12215_v18, 5  ;;  %v1180_v23 = vsel %vm14960_vm4, %v12036_v12, %v1179_v16  ;;  %v1181_v24 = vrot.slane %v1179_v16, 4  ;;  %v2881_v25 = vrot.slane %v12216_v20, 5  ;;  %v14125_v27 = vld [vmem:[%s18268_s2 + $0x110] sm:$0xff]   ;;  %v486_v29 = vld [vmem:[%s14936_s17 + $0x24] sm:$0xf]  ;;  %13760 = vmatprep.subr.bf16.mxu0 %v14132_v6 }
  0x86   : > { %1296 = vst [vmem:[#allocation3 + $0x80] sm:$0xf] %v1180_v23  ;;  %v487_v30 = vld [vmem:[%s14936_s17 + $0x28] sm:$0xf]  ;;  %v2875_v32 = vsel %vm14960_vm4, %v2873_v15, %v2874_v5  ;;  %518 = vst [vmem:[#allocation3 + $0x48] sm:$0xf] %v486_v29  ;;  %13036 = vmatprep.subr.bf16.mxu1 %v14125_v27  ;;  %13761 = vmatpush3.bf16.msra.mxu0 %v14132_v6 }
  0x87   : > { %v2880_v26 = vrot.slane %v2878_v22, 4  ;;  %v1183_v28 = vsel %vm14960_vm4, %v1181_v24, %v1182_v17  ;;  %519 = vst [vmem:[#allocation3 + $0x54] sm:$0xf] %v487_v30  ;;  %v553_v33 = vld [vmem:[%s14936_s17 + $0x24] sm:$0xf]  ;;  %v2879_v52 = vsel %vm14960_vm4, %v12252_v21, %v2878_v22  ;;  %v14126_v62 = vld [vmem:[%s18268_s2 + $0xd0] sm:$0xff]  }
  0x88   : > { %1297 = vst [vmem:[#allocation3 + $0x8c] sm:$0xf] %v1183_v28  ;;  %v554_v34 = vld [vmem:[%s14936_s17 + $0x28] sm:$0xf]  ;;  %v555_v35 = vld [vmem:[%s14936_s17 + $0x2c] sm:$0x1]  ;;  %13037 = vmatpush3.bf16.msra.mxu1 %v14126_v62 }
  0x89   : > { %v668_v36 = vshrl.u32 %v553_v33, 16  ;;  %v671_v37 = vshll.u32 %v553_v33, 16  ;;  %v677_v38 = vshll.u32 %v554_v34, 16  ;;  %v681_v39 = vshrl.u32 %v554_v34, 16  ;;  %v14097_v40 = vld [vmem:[#allocation3 + $0x34] ss:$12 sps:$4 sm:$0xff]  }
  0x8a   : > { %v687_v41 = vshll.u32 %v555_v35, 16  ;;  %v14099_v43 = vld [vmem:[#allocation3 + $0x68] ss:$12 sps:$4 sm:$0xff]   ;;  %v14100_v46 = vld [vmem:[#allocation3 + $0x30] ss:$12 sps:$4 sm:$0xff]   ;;  %1878 = vmatprep.mubr.bf16.mxu0 %v14097_v40  ;;  %v2882_v53 = vsel %vm14960_vm4, %v2880_v26, %v2881_v25  ;;  %s14614_s18 = scalar_lea.vmem %s18222_s22, 4096 }
  0x8b   : > { %2993 = vst [vmem:[#allocation3 + $0x68] sm:$0xf] %v2872_v31  ;;  %2994 = vst [vmem:[#allocation3 + $0x74] sm:$0xf] %v2875_v32  ;;  %v670_v47 = vrot.slane %v668_v36, 4  ;;  %v673_v48 = vrot.slane %v671_v37, 5  ;;  %13730 = vmatprep.mubr.bf16.mxu1 %v14099_v43  ;;  %1879 = vmatmul.mubr.bf16.gmra.mxu0 %v14100_v46  ;;  %p14615_p11 = scmp.ne.s32.totalorder %s18222_s22, %s14614_s18 }
  0x8c   : > { %v679_v49 = vrot.slane %v677_v38, 5  ;;  %v683_v50 = vrot.slane %v681_v39, 4  ;;  %v1061_v51 = vld [vmem:[%s14936_s17 + $0x48] sm:$0xe]  ;;  %v689_v54 = vrot.slane %v687_v41, 5  ;;  %v14140_v22 = vld [vmem:[%s18268_s2 + $0x100] sm:$0xff]  }
  0x8d   : > { %v1062_v55 = vld [vmem:[%s14936_s17 + $0x4c] sm:$0xf]  ;;  %v12037_v56 = vrot.slane %v1061_v51, 9  ;;  %v674_v57 = vor.u32 %v673_v48, %v670_v47  ;;  %v1063_v59 = vld [vmem:[%s14936_s17 + $0x50] sm:$0x1]  ;;  %v14141_v31 = vld [vmem:[%s18268_s2 + $0xc0] sm:$0xff]  }
  0x8e   : > { %v684_v58 = vor.u32 %v683_v50, %v679_v49  ;;  %v1186_v60 = vrot.slane %v1062_v55, 5  ;;  %v12217_v61 = vld [vmem:[%s14936_s17 + $0x54] sm:$0xe]  ;;  %v1189_v0 = vrot.slane %v1063_v59, 5  ;;  %v12218_v5 = vld [vmem:[%s14936_s17 + $0x58] sm:$0xf] }
  0x8f   : > { %v14101_v63 = vld [vmem:[#allocation3 + $0x80] ss:$12 sps:$4 sm:$0xff]   ;;  %v12253_v1 = vrot.slane %v12217_v61, 9  ;;  %v675_v2 = vrot.slane %v674_v57, 4  ;;  %v12219_v7 = vld [vmem:[%s14936_s17 + $0x5c] sm:$0x1] }
  0x90   : > { %2995 = vst [vmem:[#allocation3 + $0x80] sm:$0xf] %v2879_v52  ;;  %2996 = vst [vmem:[#allocation3 + $0x8c] sm:$0xf] %v2882_v53  ;;  %v685_v3 = vrot.slane %v684_v58, 4  ;;  %v1187_v44 = vsel %vm14960_vm4, %v12037_v56, %v1186_v60  ;;  %v1188_v4 = vrot.slane %v1186_v60, 4  ;;  %13731 = vmatmul.mubr.bf16.gmra.mxu1 %v14101_v63 }
  0x91   : > { %1298 = vst [vmem:[#allocation3 + $0x98] sm:$0xf] %v1187_v44  ;;  %v2885_v8 = vrot.slane %v12218_v5, 5  ;;  %v1064_v9 = vld [vmem:[%s14936_s17 + $0x54] sm:$0xe]  ;;  %v14133_v10 = vld [vmem:[%s18268_s2 + $0x108] sm:$0xff]   ;;  %v680_v11 = vsel %vm14971_vm5, %v675_v2, %v679_v49 }
  0x92   : > { %v690_v12 = vsel %vm14971_vm5, %v685_v3, %v689_v54  ;;  %v1190_v13 = vsel %vm14960_vm4, %v1188_v4, %v1189_v0  ;;  %v2888_v14 = vrot.slane %v12219_v7, 5  ;;  %v1065_v15 = vld [vmem:[%s14936_s17 + $0x58] sm:$0xf]  ;;  %v1066_v16 = vld [vmem:[%s14936_s17 + $0x5c] sm:$0x1]  ;;  %v14134_v17 = vld [vmem:[%s18268_s2 + $0xc8] sm:$0xff]   ;;  %13038 = vmatprep.subr.bf16.mxu1 %v14133_v10 }
  0x93   : > { %1017 = vst [vmem:[#allocation3 + $0x4c] sm:$0xf] %v680_v11  ;;  %1018 = vst [vmem:[#allocation3 + $0x58] sm:$0xf] %v690_v12  ;;  %v2887_v18 = vrot.slane %v2885_v8, 4  ;;  %v12038_v19 = vrot.slane %v1064_v9, 9  ;;  %13039 = vmatpush3.bf16.msra.mxu1 %v14134_v17  ;;  %v2886_v37 = vsel %vm14960_vm4, %v12253_v1, %v2885_v8 }
  0x94   : > { %1299 = vst [vmem:[#allocation3 + $0xa4] sm:$0xf] %v1190_v13  ;;  %v1193_v20 = vrot.slane %v1065_v15, 5  ;;  %v12220_v21 = vld [vmem:[%s14936_s17 + $0x60] sm:$0xe]  ;;  %v1196_v23 = vrot.slane %v1066_v16, 5  ;;  %13040 = vmatprep.subr.bf16.mxu1 %v14140_v22 }
  0x95   : > { %v12221_v24 = vld [vmem:[%s14936_s17 + $0x64] sm:$0xf]  ;;  %v12222_v25 = vld [vmem:[%s14936_s17 + $0x68] sm:$0x1]  ;;  %v12254_v26 = vrot.slane %v12220_v21, 9  ;;  %v14148_v36 = vld [vmem:[%s18268_s2 + $0x158] sm:$0xff]   ;;  %v2889_v40 = vsel %vm14960_vm4, %v2887_v18, %v2888_v14 }
  0x96   : > { %v1194_v27 = vsel %vm14960_vm4, %v12038_v19, %v1193_v20  ;;  %v1195_v28 = vrot.slane %v1193_v20, 4  ;;  %v2892_v29 = vrot.slane %v12221_v24, 5  ;;  %v2895_v30 = vrot.slane %v12222_v25, 5  ;;  %v488_v34 = vld [vmem:[%s14936_s17 + $0x30] sm:$0xf]  ;;  %13762 = vmatprep.subr.bf16.mxu0 %v14148_v36  ;;  %v14149_v48 = vld [vmem:[%s18268_s2 + $0x238] sm:$0xff]  }
  0x97   : > { %1300 = vst [vmem:[#allocation3 + $0xb0] sm:$0xf] %v1194_v27  ;;  %v489_v35 = vld [vmem:[%s14936_s17 + $0x34] sm:$0xf]  ;;  %520 = vst [vmem:[#allocation3 + $0x60] sm:$0xf] %v488_v34  ;;  %13041 = vmatpush3.bf16.msra.mxu1 %v14141_v31  ;;  %13763 = vmatpush3.bf16.msra.mxu0 %v14148_v36 }
  0x98   : > { %v1197_v32 = vsel %vm14960_vm4, %v1195_v28, %v1196_v23  ;;  %v2894_v33 = vrot.slane %v2892_v29, 4  ;;  %521 = vst [vmem:[#allocation3 + $0x6c] sm:$0xf] %v489_v35  ;;  %v556_v38 = vld [vmem:[%s14936_s17 + $0x30] sm:$0xf]  ;;  %13802 = vmatprep.subr.bf16.mxu1 %v14149_v48  ;;  %v2893_v59 = vsel %vm14960_vm4, %v12254_v26, %v2892_v29  ;;  %v14176_v15 = vld [vmem:[%s18268_s2 + $0x148] sm:$0xff]  }
  0x99   : > { %1301 = vst [vmem:[#allocation3 + $0xbc] sm:$0xf] %v1197_v32  ;;  %v557_v39 = vld [vmem:[%s14936_s17 + $0x34] sm:$0xf]  ;;  %v558_v41 = vld [vmem:[%s14936_s17 + $0x38] sm:$0x1] }
  0x9a   : > { %v692_v43 = vshrl.u32 %v556_v38, 16  ;;  %v695_v46 = vshll.u32 %v556_v38, 16  ;;  %v701_v47 = vshll.u32 %v557_v39, 16  ;;  %v14105_v49 = vld [vmem:[#allocation3 + $0x4c] ss:$12 sps:$4 sm:$0xff]   ;;  %v705_v50 = vshrl.u32 %v557_v39, 16 }
  0x9b   : > { %v711_v51 = vshll.u32 %v558_v41, 16  ;;  %v14107_v52 = vld [vmem:[#allocation3 + $0x98] ss:$12 sps:$4 sm:$0xff]   ;;  %v14108_v53 = vld [vmem:[#allocation3 + $0x48] ss:$12 sps:$4 sm:$0xff]   ;;  %1886 = vmatprep.mubr.bf16.mxu0 %v14105_v49  ;;  %v2896_v60 = vsel %vm14960_vm4, %v2894_v33, %v2895_v30  ;;  %p18464_p7 = scmp.ne.s32.totalorder %s18291_s26, 0 }
  0x9c   : > { %2997 = vst [vmem:[#allocation3 + $0x98] sm:$0xf] %v2886_v37  ;;  %2998 = vst [vmem:[#allocation3 + $0xa4] sm:$0xf] %v2889_v40  ;;  %v694_v54 = vrot.slane %v692_v43, 4  ;;  %v697_v55 = vrot.slane %v695_v46, 5  ;;  %13734 = vmatprep.mubr.bf16.mxu1 %v14107_v52  ;;  %1887 = vmatmul.mubr.bf16.gmra.mxu0 %v14108_v53 }
  0x9d   : > { %v703_v56 = vrot.slane %v701_v47, 5  ;;  %v707_v57 = vrot.slane %v705_v50, 4  ;;  %v1067_v58 = vld [vmem:[%s14936_s17 + $0x60] sm:$0xe]  ;;  %v713_v61 = vrot.slane %v711_v51, 5  ;;  %v14162_v4 = vld [vmem:[%s18268_s2 + $0x150] sm:$0xff]   ;;  %p14616_p12 = pnand %p14615_p11, %p18464_p7 }
  0x9e   : > { %v1068_v62 = vld [vmem:[%s14936_s17 + $0x64] sm:$0xf]  ;;  %v12039_v63 = vrot.slane %v1067_v58, 9  ;;  %v698_v0 = vor.u32 %v697_v55, %v694_v54  ;;  %v1069_v2 = vld [vmem:[%s14936_s17 + $0x68] sm:$0x1]  ;;  %13764 = vmatprep.subr.bf16.mxu0 %v14162_v4  ;;  %s14691_s9 = smov [#allocation10]  }
  0x9f   : > { %v708_v1 = vor.u32 %v707_v57, %v703_v56  ;;  %v1200_v3 = vrot.slane %v1068_v62, 5  ;;  %v12223_v44 = vld [vmem:[%s14936_s17 + $0x6c] sm:$0xe]  ;;  %v1203_v6 = vrot.slane %v1069_v2, 5  ;;  %v12224_v11 = vld [vmem:[%s14936_s17 + $0x70] sm:$0xf]  ;;  %13765 = vmatpush3.bf16.msra.mxu0 %v14162_v4  ;;  %p14617_p10 = pneg %p14616_p12 }
  0xa0   : > { %v14109_v5 = vld [vmem:[#allocation3 + $0xb0] ss:$12 sps:$4 sm:$0xff]   ;;  %v699_v7 = vrot.slane %v698_v0, 4  ;;  %v2899_v13 = vrot.slane %v12224_v11, 5  ;;  %v1070_v14 = vld [vmem:[%s14936_s17 + $0x6c] sm:$0xe]  ;;  %13766 = vmatprep.subr.bf16.mxu0 %v14176_v15 }
  0xa1   : > { %2999 = vst [vmem:[#allocation3 + $0xb0] sm:$0xf] %v2893_v59  ;;  %3000 = vst [vmem:[#allocation3 + $0xbc] sm:$0xf] %v2896_v60  ;;  %v709_v8 = vrot.slane %v708_v1, 4  ;;  %v1201_v9 = vsel %vm14960_vm4, %v12039_v63, %v1200_v3  ;;  %v1202_v10 = vrot.slane %v1200_v3, 4  ;;  %13735 = vmatmul.mubr.bf16.gmra.mxu1 %v14109_v5 }
  0xa2   : > { %1302 = vst [vmem:[#allocation3 + $0xc8] sm:$0xf] %v1201_v9  ;;  %v12225_v12 = vld [vmem:[%s14936_s17 + $0x74] sm:$0x1]  ;;  %v704_v16 = vsel %vm14971_vm5, %v699_v7, %v703_v56  ;;  %v1071_v19 = vld [vmem:[%s14936_s17 + $0x70] sm:$0xf] }
  0xa3   : > { %v714_v17 = vsel %vm14971_vm5, %v709_v8, %v713_v61  ;;  %v1204_v18 = vsel %vm14960_vm4, %v1202_v10, %v1203_v6  ;;  %v1072_v20 = vld [vmem:[%s14936_s17 + $0x74] sm:$0x1]  ;;  %1019 = vst [vmem:[#allocation3 + $0x64] sm:$0xf] %v704_v16  ;;  %v12255_v21 = vrot.slane %v12223_v44, 9  ;;  %v2902_v22 = vrot.slane %v12225_v12, 5  ;;  %13767 = vmatpush3.bf16.msra.mxu0 %v14176_v15 }
  0xa4   : > { %1020 = vst [vmem:[#allocation3 + $0x70] sm:$0xf] %v714_v17  ;;  %1303 = vst [vmem:[#allocation3 + $0xd4] sm:$0xf] %v1204_v18  ;;  %v12040_v23 = vrot.slane %v1070_v14, 9  ;;  %v1207_v24 = vrot.slane %v1071_v19, 5 }
  0xa5   : > { %v12226_v25 = vld [vmem:[%s14936_s17 + $0x78] sm:$0xe]  ;;  %v2901_v26 = vrot.slane %v2899_v13, 4  ;;  %v1210_v27 = vrot.slane %v1072_v20, 5  ;;  %v12227_v28 = vld [vmem:[%s14936_s17 + $0x7c] sm:$0xf]  ;;  %v2900_v39 = vsel %vm14960_vm4, %v12255_v21, %v2899_v13 }
  0xa6   : > { %v12228_v29 = vld [vmem:[%s14936_s17 + $0x80] sm:$0x1]  ;;  %v1208_v30 = vsel %vm14960_vm4, %v12040_v23, %v1207_v24  ;;  %v1209_v31 = vrot.slane %v1207_v24, 4  ;;  %v2906_v32 = vrot.slane %v12227_v28, 5  ;;  %v12256_v33 = vrot.slane %v12226_v25, 9  ;;  %s14618_s19 = sshll.u32 %s14691_s9, 4  ;;  %s14619_s19 = int_to_ptr.vmem [resolvable:$false] %s14618_s19 }
  0xa7   : > { %1304 = vst [vmem:[#allocation3 + $0xe0] sm:$0xf] %v1208_v30  ;;  %v2909_v36 = vrot.slane %v12228_v29, 5  ;;  %v490_v37 = vld [vmem:[%s14936_s17 + $0x3c] sm:$0xf]  ;;  %v2903_v40 = vsel %vm14960_vm4, %v2901_v26, %v2902_v22  ;;  %v14190_v24 = vld [vmem:[%s18268_s2 + $0x140] sm:$0xff]   ;;  %p14621_p2 = scmp.lt.s32.totalorder %s18222_s22, %s14619_s19 }
  0xa8   : > { %v1211_v34 = vsel %vm14960_vm4, %v1209_v31, %v1210_v27  ;;  %v2908_v35 = vrot.slane %v2906_v32, 4  ;;  %v491_v38 = vld [vmem:[%s14936_s17 + $0x40] sm:$0xf]  ;;  %522 = vst [vmem:[#allocation3 + $0x78] sm:$0xf] %v490_v37  ;;  %v2907_v57 = vsel %vm14960_vm4, %v12256_v33, %v2906_v32  ;;  %13768 = vmatprep.subr.bf16.mxu0 %v14190_v24  ;;  %s14620_s20 = scalar_lea.vmem %s14619_s19, 8192 }
  0xa9   : > { %1305 = vst [vmem:[#allocation3 + $0xec] sm:$0xf] %v1211_v34  ;;  %523 = vst [vmem:[#allocation3 + $0x84] sm:$0xf] %v491_v38  ;;  %v559_v41 = vld [vmem:[%s14936_s17 + $0x3c] sm:$0xf]  ;;  %13769 = vmatpush3.bf16.msra.mxu0 %v14190_v24  ;;  %p14622_p13 = scmp.lt.s32.totalorder %s14620_s20, %s14614_s18 }
  0xaa   : > { %v560_v43 = vld [vmem:[%s14936_s17 + $0x40] sm:$0xf]  ;;  %v561_v46 = vld [vmem:[%s14936_s17 + $0x44] sm:$0x1]  ;;  %v716_v48 = vshrl.u32 %v559_v41, 16  ;;  %v719_v49 = vshll.u32 %v559_v41, 16  ;;  %v2910_v58 = vsel %vm14960_vm4, %v2908_v35, %v2909_v36 }
  0xab   : > { %v14112_v47 = vld [vmem:[#allocation3 + $0x64] ss:$12 sps:$4 sm:$0xff]   ;;  %v14114_v50 = vld [vmem:[#allocation3 + $0xc8] ss:$12 sps:$4 sm:$0xff]   ;;  %v14115_v51 = vld [vmem:[#allocation3 + $0x60] ss:$12 sps:$4 sm:$0xff]   ;;  %p14623_p0 = por %p14622_p13, %p14621_p2 }
  0xac   : > { %1894 = vmatprep.mubr.bf16.mxu0 %v14112_v47  ;;  %3001 = vst [vmem:[#allocation3 + $0xc8] sm:$0xf] %v2900_v39  ;;  %3002 = vst [vmem:[#allocation3 + $0xd4] sm:$0xf] %v2903_v40  ;;  %v718_v52 = vrot.slane %v716_v48, 4  ;;  %v721_v53 = vrot.slane %v719_v49, 5  ;;  %13738 = vmatprep.mubr.bf16.mxu1 %v14114_v50 }
  0xad   : > { %v725_v54 = vshll.u32 %v560_v43, 16  ;;  %v729_v55 = vshrl.u32 %v560_v43, 16  ;;  %v1073_v56 = vld [vmem:[%s14936_s17 + $0x78] sm:$0xe]  ;;  %1895 = vmatmul.mubr.bf16.gmra.mxu0 %v14115_v51  ;;  %v735_v59 = vshll.u32 %v561_v46, 16  ;;  %p14624_p5 = pnand %p14623_p0, %p14617_p10 }
  0xae   : > { %v1074_v60 = vld [vmem:[%s14936_s17 + $0x7c] sm:$0xf]  ;;  %v12041_v61 = vrot.slane %v1073_v56, 9  ;;  %v722_v62 = vor.u32 %v721_v53, %v718_v52  ;;  %v1075_v1 = vld [vmem:[%s14936_s17 + $0x80] sm:$0x1] }
  0xaf   : > { %v727_v63 = vrot.slane %v725_v54, 5  ;;  %v731_v0 = vrot.slane %v729_v55, 4  ;;  %v1214_v2 = vrot.slane %v1074_v60, 5  ;;  %v737_v44 = vrot.slane %v735_v59, 5  ;;  %v12229_v9 = vld [vmem:[%s14936_s17 + $0x84] sm:$0xe] }
  0xb0   : > { %v14116_v3 = vld [vmem:[#allocation3 + $0xe0] ss:$12 sps:$4 sm:$0xff]   ;;  %v1217_v4 = vrot.slane %v1075_v1, 5  ;;  %v723_v5 = vrot.slane %v722_v62, 4  ;;  %v12230_v10 = vld [vmem:[%s14936_s17 + $0x88] sm:$0xf] }
  0xb1   : > { %3003 = vst [vmem:[#allocation3 + $0xe0] sm:$0xf] %v2907_v57  ;;  %3004 = vst [vmem:[#allocation3 + $0xec] sm:$0xf] %v2910_v58  ;;  %v732_v6 = vor.u32 %v731_v0, %v727_v63  ;;  %v1215_v7 = vsel %vm14960_vm4, %v12041_v61, %v1214_v2  ;;  %v1216_v8 = vrot.slane %v1214_v2, 4  ;;  %13739 = vmatmul.mubr.bf16.gmra.mxu1 %v14116_v3  ;;  %v2913_v12 = vrot.slane %v12230_v10, 5 }
  0xb2   : > { %1306 = vst [vmem:[#allocation3 + $0xf8] sm:$0xf] %v1215_v7  ;;  %v12231_v11 = vld [vmem:[%s14936_s17 + $0x8c] sm:$0x1]  ;;  %v1076_v13 = vld [vmem:[%s14936_s17 + $0x84] sm:$0xe]  ;;  %v728_v14 = vsel %vm14971_vm5, %v723_v5, %v727_v63 }
  0xb3   : > { %v733_v15 = vrot.slane %v732_v6, 4  ;;  %v1218_v16 = vsel %vm14960_vm4, %v1216_v8, %v1217_v4  ;;  %v12257_v17 = vrot.slane %v12229_v9, 9  ;;  %v1077_v18 = vld [vmem:[%s14936_s17 + $0x88] sm:$0xf]  ;;  %v1078_v19 = vld [vmem:[%s14936_s17 + $0x8c] sm:$0x1] }
  0xb4   : > { %1021 = vst [vmem:[#allocation3 + $0x7c] sm:$0xf] %v728_v14  ;;  %1307 = vst [vmem:[#allocation3 + $0x104] sm:$0xf] %v1218_v16  ;;  %v2916_v20 = vrot.slane %v12231_v11, 5  ;;  %v12042_v21 = vrot.slane %v1076_v13, 9 }
  0xb5   : > { %v1221_v22 = vrot.slane %v1077_v18, 5  ;;  %v12232_v23 = vld [vmem:[%s14936_s17 + $0x90] sm:$0xe]  ;;  %v738_v25 = vsel %vm14971_vm5, %v733_v15, %v737_v44  ;;  %v2915_v26 = vrot.slane %v2913_v12, 4  ;;  %v1224_v27 = vrot.slane %v1078_v19, 5 }
  0xb6   : > { %v12233_v28 = vld [vmem:[%s14936_s17 + $0x94] sm:$0xf]  ;;  %v12234_v29 = vld [vmem:[%s14936_s17 + $0x98] sm:$0x1]  ;;  %1022 = vst [vmem:[#allocation3 + $0x88] sm:$0xf] %v738_v25  ;;  %v2914_v38 = vsel %vm14960_vm4, %v12257_v17, %v2913_v12 }
  0xb7   : > { %v1222_v30 = vsel %vm14960_vm4, %v12042_v21, %v1221_v22  ;;  %v1223_v31 = vrot.slane %v1221_v22, 4  ;;  %v2920_v32 = vrot.slane %v12233_v28, 5  ;;  %v12258_v34 = vrot.slane %v12232_v23, 9  ;;  %v492_v36 = vld [vmem:[%s14936_s17 + $0x48] sm:$0xf] }
  0xb8   : > { %1308 = vst [vmem:[#allocation3 + $0x110] sm:$0xf] %v1222_v30  ;;  %v2923_v35 = vrot.slane %v12234_v29, 5  ;;  %v493_v37 = vld [vmem:[%s14936_s17 + $0x4c] sm:$0xf]  ;;  %v2917_v39 = vsel %vm14960_vm4, %v2915_v26, %v2916_v20 }
  0xb9   : > { %v1225_v33 = vsel %vm14960_vm4, %v1223_v31, %v1224_v27  ;;  %524 = vst [vmem:[#allocation3 + $0x90] sm:$0xf] %v492_v36  ;;  %525 = vst [vmem:[#allocation3 + $0x9c] sm:$0xf] %v493_v37  ;;  %v562_v40 = vld [vmem:[%s14936_s17 + $0x48] sm:$0xf]  ;;  %v2921_v60 = vsel %vm14960_vm4, %v12258_v34, %v2920_v32 }
  0xba   : > { %1309 = vst [vmem:[#allocation3 + $0x11c] sm:$0xf] %v1225_v33  ;;  %v563_v41 = vld [vmem:[%s14936_s17 + $0x4c] sm:$0xf]  ;;  %v2922_v43 = vrot.slane %v2920_v32, 4  ;;  %v740_v47 = vshrl.u32 %v562_v40, 16 }
  0xbb   : > { %v564_v46 = vld [vmem:[%s14936_s17 + $0x50] sm:$0x1]  ;;  %v743_v48 = vshll.u32 %v562_v40, 16  ;;  %v749_v49 = vshll.u32 %v563_v41, 16  ;;  %v753_v51 = vshrl.u32 %v563_v41, 16  ;;  %v14203_v32 = vld [vmem:[%s18268_s2 + $0x1f8] sm:$0xff]  }
  0xbc   : > { %v14122_v50 = vld [vmem:[#allocation3 + $0xf8] ss:$12 sps:$4 sm:$0xff]   ;;  %v742_v52 = vrot.slane %v740_v47, 4  ;;  %v759_v55 = vshll.u32 %v564_v46, 16  ;;  %v2924_v61 = vsel %vm14960_vm4, %v2922_v43, %v2923_v35  ;;  %v1080_v63 = vld [vmem:[%s14936_s17 + $0x94] sm:$0xf]  ;;  %13162 = vmatprep.subr.bf16.mxu0 %v14203_v32 }
  0xbd   : > { %3005 = vst [vmem:[#allocation3 + $0xf8] sm:$0xf] %v2914_v38  ;;  %3006 = vst [vmem:[#allocation3 + $0x104] sm:$0xf] %v2917_v39  ;;  %v745_v53 = vrot.slane %v743_v48, 5  ;;  %v751_v54 = vrot.slane %v749_v49, 5  ;;  %13742 = vmatprep.mubr.bf16.mxu1 %v14122_v50 }
  0xbe   : > { %v1079_v56 = vld [vmem:[%s14936_s17 + $0x90] sm:$0xe]  ;;  %v14120_v57 = vld [vmem:[#allocation3 + $0x7c] ss:$12 sps:$4 sm:$0xff]   ;;  %v755_v59 = vrot.slane %v753_v51, 4  ;;  %v761_v2 = vrot.slane %v759_v55, 5 }
  0xbf   : > { %v14123_v58 = vld [vmem:[#allocation3 + $0x78] ss:$12 sps:$4 sm:$0xff]   ;;  %v746_v62 = vor.u32 %v745_v53, %v742_v52  ;;  %v12043_v0 = vrot.slane %v1079_v56, 9  ;;  %1902 = vmatprep.mubr.bf16.mxu0 %v14120_v57  ;;  %v1081_v3 = vld [vmem:[%s14936_s17 + $0x98] sm:$0x1]  ;;  %v1228_v44 = vrot.slane %v1080_v63, 5 }
  0xc0   : > { %v756_v1 = vor.u32 %v755_v59, %v751_v54  ;;  %v12235_v4 = vld [vmem:[%s14936_s17 + $0x9c] sm:$0xe]  ;;  %1903 = vmatmul.mubr.bf16.gmra.mxu0 %v14123_v58  ;;  %v1231_v7 = vrot.slane %v1081_v3, 5  ;;  %v12236_v11 = vld [vmem:[%s14936_s17 + $0xa0] sm:$0xf] }
  0xc1   : > { %v14124_v5 = vld [vmem:[#allocation3 + $0x110] ss:$12 sps:$4 sm:$0xff]   ;;  %v747_v6 = vrot.slane %v746_v62, 4  ;;  %v1229_v9 = vsel %vm14960_vm4, %v12043_v0, %v1228_v44  ;;  %v1230_v10 = vrot.slane %v1228_v44, 4  ;;  %v12237_v12 = vld [vmem:[%s14936_s17 + $0xa4] sm:$0x1] }
  0xc2   : > { %3007 = vst [vmem:[#allocation3 + $0x110] sm:$0xf] %v2921_v60  ;;  %3008 = vst [vmem:[#allocation3 + $0x11c] sm:$0xf] %v2924_v61  ;;  %v757_v8 = vrot.slane %v756_v1, 4  ;;  %13743 = vmatmul.mubr.bf16.gmra.mxu1 %v14124_v5  ;;  %v2927_v14 = vrot.slane %v12236_v11, 5 }
  0xc3   : > { %v752_v13 = vsel %vm14971_vm5, %v747_v6, %v751_v54  ;;  %1310 = vst [vmem:[#allocation3 + $0x128] sm:$0xf] %v1229_v9  ;;  %v1082_v15 = vld [vmem:[%s14936_s17 + $0x9c] sm:$0xe]  ;;  %v1232_v17 = vsel %vm14960_vm4, %v1230_v10, %v1231_v7  ;;  %v12259_v18 = vrot.slane %v12235_v4, 9  ;;  %v2930_v23 = vrot.slane %v12237_v12, 5 }
  0xc4   : > { %v762_v16 = vsel %vm14971_vm5, %v757_v8, %v761_v2  ;;  %1023 = vst [vmem:[#allocation3 + $0x94] sm:$0xf] %v752_v13  ;;  %v1083_v19 = vld [vmem:[%s14936_s17 + $0xa0] sm:$0xf]  ;;  %v1084_v20 = vld [vmem:[%s14936_s17 + $0xa4] sm:$0x1] }
  0xc5   : > { %v12044_v21 = vrot.slane %v1082_v15, 9  ;;  %1024 = vst [vmem:[#allocation3 + $0xa0] sm:$0xf] %v762_v16  ;;  %1311 = vst [vmem:[#allocation3 + $0x134] sm:$0xf] %v1232_v17  ;;  %v2929_v22 = vrot.slane %v2927_v14, 4  ;;  %v2928_v38 = vsel %vm14960_vm4, %v12259_v18, %v2927_v14 }
  0xc6   : > { %v1235_v24 = vrot.slane %v1083_v19, 5  ;;  %v1238_v25 = vrot.slane %v1084_v20, 5  ;;  %v12238_v26 = vld [vmem:[%s14936_s17 + $0xa8] sm:$0xe]  ;;  %v12239_v27 = vld [vmem:[%s14936_s17 + $0xac] sm:$0xf] }
  0xc7   : > { %v12240_v28 = vld [vmem:[%s14936_s17 + $0xb0] sm:$0x1]  ;;  %v2934_v31 = vrot.slane %v12239_v27, 5  ;;  %v12260_v34 = vrot.slane %v12238_v26, 9  ;;  %v494_v36 = vld [vmem:[%s14936_s17 + $0x54] sm:$0xf]  ;;  %v2931_v39 = vsel %vm14960_vm4, %v2929_v22, %v2930_v23 }
  0xc8   : > { %v1236_v29 = vsel %vm14960_vm4, %v12044_v21, %v1235_v24  ;;  %v1237_v30 = vrot.slane %v1235_v24, 4  ;;  %v2937_v35 = vrot.slane %v12240_v28, 5  ;;  %v495_v37 = vld [vmem:[%s14936_s17 + $0x58] sm:$0xf]  ;;  %526 = vst [vmem:[#allocation3 + $0xa8] sm:$0xf] %v494_v36 }
  0xc9   : > { %1312 = vst [vmem:[#allocation3 + $0x140] sm:$0xf] %v1236_v29  ;;  %v2936_v40 = vrot.slane %v2934_v31, 4  ;;  %527 = vst [vmem:[#allocation3 + $0xb4] sm:$0xf] %v495_v37  ;;  %v2935_v56 = vsel %vm14960_vm4, %v12260_v34, %v2934_v31 }
  0xca   : > { %v1239_v33 = vsel %vm14960_vm4, %v1237_v30, %v1238_v25  ;;  %v565_v41 = vld [vmem:[%s14936_s17 + $0x54] sm:$0xf]  ;;  %v566_v43 = vld [vmem:[%s14936_s17 + $0x58] sm:$0xf]  ;;  %v567_v50 = vld [vmem:[%s14936_s17 + $0x5c] sm:$0x1] }
  0xcb   : > { %1313 = vst [vmem:[#allocation3 + $0x14c] sm:$0xf] %v1239_v33  ;;  %v764_v47 = vshrl.u32 %v565_v41, 16  ;;  %v14130_v49 = vld [vmem:[#allocation3 + $0x90] ss:$12 sps:$4 sm:$0xff]   ;;  %v767_v52 = vshll.u32 %v565_v41, 16  ;;  %v2938_v57 = vsel %vm14960_vm4, %v2936_v40, %v2937_v35 }
  0xcc   : > { %v14127_v46 = vld [vmem:[#allocation3 + $0x94] ss:$12 sps:$4 sm:$0xff]   ;;  %v773_v53 = vshll.u32 %v566_v43, 16  ;;  %v777_v54 = vshrl.u32 %v566_v43, 16  ;;  %v1085_v55 = vld [vmem:[%s14936_s17 + $0xa8] sm:$0xe] }
  0xcd   : > { %v14129_v48 = vld [vmem:[#allocation3 + $0x128] ss:$12 sps:$4 sm:$0xff]   ;;  %1910 = vmatprep.mubr.bf16.mxu0 %v14127_v46  ;;  %v766_v51 = vrot.slane %v764_v47, 4  ;;  %v783_v58 = vshll.u32 %v567_v50, 16  ;;  %v12045_v60 = vrot.slane %v1085_v55, 9  ;;  %v769_v61 = vrot.slane %v767_v52, 5 }
  0xce   : > { %3009 = vst [vmem:[#allocation3 + $0x128] sm:$0xf] %v2928_v38  ;;  %3010 = vst [vmem:[#allocation3 + $0x134] sm:$0xf] %v2931_v39  ;;  %13746 = vmatprep.mubr.bf16.mxu1 %v14129_v48  ;;  %1911 = vmatmul.mubr.bf16.gmra.mxu0 %v14130_v49  ;;  %v1086_v59 = vld [vmem:[%s14936_s17 + $0xac] sm:$0xf] }
  0xcf   : > { %v775_v62 = vrot.slane %v773_v53, 5  ;;  %v779_v63 = vrot.slane %v777_v54, 4  ;;  %v1087_v0 = vld [vmem:[%s14936_s17 + $0xb0] sm:$0x1]  ;;  %v1242_v1 = vrot.slane %v1086_v59, 5  ;;  %v785_v3 = vrot.slane %v783_v58, 5 }
  0xd0   : > { %v1245_v44 = vrot.slane %v1087_v0, 5  ;;  %v770_v4 = vor.u32 %v769_v61, %v766_v51  ;;  %v12241_v8 = vld [vmem:[%s14936_s17 + $0xb4] sm:$0xe]  ;;  %v12242_v9 = vld [vmem:[%s14936_s17 + $0xb8] sm:$0xf] }
  0xd1   : > { %v780_v5 = vor.u32 %v779_v63, %v775_v62  ;;  %v1243_v6 = vsel %vm14960_vm4, %v12045_v60, %v1242_v1  ;;  %v1244_v7 = vrot.slane %v1242_v1, 4  ;;  %v12243_v10 = vld [vmem:[%s14936_s17 + $0xbc] sm:$0x1]  ;;  %v2941_v11 = vrot.slane %v12242_v9, 5  ;;  %v1088_v12 = vld [vmem:[%s14936_s17 + $0xb4] sm:$0xe] }
  0xd2   : > { %v14131_v2 = vld [vmem:[#allocation3 + $0x140] ss:$12 sps:$4 sm:$0xff]   ;;  %1314 = vst [vmem:[#allocation3 + $0x158] sm:$0xf] %v1243_v6  ;;  %v771_v13 = vrot.slane %v770_v4, 4  ;;  %v12261_v17 = vrot.slane %v12241_v8, 9 }
  0xd3   : > { %3011 = vst [vmem:[#allocation3 + $0x140] sm:$0xf] %v2935_v56  ;;  %3012 = vst [vmem:[#allocation3 + $0x14c] sm:$0xf] %v2938_v57  ;;  %13747 = vmatmul.mubr.bf16.gmra.mxu1 %v14131_v2  ;;  %v781_v14 = vrot.slane %v780_v5, 4  ;;  %v1246_v15 = vsel %vm14960_vm4, %v1244_v7, %v1245_v44  ;;  %v2944_v18 = vrot.slane %v12243_v10, 5 }
  0xd4   : > { %v1089_v16 = vld [vmem:[%s14936_s17 + $0xb8] sm:$0xf]  ;;  %1315 = vst [vmem:[#allocation3 + $0x164] sm:$0xf] %v1246_v15  ;;  %v1090_v19 = vld [vmem:[%s14936_s17 + $0xbc] sm:$0x1]  ;;  %v776_v22 = vsel %vm14971_vm5, %v771_v13, %v775_v62  ;;  %v2942_v36 = vsel %vm14960_vm4, %v12261_v17, %v2941_v11 }
  0xd5   : > { %v12046_v20 = vrot.slane %v1088_v12, 9  ;;  %v1249_v21 = vrot.slane %v1089_v16, 5  ;;  %v786_v23 = vsel %vm14971_vm5, %v781_v14, %v785_v3  ;;  %v2943_v24 = vrot.slane %v2941_v11, 4  ;;  %v12244_v26 = vld [vmem:[%s14936_s17 + $0xc0] sm:$0xe] }
  0xd6   : > { %v1252_v25 = vrot.slane %v1090_v19, 5  ;;  %v12245_v27 = vld [vmem:[%s14936_s17 + $0xc4] sm:$0xf]  ;;  %1025 = vst [vmem:[#allocation3 + $0xac] sm:$0xf] %v776_v22  ;;  %v12262_v31 = vrot.slane %v12244_v26, 9 }
  0xd7   : > { %1026 = vst [vmem:[#allocation3 + $0xb8] sm:$0xf] %v786_v23  ;;  %v1250_v28 = vsel %vm14960_vm4, %v12046_v20, %v1249_v21  ;;  %v1251_v29 = vrot.slane %v1249_v21, 4  ;;  %v12246_v30 = vld [vmem:[%s14936_s17 + $0xc8] sm:$0x1]  ;;  %v2948_v32 = vrot.slane %v12245_v27, 5  ;;  %v2945_v37 = vsel %vm14960_vm4, %v2943_v24, %v2944_v18 }
  0xd8   : > { %1316 = vst [vmem:[#allocation3 + $0x170] sm:$0xf] %v1250_v28  ;;  %v496_v34 = vld [vmem:[%s14936_s17 + $0x60] sm:$0xf]  ;;  %v497_v35 = vld [vmem:[%s14936_s17 + $0x64] sm:$0xf] }
  0xd9   : > { %v1253_v33 = vsel %vm14960_vm4, %v1251_v29, %v1252_v25  ;;  %v2950_v38 = vrot.slane %v2948_v32, 4  ;;  %v2951_v39 = vrot.slane %v12246_v30, 5  ;;  %528 = vst [vmem:[#allocation3 + $0xc0] sm:$0xf] %v496_v34  ;;  %529 = vst [vmem:[#allocation3 + $0xcc] sm:$0xf] %v497_v35  ;;  %v2949_v59 = vsel %vm14960_vm4, %v12262_v31, %v2948_v32 }
  0xda   : > { %1317 = vst [vmem:[#allocation3 + $0x17c] sm:$0xf] %v1253_v33  ;;  %v568_v40 = vld [vmem:[%s14936_s17 + $0x60] sm:$0xf]  ;;  %v569_v41 = vld [vmem:[%s14936_s17 + $0x64] sm:$0xf] }
  0xdb   : > { %v570_v43 = vld [vmem:[%s14936_s17 + $0x68] sm:$0x1]  ;;  %v788_v46 = vshrl.u32 %v568_v40, 16  ;;  %v791_v47 = vshll.u32 %v568_v40, 16  ;;  %v14137_v48 = vld [vmem:[#allocation3 + $0x158] ss:$12 sps:$4 sm:$0xff]   ;;  %v2952_v60 = vsel %vm14960_vm4, %v2950_v38, %v2951_v39 }
  0xdc   : > { %v797_v49 = vshll.u32 %v569_v41, 16  ;;  %v801_v50 = vshrl.u32 %v569_v41, 16  ;;  %3013 = vst [vmem:[#allocation3 + $0x158] sm:$0xf] %v2942_v36  ;;  %3014 = vst [vmem:[#allocation3 + $0x164] sm:$0xf] %v2945_v37  ;;  %13750 = vmatprep.mubr.bf16.mxu1 %v14137_v48 }
  0xdd   : > { %v790_v51 = vrot.slane %v788_v46, 4  ;;  %v793_v52 = vrot.slane %v791_v47, 5  ;;  %v807_v53 = vshll.u32 %v570_v43, 16  ;;  %v12119_v54 = vld [vmem:[%s14936_s17 + $0xc] sm:$0xf] }
  0xde   : > { %v14135_v55 = vld [vmem:[#allocation3 + $0xac] ss:$12 sps:$4 sm:$0xff]   ;;  %v799_v56 = vrot.slane %v797_v49, 5  ;;  %v803_v57 = vrot.slane %v801_v50, 4  ;;  %2217 = vst [vmem:[#allocation3] sm:$0xf] %v12119_v54 }
  0xdf   : > { %v14138_v58 = vld [vmem:[#allocation3 + $0xa8] ss:$12 sps:$4 sm:$0xff]   ;;  %v794_v61 = vor.u32 %v793_v52, %v790_v51  ;;  %v809_v62 = vrot.slane %v807_v53, 5  ;;  %1918 = vmatprep.mubr.bf16.mxu0 %v14135_v55  ;;  %v12120_v0 = vld [vmem:[%s14936_s17 + $0x10] sm:$0xf] }
  0xe0   : > { %v804_v63 = vor.u32 %v803_v57, %v799_v56  ;;  %v12151_v1 = vld [vmem:[%s14936_s17 + $0xc] sm:$0xf]  ;;  %v12152_v2 = vld [vmem:[%s14936_s17 + $0x10] sm:$0xf]  ;;  %1919 = vmatmul.mubr.bf16.gmra.mxu0 %v14138_v58  ;;  %2218 = vst [vmem:[#allocation3 + $0xc] sm:$0xf] %v12120_v0 }
  0xe1   : > { %v14139_v3 = vld [vmem:[#allocation3 + $0x170] ss:$12 sps:$4 sm:$0xff]   ;;  %v795_v44 = vrot.slane %v794_v61, 4  ;;  %v2298_v4 = vshrl.u32 %v12151_v1, 16  ;;  %v2301_v7 = vshll.u32 %v12151_v1, 16  ;;  %v2307_v8 = vshll.u32 %v12152_v2, 16 }
  0xe2   : > { %3015 = vst [vmem:[#allocation3 + $0x170] sm:$0xf] %v2949_v59  ;;  %3016 = vst [vmem:[#allocation3 + $0x17c] sm:$0xf] %v2952_v60  ;;  %v805_v5 = vrot.slane %v804_v63, 4  ;;  %v2311_v9 = vshrl.u32 %v12152_v2, 16  ;;  %13751 = vmatmul.mubr.bf16.gmra.mxu1 %v14139_v3 }
  0xe3   : > { %v12153_v6 = vld [vmem:[%s14936_s17 + $0x14] sm:$0x1]  ;;  %v800_v10 = vsel %vm14971_vm5, %v795_v44, %v799_v56  ;;  %v2300_v11 = vrot.slane %v2298_v4, 4  ;;  %v2303_v14 = vrot.slane %v2301_v7, 5  ;;  %v2309_v15 = vrot.slane %v2307_v8, 5 }
  0xe4   : > { %v2317_v12 = vshll.u32 %v12153_v6, 16  ;;  %v810_v13 = vsel %vm14971_vm5, %v805_v5, %v809_v62  ;;  %1027 = vst [vmem:[#allocation3 + $0xc4] sm:$0xf] %v800_v10  ;;  %v2313_v16 = vrot.slane %v2311_v9, 4  ;;  %v498_v18 = vld [vmem:[%s14936_s17 + $0x6c] sm:$0xf] }
  0xe5   : > { %1028 = vst [vmem:[#allocation3 + $0xd0] sm:$0xf] %v810_v13  ;;  %v2304_v19 = vor.u32 %v2303_v14, %v2300_v11  ;;  %v499_v21 = vld [vmem:[%s14936_s17 + $0x70] sm:$0xf]  ;;  %530 = vst [vmem:[#allocation3 + $0xd8] sm:$0xf] %v498_v18 }
  0xe6   : > { %v2319_v17 = vrot.slane %v2317_v12, 5  ;;  %v2314_v20 = vor.u32 %v2313_v16, %v2309_v15  ;;  %v571_v22 = vld [vmem:[%s14936_s17 + $0x6c] sm:$0xf]  ;;  %v572_v23 = vld [vmem:[%s14936_s17 + $0x70] sm:$0xf] }
  0xe7   : > { %531 = vst [vmem:[#allocation3 + $0xe4] sm:$0xf] %v499_v21  ;;  %v573_v24 = vld [vmem:[%s14936_s17 + $0x74] sm:$0x1]  ;;  %v812_v25 = vshrl.u32 %v571_v22, 16  ;;  %v815_v26 = vshll.u32 %v571_v22, 16 }
  0xe8   : > { %v821_v27 = vshll.u32 %v572_v23, 16  ;;  %v825_v28 = vshrl.u32 %v572_v23, 16  ;;  %v2305_v29 = vrot.slane %v2304_v19, 4  ;;  %v2315_v30 = vrot.slane %v2314_v20, 4  ;;  %v12121_v32 = vld [vmem:[%s14936_s17 + $0x18] sm:$0xf] }
  0xe9   : > { %v831_v31 = vshll.u32 %v573_v24, 16  ;;  %v814_v33 = vrot.slane %v812_v25, 4  ;;  %v817_v34 = vrot.slane %v815_v26, 5  ;;  %v12122_v37 = vld [vmem:[%s14936_s17 + $0x1c] sm:$0xf]  ;;  %v14163_v22 = vld [vmem:[%s18268_s2 + $0x230] sm:$0xff]  }
  0xea   : > { %v823_v35 = vrot.slane %v821_v27, 5  ;;  %v827_v36 = vrot.slane %v825_v28, 4  ;;  %2219 = vst [vmem:[#allocation3 + $0x18] sm:$0xf] %v12121_v32  ;;  %v2310_v38 = vsel %vm14971_vm5, %v2305_v29, %v2309_v15  ;;  %v2320_v39 = vsel %vm14971_vm5, %v2315_v30, %v2319_v17  ;;  %2220 = vst [vmem:[#allocation3 + $0x24] sm:$0xf] %v12122_v37 }
  0xeb   : > { %v833_v40 = vrot.slane %v831_v31, 5  ;;  %v12154_v41 = vld [vmem:[%s14936_s17 + $0x18] sm:$0xf]  ;;  %v12155_v43 = vld [vmem:[%s14936_s17 + $0x1c] sm:$0xf]  ;;  %v818_v46 = vor.u32 %v817_v34, %v814_v33 }
  0xec   : > { %2713 = vst [vmem:[#allocation3 + $0x4] sm:$0xf] %v2310_v38  ;;  %2714 = vst [vmem:[#allocation3 + $0x10] sm:$0xf] %v2320_v39  ;;  %v828_v47 = vor.u32 %v827_v36, %v823_v35  ;;  %v12156_v48 = vld [vmem:[%s14936_s17 + $0x20] sm:$0x1] }
  0xed   : > { %v2322_v49 = vshrl.u32 %v12154_v41, 16  ;;  %v2325_v50 = vshll.u32 %v12154_v41, 16  ;;  %v14142_v51 = vld [vmem:[#allocation3 + $0xc4] ss:$12 sps:$4 sm:$0xff]   ;;  %v14146_v52 = vld [vmem:[#allocation3 + $0xc0] ss:$12 sps:$4 sm:$0xff]  }
  0xee   : > { %v2331_v53 = vshll.u32 %v12155_v43, 16  ;;  %v819_v54 = vrot.slane %v818_v46, 4  ;;  %v829_v55 = vrot.slane %v828_v47, 4  ;;  %v500_v58 = vld [vmem:[%s14936_s17 + $0x78] sm:$0xf]  ;;  %1926 = vmatprep.mubr.bf16.mxu0 %v14142_v51  ;;  %v2335_v60 = vshrl.u32 %v12155_v43, 16 }
  0xef   : > { %v2324_v56 = vrot.slane %v2322_v49, 4  ;;  %v2327_v57 = vrot.slane %v2325_v50, 5  ;;  %v2341_v61 = vshll.u32 %v12156_v48, 16  ;;  %v501_v62 = vld [vmem:[%s14936_s17 + $0x7c] sm:$0xf]  ;;  %1927 = vmatmul.mubr.bf16.gmra.mxu0 %v14146_v52  ;;  %v14177_v38 = vld [vmem:[%s18268_s2 + $0x228] sm:$0xff]  }
  0xf0   : > { %v2333_v59 = vrot.slane %v2331_v53, 5  ;;  %532 = vst [vmem:[#allocation3 + $0xf0] sm:$0xf] %v500_v58  ;;  %v824_v63 = vsel %vm14971_vm5, %v819_v54, %v823_v35  ;;  %v834_v0 = vsel %vm14971_vm5, %v829_v55, %v833_v40  ;;  %533 = vst [vmem:[#allocation3 + $0xfc] sm:$0xf] %v501_v62  ;;  %v2337_v4 = vrot.slane %v2335_v60, 4 }
  0xf1   : > { %v2328_v1 = vor.u32 %v2327_v57, %v2324_v56  ;;  %v574_v2 = vld [vmem:[%s14936_s17 + $0x78] sm:$0xf]  ;;  %v575_v3 = vld [vmem:[%s14936_s17 + $0x7c] sm:$0xf]  ;;  %v576_v44 = vld [vmem:[%s14936_s17 + $0x80] sm:$0x1] }
  0xf2   : > { %1029 = vst [vmem:[#allocation3 + $0xdc] sm:$0xf] %v824_v63  ;;  %1030 = vst [vmem:[#allocation3 + $0xe8] sm:$0xf] %v834_v0  ;;  %v2343_v5 = vrot.slane %v2341_v61, 5  ;;  %v836_v6 = vshrl.u32 %v574_v2, 16  ;;  %v2338_v15 = vor.u32 %v2337_v4, %v2333_v59 }
  0xf3   : > { %v839_v7 = vshll.u32 %v574_v2, 16  ;;  %v12123_v8 = vld [vmem:[%s14936_s17 + $0x24] sm:$0xf]  ;;  %v2329_v9 = vrot.slane %v2328_v1, 4  ;;  %v845_v10 = vshll.u32 %v575_v3, 16  ;;  %v849_v11 = vshrl.u32 %v575_v3, 16 }
  0xf4   : > { %v855_v12 = vshll.u32 %v576_v44, 16  ;;  %v12124_v13 = vld [vmem:[%s14936_s17 + $0x28] sm:$0xf]  ;;  %2221 = vst [vmem:[#allocation3 + $0x30] sm:$0xf] %v12123_v8  ;;  %v838_v16 = vrot.slane %v836_v6, 4 }
  0xf5   : > { %v14144_v14 = vld [vmem:[#allocation3 + $0x4] ss:$12 sps:$4 sm:$0xff]   ;;  %v841_v17 = vrot.slane %v839_v7, 5  ;;  %2222 = vst [vmem:[#allocation3 + $0x3c] sm:$0xf] %v12124_v13  ;;  %v2334_v19 = vsel %vm14971_vm5, %v2329_v9, %v2333_v59  ;;  %v847_v20 = vrot.slane %v845_v10, 5 }
  0xf6   : > { %v14147_v18 = vld [vmem:[#allocation3] ss:$12 sps:$4 sm:$0xff]   ;;  %v851_v21 = vrot.slane %v849_v11, 4  ;;  %3561 = vmatprep.mubr.bf16.mxu1 %v14144_v14  ;;  %v2339_v23 = vrot.slane %v2338_v15, 4  ;;  %2715 = vst [vmem:[#allocation3 + $0x1c] sm:$0xf] %v2334_v19 }
  0xf7   : > { %v842_v24 = vor.u32 %v841_v17, %v838_v16  ;;  %v857_v25 = vrot.slane %v855_v12, 5  ;;  %v12157_v26 = vld [vmem:[%s14936_s17 + $0x24] sm:$0xf]  ;;  %v12158_v27 = vld [vmem:[%s14936_s17 + $0x28] sm:$0xf]  ;;  %3562 = vmatmul.mubr.bf16.vlgmr.msra.gmra.mxu1 %v14147_v18  ;;  %v14554_v33 = vld [vmem:[%s18268_s2 + $0x238] sm:$0xff]  }
  0xf8   : > { %v852_v28 = vor.u32 %v851_v21, %v847_v20  ;;  %v12159_v29 = vld [vmem:[%s14936_s17 + $0x2c] sm:$0x1]  ;;  %v2346_v30 = vshrl.u32 %v12157_v26, 16  ;;  %v2349_v31 = vshll.u32 %v12157_v26, 16  ;;  %v2355_v32 = vshll.u32 %v12158_v27, 16  ;;  %13803 = vmatpush3.bf16.msra.mxu1 %v14554_v33  ;;  %v14191_v52 = vld [vmem:[%s18268_s2 + $0x220] sm:$0xff]  }
  0xf9   : > { %v2344_v34 = vsel %vm14971_vm5, %v2339_v23, %v2343_v5  ;;  %v843_v35 = vrot.slane %v842_v24, 4  ;;  %v2359_v36 = vshrl.u32 %v12158_v27, 16  ;;  %v2365_v37 = vshll.u32 %v12159_v29, 16  ;;  %v14150_v39 = vld [vmem:[#allocation3 + $0xdc] ss:$12 sps:$4 sm:$0xff]   ;;  %13804 = vmatprep.subr.bf16.mxu1 %v14163_v22  ;;  %v14205_v12 = vld [vmem:[%s18268_s2 + $0x218] sm:$0xff]  }
  0xfa   : > { %2716 = vst [vmem:[#allocation3 + $0x28] sm:$0xf] %v2344_v34  ;;  %v853_v40 = vrot.slane %v852_v28, 4  ;;  %v2348_v41 = vrot.slane %v2346_v30, 4  ;;  %v14154_v43 = vld [vmem:[#allocation3 + $0xd8] ss:$12 sps:$4 sm:$0xff]   ;;  %1934 = vmatprep.mubr.bf16.mxu0 %v14150_v39 }
  0xfb   : > { %v848_v46 = vsel %vm14971_vm5, %v843_v35, %v847_v20  ;;  %v2351_v47 = vrot.slane %v2349_v31, 5  ;;  %v2357_v48 = vrot.slane %v2355_v32, 5  ;;  %v2361_v49 = vrot.slane %v2359_v36, 4  ;;  %1935 = vmatmul.mubr.bf16.gmra.mxu0 %v14154_v43  ;;  %v502_v55 = vld [vmem:[%s14936_s17 + $0x84] sm:$0xf] }
  0xfc   : > { %v858_v50 = vsel %vm14971_vm5, %v853_v40, %v857_v25  ;;  %1031 = vst [vmem:[#allocation3 + $0xf4] sm:$0xf] %v848_v46  ;;  %v2367_v51 = vrot.slane %v2365_v37, 5  ;;  %13805 = vmatpush3.bf16.msra.mxu1 %v14163_v22  ;;  %v503_v56 = vld [vmem:[%s14936_s17 + $0x88] sm:$0xf]  ;;  %v14220_v25 = vld [vmem:[%s18268_s2 + $0x210] sm:$0xff]  }
  0xfd   : > { %1032 = vst [vmem:[#allocation3 + $0x100] sm:$0xf] %v858_v50  ;;  %v2352_v53 = vor.u32 %v2351_v47, %v2348_v41  ;;  %v2362_v54 = vor.u32 %v2361_v49, %v2357_v48  ;;  %534 = vst [vmem:[#allocation3 + $0x108] sm:$0xf] %v502_v55  ;;  %v577_v57 = vld [vmem:[%s14936_s17 + $0x84] sm:$0xf]  ;;  %13806 = vmatprep.subr.bf16.mxu1 %v14177_v38 }
  0xfe   : > { %535 = vst [vmem:[#allocation3 + $0x114] sm:$0xf] %v503_v56  ;;  %v578_v58 = vld [vmem:[%s14936_s17 + $0x88] sm:$0xf]  ;;  %v579_v61 = vld [vmem:[%s14936_s17 + $0x8c] sm:$0x1] }
  0xff   : > { %v2353_v59 = vrot.slane %v2352_v53, 4  ;;  %v2363_v60 = vrot.slane %v2362_v54, 4  ;;  %v860_v62 = vshrl.u32 %v577_v57, 16  ;;  %v863_v63 = vshll.u32 %v577_v57, 16  ;;  %v12125_v3 = vld [vmem:[%s14936_s17 + $0x30] sm:$0xf] }
 0x100   : > { %v869_v0 = vshll.u32 %v578_v58, 16  ;;  %v873_v1 = vshrl.u32 %v578_v58, 16  ;;  %v879_v2 = vshll.u32 %v579_v61, 16  ;;  %v14155_v4 = vld [vmem:[#allocation3 + $0x18] ss:$12 sps:$4 sm:$0xff]   ;;  %13807 = vmatpush3.bf16.msra.mxu1 %v14177_v38  ;;  %v14235_v40 = vld [vmem:[%s18268_s2 + $0x208] sm:$0xff]  }
 0x101   : > { %v14152_v44 = vld [vmem:[#allocation3 + $0x1c] ss:$12 sps:$4 sm:$0xff]   ;;  %v2358_v5 = vsel %vm14971_vm5, %v2353_v59, %v2357_v48  ;;  %v2368_v6 = vsel %vm14971_vm5, %v2363_v60, %v2367_v51  ;;  %v862_v7 = vrot.slane %v860_v62, 4  ;;  %2223 = vst [vmem:[#allocation3 + $0x48] sm:$0xf] %v12125_v3  ;;  %v865_v8 = vrot.slane %v863_v63, 5  ;;  %13808 = vmatprep.subr.bf16.mxu1 %v14191_v52 }
 0x102   : > { %2717 = vst [vmem:[#allocation3 + $0x34] sm:$0xf] %v2358_v5  ;;  %2718 = vst [vmem:[#allocation3 + $0x40] sm:$0xf] %v2368_v6  ;;  %v871_v9 = vrot.slane %v869_v0, 5  ;;  %v875_v10 = vrot.slane %v873_v1, 4  ;;  %3569 = vmatprep.mubr.bf16.mxu1 %v14152_v44 }
 0x103   : > { %v12126_v11 = vld [vmem:[%s14936_s17 + $0x34] sm:$0xf]  ;;  %v881_v13 = vrot.slane %v879_v2, 5  ;;  %v12160_v14 = vld [vmem:[%s14936_s17 + $0x30] sm:$0xf]  ;;  %3570 = vmatmul.mubr.bf16.gmra.mxu1 %v14155_v4  ;;  %v866_v18 = vor.u32 %v865_v8, %v862_v7 }
 0x104   : > { %2224 = vst [vmem:[#allocation3 + $0x54] sm:$0xf] %v12126_v11  ;;  %v12161_v15 = vld [vmem:[%s14936_s17 + $0x34] sm:$0xf]  ;;  %v14156_v16 = vld [vmem:[#allocation3 + $0xf4] ss:$12 sps:$4 sm:$0xff]   ;;  %v876_v19 = vor.u32 %v875_v10, %v871_v9  ;;  %13809 = vmatpush3.bf16.msra.mxu1 %v14191_v52 }
 0x105   : > { %v14160_v17 = vld [vmem:[#allocation3 + $0xf0] ss:$12 sps:$4 sm:$0xff]   ;;  %v2370_v20 = vshrl.u32 %v12160_v14, 16  ;;  %v12162_v21 = vld [vmem:[%s14936_s17 + $0x38] sm:$0x1]  ;;  %v2373_v22 = vshll.u32 %v12160_v14, 16  ;;  %1942 = vmatprep.mubr.bf16.mxu0 %v14156_v16  ;;  %13810 = vmatprep.subr.bf16.mxu1 %v14205_v12 }
 0x106   : > { %v2379_v23 = vshll.u32 %v12161_v15, 16  ;;  %v2383_v24 = vshrl.u32 %v12161_v15, 16  ;;  %v867_v26 = vrot.slane %v866_v18, 4  ;;  %v877_v27 = vrot.slane %v876_v19, 4  ;;  %v504_v30 = vld [vmem:[%s14936_s17 + $0x90] sm:$0xf]  ;;  %1943 = vmatmul.mubr.bf16.gmra.mxu0 %v14160_v17 }
 0x107   : > { %v2372_v28 = vrot.slane %v2370_v20, 4  ;;  %v2389_v29 = vshll.u32 %v12162_v21, 16  ;;  %v2375_v31 = vrot.slane %v2373_v22, 5  ;;  %v505_v34 = vld [vmem:[%s14936_s17 + $0x94] sm:$0xf] }
 0x108   : > { %v2381_v32 = vrot.slane %v2379_v23, 5  ;;  %v2385_v33 = vrot.slane %v2383_v24, 4  ;;  %536 = vst [vmem:[#allocation3 + $0x120] sm:$0xf] %v504_v30  ;;  %v872_v35 = vsel %vm14971_vm5, %v867_v26, %v871_v9  ;;  %v882_v36 = vsel %vm14971_vm5, %v877_v27, %v881_v13  ;;  %537 = vst [vmem:[#allocation3 + $0x12c] sm:$0xf] %v505_v34  ;;  %13811 = vmatpush3.bf16.msra.mxu1 %v14205_v12 }
 0x109   : > { %v2391_v37 = vrot.slane %v2389_v29, 5  ;;  %v580_v38 = vld [vmem:[%s14936_s17 + $0x90] sm:$0xf]  ;;  %v581_v39 = vld [vmem:[%s14936_s17 + $0x94] sm:$0xf]  ;;  %v2376_v43 = vor.u32 %v2375_v31, %v2372_v28  ;;  %13812 = vmatprep.subr.bf16.mxu1 %v14220_v25 }
 0x10a   : > { %v14158_v41 = vld [vmem:[#allocation3 + $0x34] ss:$12 sps:$4 sm:$0xff]   ;;  %1033 = vst [vmem:[#allocation3 + $0x10c] sm:$0xf] %v872_v35  ;;  %1034 = vst [vmem:[#allocation3 + $0x118] sm:$0xf] %v882_v36  ;;  %v2386_v46 = vor.u32 %v2385_v33, %v2381_v32 }
 0x10b   : > { %v884_v47 = vshrl.u32 %v580_v38, 16  ;;  %v887_v48 = vshll.u32 %v580_v38, 16  ;;  %v14161_v49 = vld [vmem:[#allocation3 + $0x30] ss:$12 sps:$4 sm:$0xff]   ;;  %v582_v50 = vld [vmem:[%s14936_s17 + $0x98] sm:$0x1]  ;;  %3577 = vmatprep.mubr.bf16.mxu1 %v14158_v41 }
 0x10c   : > { %v893_v51 = vshll.u32 %v581_v39, 16  ;;  %v897_v52 = vshrl.u32 %v581_v39, 16  ;;  %v2377_v53 = vrot.slane %v2376_v43, 4  ;;  %v2387_v54 = vrot.slane %v2386_v46, 4  ;;  %v12127_v57 = vld [vmem:[%s14936_s17 + $0x3c] sm:$0xf]  ;;  %3578 = vmatmul.mubr.bf16.gmra.mxu1 %v14161_v49 }
 0x10d   : > { %v886_v55 = vrot.slane %v884_v47, 4  ;;  %v889_v56 = vrot.slane %v887_v48, 5  ;;  %v903_v60 = vshll.u32 %v582_v50, 16  ;;  %v12128_v61 = vld [vmem:[%s14936_s17 + $0x40] sm:$0xf]  ;;  %13813 = vmatpush3.bf16.msra.mxu1 %v14220_v25 }
 0x10e   : > { %v895_v58 = vrot.slane %v893_v51, 5  ;;  %v899_v59 = vrot.slane %v897_v52, 4  ;;  %2225 = vst [vmem:[#allocation3 + $0x60] sm:$0xf] %v12127_v57  ;;  %v2382_v62 = vsel %vm14971_vm5, %v2377_v53, %v2381_v32  ;;  %v2392_v63 = vsel %vm14971_vm5, %v2387_v54, %v2391_v37  ;;  %2226 = vst [vmem:[#allocation3 + $0x6c] sm:$0xf] %v12128_v61  ;;  %13814 = vmatprep.subr.bf16.mxu1 %v14235_v40 }
 0x10f   : > { %v890_v0 = vor.u32 %v889_v56, %v886_v55  ;;  %v12163_v1 = vld [vmem:[%s14936_s17 + $0x3c] sm:$0xf]  ;;  %v12164_v2 = vld [vmem:[%s14936_s17 + $0x40] sm:$0xf]  ;;  %v12165_v3 = vld [vmem:[%s14936_s17 + $0x44] sm:$0x1] }
 0x110   : > { %2719 = vst [vmem:[#allocation3 + $0x4c] sm:$0xf] %v2382_v62  ;;  %2720 = vst [vmem:[#allocation3 + $0x58] sm:$0xf] %v2392_v63  ;;  %v900_v44 = vor.u32 %v899_v59, %v895_v58  ;;  %v905_v4 = vrot.slane %v903_v60, 5  ;;  %v2394_v5 = vshrl.u32 %v12163_v1, 16 }
 0x111   : > { %v2397_v6 = vshll.u32 %v12163_v1, 16  ;;  %v891_v7 = vrot.slane %v890_v0, 4  ;;  %v2403_v8 = vshll.u32 %v12164_v2, 16  ;;  %v2407_v9 = vshrl.u32 %v12164_v2, 16  ;;  %v14164_v11 = vld [vmem:[#allocation3 + $0x10c] ss:$12 sps:$4 sm:$0xff]   ;;  %13815 = vmatpush3.bf16.msra.mxu1 %v14235_v40 }
 0x112   : > { %v2413_v10 = vshll.u32 %v12165_v3, 16  ;;  %v901_v12 = vrot.slane %v900_v44, 4  ;;  %v2396_v13 = vrot.slane %v2394_v5, 4  ;;  %v14168_v14 = vld [vmem:[#allocation3 + $0x108] ss:$12 sps:$4 sm:$0xff]   ;;  %1950 = vmatprep.mubr.bf16.mxu0 %v14164_v11 }
 0x113   : > { %v896_v15 = vsel %vm14971_vm5, %v891_v7, %v895_v58  ;;  %v2399_v16 = vrot.slane %v2397_v6, 5  ;;  %v2405_v17 = vrot.slane %v2403_v8, 5  ;;  %v2409_v18 = vrot.slane %v2407_v9, 4  ;;  %1951 = vmatmul.mubr.bf16.gmra.mxu0 %v14168_v14  ;;  %v506_v23 = vld [vmem:[%s14936_s17 + $0x9c] sm:$0xf] }
 0x114   : > { %v906_v19 = vsel %vm14971_vm5, %v901_v12, %v905_v4  ;;  %1035 = vst [vmem:[#allocation3 + $0x124] sm:$0xf] %v896_v15  ;;  %v2415_v20 = vrot.slane %v2413_v10, 5  ;;  %v507_v24 = vld [vmem:[%s14936_s17 + $0xa0] sm:$0xf] }
 0x115   : > { %1036 = vst [vmem:[#allocation3 + $0x130] sm:$0xf] %v906_v19  ;;  %v2400_v21 = vor.u32 %v2399_v16, %v2396_v13  ;;  %v2410_v22 = vor.u32 %v2409_v18, %v2405_v17  ;;  %v583_v25 = vld [vmem:[%s14936_s17 + $0x9c] sm:$0xf]  ;;  %538 = vst [vmem:[#allocation3 + $0x138] sm:$0xf] %v506_v23 }
 0x116   : > { %539 = vst [vmem:[#allocation3 + $0x144] sm:$0xf] %v507_v24  ;;  %v584_v26 = vld [vmem:[%s14936_s17 + $0xa0] sm:$0xf]  ;;  %v585_v27 = vld [vmem:[%s14936_s17 + $0xa4] sm:$0x1] }
 0x117   : > { %v908_v28 = vshrl.u32 %v583_v25, 16  ;;  %v911_v29 = vshll.u32 %v583_v25, 16  ;;  %v14166_v30 = vld [vmem:[#allocation3 + $0x4c] ss:$12 sps:$4 sm:$0xff]   ;;  %v2401_v31 = vrot.slane %v2400_v21, 4  ;;  %v2411_v32 = vrot.slane %v2410_v22, 4 }
 0x118   : > { %v14169_v33 = vld [vmem:[#allocation3 + $0x48] ss:$12 sps:$4 sm:$0xff]   ;;  %v917_v36 = vshll.u32 %v584_v26, 16  ;;  %v921_v37 = vshrl.u32 %v584_v26, 16  ;;  %3585 = vmatprep.mubr.bf16.mxu1 %v14166_v30  ;;  %v927_v40 = vshll.u32 %v585_v27, 16 }
 0x119   : > { %v910_v34 = vrot.slane %v908_v28, 4  ;;  %v913_v35 = vrot.slane %v911_v29, 5  ;;  %v2406_v38 = vsel %vm14971_vm5, %v2401_v31, %v2405_v17  ;;  %v2416_v39 = vsel %vm14971_vm5, %v2411_v32, %v2415_v20  ;;  %v12129_v41 = vld [vmem:[%s14936_s17 + $0x48] sm:$0xf]  ;;  %v12130_v43 = vld [vmem:[%s14936_s17 + $0x4c] sm:$0xf]  ;;  %3586 = vmatmul.mubr.bf16.gmra.mxu1 %v14169_v33 }
 0x11a   : > { %2721 = vst [vmem:[#allocation3 + $0x64] sm:$0xf] %v2406_v38  ;;  %2722 = vst [vmem:[#allocation3 + $0x70] sm:$0xf] %v2416_v39  ;;  %v919_v47 = vrot.slane %v917_v36, 5  ;;  %v923_v48 = vrot.slane %v921_v37, 4 }
 0x11b   : > { %v914_v46 = vor.u32 %v913_v35, %v910_v34  ;;  %2227 = vst [vmem:[#allocation3 + $0x78] sm:$0xf] %v12129_v41  ;;  %2228 = vst [vmem:[#allocation3 + $0x84] sm:$0xf] %v12130_v43  ;;  %v12166_v49 = vld [vmem:[%s14936_s17 + $0x48] sm:$0xf] }
 0x11c   : > { %v12167_v50 = vld [vmem:[%s14936_s17 + $0x4c] sm:$0xf]  ;;  %v929_v51 = vrot.slane %v927_v40, 5  ;;  %v12168_v52 = vld [vmem:[%s14936_s17 + $0x50] sm:$0x1]  ;;  %v2418_v53 = vshrl.u32 %v12166_v49, 16  ;;  %v924_v58 = vor.u32 %v923_v48, %v919_v47 }
 0x11d   : > { %v2421_v54 = vshll.u32 %v12166_v49, 16  ;;  %v14170_v55 = vld [vmem:[#allocation3 + $0x124] ss:$12 sps:$4 sm:$0xff]   ;;  %v14174_v56 = vld [vmem:[#allocation3 + $0x120] ss:$12 sps:$4 sm:$0xff]   ;;  %v915_v57 = vrot.slane %v914_v46, 4 }
 0x11e   : > { %v2420_v59 = vrot.slane %v2418_v53, 4  ;;  %v2427_v61 = vshll.u32 %v12167_v50, 16  ;;  %v2431_v62 = vshrl.u32 %v12167_v50, 16  ;;  %v508_v63 = vld [vmem:[%s14936_s17 + $0xa8] sm:$0xf]  ;;  %1958 = vmatprep.mubr.bf16.mxu0 %v14170_v55  ;;  %v925_v1 = vrot.slane %v924_v58, 4 }
 0x11f   : > { %v2423_v60 = vrot.slane %v2421_v54, 5  ;;  %v920_v0 = vsel %vm14971_vm5, %v915_v57, %v919_v47  ;;  %v2437_v2 = vshll.u32 %v12168_v52, 16  ;;  %v509_v3 = vld [vmem:[%s14936_s17 + $0xac] sm:$0xf]  ;;  %540 = vst [vmem:[#allocation3 + $0x150] sm:$0xf] %v508_v63  ;;  %1959 = vmatmul.mubr.bf16.gmra.mxu0 %v14174_v56 }
 0x120   : > { %v586_v44 = vld [vmem:[%s14936_s17 + $0xa8] sm:$0xf]  ;;  %1037 = vst [vmem:[#allocation3 + $0x13c] sm:$0xf] %v920_v0  ;;  %v2429_v5 = vrot.slane %v2427_v61, 5  ;;  %v2433_v6 = vrot.slane %v2431_v62, 4  ;;  %v930_v9 = vsel %vm14971_vm5, %v925_v1, %v929_v51 }
 0x121   : > { %v2424_v4 = vor.u32 %v2423_v60, %v2420_v59  ;;  %541 = vst [vmem:[#allocation3 + $0x15c] sm:$0xf] %v509_v3  ;;  %v587_v7 = vld [vmem:[%s14936_s17 + $0xac] sm:$0xf]  ;;  %v588_v8 = vld [vmem:[%s14936_s17 + $0xb0] sm:$0x1] }
 0x122   : > { %v2439_v10 = vrot.slane %v2437_v2, 5  ;;  %v932_v11 = vshrl.u32 %v586_v44, 16  ;;  %v935_v12 = vshll.u32 %v586_v44, 16  ;;  %v12131_v13 = vld [vmem:[%s14936_s17 + $0x54] sm:$0xf]  ;;  %v2434_v16 = vor.u32 %v2433_v6, %v2429_v5  ;;  %v14250_v37 = vld [vmem:[%s18268_s2 + $0x200] sm:$0xff]  }
 0x123   : > { %v14172_v14 = vld [vmem:[#allocation3 + $0x64] ss:$12 sps:$4 sm:$0xff]   ;;  %1038 = vst [vmem:[#allocation3 + $0x148] sm:$0xf] %v930_v9  ;;  %v2425_v15 = vrot.slane %v2424_v4, 4  ;;  %v941_v17 = vshll.u32 %v587_v7, 16  ;;  %13816 = vmatprep.subr.bf16.mxu1 %v14250_v37 }
 0x124   : > { %2229 = vst [vmem:[#allocation3 + $0x90] sm:$0xf] %v12131_v13  ;;  %v14175_v18 = vld [vmem:[#allocation3 + $0x60] ss:$12 sps:$4 sm:$0xff]   ;;  %v934_v19 = vrot.slane %v932_v11, 4  ;;  %v937_v20 = vrot.slane %v935_v12, 5  ;;  %3593 = vmatprep.mubr.bf16.mxu1 %v14172_v14  ;;  %13817 = vmatpush3.bf16.msra.mxu1 %v14250_v37 }
 0x125   : > { %v945_v21 = vshrl.u32 %v587_v7, 16  ;;  %v951_v22 = vshll.u32 %v588_v8, 16  ;;  %v2430_v23 = vsel %vm14971_vm5, %v2425_v15, %v2429_v5  ;;  %v2435_v24 = vrot.slane %v2434_v16, 4  ;;  %v12132_v26 = vld [vmem:[%s14936_s17 + $0x58] sm:$0xf]  ;;  %3594 = vmatmul.mubr.bf16.gmra.mxu1 %v14175_v18 }
 0x126   : > { %v943_v25 = vrot.slane %v941_v17, 5  ;;  %v12169_v27 = vld [vmem:[%s14936_s17 + $0x54] sm:$0xf]  ;;  %2723 = vst [vmem:[#allocation3 + $0x7c] sm:$0xf] %v2430_v23  ;;  %v938_v28 = vor.u32 %v937_v20, %v934_v19 }
 0x127   : > { %v947_v29 = vrot.slane %v945_v21, 4  ;;  %v953_v30 = vrot.slane %v951_v22, 5  ;;  %2230 = vst [vmem:[#allocation3 + $0x9c] sm:$0xf] %v12132_v26  ;;  %v12170_v31 = vld [vmem:[%s14936_s17 + $0x58] sm:$0xf]  ;;  %v2440_v33 = vsel %vm14971_vm5, %v2435_v24, %v2439_v10 }
 0x128   : > { %v12171_v32 = vld [vmem:[%s14936_s17 + $0x5c] sm:$0x1]  ;;  %v2442_v34 = vshrl.u32 %v12169_v27, 16  ;;  %v2445_v35 = vshll.u32 %v12169_v27, 16  ;;  %v2451_v36 = vshll.u32 %v12170_v31, 16  ;;  %v939_v38 = vrot.slane %v938_v28, 4 }
 0x129   : > { %2724 = vst [vmem:[#allocation3 + $0x88] sm:$0xf] %v2440_v33  ;;  %v948_v39 = vor.u32 %v947_v29, %v943_v25  ;;  %v2455_v40 = vshrl.u32 %v12170_v31, 16  ;;  %v2461_v41 = vshll.u32 %v12171_v32, 16  ;;  %v14182_v49 = vld [vmem:[#allocation3 + $0x138] ss:$12 sps:$4 sm:$0xff]  }
 0x12a   : > { %v2444_v43 = vrot.slane %v2442_v34, 4  ;;  %v2447_v46 = vrot.slane %v2445_v35, 5  ;;  %v2453_v47 = vrot.slane %v2451_v36, 5  ;;  %v14178_v48 = vld [vmem:[#allocation3 + $0x13c] ss:$12 sps:$4 sm:$0xff]   ;;  %v944_v50 = vsel %vm14971_vm5, %v939_v38, %v943_v25 }
 0x12b   : > { %v949_v51 = vrot.slane %v948_v39, 4  ;;  %1039 = vst [vmem:[#allocation3 + $0x154] sm:$0xf] %v944_v50  ;;  %v2457_v53 = vrot.slane %v2455_v40, 4  ;;  %v2463_v54 = vrot.slane %v2461_v41, 5  ;;  %1966 = vmatprep.mubr.bf16.mxu0 %v14178_v48  ;;  %v14690_v21 = vmov 0  }
 0x12c   : > { %v2448_v52 = vor.u32 %v2447_v46, %v2444_v43  ;;  %v510_v55 = vld [vmem:[%s14936_s17 + $0xb4] sm:$0xf]  ;;  %v511_v57 = vld [vmem:[%s14936_s17 + $0xb8] sm:$0xf]  ;;  %1967 = vmatmul.mubr.bf16.gmra.mxu0 %v14182_v49  ;;  %v591_v62 = vld [vmem:[%s14936_s17 + $0xbc] sm:$0x1] }
 0x12d   : > { %v954_v56 = vsel %vm14971_vm5, %v949_v51, %v953_v30  ;;  %542 = vst [vmem:[#allocation3 + $0x168] sm:$0xf] %v510_v55  ;;  %v589_v58 = vld [vmem:[%s14936_s17 + $0xb4] sm:$0xf]  ;;  %v590_v59 = vld [vmem:[%s14936_s17 + $0xb8] sm:$0xf]  ;;  %v2458_v61 = vor.u32 %v2457_v53, %v2453_v47 }
 0x12e   : > { %1040 = vst [vmem:[#allocation3 + $0x160] sm:$0xf] %v954_v56  ;;  %v2449_v60 = vrot.slane %v2448_v52, 4  ;;  %543 = vst [vmem:[#allocation3 + $0x174] sm:$0xf] %v511_v57  ;;  %v956_v63 = vshrl.u32 %v589_v58, 16 }
 0x12f   : > { %v959_v0 = vshll.u32 %v589_v58, 16  ;;  %v965_v1 = vshll.u32 %v590_v59, 16  ;;  %v969_v2 = vshrl.u32 %v590_v59, 16  ;;  %v975_v3 = vshll.u32 %v591_v62, 16  ;;  %v12133_v44 = vld [vmem:[%s14936_s17 + $0x60] sm:$0xf] }
 0x130   : > { %v14180_v4 = vld [vmem:[#allocation3 + $0x7c] ss:$12 sps:$4 sm:$0xff]   ;;  %v14183_v5 = vld [vmem:[#allocation3 + $0x78] ss:$12 sps:$4 sm:$0xff]   ;;  %v2454_v6 = vsel %vm14971_vm5, %v2449_v60, %v2453_v47  ;;  %v2459_v7 = vrot.slane %v2458_v61, 4  ;;  %v958_v8 = vrot.slane %v956_v63, 4 }
 0x131   : > { %2231 = vst [vmem:[#allocation3 + $0xa8] sm:$0xf] %v12133_v44  ;;  %2725 = vst [vmem:[#allocation3 + $0x94] sm:$0xf] %v2454_v6  ;;  %v961_v9 = vrot.slane %v959_v0, 5  ;;  %v967_v10 = vrot.slane %v965_v1, 5  ;;  %3601 = vmatprep.mubr.bf16.mxu1 %v14180_v4  ;;  %v12906_v55 = vpop.f32.mrf.mxu0  ;;  %v15512_v63 = vpop.f32.mrf.mxu1 }
 0x132   : > { %v971_v11 = vrot.slane %v969_v2, 4  ;;  %v12134_v12 = vld [vmem:[%s14936_s17 + $0x64] sm:$0xf]  ;;  %v2464_v13 = vsel %vm14971_vm5, %v2459_v7, %v2463_v54  ;;  %v12172_v14 = vld [vmem:[%s14936_s17 + $0x60] sm:$0xf]  ;;  %3602 = vmatmul.mubr.bf16.gmra.mxu1 %v14183_v5  ;;  %v977_v22 = vrot.slane %v975_v3, 5 }
 0x133   : > { %2232 = vst [vmem:[#allocation3 + $0xb4] sm:$0xf] %v12134_v12  ;;  %v12173_v15 = vld [vmem:[%s14936_s17 + $0x64] sm:$0xf]  ;;  %2726 = vst [vmem:[#allocation3 + $0xa0] sm:$0xf] %v2464_v13  ;;  %v962_v16 = vor.u32 %v961_v9, %v958_v8  ;;  %v12907_v0 = vpop.f32.mrf.mxu0 }
 0x134   : > { %v972_v17 = vor.u32 %v971_v11, %v967_v10  ;;  %v12174_v18 = vld [vmem:[%s14936_s17 + $0x68] sm:$0x1]  ;;  %v2466_v19 = vshrl.u32 %v12172_v14, 16  ;;  %v2469_v20 = vshll.u32 %v12172_v14, 16  ;;  %360 = vst [vmem:[#allocation2] sm:$0xf] %v14690_v21  ;;  %v12908_v5 = vadd.f32 %v12907_v0, %v12906_v55 }
 0x135   : > { %361 = vst [vmem:[#allocation2 + $0x4] sm:$0xf] %v14690_v21  ;;  %362 = vst [vmem:[#allocation2 + $0x8] sm:$0x1] %v14690_v21  ;;  %v2475_v23 = vshll.u32 %v12173_v15, 16  ;;  %v2479_v24 = vshrl.u32 %v12173_v15, 16 }
 0x136   : > { %364 = vst [vmem:[#allocation2 + $0xcc] sm:$0xf] %v14690_v21  ;;  %365 = vst [vmem:[#allocation2 + $0xd0] sm:$0xf] %v14690_v21  ;;  %v2485_v25 = vshll.u32 %v12174_v18, 16  ;;  %v963_v29 = vrot.slane %v962_v16, 4 }
 0x137   : > { %366 = vst [vmem:[#allocation2 + $0xd4] sm:$0x1] %v14690_v21  ;;  %v12135_v26 = vld [vmem:[%s14936_s17 + $0x6c] sm:$0xf]  ;;  %v14188_v28 = vld [vmem:[#allocation3 + $0x150] ss:$12 sps:$4 sm:$0xff]  }
 0x138   : > { %v14184_v27 = vld [vmem:[#allocation3 + $0x154] ss:$12 sps:$4 sm:$0xff]   ;;  %2233 = vst [vmem:[#allocation3 + $0xc0] sm:$0xf] %v12135_v26  ;;  %v973_v30 = vrot.slane %v972_v17, 4  ;;  %v2468_v31 = vrot.slane %v2466_v19, 4  ;;  %v968_v35 = vsel %vm14971_vm5, %v963_v29, %v967_v10  ;;  %v2025_v10 = vpop.f32.mrf.mxu1  ;;  %v15523_v19 = vpop.f32.mrf.mxu0 }
 0x139   : > { %v2471_v32 = vrot.slane %v2469_v20, 5  ;;  %v2477_v33 = vrot.slane %v2475_v23, 5  ;;  %v12136_v34 = vld [vmem:[%s14936_s17 + $0x70] sm:$0xf]  ;;  %1974 = vmatprep.mubr.bf16.mxu0 %v14184_v27  ;;  %v2481_v36 = vrot.slane %v2479_v24, 4  ;;  %v2487_v37 = vrot.slane %v2485_v25, 5 }
 0x13a   : > { %2234 = vst [vmem:[#allocation3 + $0xcc] sm:$0xf] %v12136_v34  ;;  %v12175_v38 = vld [vmem:[%s14936_s17 + $0x6c] sm:$0xf]  ;;  %v12176_v39 = vld [vmem:[%s14936_s17 + $0x70] sm:$0xf]  ;;  %1975 = vmatmul.mubr.bf16.gmra.mxu0 %v14188_v28  ;;  %v978_v40 = vsel %vm14971_vm5, %v973_v30, %v977_v22  ;;  %v15519_v14 = vadd.f32 %v12908_v5, %v2025_v10 }
 0x13b   : > { %1041 = vst [vmem:[#allocation3 + $0x16c] sm:$0xf] %v968_v35  ;;  %v2472_v41 = vor.u32 %v2471_v32, %v2468_v31  ;;  %v12177_v43 = vld [vmem:[%s14936_s17 + $0x74] sm:$0x1]  ;;  %v2490_v46 = vshrl.u32 %v12175_v38, 16  ;;  %v2493_v47 = vshll.u32 %v12175_v38, 16  ;;  %v2482_v48 = vor.u32 %v2481_v36, %v2477_v33  ;;  %v15538_v36 = vpop.f32.mrf.mxu1 }
 0x13c   : > { %1042 = vst [vmem:[#allocation3 + $0x178] sm:$0xf] %v978_v40  ;;  %v2499_v49 = vshll.u32 %v12176_v39, 16  ;;  %v2503_v50 = vshrl.u32 %v12176_v39, 16  ;;  %v2509_v51 = vshll.u32 %v12177_v43, 16 }
 0x13d   : > { %v14186_v52 = vld [vmem:[#allocation3 + $0x94] ss:$12 sps:$4 sm:$0xff]   ;;  %v14189_v53 = vld [vmem:[#allocation3 + $0x90] ss:$12 sps:$4 sm:$0xff]   ;;  %v2473_v54 = vrot.slane %v2472_v41, 4  ;;  %v2483_v56 = vrot.slane %v2482_v48, 4 }
 0x13e   : > { %v2492_v57 = vrot.slane %v2490_v46, 4  ;;  %v2495_v58 = vrot.slane %v2493_v47, 5  ;;  %v2501_v59 = vrot.slane %v2499_v49, 5  ;;  %3609 = vmatprep.mubr.bf16.mxu1 %v14186_v52  ;;  %v2505_v61 = vrot.slane %v2503_v50, 4  ;;  %v12415_v62 = vld [vmem:[%s14936_s17 + $0x18] sm:$0xe] }
 0x13f   : > { %v2478_v60 = vsel %vm14971_vm5, %v2473_v54, %v2477_v33  ;;  %3610 = vmatmul.mubr.bf16.gmra.mxu1 %v14189_v53  ;;  %v2488_v1 = vsel %vm14971_vm5, %v2483_v56, %v2487_v37  ;;  %v12416_v3 = vld [vmem:[%s14936_s17 + $0x1c] sm:$0xf]  ;;  %v12417_v44 = vld [vmem:[%s14936_s17 + $0x20] sm:$0x1]  ;;  %v12463_v4 = vrot.slane %v12415_v62, 9  ;;  %v2511_v7 = vrot.slane %v2509_v51, 5  ;;  %v15536_v33 = vpop.f32.mrf.mxu0 }
 0x140   : > { %2727 = vst [vmem:[#allocation3 + $0xac] sm:$0xf] %v2478_v60  ;;  %v2496_v2 = vor.u32 %v2495_v58, %v2492_v57  ;;  %2728 = vst [vmem:[#allocation3 + $0xb8] sm:$0xf] %v2488_v1  ;;  %v2506_v6 = vor.u32 %v2505_v61, %v2501_v59  ;;  %v14200_v8 = vld [vmem:[#allocation3 + $0x8] ss:$12 sps:$4 sm:$0xff]   ;;  %v15552_v57 = vpop.f32.mrf.mxu1 }
 0x141   : > { %v4606_v9 = vrot.slane %v12416_v3, 5  ;;  %v4609_v12 = vrot.slane %v12417_v44, 5  ;;  %v12418_v13 = vld [vmem:[%s14936_s17 + $0x24] sm:$0xe]  ;;  %v14196_v16 = vld [vmem:[#allocation3 + $0x168] ss:$12 sps:$4 sm:$0xff]   ;;  %v12912_v51 = vpop.f32.mrf.mxu0 }
 0x142   : > { %v2497_v11 = vrot.slane %v2496_v2, 4  ;;  %v2507_v17 = vrot.slane %v2506_v6, 4  ;;  %v12419_v22 = vld [vmem:[%s14936_s17 + $0x28] sm:$0xf]  ;;  %v12420_v23 = vld [vmem:[%s14936_s17 + $0x2c] sm:$0x1] }
 0x143   : > { %v14192_v15 = vld [vmem:[#allocation3 + $0x16c] ss:$12 sps:$4 sm:$0xff]   ;;  %v4607_v18 = vsel %vm14960_vm4, %v12463_v4, %v4606_v9  ;;  %v4608_v21 = vrot.slane %v4606_v9, 4  ;;  %v12464_v24 = vrot.slane %v12418_v13, 9  ;;  %v4613_v27 = vrot.slane %v12419_v22, 5  ;;  %v14204_v49 = vld [vmem:[%s18268_s2 + $0x1b8] sm:$0xff]   ;;  %v12913_v62 = vpop.f32.mrf.mxu0  ;;  %v15563_v13 = vpop.f32.mrf.mxu1 }
 0x144   : > { %v2502_v20 = vsel %vm14971_vm5, %v2497_v11, %v2501_v59  ;;  %4748 = vst [vmem:[#allocation3 + $0x8] sm:$0xf] %v4607_v18  ;;  %1982 = vmatprep.mubr.bf16.mxu0 %v14192_v15  ;;  %v2512_v25 = vsel %vm14971_vm5, %v2507_v17, %v2511_v7  ;;  %v14202_v26 = vld [vmem:[#allocation3 + $0x20] ss:$12 sps:$4 sm:$0xff]   ;;  %v4616_v28 = vrot.slane %v12420_v23, 5  ;;  %v14211_v56 = vld [vmem:[%s18268_s2 + $0x1f0] sm:$0xff]   ;;  %v12914_v4 = vadd.f32 %v12913_v62, %v12912_v51 }
 0x145   : > { %2729 = vst [vmem:[#allocation3 + $0xc4] sm:$0xf] %v2502_v20  ;;  %1983 = vmatmul.mubr.bf16.gmra.mxu0 %v14196_v16  ;;  %2730 = vst [vmem:[#allocation3 + $0xd0] sm:$0xf] %v2512_v25  ;;  %v4610_v29 = vsel %vm14960_vm4, %v4608_v21, %v4609_v12  ;;  %v4614_v30 = vsel %vm14960_vm4, %v12464_v24, %v4613_v27  ;;  %v4615_v31 = vrot.slane %v4613_v27, 4  ;;  %v14212_v61 = vld [vmem:[%s18268_s2 + $0x1b0] sm:$0xff]  }
 0x146   : > { %13770 = vmatprep.mubr.bf16.mxu0 %v14200_v8  ;;  %4749 = vst [vmem:[#allocation3 + $0x14] sm:$0xf] %v4610_v29  ;;  %v12137_v32 = vld [vmem:[%s14936_s17 + $0x78] sm:$0xf]  ;;  %v14197_v35 = vld [vmem:[#allocation3 + $0xa8] ss:$12 sps:$4 sm:$0xff]   ;;  %v12915_v8 = vpop.f32.mrf.mxu0  ;;  %v15566_v15 = vadd.f32 %v15512_v63, %v12914_v4 }
 0x147   : > { %v14194_v34 = vld [vmem:[#allocation3 + $0xac] ss:$12 sps:$4 sm:$0xff]   ;;  %4750 = vst [vmem:[#allocation3 + $0x20] sm:$0xf] %v4614_v30  ;;  %2235 = vst [vmem:[#allocation3 + $0xd8] sm:$0xf] %v12137_v32  ;;  %v4617_v37 = vsel %vm14960_vm4, %v4615_v31, %v4616_v28 }
 0x148   : > { %v12138_v38 = vld [vmem:[%s14936_s17 + $0x7c] sm:$0xf]  ;;  %v12178_v39 = vld [vmem:[%s14936_s17 + $0x78] sm:$0xf]  ;;  %3617 = vmatprep.mubr.bf16.mxu1 %v14194_v34  ;;  %4751 = vst [vmem:[#allocation3 + $0x2c] sm:$0xf] %v4617_v37  ;;  %v12916_v22 = vpop.f32.mrf.mxu0  ;;  %v15586_v34 = vpop.f32.mrf.mxu1 }
 0x149   : > { %v12179_v40 = vld [vmem:[%s14936_s17 + $0x7c] sm:$0xf]  ;;  %2236 = vst [vmem:[#allocation3 + $0xe4] sm:$0xf] %v12138_v38  ;;  %v12180_v41 = vld [vmem:[%s14936_s17 + $0x80] sm:$0x1]  ;;  %3618 = vmatmul.mubr.bf16.gmra.mxu1 %v14197_v35  ;;  %v12917_v28 = vadd.f32 %v12916_v22, %v12915_v8 }
 0x14a   : > { %v2514_v43 = vshrl.u32 %v12178_v39, 16  ;;  %v2517_v46 = vshll.u32 %v12178_v39, 16  ;;  %v2523_v47 = vshll.u32 %v12179_v40, 16  ;;  %v2527_v48 = vshrl.u32 %v12179_v40, 16  ;;  %v14201_v59 = vld [vmem:[#allocation3 + $0xc0] ss:$12 sps:$4 sm:$0xff]  }
 0x14b   : > { %v2533_v50 = vshll.u32 %v12180_v41, 16  ;;  %v14208_v2 = vld [vmem:[#allocation3 + $0x38] ss:$12 sps:$4 sm:$0xff]   ;;  %v12422_v44 = vld [vmem:[%s14936_s17 + $0x34] sm:$0xf]  ;;  %v14218_v12 = vld [vmem:[%s18268_s2 + $0x1e8] sm:$0xff]   ;;  %v15589_v35 = vadd.f32 %v15538_v36, %v12917_v28 }
 0x14c   : > { %v2516_v52 = vrot.slane %v2514_v43, 4  ;;  %v2519_v53 = vrot.slane %v2517_v46, 5  ;;  %v2525_v54 = vrot.slane %v2523_v47, 5  ;;  %v2529_v55 = vrot.slane %v2527_v48, 4  ;;  %v14198_v58 = vld [vmem:[#allocation3 + $0xc4] ss:$12 sps:$4 sm:$0xff]  }
 0x14d   : > { %v2535_v60 = vrot.slane %v2533_v50, 5  ;;  %13771 = vmatmul.mubr.bf16.vlgmr.msra.gmra.mxu0 %v14202_v26  ;;  %v12421_v3 = vld [vmem:[%s14936_s17 + $0x30] sm:$0xe]  ;;  %3625 = vmatprep.mubr.bf16.mxu1 %v14198_v58  ;;  %v12423_v5 = vld [vmem:[%s14936_s17 + $0x38] sm:$0x1]  ;;  %v4620_v7 = vrot.slane %v12422_v44, 5 }
 0x14e   : > { %v2520_v0 = vor.u32 %v2519_v53, %v2516_v52  ;;  %v2530_v1 = vor.u32 %v2529_v55, %v2525_v54  ;;  %13163 = vmatpush3.bf16.msra.mxu0 %v14204_v49  ;;  %v12465_v6 = vrot.slane %v12421_v3, 9  ;;  %13774 = vmatprep.mubr.bf16.mxu0 %v14208_v2  ;;  %v4623_v11 = vrot.slane %v12423_v5, 5  ;;  %v14210_v18 = vld [vmem:[#allocation3 + $0x50] ss:$12 sps:$4 sm:$0xff]   ;;  %v12424_v20 = vld [vmem:[%s14936_s17 + $0x3c] sm:$0xe]  ;;  %v12918_v2 = vpop.f32.mrf.mxu0 }
 0x14f   : > { %13164 = vmatprep.subr.bf16.mxu0 %v14211_v56  ;;  %v4622_v17 = vrot.slane %v4620_v7, 4  ;;  %v14219_v21 = vld [vmem:[%s18268_s2 + $0x1a8] sm:$0xff]   ;;  %v12425_v63 = vld [vmem:[%s14936_s17 + $0x40] sm:$0xf]  ;;  %v12426_v25 = vld [vmem:[%s14936_s17 + $0x44] sm:$0x1]  ;;  %v15605_v56 = vpop.f32.mrf.mxu1 }
 0x150   : > { %v2521_v9 = vrot.slane %v2520_v0, 4  ;;  %v2531_v10 = vrot.slane %v2530_v1, 4  ;;  %v4621_v16 = vsel %vm14960_vm4, %v12465_v6, %v4620_v7  ;;  %v12466_v26 = vrot.slane %v12424_v20, 9  ;;  %v14226_v27 = vld [vmem:[%s18268_s2 + $0x1e0] sm:$0xff]   ;;  %v12140_v39 = vld [vmem:[%s14936_s17 + $0x88] sm:$0xf] }
 0x151   : > { %4752 = vst [vmem:[#allocation3 + $0x38] sm:$0xf] %v4621_v16  ;;  %3626 = vmatmul.mubr.bf16.gmra.mxu1 %v14201_v59  ;;  %v4624_v29 = vsel %vm14960_vm4, %v4622_v17, %v4623_v11  ;;  %v4627_v30 = vrot.slane %v12425_v63, 5  ;;  %v4630_v31 = vrot.slane %v12426_v25, 5  ;;  %v12139_v32 = vld [vmem:[%s14936_s17 + $0x84] sm:$0xf]  ;;  %v12919_v11 = vpop.f32.mrf.mxu0 }
 0x152   : > { %v2526_v23 = vsel %vm14971_vm5, %v2521_v9, %v2525_v54  ;;  %v2536_v24 = vsel %vm14971_vm5, %v2531_v10, %v2535_v60  ;;  %13165 = vmatpush3.bf16.msra.mxu0 %v14212_v61  ;;  %4753 = vst [vmem:[#allocation3 + $0x44] sm:$0xf] %v4624_v29  ;;  %2237 = vst [vmem:[#allocation3 + $0xf0] sm:$0xf] %v12139_v32  ;;  %v12181_v40 = vld [vmem:[%s14936_s17 + $0x84] sm:$0xf]  ;;  %v15613_v10 = vpop.f32.mrf.mxu1 }
 0x153   : > { %2731 = vst [vmem:[#allocation3 + $0xdc] sm:$0xf] %v2526_v23  ;;  %2732 = vst [vmem:[#allocation3 + $0xe8] sm:$0xf] %v2536_v24  ;;  %13166 = vmatprep.subr.bf16.mxu0 %v14218_v12  ;;  %v4628_v37 = vsel %vm14960_vm4, %v12466_v26, %v4627_v30  ;;  %v4629_v38 = vrot.slane %v4627_v30, 4  ;;  %v14227_v41 = vld [vmem:[%s18268_s2 + $0x1a0] sm:$0xff]  }
 0x154   : > { %4754 = vst [vmem:[#allocation3 + $0x50] sm:$0xf] %v4628_v37  ;;  %2238 = vst [vmem:[#allocation3 + $0xfc] sm:$0xf] %v12140_v39  ;;  %v12182_v43 = vld [vmem:[%s14936_s17 + $0x88] sm:$0xf]  ;;  %v15635_v32 = vpop.f32.mrf.mxu1 }
 0x155   : > { %13775 = vmatmul.mubr.bf16.gmra.mxu0 %v14210_v18  ;;  %v12183_v46 = vld [vmem:[%s14936_s17 + $0x8c] sm:$0x1]  ;;  %v2538_v47 = vshrl.u32 %v12181_v40, 16  ;;  %v2541_v36 = vshll.u32 %v12181_v40, 16  ;;  %v4631_v48 = vsel %vm14960_vm4, %v4629_v38, %v4630_v31  ;;  %v2547_v49 = vshll.u32 %v12182_v43, 16  ;;  %v14233_v52 = vld [vmem:[%s18268_s2 + $0x1d8] sm:$0xff]  }
 0x156   : > { %v2551_v50 = vshrl.u32 %v12182_v43, 16  ;;  %v2557_v51 = vshll.u32 %v12183_v46, 16  ;;  %13167 = vmatpush3.bf16.msra.mxu0 %v14219_v21  ;;  %4755 = vst [vmem:[#allocation3 + $0x5c] sm:$0xf] %v4631_v48  ;;  %v14215_v55 = vld [vmem:[#allocation3 + $0x68] ss:$12 sps:$4 sm:$0xff]   ;;  %v12920_v18 = vadd.f32 %v12919_v11, %v12918_v2  ;;  %v15647_v43 = vpop.f32.mrf.mxu0 }
 0x157   : > { %v2540_v53 = vrot.slane %v2538_v47, 4  ;;  %v2543_v54 = vrot.slane %v2541_v36, 5  ;;  %13168 = vmatprep.subr.bf16.mxu0 %v14226_v27  ;;  %v2549_v58 = vrot.slane %v2547_v49, 5  ;;  %v12427_v60 = vld [vmem:[%s14936_s17 + $0x48] sm:$0xe]  ;;  %13778 = vmatprep.mubr.bf16.mxu0 %v14215_v55  ;;  %v14234_v9 = vld [vmem:[%s18268_s2 + $0x198] sm:$0xff]  }
 0x158   : > { %v2553_v59 = vrot.slane %v2551_v50, 4  ;;  %v2559_v0 = vrot.slane %v2557_v51, 5  ;;  %v12467_v1 = vrot.slane %v12427_v60, 9  ;;  %v14209_v3 = vld [vmem:[#allocation3 + $0xd8] ss:$12 sps:$4 sm:$0xff]   ;;  %v15628_v28 = vadd.f32 %v12920_v18, %v15586_v34  ;;  %v14248_v38 = vld [vmem:[%s18268_s2 + $0x1c8] sm:$0xff]  }
 0x159   : > { %v2544_v62 = vor.u32 %v2543_v54, %v2540_v53  ;;  %v12428_v4 = vld [vmem:[%s14936_s17 + $0x4c] sm:$0xf]  ;;  %v12429_v5 = vld [vmem:[%s14936_s17 + $0x50] sm:$0x1]  ;;  %v14217_v16 = vld [vmem:[#allocation3 + $0x80] ss:$12 sps:$4 sm:$0xff]   ;;  %v15654_v53 = vpop.f32.mrf.mxu1 }
 0x15a   : > { %v14206_v61 = vld [vmem:[#allocation3 + $0xdc] ss:$12 sps:$4 sm:$0xff]   ;;  %v2554_v44 = vor.u32 %v2553_v59, %v2549_v58  ;;  %13169 = vmatpush3.bf16.msra.mxu0 %v14227_v41  ;;  %v4634_v7 = vrot.slane %v12428_v4, 5  ;;  %v4637_v8 = vrot.slane %v12429_v5, 5  ;;  %v12431_v24 = vld [vmem:[%s14936_s17 + $0x58] sm:$0xf] }
 0x15b   : > { %3633 = vmatprep.mubr.bf16.mxu1 %v14206_v61  ;;  %v2545_v6 = vrot.slane %v2544_v62, 4  ;;  %13170 = vmatprep.subr.bf16.mxu0 %v14233_v52  ;;  %v14241_v17 = vld [vmem:[%s18268_s2 + $0x1d0] sm:$0xff]   ;;  %v12432_v25 = vld [vmem:[%s14936_s17 + $0x5c] sm:$0x1]  ;;  %v4641_v27 = vrot.slane %v12431_v24, 5  ;;  %v14249_v41 = vld [vmem:[%s18268_s2 + $0x188] sm:$0xff]  }
 0x15c   : > { %3634 = vmatmul.mubr.bf16.gmra.mxu1 %v14209_v3  ;;  %v2555_v12 = vrot.slane %v2554_v44, 4  ;;  %v4635_v21 = vsel %vm14960_vm4, %v12467_v1, %v4634_v7  ;;  %v4636_v22 = vrot.slane %v4634_v7, 4  ;;  %v12430_v23 = vld [vmem:[%s14936_s17 + $0x54] sm:$0xe]  ;;  %v4644_v30 = vrot.slane %v12432_v25, 5 }
 0x15d   : > { %v2550_v20 = vsel %vm14971_vm5, %v2545_v6, %v2549_v58  ;;  %4756 = vst [vmem:[#allocation3 + $0x68] sm:$0xf] %v4635_v21  ;;  %13779 = vmatmul.mubr.bf16.gmra.mxu0 %v14217_v16  ;;  %v12468_v26 = vrot.slane %v12430_v23, 9  ;;  %v14242_v31 = vld [vmem:[%s18268_s2 + $0x190] sm:$0xff]   ;;  %v4643_v37 = vrot.slane %v4641_v27, 4  ;;  %v14256_v58 = vld [vmem:[%s18268_s2 + $0x1c0] sm:$0xff]  }
 0x15e   : > { %v2560_v63 = vsel %vm14971_vm5, %v2555_v12, %v2559_v0  ;;  %2733 = vst [vmem:[#allocation3 + $0xf4] sm:$0xf] %v2550_v20  ;;  %v4638_v29 = vsel %vm14960_vm4, %v4636_v22, %v4637_v8  ;;  %13171 = vmatpush3.bf16.msra.mxu0 %v14234_v9  ;;  %v12141_v39 = vld [vmem:[%s14936_s17 + $0x90] sm:$0xf]  ;;  %v12142_v40 = vld [vmem:[%s14936_s17 + $0x94] sm:$0xf]  ;;  %v15659_v0 = vpop.f32.mrf.mxu0  ;;  %v15664_v8 = vpop.f32.mrf.mxu1 }
 0x15f   : > { %2734 = vst [vmem:[#allocation3 + $0x100] sm:$0xf] %v2560_v63  ;;  %4757 = vst [vmem:[#allocation3 + $0x74] sm:$0xf] %v4638_v29  ;;  %v4642_v34 = vsel %vm14960_vm4, %v12468_v26, %v4641_v27  ;;  %13172 = vmatprep.subr.bf16.mxu0 %v14241_v17  ;;  %v4645_v46 = vsel %vm14960_vm4, %v4643_v37, %v4644_v30  ;;  %v12184_v47 = vld [vmem:[%s14936_s17 + $0x90] sm:$0xf] }
 0x160   : > { %4758 = vst [vmem:[#allocation3 + $0x80] sm:$0xf] %v4642_v34  ;;  %2239 = vst [vmem:[#allocation3 + $0x108] sm:$0xf] %v12141_v39  ;;  %v12185_v36 = vld [vmem:[%s14936_s17 + $0x94] sm:$0xf]  ;;  %v12924_v21 = vpop.f32.mrf.mxu0 }
 0x161   : > { %2240 = vst [vmem:[#allocation3 + $0x114] sm:$0xf] %v12142_v40  ;;  %v12186_v48 = vld [vmem:[%s14936_s17 + $0x98] sm:$0x1]  ;;  %4759 = vst [vmem:[#allocation3 + $0x8c] sm:$0xf] %v4645_v46 }
 0x162   : > { %v2562_v49 = vshrl.u32 %v12184_v47, 16  ;;  %v2565_v50 = vshll.u32 %v12184_v47, 16  ;;  %v2571_v51 = vshll.u32 %v12185_v36, 16  ;;  %v2575_v52 = vshrl.u32 %v12185_v36, 16  ;;  %13173 = vmatpush3.bf16.msra.mxu0 %v14242_v31  ;;  %v14223_v55 = vld [vmem:[#allocation3 + $0x98] ss:$12 sps:$4 sm:$0xff]   ;;  %v15678_v31 = vpop.f32.mrf.mxu1  ;;  %v12925_v34 = vpop.f32.mrf.mxu0 }
 0x163   : > { %v2581_v54 = vshll.u32 %v12186_v48, 16  ;;  %13174 = vmatprep.subr.bf16.mxu0 %v14248_v38  ;;  %v14216_v2 = vld [vmem:[#allocation3 + $0xf0] ss:$12 sps:$4 sm:$0xff]   ;;  %13782 = vmatprep.mubr.bf16.mxu0 %v14223_v55  ;;  %v12433_v5 = vld [vmem:[%s14936_s17 + $0x60] sm:$0xe]  ;;  %18302 = vst [vmem:[#allocation16_spill] sm:$0xff] %v15678_v31  ;;  %v12926_v39 = vadd.f32 %v12925_v34, %v12924_v21 }
 0x164   : > { %v2564_v59 = vrot.slane %v2562_v49, 4  ;;  %v2567_v60 = vrot.slane %v2565_v50, 5  ;;  %v2573_v61 = vrot.slane %v2571_v51, 5  ;;  %v2577_v62 = vrot.slane %v2575_v52, 4  ;;  %v12434_v6 = vld [vmem:[%s14936_s17 + $0x64] sm:$0xf]  ;;  %v12927_v47 = vpop.f32.mrf.mxu0 }
 0x165   : > { %v2583_v3 = vrot.slane %v2581_v54, 5  ;;  %v12435_v7 = vld [vmem:[%s14936_s17 + $0x68] sm:$0x1]  ;;  %v12469_v9 = vrot.slane %v12433_v5, 9  ;;  %v4648_v11 = vrot.slane %v12434_v6, 5  ;;  %v14257_v16 = vld [vmem:[%s18268_s2 + $0x180] sm:$0xff]   ;;  %v15689_v50 = vadd.f32 %v15563_v13, %v12926_v39 }
 0x166   : > { %v14213_v1 = vld [vmem:[#allocation3 + $0xf4] ss:$12 sps:$4 sm:$0xff]   ;;  %v2568_v44 = vor.u32 %v2567_v60, %v2564_v59  ;;  %v2578_v4 = vor.u32 %v2577_v62, %v2573_v61  ;;  %13175 = vmatpush3.bf16.msra.mxu0 %v14249_v41  ;;  %v4651_v12 = vrot.slane %v12435_v7, 5  ;;  %v14225_v20 = vld [vmem:[#allocation3 + $0xb0] ss:$12 sps:$4 sm:$0xff]   ;;  %v15694_v59 = vpop.f32.mrf.mxu1  ;;  %v12928_v60 = vpop.f32.mrf.mxu0 }
 0x167   : > { %3641 = vmatprep.mubr.bf16.mxu1 %v14213_v1  ;;  %13176 = vmatprep.subr.bf16.mxu0 %v14256_v58  ;;  %v4649_v22 = vsel %vm14960_vm4, %v12469_v9, %v4648_v11  ;;  %v4650_v23 = vrot.slane %v4648_v11, 4  ;;  %v12436_v24 = vld [vmem:[%s14936_s17 + $0x6c] sm:$0xe]  ;;  %v12437_v63 = vld [vmem:[%s14936_s17 + $0x70] sm:$0xf]  ;;  %18303 = vst [vmem:[#allocation17_spill] sm:$0xff] %v15694_v59  ;;  %v12929_v1 = vadd.f32 %v12928_v60, %v12927_v47 }
 0x168   : > { %3642 = vmatmul.mubr.bf16.gmra.mxu1 %v14216_v2  ;;  %v2569_v17 = vrot.slane %v2568_v44, 4  ;;  %v2579_v18 = vrot.slane %v2578_v4, 4  ;;  %4760 = vst [vmem:[#allocation3 + $0x98] sm:$0xf] %v4649_v22  ;;  %13783 = vmatmul.mubr.bf16.gmra.mxu0 %v14225_v20  ;;  %v12438_v27 = vld [vmem:[%s14936_s17 + $0x74] sm:$0x1] }
 0x169   : > { %v12470_v29 = vrot.slane %v12436_v24, 9  ;;  %v4655_v30 = vrot.slane %v12437_v63, 5  ;;  %v4652_v37 = vsel %vm14960_vm4, %v4650_v23, %v4651_v12  ;;  %v4658_v38 = vrot.slane %v12438_v27, 5  ;;  %v12143_v46 = vld [vmem:[%s14936_s17 + $0x9c] sm:$0xf] }
 0x16a   : > { %v2574_v25 = vsel %vm14971_vm5, %v2569_v17, %v2573_v61  ;;  %v2584_v26 = vsel %vm14971_vm5, %v2579_v18, %v2583_v3  ;;  %13177 = vmatpush3.bf16.msra.mxu0 %v14257_v16  ;;  %4761 = vst [vmem:[#allocation3 + $0xa4] sm:$0xf] %v4652_v37  ;;  %v12144_v36 = vld [vmem:[%s14936_s17 + $0xa0] sm:$0xf]  ;;  %2241 = vst [vmem:[#allocation3 + $0x120] sm:$0xf] %v12143_v46  ;;  %v15699_v9 = vadd.f32 %v15605_v56, %v12929_v1  ;;  %v15701_v18 = vpop.f32.mrf.mxu1 }
 0x16b   : > { %2735 = vst [vmem:[#allocation3 + $0x10c] sm:$0xf] %v2574_v25  ;;  %2736 = vst [vmem:[#allocation3 + $0x118] sm:$0xf] %v2584_v26  ;;  %v4656_v40 = vsel %vm14960_vm4, %v12470_v29, %v4655_v30  ;;  %v4657_v41 = vrot.slane %v4655_v30, 4 }
 0x16c   : > { %4762 = vst [vmem:[#allocation3 + $0xb0] sm:$0xf] %v4656_v40  ;;  %v12187_v48 = vld [vmem:[%s14936_s17 + $0x9c] sm:$0xf]  ;;  %v12188_v49 = vld [vmem:[%s14936_s17 + $0xa0] sm:$0xf]  ;;  %v15713_v39 = vpop.f32.mrf.mxu1 }
 0x16d   : > { %v4659_v51 = vsel %vm14960_vm4, %v4657_v41, %v4658_v38  ;;  %2242 = vst [vmem:[#allocation3 + $0x12c] sm:$0xf] %v12144_v36  ;;  %v12189_v52 = vld [vmem:[%s14936_s17 + $0xa4] sm:$0x1]  ;;  %v2586_v54 = vshrl.u32 %v12187_v48, 16  ;;  %v2589_v55 = vshll.u32 %v12187_v48, 16  ;;  %v12930_v47 = vpop.f32.mrf.mxu0 }
 0x16e   : > { %v2595_v58 = vshll.u32 %v12188_v49, 16  ;;  %4763 = vst [vmem:[#allocation3 + $0xbc] sm:$0xf] %v4659_v51  ;;  %v2599_v61 = vshrl.u32 %v12188_v49, 16  ;;  %v2605_v62 = vshll.u32 %v12189_v52, 16  ;;  %18304 = vst [vmem:[#allocation18_spill] sm:$0xff] %v15713_v39 }
 0x16f   : > { %v2588_v2 = vrot.slane %v2586_v54, 4  ;;  %v2591_v13 = vrot.slane %v2589_v55, 5  ;;  %v14230_v44 = vld [vmem:[#allocation3 + $0xc8] ss:$12 sps:$4 sm:$0xff]   ;;  %v12439_v6 = vld [vmem:[%s14936_s17 + $0x78] sm:$0xe]  ;;  %v15723_v55 = vpop.f32.mrf.mxu1 }
 0x170   : > { %v2597_v3 = vrot.slane %v2595_v58, 5  ;;  %v2601_v4 = vrot.slane %v2599_v61, 4  ;;  %v2607_v5 = vrot.slane %v2605_v62, 5  ;;  %v12440_v7 = vld [vmem:[%s14936_s17 + $0x7c] sm:$0xf]  ;;  %13786 = vmatprep.mubr.bf16.mxu0 %v14230_v44  ;;  %v12471_v16 = vrot.slane %v12439_v6, 9  ;;  %v12931_v58 = vpop.f32.mrf.mxu0 }
 0x171   : > { %v2592_v12 = vor.u32 %v2591_v13, %v2588_v2  ;;  %v4662_v17 = vrot.slane %v12440_v7, 5  ;;  %v14224_v20 = vld [vmem:[#allocation3 + $0x108] ss:$12 sps:$4 sm:$0xff]   ;;  %v14232_v26 = vld [vmem:[#allocation3 + $0xe0] ss:$12 sps:$4 sm:$0xff]   ;;  %18305 = vst [vmem:[#allocation19_spill] sm:$0xff] %v15723_v55  ;;  %v12932_v44 = vadd.f32 %v12931_v58, %v12930_v47 }
 0x172   : > { %v14221_v11 = vld [vmem:[#allocation3 + $0x10c] ss:$12 sps:$4 sm:$0xff]   ;;  %v2602_v21 = vor.u32 %v2601_v4, %v2597_v3  ;;  %v12441_v22 = vld [vmem:[%s14936_s17 + $0x80] sm:$0x1]  ;;  %v12443_v34 = vld [vmem:[%s14936_s17 + $0x88] sm:$0xf]  ;;  %13787 = vmatmul.mubr.bf16.gmra.mxu0 %v14232_v26 }
 0x173   : > { %3649 = vmatprep.mubr.bf16.mxu1 %v14221_v11  ;;  %v2593_v23 = vrot.slane %v2592_v12, 4  ;;  %v4663_v24 = vsel %vm14960_vm4, %v12471_v16, %v4662_v17  ;;  %v4664_v56 = vrot.slane %v4662_v17, 4  ;;  %v4665_v63 = vrot.slane %v12441_v22, 5  ;;  %v12442_v27 = vld [vmem:[%s14936_s17 + $0x84] sm:$0xe]  ;;  %v15729_v17 = vpop.f32.mrf.mxu1 }
 0x174   : > { %3650 = vmatmul.mubr.bf16.gmra.mxu1 %v14224_v20  ;;  %v2603_v25 = vrot.slane %v2602_v21, 4  ;;  %4764 = vst [vmem:[#allocation3 + $0xc8] sm:$0xf] %v4663_v24  ;;  %v12444_v37 = vld [vmem:[%s14936_s17 + $0x8c] sm:$0x1]  ;;  %v12472_v38 = vrot.slane %v12442_v27, 9  ;;  %v15732_v20 = vadd.f32 %v12932_v44, %v15654_v53 }
 0x175   : > { %v2598_v29 = vsel %vm14971_vm5, %v2593_v23, %v2597_v3  ;;  %v4666_v30 = vsel %vm14960_vm4, %v4664_v56, %v4665_v63  ;;  %v4669_v41 = vrot.slane %v12443_v34, 5  ;;  %v4672_v46 = vrot.slane %v12444_v37, 5  ;;  %v12145_v49 = vld [vmem:[%s14936_s17 + $0xa8] sm:$0xf]  ;;  %v12146_v51 = vld [vmem:[%s14936_s17 + $0xac] sm:$0xf]  ;;  %v15737_v37 = vpop.f32.mrf.mxu1 }
 0x176   : > { %v2608_v40 = vsel %vm14971_vm5, %v2603_v25, %v2607_v5  ;;  %2737 = vst [vmem:[#allocation3 + $0x124] sm:$0xf] %v2598_v29  ;;  %4765 = vst [vmem:[#allocation3 + $0xd4] sm:$0xf] %v4666_v30  ;;  %v12190_v52 = vld [vmem:[%s14936_s17 + $0xa8] sm:$0xf] }
 0x177   : > { %2738 = vst [vmem:[#allocation3 + $0x130] sm:$0xf] %v2608_v40  ;;  %v4670_v36 = vsel %vm14960_vm4, %v12472_v38, %v4669_v41  ;;  %v4671_v48 = vrot.slane %v4669_v41, 4  ;;  %2243 = vst [vmem:[#allocation3 + $0x138] sm:$0xf] %v12145_v49  ;;  %v2610_v62 = vshrl.u32 %v12190_v52, 16  ;;  %v15739_v38 = vpop.f32.mrf.mxu0 }
 0x178   : > { %4766 = vst [vmem:[#allocation3 + $0xe0] sm:$0xf] %v4670_v36  ;;  %v12191_v54 = vld [vmem:[%s14936_s17 + $0xac] sm:$0xf]  ;;  %2244 = vst [vmem:[#allocation3 + $0x144] sm:$0xf] %v12146_v51 }
 0x179   : > { %v4673_v60 = vsel %vm14960_vm4, %v4671_v48, %v4672_v46  ;;  %v12192_v61 = vld [vmem:[%s14936_s17 + $0xb0] sm:$0x1]  ;;  %v2613_v1 = vshll.u32 %v12190_v52, 16  ;;  %v2619_v2 = vshll.u32 %v12191_v54, 16  ;;  %v2623_v13 = vshrl.u32 %v12191_v54, 16  ;;  %18306 = vst [vmem:[#allocation20_spill] sm:$0xff] %v15729_v17 }
 0x17a   : > { %4767 = vst [vmem:[#allocation3 + $0xec] sm:$0xf] %v4673_v60  ;;  %v2629_v3 = vshll.u32 %v12192_v61, 16  ;;  %v2612_v4 = vrot.slane %v2610_v62, 4  ;;  %v14238_v7 = vld [vmem:[#allocation3 + $0xf8] ss:$12 sps:$4 sm:$0xff]  }
 0x17b   : > { %v2615_v5 = vrot.slane %v2613_v1, 5  ;;  %v2621_v6 = vrot.slane %v2619_v2, 5  ;;  %v2625_v11 = vrot.slane %v2623_v13, 4  ;;  %v12445_v16 = vld [vmem:[%s14936_s17 + $0x90] sm:$0xe]  ;;  %18307 = vst [vmem:[#allocation21_spill] sm:$0xff] %v15732_v20  ;;  %13790 = vmatprep.mubr.bf16.mxu0 %v14238_v7  ;;  %v15756_v2 = vpop.f32.mrf.mxu1  ;;  %v15758_v13 = vpop.f32.mrf.mxu0 }
 0x17c   : > { %v2631_v12 = vrot.slane %v2629_v3, 5  ;;  %v14231_v22 = vld [vmem:[#allocation3 + $0x120] ss:$12 sps:$4 sm:$0xff]   ;;  %v12473_v24 = vrot.slane %v12445_v16, 9  ;;  %v12446_v63 = vld [vmem:[%s14936_s17 + $0x94] sm:$0xf] }
 0x17d   : > { %v2616_v23 = vor.u32 %v2615_v5, %v2612_v4  ;;  %v2626_v56 = vor.u32 %v2625_v11, %v2621_v6  ;;  %v12447_v25 = vld [vmem:[%s14936_s17 + $0x98] sm:$0x1]  ;;  %v4676_v27 = vrot.slane %v12446_v63, 5  ;;  %v14240_v34 = vld [vmem:[#allocation3 + $0x110] ss:$12 sps:$4 sm:$0xff]   ;;  %18308 = vst [vmem:[#allocation22_spill] sm:$0xff] %v15756_v2 }
 0x17e   : > { %v14228_v21 = vld [vmem:[#allocation3 + $0x124] ss:$12 sps:$4 sm:$0xff]   ;;  %v4679_v29 = vrot.slane %v12447_v25, 5  ;;  %v12449_v47 = vld [vmem:[%s14936_s17 + $0xa0] sm:$0xf]  ;;  %13791 = vmatmul.mubr.bf16.gmra.mxu0 %v14240_v34  ;;  %v15765_v25 = vpop.f32.mrf.mxu1 }
 0x17f   : > { %3657 = vmatprep.mubr.bf16.mxu1 %v14228_v21  ;;  %v2617_v26 = vrot.slane %v2616_v23, 4  ;;  %v2627_v30 = vrot.slane %v2626_v56, 4  ;;  %v12448_v53 = vld [vmem:[%s14936_s17 + $0x9c] sm:$0xe]  ;;  %v4677_v41 = vsel %vm14960_vm4, %v12473_v24, %v4676_v27  ;;  %v4678_v46 = vrot.slane %v4676_v27, 4  ;;  %18309 = vst [vmem:[#allocation23_spill] sm:$0xff] %v15765_v25 }
 0x180   : > { %3658 = vmatmul.mubr.bf16.gmra.mxu1 %v14231_v22  ;;  %v12450_v36 = vld [vmem:[%s14936_s17 + $0xa4] sm:$0x1]  ;;  %v12474_v48 = vrot.slane %v12448_v53, 9  ;;  %4768 = vst [vmem:[#allocation3 + $0xf8] sm:$0xf] %v4677_v41  ;;  %v4683_v51 = vrot.slane %v12449_v47, 5 }
 0x181   : > { %v2622_v40 = vsel %vm14971_vm5, %v2617_v26, %v2621_v6  ;;  %v2632_v49 = vsel %vm14971_vm5, %v2627_v30, %v2631_v12  ;;  %v4686_v52 = vrot.slane %v12450_v36, 5  ;;  %v4680_v54 = vsel %vm14960_vm4, %v4678_v46, %v4679_v29  ;;  %v12147_v58 = vld [vmem:[%s14936_s17 + $0xb4] sm:$0xf]  ;;  %v12148_v62 = vld [vmem:[%s14936_s17 + $0xb8] sm:$0xf]  ;;  %v12936_v26 = vpop.f32.mrf.mxu0 }
 0x182   : > { %2739 = vst [vmem:[#allocation3 + $0x13c] sm:$0xf] %v2622_v40  ;;  %2740 = vst [vmem:[#allocation3 + $0x148] sm:$0xf] %v2632_v49  ;;  %v4684_v60 = vsel %vm14960_vm4, %v12474_v48, %v4683_v51  ;;  %v4685_v61 = vrot.slane %v4683_v51, 4 }
 0x183   : > { %4769 = vst [vmem:[#allocation3 + $0x104] sm:$0xf] %v4680_v54  ;;  %2245 = vst [vmem:[#allocation3 + $0x150] sm:$0xf] %v12147_v58  ;;  %v12193_v1 = vld [vmem:[%s14936_s17 + $0xb4] sm:$0xf]  ;;  %v12937_v47 = vpop.f32.mrf.mxu0 }
 0x184   : > { %4770 = vst [vmem:[#allocation3 + $0x110] sm:$0xf] %v4684_v60  ;;  %2246 = vst [vmem:[#allocation3 + $0x15c] sm:$0xf] %v12148_v62  ;;  %v12194_v3 = vld [vmem:[%s14936_s17 + $0xb8] sm:$0xf]  ;;  %v4687_v6 = vsel %vm14960_vm4, %v4685_v61, %v4686_v52  ;;  %v12938_v49 = vadd.f32 %v12937_v47, %v12936_v26  ;;  %v15772_v61 = vpop.f32.mrf.mxu1 }
 0x185   : > { %v12195_v44 = vld [vmem:[%s14936_s17 + $0xbc] sm:$0x1]  ;;  %v2634_v4 = vshrl.u32 %v12193_v1, 16  ;;  %v2637_v5 = vshll.u32 %v12193_v1, 16  ;;  %v2643_v7 = vshll.u32 %v12194_v3, 16  ;;  %v2647_v11 = vshrl.u32 %v12194_v3, 16  ;;  %v12939_v62 = vpop.f32.mrf.mxu0 }
 0x186   : > { %v2653_v12 = vshll.u32 %v12195_v44, 16  ;;  %4771 = vst [vmem:[#allocation3 + $0x11c] sm:$0xf] %v4687_v6  ;;  %v14245_v22 = vld [vmem:[#allocation3 + $0x128] ss:$12 sps:$4 sm:$0xff]   ;;  %18310 = vst [vmem:[#allocation24_spill] sm:$0xff] %v15772_v61 }
 0x187   : > { %v2636_v16 = vrot.slane %v2634_v4, 4  ;;  %v2639_v21 = vrot.slane %v2637_v5, 5  ;;  %v2645_v23 = vrot.slane %v2643_v7, 5  ;;  %v2649_v24 = vrot.slane %v2647_v11, 4  ;;  %v12451_v63 = vld [vmem:[%s14936_s17 + $0xa8] sm:$0xe]  ;;  %13794 = vmatprep.mubr.bf16.mxu0 %v14245_v22 }
 0x188   : > { %v2655_v56 = vrot.slane %v2653_v12, 5  ;;  %v12452_v29 = vld [vmem:[%s14936_s17 + $0xac] sm:$0xf]  ;;  %v12453_v30 = vld [vmem:[%s14936_s17 + $0xb0] sm:$0x1]  ;;  %v12475_v34 = vrot.slane %v12451_v63, 9  ;;  %v15779_v5 = vadd.f32 %v15635_v32, %v12938_v49 }
 0x189   : > { %v2640_v27 = vor.u32 %v2639_v21, %v2636_v16  ;;  %v14236_v53 = vld [vmem:[#allocation3 + $0x13c] ss:$12 sps:$4 sm:$0xff]   ;;  %v14239_v40 = vld [vmem:[#allocation3 + $0x138] ss:$12 sps:$4 sm:$0xff]   ;;  %v2650_v41 = vor.u32 %v2649_v24, %v2645_v23  ;;  %v4690_v46 = vrot.slane %v12452_v29, 5  ;;  %v4693_v48 = vrot.slane %v12453_v30, 5  ;;  %v12940_v16 = vpop.f32.mrf.mxu0  ;;  %v15788_v24 = vpop.f32.mrf.mxu1 }
 0x18a   : > { %3665 = vmatprep.mubr.bf16.mxu1 %v14236_v53  ;;  %v14247_v58 = vld [vmem:[#allocation3 + $0x140] ss:$12 sps:$4 sm:$0xff]   ;;  %v12454_v60 = vld [vmem:[%s14936_s17 + $0xb4] sm:$0xe]  ;;  %v12456_v44 = vld [vmem:[%s14936_s17 + $0xbc] sm:$0x1]  ;;  %v12941_v21 = vadd.f32 %v12940_v16, %v12939_v62 }
 0x18b   : > { %v2641_v36 = vrot.slane %v2640_v27, 4  ;;  %v2651_v51 = vrot.slane %v2650_v41, 4  ;;  %v4691_v52 = vsel %vm14960_vm4, %v12475_v34, %v4690_v46  ;;  %v4692_v54 = vrot.slane %v4690_v46, 4  ;;  %3666 = vmatmul.mubr.bf16.gmra.mxu1 %v14239_v40  ;;  %v12455_v3 = vld [vmem:[%s14936_s17 + $0xb8] sm:$0xf]  ;;  %13795 = vmatmul.mubr.bf16.gmra.mxu0 %v14247_v58  ;;  %18311 = vst [vmem:[#allocation25_spill] sm:$0xff] %v15788_v24 }
 0x18c   : > { %4772 = vst [vmem:[#allocation3 + $0x128] sm:$0xf] %v4691_v52  ;;  %v12476_v4 = vrot.slane %v12454_v60, 9  ;;  %v4697_v11 = vrot.slane %v12455_v3, 5  ;;  %v4700_v12 = vrot.slane %v12456_v44, 5  ;;  %v15794_v27 = vadd.f32 %v15664_v8, %v12941_v21  ;;  %v15799_v8 = vpop.f32.mrf.mxu1 }
 0x18d   : > { %v2646_v1 = vsel %vm14971_vm5, %v2641_v36, %v2645_v23  ;;  %v2656_v6 = vsel %vm14971_vm5, %v2651_v51, %v2655_v56  ;;  %v4694_v7 = vsel %vm14960_vm4, %v4692_v54, %v4693_v48  ;;  %v12149_v23 = vld [vmem:[%s14936_s17 + $0xc0] sm:$0xf]  ;;  %v12150_v56 = vld [vmem:[%s14936_s17 + $0xc4] sm:$0xf]  ;;  %v12198_v30 = vld [vmem:[%s14936_s17 + $0xc8] sm:$0x1] }
 0x18e   : > { %2741 = vst [vmem:[#allocation3 + $0x154] sm:$0xf] %v2646_v1  ;;  %2742 = vst [vmem:[#allocation3 + $0x160] sm:$0xf] %v2656_v6  ;;  %v4698_v32 = vsel %vm14960_vm4, %v12476_v4, %v4697_v11  ;;  %v4699_v22 = vrot.slane %v4697_v11, 4  ;;  %v2677_v46 = vshll.u32 %v12198_v30, 16  ;;  %v12942_v3 = vpop.f32.mrf.mxu0  ;;  %v15804_v16 = vpop.f32.mrf.mxu1 }
 0x18f   : > { %4773 = vst [vmem:[#allocation3 + $0x134] sm:$0xf] %v4694_v7  ;;  %4774 = vst [vmem:[#allocation3 + $0x140] sm:$0xf] %v4698_v32  ;;  %v12196_v63 = vld [vmem:[%s14936_s17 + $0xc0] sm:$0xf] }
 0x190   : > { %2247 = vst [vmem:[#allocation3 + $0x168] sm:$0xf] %v12149_v23  ;;  %v12197_v26 = vld [vmem:[%s14936_s17 + $0xc4] sm:$0xf]  ;;  %18312 = vst [vmem:[#allocation26_spill] sm:$0xff] %v15794_v27  ;;  %v4701_v29 = vsel %vm14960_vm4, %v4699_v22, %v4700_v12  ;;  %v2658_v34 = vshrl.u32 %v12196_v63, 16  ;;  %v12943_v21 = vpop.f32.mrf.mxu0 }
 0x191   : > { %2248 = vst [vmem:[#allocation3 + $0x174] sm:$0xf] %v12150_v56  ;;  %v2661_v53 = vshll.u32 %v12196_v63, 16  ;;  %v2667_v40 = vshll.u32 %v12197_v26, 16  ;;  %4775 = vst [vmem:[#allocation3 + $0x14c] sm:$0xf] %v4701_v29  ;;  %v12944_v56 = vadd.f32 %v12943_v21, %v12942_v3 }
 0x192   : > { %v2671_v41 = vshrl.u32 %v12197_v26, 16  ;;  %v2660_v47 = vrot.slane %v2658_v34, 4  ;;  %v14253_v49 = vld [vmem:[#allocation3 + $0x158] ss:$12 sps:$4 sm:$0xff]   ;;  %18313 = vst [vmem:[#allocation27_spill] sm:$0xff] %v15799_v8  ;;  %v2679_v52 = vrot.slane %v2677_v46, 5 }
 0x193   : > { %v2663_v36 = vrot.slane %v2661_v53, 5  ;;  %v2669_v48 = vrot.slane %v2667_v40, 5  ;;  %v12457_v54 = vld [vmem:[%s14936_s17 + $0xc0] sm:$0xe]  ;;  %v14246_v60 = vld [vmem:[#allocation3 + $0x150] ss:$12 sps:$4 sm:$0xff]   ;;  %13798 = vmatprep.mubr.bf16.mxu0 %v14253_v49 }
 0x194   : > { %v2673_v51 = vrot.slane %v2671_v41, 4  ;;  %v12477_v1 = vrot.slane %v12457_v54, 9  ;;  %v12458_v4 = vld [vmem:[%s14936_s17 + $0xc4] sm:$0xf]  ;;  %v12459_v6 = vld [vmem:[%s14936_s17 + $0xc8] sm:$0x1] }
 0x195   : > { %v14243_v58 = vld [vmem:[#allocation3 + $0x154] ss:$12 sps:$4 sm:$0xff]   ;;  %v2664_v62 = vor.u32 %v2663_v36, %v2660_v47  ;;  %v4704_v11 = vrot.slane %v12458_v4, 5  ;;  %v4707_v12 = vrot.slane %v12459_v6, 5  ;;  %18314 = vst [vmem:[#allocation28_spill] sm:$0xff] %v15804_v16  ;;  %v15816_v47 = vadd.f32 %v12944_v56, %v15701_v18 }
 0x196   : > { %v2674_v44 = vor.u32 %v2673_v51, %v2669_v48  ;;  %3673 = vmatprep.mubr.bf16.mxu1 %v14243_v58  ;;  %v14255_v22 = vld [vmem:[#allocation3 + $0x170] ss:$12 sps:$4 sm:$0xff]   ;;  %v12460_v23 = vld [vmem:[%s14936_s17 + $0xcc] sm:$0xe]  ;;  %v12461_v30 = vld [vmem:[%s14936_s17 + $0xd0] sm:$0xf] }
 0x197   : > { %v2665_v7 = vrot.slane %v2664_v62, 4  ;;  %3674 = vmatmul.mubr.bf16.gmra.mxu1 %v14246_v60  ;;  %v4705_v26 = vsel %vm14960_vm4, %v12477_v1, %v4704_v11  ;;  %v4706_v29 = vrot.slane %v4704_v11, 4  ;;  %v12462_v34 = vld [vmem:[%s14936_s17 + $0xd4] sm:$0x1]  ;;  %v12478_v53 = vrot.slane %v12460_v23, 9  ;;  %13799 = vmatmul.mubr.bf16.gmra.mxu0 %v14255_v22  ;;  %18315 = vst [vmem:[#allocation29_spill] sm:$0xff] %v15816_v47 }
 0x198   : > { %v2675_v32 = vrot.slane %v2674_v44, 4  ;;  %4776 = vst [vmem:[#allocation3 + $0x158] sm:$0xf] %v4705_v26  ;;  %v4711_v41 = vrot.slane %v12461_v30, 5  ;;  %v4714_v46 = vrot.slane %v12462_v34, 5 }
 0x199   : > { %v2670_v63 = vsel %vm14971_vm5, %v2665_v7, %v2669_v48  ;;  %v4708_v36 = vsel %vm14960_vm4, %v4706_v29, %v4707_v12  ;;  %v15820_v48 = vpop.f32.mrf.mxu1  ;;  %v370_v18 = vld [vmem:[#allocation2] sm:$0x1]  ;;  %v426_v60 = vld [vmem:[#allocation2 + $0x8] sm:$0x1]  ;;  %v12335_v62 = vld [vmem:[%s14936_s17 + $0x18] sm:$0xf] }
 0x19a   : > { %v2680_v40 = vsel %vm14971_vm5, %v2675_v32, %v2679_v52  ;;  %2743 = vst [vmem:[#allocation3 + $0x16c] sm:$0xf] %v2670_v63  ;;  %18316 = vst [vmem:[#allocation30_spill] sm:$0xff] %v15820_v48  ;;  %v4712_v49 = vsel %vm14960_vm4, %v12478_v53, %v4711_v41  ;;  %v4713_v51 = vrot.slane %v4711_v41, 4  ;;  %v371_v54 = vsel %vm15826_vm8, 0, %v370_v18  ;;  %v15849_v32 = vpop.f32.mrf.mxu0 }
 0x19b   : > { %2744 = vst [vmem:[#allocation3 + $0x178] sm:$0xf] %v2680_v40  ;;  %4777 = vst [vmem:[#allocation3 + $0x164] sm:$0xf] %v4708_v36  ;;  %v427_v3 = vsel %vm15834_vm10, 0, %v426_v60  ;;  %v15847_v21 = vpop.f32.mrf.mxu1 }
 0x19c   : > { %4778 = vst [vmem:[#allocation3 + $0x170] sm:$0xf] %v4712_v49  ;;  %v4715_v1 = vsel %vm14960_vm4, %v4713_v51, %v4714_v46  ;;  %372 = vst [vmem:[#allocation2] sm:$0x1] %v371_v54  ;;  %v12336_v44 = vld [vmem:[%s14936_s17 + $0x1c] sm:$0xf]  ;;  %v15853_v49 = vpop.f32.mrf.mxu0 }
 0x19d   : > { %3980 = vst [vmem:[#allocation3] sm:$0xf] %v12335_v62  ;;  %v12367_v4 = vld [vmem:[%s14936_s17 + $0x18] sm:$0xf]  ;;  %4779 = vst [vmem:[#allocation3 + $0x17c] sm:$0xf] %v4715_v1  ;;  %v15851_v36 = vpop.f32.mrf.mxu1 }
 0x19e   : > { %428 = vst [vmem:[#allocation2 + $0x8] sm:$0x1] %v427_v3  ;;  %3981 = vst [vmem:[#allocation3 + $0xc] sm:$0xf] %v12336_v44  ;;  %v12368_v6 = vld [vmem:[%s14936_s17 + $0x1c] sm:$0xf] }
 0x19f   : > { %v12369_v7 = vld [vmem:[%s14936_s17 + $0x20] sm:$0x1]  ;;  %v4061_v11 = vshrl.u32 %v12367_v4, 16  ;;  %v4064_v12 = vshll.u32 %v12367_v4, 16  ;;  %18321 = vst [vmem:[#allocation31_spill] sm:$0xff] %v15847_v21  ;;  %18322 = vst [vmem:[#allocation32_spill] sm:$0xff] %v15849_v32 }
 0x1a0   : > { %v4070_v22 = vshll.u32 %v12368_v6, 16  ;;  %v4074_v23 = vshrl.u32 %v12368_v6, 16  ;;  %v4080_v26 = vshll.u32 %v12369_v7, 16  ;;  %v6482_v29 = vld [vmem:[#allocation2 + $0x4] sm:$0xf]  ;;  %18323 = vst [vmem:[#allocation33_spill] sm:$0xff] %v15851_v36 }
 0x1a1   : > { %v4063_v56 = vrot.slane %v4061_v11, 4  ;;  %v4066_v63 = vrot.slane %v4064_v12, 5  ;;  %v14254_v34 = vld [vmem:[#allocation3 + $0x168] ss:$12 sps:$4 sm:$0xff]   ;;  %v6539_v46 = vshll.u32 %v6482_v29, 16  ;;  %18324 = vst [vmem:[#allocation34_spill] sm:$0xff] %v15853_v49 }
 0x1a2   : > { %v14251_v30 = vld [vmem:[#allocation3 + $0x16c] ss:$12 sps:$4 sm:$0xff]   ;;  %v4072_v53 = vrot.slane %v4070_v22, 5  ;;  %v4076_v41 = vrot.slane %v4074_v23, 4  ;;  %v6543_v51 = vshrl.u32 %v6482_v29, 16  ;;  %v4082_v62 = vrot.slane %v4080_v26, 5  ;;  %v12948_v29 = vpop.f32.mrf.mxu0 }
 0x1a3   : > { %v4067_v40 = vor.u32 %v4066_v63, %v4063_v56  ;;  %3681 = vmatprep.mubr.bf16.mxu1 %v14251_v30  ;;  %v14260_v18 = vld [vmem:[#allocation3 + $0x8] ss:$12 sps:$4 sm:$0xff]   ;;  %v15855_v3 = vrot.slane %v6539_v46, 5  ;;  %v6978_v56 = vld [vmem:[#allocation2 + $0x4] sm:$0xf]  ;;  %v15859_v63 = vpop.f32.mrf.mxu1 }
 0x1a4   : > { %3682 = vmatmul.mubr.bf16.gmra.mxu1 %v14254_v34  ;;  %v4077_v60 = vor.u32 %v4076_v41, %v4072_v53  ;;  %v6481_v1 = vld [vmem:[#allocation2] sm:$0xf]  ;;  %v6545_v7 = vrot.slane %v6543_v51, 4  ;;  %18325 = vst [vmem:[#allocation35_spill] sm:$0xff] %v15859_v63 }
 0x1a5   : > { %v4068_v54 = vrot.slane %v4067_v40, 4  ;;  %v6483_v44 = vld [vmem:[#allocation2 + $0x8] sm:$0x1]  ;;  %v6530_v4 = vshrl.u32 %v6481_v1, 16  ;;  %v6533_v6 = vshll.u32 %v6481_v1, 16  ;;  %13818 = vmatprep.mubr.bf16.mxu1 %v14260_v18  ;;  %v12949_v18 = vpop.f32.mrf.mxu0 }
 0x1a6   : > { %v4078_v12 = vrot.slane %v4077_v60, 4  ;;  %v6549_v22 = vshll.u32 %v6483_v44, 16  ;;  %v6977_v23 = vld [vmem:[#allocation2] sm:$0xe]  ;;  %v6546_v34 = vor.u32 %v6545_v7, %v15855_v3  ;;  %v6979_v40 = vld [vmem:[#allocation2 + $0x8] sm:$0x1] }
 0x1a7   : > { %v4073_v11 = vsel %vm14971_vm5, %v4068_v54, %v4072_v53  ;;  %v6532_v26 = vrot.slane %v6530_v4, 4  ;;  %v6535_v30 = vrot.slane %v6533_v6, 5  ;;  %v12585_v41 = vrot.slane %v6977_v23, 9  ;;  %v14261_v44 = vld [vmem:[#allocation3 + $0x20] ss:$12 sps:$4 sm:$0xff]  }
 0x1a8   : > { %4476 = vst [vmem:[#allocation3 + $0x4] sm:$0xf] %v4073_v11  ;;  %v4083_v46 = vsel %vm14971_vm5, %v4078_v12, %v4082_v62  ;;  %v7075_v53 = vrot.slane %v6978_v56, 5  ;;  %v7078_v51 = vrot.slane %v6979_v40, 5  ;;  %v6547_v60 = vrot.slane %v6546_v34, 4  ;;  %v15870_v62 = vpop.f32.mrf.mxu1 }
 0x1a9   : > { %4477 = vst [vmem:[#allocation3 + $0x10] sm:$0xf] %v4083_v46  ;;  %v6536_v54 = vor.u32 %v6535_v30, %v6532_v26  ;;  %v6551_v1 = vrot.slane %v6549_v22, 5  ;;  %v15864_v4 = vadd.f32 %v12949_v18, %v12948_v29  ;;  %v12337_v11 = vld [vmem:[%s14936_s17 + $0x24] sm:$0xf]  ;;  %18327 = vst [vmem:[#allocation37_spill] sm:$0xff] %v15870_v62 }
 0x1aa   : > { %v7076_v6 = vsel %vm14960_vm4, %v12585_v41, %v7075_v53  ;;  %v7077_v7 = vrot.slane %v7075_v53, 4  ;;  %v12338_v23 = vld [vmem:[%s14936_s17 + $0x28] sm:$0xf]  ;;  %3982 = vst [vmem:[#allocation3 + $0x18] sm:$0xf] %v12337_v11  ;;  %v15877_v53 = vpop.f32.mrf.mxu0 }
 0x1ab   : > { %18326 = vst [vmem:[#allocation36_spill] sm:$0xff] %v15864_v4  ;;  %v6537_v12 = vrot.slane %v6536_v54, 4  ;;  %7217 = vst [vmem:[#allocation3 + $0x8] sm:$0xf] %v7076_v6  ;;  %v12370_v56 = vld [vmem:[%s14936_s17 + $0x24] sm:$0xf]  ;;  %v6552_v18 = vsel %vm14971_vm5, %v6547_v60, %v6551_v1 }
 0x1ac   : > { %3983 = vst [vmem:[#allocation3 + $0x24] sm:$0xf] %v12338_v23  ;;  %v12371_v26 = vld [vmem:[%s14936_s17 + $0x28] sm:$0xf]  ;;  %v6417_v30 = vld [vmem:[#allocation2] sm:$0xf]  ;;  %v7079_v29 = vsel %vm14960_vm4, %v7077_v7, %v7078_v51  ;;  %13819 = vmatmul.mubr.bf16.vlgmr.msra.gmra.mxu1 %v14261_v44 }
 0x1ad   : > { %v6418_v22 = vld [vmem:[#allocation2 + $0x4] sm:$0xf]  ;;  %v12372_v34 = vld [vmem:[%s14936_s17 + $0x2c] sm:$0x1]  ;;  %v4085_v40 = vshrl.u32 %v12370_v56, 16  ;;  %v4088_v41 = vshll.u32 %v12370_v56, 16  ;;  %v6542_v23 = vsel %vm14971_vm5, %v6537_v12, %v15855_v3  ;;  %v15884_v56 = vpop.f32.mrf.mxu1 }
 0x1ae   : > { %v4094_v46 = vshll.u32 %v12371_v26, 16  ;;  %18328 = vst [vmem:[#allocation38_spill] sm:$0xff] %v15877_v53  ;;  %7218 = vst [vmem:[#allocation3 + $0x14] sm:$0xf] %v7079_v29  ;;  %v4098_v54 = vshrl.u32 %v12371_v26, 16  ;;  %v4104_v6 = vshll.u32 %v12372_v34, 16  ;;  %v15886_v34 = vpop.f32.mrf.mxu0 }
 0x1af   : > { %v4780_v11 = vld [vmem:[#allocation3] sm:$0xff]  ;;  %v4087_v42 = vrot.slane %v4085_v40, 4  ;;  %v4090_v51 = vrot.slane %v4088_v41, 5  ;;  %18329 = vst [vmem:[#allocation39_spill] sm:$0xff] %v15884_v56  ;;  %v14266_v29 = vld [vmem:[#allocation3 + $0x50] ss:$12 sps:$4 sm:$0xff]  }
 0x1b0   : > { %v4096_v44 = vrot.slane %v4094_v46, 5  ;;  %v14265_v7 = vld [vmem:[#allocation3 + $0x38] ss:$12 sps:$4 sm:$0xff]   ;;  %v4100_v62 = vrot.slane %v4098_v54, 4  ;;  %v4782_v36 = vld [vmem:[#allocation3 + $0xc] sm:$0xff]  ;;  %v4106_v26 = vrot.slane %v4104_v6, 5 }
 0x1b1   : > { %v14258_v60 = vld [vmem:[#allocation3 + $0x4] ss:$12 sps:$4 sm:$0xff]   ;;  %v4091_v1 = vor.u32 %v4090_v51, %v4087_v42  ;;  %13822 = vmatprep.mubr.bf16.mxu1 %v14265_v7  ;;  %18330 = vst [vmem:[#allocation40_spill] sm:$0xff] %v15886_v34  ;;  %6449 = vst [vmem:[#allocation3] sm:$0xf] %v6417_v30  ;;  %v12479_v3 = vcombine.low %v4780_v11, %v4782_v36  ;;  %v15893_v7 = vpop.f32.mrf.mxu1 }
 0x1b2   : > { %6450 = vst [vmem:[#allocation3 + $0xc] sm:$0xf] %v6418_v22  ;;  %6945 = vst [vmem:[#allocation3 + $0x4] sm:$0xf] %v6542_v23  ;;  %v4101_v12 = vor.u32 %v4100_v62, %v4096_v44  ;;  %v12339_v40 = vld [vmem:[%s14936_s17 + $0x30] sm:$0xf]  ;;  %5324 = vmatprep.mubr.bf16.mxu0 %v14258_v60 }
 0x1b3   : > { %6946 = vst [vmem:[#allocation3 + $0x10] sm:$0xf] %v6552_v18  ;;  %v12340_v41 = vld [vmem:[%s14936_s17 + $0x34] sm:$0xf]  ;;  %v12373_v46 = vld [vmem:[%s14936_s17 + $0x30] sm:$0xf]  ;;  %5325 = vmatmul.mubr.bf16.vlgmr.msra.gmra.mxu0 %v12479_v3 }
 0x1b4   : > { %v4092_v54 = vrot.slane %v4091_v1, 4  ;;  %3984 = vst [vmem:[#allocation3 + $0x30] sm:$0xf] %v12339_v40  ;;  %3985 = vst [vmem:[#allocation3 + $0x3c] sm:$0xf] %v12340_v41  ;;  %v4109_v51 = vshrl.u32 %v12373_v46, 16  ;;  %13823 = vmatmul.mubr.bf16.gmra.mxu1 %v14266_v29  ;;  %v12954_v41 = vpop.f32.mrf.mxu0 }
 0x1b5   : > { %v12374_v42 = vld [vmem:[%s14936_s17 + $0x34] sm:$0xf]  ;;  %v12375_v6 = vld [vmem:[%s14936_s17 + $0x38] sm:$0x1]  ;;  %18331 = vst [vmem:[#allocation41_spill] sm:$0xff] %v15893_v7  ;;  %v4102_v30 = vrot.slane %v4101_v12, 4 }
 0x1b6   : > { %v4112_v22 = vshll.u32 %v12373_v46, 16  ;;  %v4118_v36 = vshll.u32 %v12374_v42, 16  ;;  %v4122_v62 = vshrl.u32 %v12374_v42, 16  ;;  %v12341_v18 = vld [vmem:[%s14936_s17 + $0x3c] sm:$0xf]  ;;  %v4097_v11 = vsel %vm14971_vm5, %v4092_v54, %v4096_v44 }
 0x1b7   : > { %v4111_v23 = vrot.slane %v4109_v51, 4  ;;  %v4128_v60 = vshll.u32 %v12375_v6, 16  ;;  %v12342_v1 = vld [vmem:[%s14936_s17 + $0x40] sm:$0xf]  ;;  %3986 = vst [vmem:[#allocation3 + $0x48] sm:$0xf] %v12341_v18  ;;  %v4107_v3 = vsel %vm14971_vm5, %v4102_v30, %v4106_v26  ;;  %v15904_v6 = vpop.f32.mrf.mxu1  ;;  %v12955_v18 = vpop.f32.mrf.mxu0 }
 0x1b8   : > { %v12376_v40 = vld [vmem:[%s14936_s17 + $0x3c] sm:$0xf]  ;;  %4478 = vst [vmem:[#allocation3 + $0x1c] sm:$0xf] %v4097_v11  ;;  %v4114_v12 = vrot.slane %v4112_v22, 5  ;;  %v4120_v46 = vrot.slane %v4118_v36, 5  ;;  %v12956_v11 = vadd.f32 %v12955_v18, %v12954_v41 }
 0x1b9   : > { %v4124_v42 = vrot.slane %v4122_v62, 4  ;;  %3987 = vst [vmem:[#allocation3 + $0x54] sm:$0xf] %v12342_v1  ;;  %v12377_v7 = vld [vmem:[%s14936_s17 + $0x40] sm:$0xf]  ;;  %v4130_v56 = vrot.slane %v4128_v60, 5  ;;  %v15906_v1 = vpop.f32.mrf.mxu0 }
 0x1ba   : > { %4479 = vst [vmem:[#allocation3 + $0x28] sm:$0xf] %v4107_v3  ;;  %v12378_v44 = vld [vmem:[%s14936_s17 + $0x44] sm:$0x1]  ;;  %v4133_v29 = vshrl.u32 %v12376_v40, 16  ;;  %v4136_v54 = vshll.u32 %v12376_v40, 16  ;;  %v4115_v63 = vor.u32 %v4114_v12, %v4111_v23 }
 0x1bb   : > { %v4142_v51 = vshll.u32 %v12377_v7, 16  ;;  %18332 = vst [vmem:[#allocation42_spill] sm:$0xff] %v15904_v6  ;;  %v4125_v48 = vor.u32 %v4124_v42, %v4120_v46  ;;  %v4146_v21 = vshrl.u32 %v12377_v7, 16  ;;  %v4152_v26 = vshll.u32 %v12378_v44, 16  ;;  %v14273_v62 = vld [vmem:[#allocation3 + $0x68] ss:$12 sps:$4 sm:$0xff]   ;;  %v13042_v7 = vpop.f32.mrf.mxu1 }
 0x1bc   : > { %v4135_v30 = vrot.slane %v4133_v29, 4  ;;  %v4138_v22 = vrot.slane %v4136_v54, 5  ;;  %18333 = vst [vmem:[#allocation43_spill] sm:$0xff] %v15906_v1  ;;  %v4116_v60 = vrot.slane %v4115_v63, 4  ;;  %13826 = vmatprep.mubr.bf16.mxu1 %v14273_v62  ;;  %v14274_v23 = vld [vmem:[#allocation3 + $0x80] ss:$12 sps:$4 sm:$0xff]   ;;  %v15910_v42 = vadd.f32 %v12956_v11, %v15737_v37  ;;  %v15919_v54 = vpop.f32.mrf.mxu0 }
 0x1bd   : > { %v4144_v36 = vrot.slane %v4142_v51, 5  ;;  %v4126_v40 = vrot.slane %v4125_v48, 4  ;;  %v4148_v3 = vrot.slane %v4146_v21, 4  ;;  %v4154_v6 = vrot.slane %v4152_v26, 5  ;;  %v12343_v12 = vld [vmem:[%s14936_s17 + $0x48] sm:$0xf]  ;;  %13827 = vmatmul.mubr.bf16.gmra.mxu1 %v14274_v23 }
 0x1be   : > { %v4139_v16 = vor.u32 %v4138_v22, %v4135_v30  ;;  %18334 = vst [vmem:[#allocation44_spill] sm:$0xff] %v15910_v42  ;;  %v4121_v41 = vsel %vm14971_vm5, %v4116_v60, %v4120_v46  ;;  %v12344_v29 = vld [vmem:[%s14936_s17 + $0x4c] sm:$0xf]  ;;  %3988 = vst [vmem:[#allocation3 + $0x60] sm:$0xf] %v12343_v12  ;;  %v13043_v46 = vpop.f32.mrf.mxu1 }
 0x1bf   : > { %v4131_v44 = vsel %vm14971_vm5, %v4126_v40, %v4130_v56  ;;  %v4149_v63 = vor.u32 %v4148_v3, %v4144_v36  ;;  %v12379_v48 = vld [vmem:[%s14936_s17 + $0x48] sm:$0xf]  ;;  %v12380_v21 = vld [vmem:[%s14936_s17 + $0x4c] sm:$0xf]  ;;  %18335 = vst [vmem:[#allocation45_spill] sm:$0xff] %v15919_v54  ;;  %v15922_v62 = vadd.f32 %v13043_v46, %v13042_v7 }
 0x1c0   : > { %4480 = vst [vmem:[#allocation3 + $0x34] sm:$0xf] %v4121_v41  ;;  %4481 = vst [vmem:[#allocation3 + $0x40] sm:$0xf] %v4131_v44  ;;  %v4140_v51 = vrot.slane %v4139_v16, 4  ;;  %v4157_v18 = vshrl.u32 %v12379_v48, 16  ;;  %v15927_v23 = vpop.f32.mrf.mxu1 }
 0x1c1   : > { %3989 = vst [vmem:[#allocation3 + $0x6c] sm:$0xf] %v12344_v29  ;;  %v12381_v37 = vld [vmem:[%s14936_s17 + $0x50] sm:$0x1]  ;;  %v4160_v26 = vshll.u32 %v12379_v48, 16  ;;  %v4150_v22 = vrot.slane %v4149_v63, 4  ;;  %v12960_v29 = vpop.f32.mrf.mxu0 }
 0x1c2   : > { %v14262_v30 = vld [vmem:[#allocation3 + $0x1c] ss:$12 sps:$4 sm:$0xff]   ;;  %v14264_v56 = vld [vmem:[#allocation3 + $0x18] ss:$12 sps:$4 sm:$0xff]   ;;  %v4145_v11 = vsel %vm14971_vm5, %v4140_v51, %v4144_v36  ;;  %v4159_v60 = vrot.slane %v4157_v18, 4  ;;  %v4166_v3 = vshll.u32 %v12380_v21, 16 }
 0x1c3   : > { %v4162_v40 = vrot.slane %v4160_v26, 5  ;;  %v12345_v16 = vld [vmem:[%s14936_s17 + $0x54] sm:$0xf]  ;;  %5332 = vmatprep.mubr.bf16.mxu0 %v14262_v30  ;;  %v4155_v12 = vsel %vm14971_vm5, %v4150_v22, %v4154_v6  ;;  %4482 = vst [vmem:[#allocation3 + $0x4c] sm:$0xf] %v4145_v11  ;;  %v4170_v41 = vshrl.u32 %v12380_v21, 16  ;;  %v12961_v6 = vpop.f32.mrf.mxu0 }
 0x1c4   : > { %v4176_v44 = vshll.u32 %v12381_v37, 16  ;;  %v12346_v7 = vld [vmem:[%s14936_s17 + $0x58] sm:$0xf]  ;;  %3990 = vst [vmem:[#allocation3 + $0x78] sm:$0xf] %v12345_v16  ;;  %5333 = vmatmul.mubr.bf16.gmra.mxu0 %v14264_v56  ;;  %v4168_v48 = vrot.slane %v4166_v3, 5  ;;  %v15935_v16 = vpop.f32.mrf.mxu1 }
 0x1c5   : > { %v12382_v63 = vld [vmem:[%s14936_s17 + $0x54] sm:$0xf]  ;;  %4483 = vst [vmem:[#allocation3 + $0x58] sm:$0xf] %v4155_v12  ;;  %v4163_v36 = vor.u32 %v4162_v40, %v4159_v60  ;;  %3991 = vst [vmem:[#allocation3 + $0x84] sm:$0xf] %v12346_v7  ;;  %v15937_v40 = vpop.f32.mrf.mxu0 }
 0x1c6   : > { %v12383_v51 = vld [vmem:[%s14936_s17 + $0x58] sm:$0xf]  ;;  %v12384_v18 = vld [vmem:[%s14936_s17 + $0x5c] sm:$0x1]  ;;  %v4181_v26 = vshrl.u32 %v12382_v63, 16  ;;  %v4172_v46 = vrot.slane %v4170_v41, 4  ;;  %v13048_v25 = vpop.f32.mrf.mxu1 }
 0x1c7   : > { %v4178_v30 = vrot.slane %v4176_v44, 5  ;;  %v4184_v8 = vshll.u32 %v12382_v63, 16  ;;  %v4190_v24 = vshll.u32 %v12383_v51, 16  ;;  %v4164_v22 = vrot.slane %v4163_v36, 4  ;;  %v14267_v61 = vld [vmem:[#allocation3 + $0x34] ss:$12 sps:$4 sm:$0xff]  }
 0x1c8   : > { %v4183_v21 = vrot.slane %v4181_v26, 4  ;;  %v4194_v37 = vshrl.u32 %v12383_v51, 16  ;;  %v4200_v11 = vshll.u32 %v12384_v18, 16  ;;  %v4173_v56 = vor.u32 %v4172_v46, %v4168_v48  ;;  %18336 = vst [vmem:[#allocation46_spill] sm:$0xff] %v15937_v40  ;;  %v14269_v3 = vld [vmem:[#allocation3 + $0x30] ss:$12 sps:$4 sm:$0xff]   ;;  %5340 = vmatprep.mubr.bf16.mxu0 %v14267_v61  ;;  %v15943_v18 = vpop.f32.mrf.mxu0 }
 0x1c9   : > { %v4186_v12 = vrot.slane %v4184_v8, 5  ;;  %v4192_v60 = vrot.slane %v4190_v24, 5  ;;  %v4169_v41 = vsel %vm14971_vm5, %v4164_v22, %v4168_v48  ;;  %v14281_v7 = vld [vmem:[#allocation3 + $0x98] ss:$12 sps:$4 sm:$0xff]   ;;  %v15941_v63 = vadd.f32 %v12961_v6, %v12960_v29  ;;  %18338 = vst [vmem:[#allocation48_spill] sm:$0xff] %v15943_v18 }
 0x1ca   : > { %v4196_v44 = vrot.slane %v4194_v37, 4  ;;  %v4174_v36 = vrot.slane %v4173_v56, 4  ;;  %4484 = vst [vmem:[#allocation3 + $0x64] sm:$0xf] %v4169_v41  ;;  %v4202_v8 = vrot.slane %v4200_v11, 5  ;;  %13830 = vmatprep.mubr.bf16.mxu1 %v14281_v7  ;;  %v13049_v37 = vpop.f32.mrf.mxu1 }
 0x1cb   : > { %18337 = vst [vmem:[#allocation47_spill] sm:$0xff] %v15941_v63  ;;  %v4187_v51 = vor.u32 %v4186_v12, %v4183_v21  ;;  %v14282_v26 = vld [vmem:[#allocation3 + $0xb0] ss:$12 sps:$4 sm:$0xff]   ;;  %v12347_v46 = vld [vmem:[%s14936_s17 + $0x60] sm:$0xf] }
 0x1cc   : > { %v4197_v24 = vor.u32 %v4196_v44, %v4192_v60  ;;  %v14270_v48 = vld [vmem:[#allocation3 + $0x4c] ss:$12 sps:$4 sm:$0xff]   ;;  %v4179_v29 = vsel %vm14971_vm5, %v4174_v36, %v4178_v30  ;;  %3992 = vst [vmem:[#allocation3 + $0x90] sm:$0xf] %v12347_v46  ;;  %5341 = vmatmul.mubr.bf16.gmra.mxu0 %v14269_v3  ;;  %13831 = vmatmul.mubr.bf16.gmra.mxu1 %v14282_v26  ;;  %v12385_v21 = vld [vmem:[%s14936_s17 + $0x60] sm:$0xf]  ;;  %v12966_v3 = vpop.f32.mrf.mxu0  ;;  %v15959_v46 = vpop.f32.mrf.mxu1 }
 0x1cd   : > { %v4188_v61 = vrot.slane %v4187_v51, 4  ;;  %4485 = vst [vmem:[#allocation3 + $0x70] sm:$0xf] %v4179_v29  ;;  %v12348_v22 = vld [vmem:[%s14936_s17 + $0x64] sm:$0xf]  ;;  %5348 = vmatprep.mubr.bf16.mxu0 %v14270_v48  ;;  %v4205_v41 = vshrl.u32 %v12385_v21, 16  ;;  %v15954_v44 = vadd.f32 %v13049_v37, %v13048_v25 }
 0x1ce   : > { %v4198_v6 = vrot.slane %v4197_v24, 4  ;;  %3993 = vst [vmem:[#allocation3 + $0x9c] sm:$0xf] %v12348_v22  ;;  %v12386_v56 = vld [vmem:[%s14936_s17 + $0x64] sm:$0xf]  ;;  %v4208_v30 = vshll.u32 %v12385_v21, 16  ;;  %v12967_v22 = vpop.f32.mrf.mxu0 }
 0x1cf   : > { %v4193_v11 = vsel %vm14971_vm5, %v4188_v61, %v4192_v60  ;;  %v12387_v12 = vld [vmem:[%s14936_s17 + $0x68] sm:$0x1]  ;;  %v14272_v7 = vld [vmem:[#allocation3 + $0x48] ss:$12 sps:$4 sm:$0xff]   ;;  %v4214_v51 = vshll.u32 %v12386_v56, 16  ;;  %v4218_v24 = vshrl.u32 %v12386_v56, 16 }
 0x1d0   : > { %v4203_v36 = vsel %vm14971_vm5, %v4198_v6, %v4202_v8  ;;  %4486 = vst [vmem:[#allocation3 + $0x7c] sm:$0xf] %v4193_v11  ;;  %v4224_v26 = vshll.u32 %v12387_v12, 16  ;;  %v12349_v60 = vld [vmem:[%s14936_s17 + $0x6c] sm:$0xf]  ;;  %v4207_v48 = vrot.slane %v4205_v41, 4  ;;  %v15964_v6 = vpop.f32.mrf.mxu1  ;;  %v15966_v11 = vadd.f32 %v12967_v22, %v12966_v3  ;;  %v15969_v41 = vpop.f32.mrf.mxu0 }
 0x1d1   : > { %4487 = vst [vmem:[#allocation3 + $0x88] sm:$0xf] %v4203_v36  ;;  %v4210_v29 = vrot.slane %v4208_v30, 5  ;;  %v12350_v61 = vld [vmem:[%s14936_s17 + $0x70] sm:$0xf]  ;;  %v4216_v21 = vrot.slane %v4214_v51, 5 }
 0x1d2   : > { %3994 = vst [vmem:[#allocation3 + $0xa8] sm:$0xf] %v12349_v60  ;;  %v12388_v25 = vld [vmem:[%s14936_s17 + $0x6c] sm:$0xf]  ;;  %v4220_v37 = vrot.slane %v4218_v24, 4  ;;  %v4226_v42 = vrot.slane %v4224_v26, 5  ;;  %v13054_v18 = vpop.f32.mrf.mxu1 }
 0x1d3   : > { %3995 = vst [vmem:[#allocation3 + $0xb4] sm:$0xf] %v12350_v61  ;;  %v12389_v8 = vld [vmem:[%s14936_s17 + $0x70] sm:$0xf]  ;;  %18339 = vst [vmem:[#allocation49_spill] sm:$0xff] %v15966_v11  ;;  %v4211_v56 = vor.u32 %v4210_v29, %v4207_v48  ;;  %v4229_v2 = vshrl.u32 %v12388_v25, 16 }
 0x1d4   : > { %v12390_v12 = vld [vmem:[%s14936_s17 + $0x74] sm:$0x1]  ;;  %v4232_v54 = vshll.u32 %v12388_v25, 16  ;;  %v4238_v36 = vshll.u32 %v12389_v8, 16  ;;  %18340 = vst [vmem:[#allocation50_spill] sm:$0xff] %v15969_v41  ;;  %v4221_v30 = vor.u32 %v4220_v37, %v4216_v21  ;;  %v4242_v60 = vshrl.u32 %v12389_v8, 16  ;;  %5349 = vmatmul.mubr.bf16.gmra.mxu0 %v14272_v7  ;;  %v13055_v22 = vpop.f32.mrf.mxu1  ;;  %v15975_v37 = vpop.f32.mrf.mxu0 }
 0x1d5   : > { %v4248_v1 = vshll.u32 %v12390_v12, 16  ;;  %v14275_v51 = vld [vmem:[#allocation3 + $0x64] ss:$12 sps:$4 sm:$0xff]   ;;  %v4212_v24 = vrot.slane %v4211_v56, 4  ;;  %v4231_v61 = vrot.slane %v4229_v2, 4  ;;  %v15973_v25 = vadd.f32 %v13055_v22, %v13054_v18  ;;  %18341 = vst [vmem:[#allocation51_spill] sm:$0xff] %v15975_v37 }
 0x1d6   : > { %v4222_v26 = vrot.slane %v4221_v30, 4  ;;  %v4234_v40 = vrot.slane %v4232_v54, 5  ;;  %v4240_v17 = vrot.slane %v4238_v36, 5  ;;  %v14289_v3 = vld [vmem:[#allocation3 + $0xc8] ss:$12 sps:$4 sm:$0xff]   ;;  %5356 = vmatprep.mubr.bf16.mxu0 %v14275_v51  ;;  %v4244_v29 = vrot.slane %v4242_v60, 4  ;;  %v15979_v56 = vpop.f32.mrf.mxu1 }
 0x1d7   : > { %v4217_v48 = vsel %vm14971_vm5, %v4212_v24, %v4216_v21  ;;  %v14277_v8 = vld [vmem:[#allocation3 + $0x60] ss:$12 sps:$4 sm:$0xff]   ;;  %v4250_v7 = vrot.slane %v4248_v1, 5  ;;  %13834 = vmatprep.mubr.bf16.mxu1 %v14289_v3  ;;  %v12352_v60 = vld [vmem:[%s14936_s17 + $0x7c] sm:$0xf] }
 0x1d8   : > { %v4227_v2 = vsel %vm14971_vm5, %v4222_v26, %v4226_v42  ;;  %4488 = vst [vmem:[#allocation3 + $0x94] sm:$0xf] %v4217_v48  ;;  %v4235_v54 = vor.u32 %v4234_v40, %v4231_v61  ;;  %v14278_v21 = vld [vmem:[#allocation3 + $0x7c] ss:$12 sps:$4 sm:$0xff]   ;;  %v4245_v12 = vor.u32 %v4244_v29, %v4240_v17  ;;  %v14290_v18 = vld [vmem:[#allocation3 + $0xe0] ss:$12 sps:$4 sm:$0xff]   ;;  %v12972_v26 = vpop.f32.mrf.mxu0 }
 0x1d9   : > { %4489 = vst [vmem:[#allocation3 + $0xa0] sm:$0xf] %v4227_v2  ;;  %v12351_v36 = vld [vmem:[%s14936_s17 + $0x78] sm:$0xf]  ;;  %13835 = vmatmul.mubr.bf16.gmra.mxu1 %v14290_v18  ;;  %3997 = vst [vmem:[#allocation3 + $0xcc] sm:$0xf] %v12352_v60  ;;  %v15989_v2 = vpop.f32.mrf.mxu1 }
 0x1da   : > { %v4236_v30 = vrot.slane %v4235_v54, 4  ;;  %3996 = vst [vmem:[#allocation3 + $0xc0] sm:$0xf] %v12351_v36  ;;  %v12391_v51 = vld [vmem:[%s14936_s17 + $0x78] sm:$0xf]  ;;  %v4246_v24 = vrot.slane %v4245_v12, 4  ;;  %v12973_v37 = vpop.f32.mrf.mxu0 }
 0x1db   : > { %v12392_v42 = vld [vmem:[%s14936_s17 + $0x7c] sm:$0xf]  ;;  %v12393_v1 = vld [vmem:[%s14936_s17 + $0x80] sm:$0x1]  ;;  %v4253_v40 = vshrl.u32 %v12391_v51, 16  ;;  %v4256_v3 = vshll.u32 %v12391_v51, 16 }
 0x1dc   : > { %v4241_v61 = vsel %vm14971_vm5, %v4236_v30, %v4240_v17  ;;  %v4262_v22 = vshll.u32 %v12392_v42, 16  ;;  %v4266_v48 = vshrl.u32 %v12392_v42, 16  ;;  %v12353_v29 = vld [vmem:[%s14936_s17 + $0x84] sm:$0xf]  ;;  %v4251_v54 = vsel %vm14971_vm5, %v4246_v24, %v4250_v7  ;;  %v12354_v36 = vld [vmem:[%s14936_s17 + $0x88] sm:$0xf]  ;;  %5357 = vmatmul.mubr.bf16.gmra.mxu0 %v14277_v8 }
 0x1dd   : > { %4490 = vst [vmem:[#allocation3 + $0xac] sm:$0xf] %v4241_v61  ;;  %v4255_v12 = vrot.slane %v4253_v40, 4  ;;  %v4272_v18 = vshll.u32 %v12393_v1, 16  ;;  %3998 = vst [vmem:[#allocation3 + $0xd8] sm:$0xf] %v12353_v29  ;;  %5364 = vmatprep.mubr.bf16.mxu0 %v14278_v21  ;;  %v15997_v24 = vadd.f32 %v12973_v37, %v12972_v26  ;;  %v15999_v40 = vpop.f32.mrf.mxu0 }
 0x1de   : > { %v12394_v60 = vld [vmem:[%s14936_s17 + $0x84] sm:$0xf]  ;;  %4491 = vst [vmem:[#allocation3 + $0xb8] sm:$0xf] %v4251_v54  ;;  %v4258_v17 = vrot.slane %v4256_v3, 5  ;;  %v4264_v30 = vrot.slane %v4262_v22, 5  ;;  %v13060_v54 = vpop.f32.mrf.mxu1 }
 0x1df   : > { %v4268_v51 = vrot.slane %v4266_v48, 4  ;;  %3999 = vst [vmem:[#allocation3 + $0xe4] sm:$0xf] %v12354_v36  ;;  %v12395_v42 = vld [vmem:[%s14936_s17 + $0x88] sm:$0xf]  ;;  %v4277_v41 = vshrl.u32 %v12394_v60, 16  ;;  %v16001_v21 = vpop.f32.mrf.mxu0 }
 0x1e0   : > { %v12396_v11 = vld [vmem:[%s14936_s17 + $0x8c] sm:$0x1]  ;;  %v4280_v63 = vshll.u32 %v12394_v60, 16  ;;  %v4286_v7 = vshll.u32 %v12395_v42, 16  ;;  %18342 = vst [vmem:[#allocation52_spill] sm:$0xff] %v15997_v24  ;;  %18343 = vst [vmem:[#allocation53_spill] sm:$0xff] %v15999_v40  ;;  %v4259_v61 = vor.u32 %v4258_v17, %v4255_v12  ;;  %v13061_v26 = vpop.f32.mrf.mxu1 }
 0x1e1   : > { %v14280_v1 = vld [vmem:[#allocation3 + $0x78] ss:$12 sps:$4 sm:$0xff]   ;;  %v4269_v29 = vor.u32 %v4268_v51, %v4264_v30  ;;  %v4274_v55 = vrot.slane %v4272_v18, 5  ;;  %v4279_v8 = vrot.slane %v4277_v41, 4  ;;  %v14283_v3 = vld [vmem:[#allocation3 + $0x94] ss:$12 sps:$4 sm:$0xff]   ;;  %v16003_v49 = vadd.f32 %v13061_v26, %v13060_v54 }
 0x1e2   : > { %v4282_v22 = vrot.slane %v4280_v63, 5  ;;  %v4288_v48 = vrot.slane %v4286_v7, 5  ;;  %v4290_v36 = vshrl.u32 %v12395_v42, 16  ;;  %v4296_v47 = vshll.u32 %v12396_v11, 16  ;;  %18344 = vst [vmem:[#allocation54_spill] sm:$0xff] %v16001_v21  ;;  %v16010_v18 = vpop.f32.mrf.mxu1  ;;  %v12978_v7 = vpop.f32.mrf.mxu0 }
 0x1e3   : > { %v4260_v60 = vrot.slane %v4259_v61, 4  ;;  %v4270_v39 = vrot.slane %v4269_v29, 4  ;;  %v14297_v37 = vld [vmem:[#allocation3 + $0xf8] ss:$12 sps:$4 sm:$0xff]   ;;  %v14298_v11 = vld [vmem:[#allocation3 + $0x110] ss:$12 sps:$4 sm:$0xff]  }
 0x1e4   : > { %v4283_v24 = vor.u32 %v4282_v22, %v4279_v8  ;;  %v4292_v40 = vrot.slane %v4290_v36, 4  ;;  %13838 = vmatprep.mubr.bf16.mxu1 %v14297_v37  ;;  %v12355_v12 = vld [vmem:[%s14936_s17 + $0x90] sm:$0xf]  ;;  %v4298_v42 = vrot.slane %v4296_v47, 5  ;;  %5365 = vmatmul.mubr.bf16.gmra.mxu0 %v14280_v1  ;;  %v12398_v29 = vld [vmem:[%s14936_s17 + $0x94] sm:$0xf] }
 0x1e5   : > { %v4265_v41 = vsel %vm14971_vm5, %v4260_v60, %v4264_v30  ;;  %v4275_v63 = vsel %vm14971_vm5, %v4270_v39, %v4274_v55  ;;  %4000 = vst [vmem:[#allocation3 + $0xf0] sm:$0xf] %v12355_v12  ;;  %13839 = vmatmul.mubr.bf16.gmra.mxu1 %v14298_v11  ;;  %v12356_v30 = vld [vmem:[%s14936_s17 + $0x94] sm:$0xf]  ;;  %v12397_v61 = vld [vmem:[%s14936_s17 + $0x90] sm:$0xf]  ;;  %v16015_v39 = vpop.f32.mrf.mxu1  ;;  %5372 = vmatprep.mubr.bf16.mxu0 %v14283_v3 }
 0x1e6   : > { %4492 = vst [vmem:[#allocation3 + $0xc4] sm:$0xf] %v4265_v41  ;;  %4493 = vst [vmem:[#allocation3 + $0xd0] sm:$0xf] %v4275_v63  ;;  %v4284_v17 = vrot.slane %v4283_v24, 4  ;;  %v4293_v51 = vor.u32 %v4292_v40, %v4288_v48  ;;  %v4301_v24 = vshrl.u32 %v12397_v61, 16  ;;  %v12979_v40 = vpop.f32.mrf.mxu0 }
 0x1e7   : > { %4001 = vst [vmem:[#allocation3 + $0xfc] sm:$0xf] %v12356_v30  ;;  %v12399_v54 = vld [vmem:[%s14936_s17 + $0x98] sm:$0x1]  ;;  %v4304_v47 = vshll.u32 %v12397_v61, 16  ;;  %v14321_v1 = vld [vmem:[#allocation8 + $0x78] sm:$0xff]   ;;  %v13066_v21 = vpop.f32.mrf.mxu1 }
 0x1e8   : > { %v4289_v55 = vsel %vm14971_vm5, %v4284_v17, %v4288_v48  ;;  %v4294_v8 = vrot.slane %v4293_v51, 4  ;;  %v14285_v22 = vld [vmem:[#allocation3 + $0x90] ss:$12 sps:$4 sm:$0xff]   ;;  %v4310_v36 = vshll.u32 %v12398_v29, 16  ;;  %v4314_v60 = vshrl.u32 %v12398_v29, 16  ;;  %v16027_v30 = vpop.f32.mrf.mxu0  ;;  %13298 = vmatprep.subr.bf16.mxu1 %v14321_v1 }
 0x1e9   : > { %4494 = vst [vmem:[#allocation3 + $0xdc] sm:$0xf] %v4289_v55  ;;  %v4320_v37 = vshll.u32 %v12399_v54, 16  ;;  %v12357_v26 = vld [vmem:[%s14936_s17 + $0x9c] sm:$0xf]  ;;  %v14322_v3 = vld [vmem:[#allocation8 + $0x38] sm:$0xff]   ;;  %v16025_v51 = vadd.f32 %v12979_v40, %v12978_v7 }
 0x1ea   : > { %v14286_v41 = vld [vmem:[#allocation3 + $0xac] ss:$12 sps:$4 sm:$0xff]   ;;  %v4299_v48 = vsel %vm14971_vm5, %v4294_v8, %v4298_v42  ;;  %v4303_v63 = vrot.slane %v4301_v24, 4  ;;  %v4306_v11 = vrot.slane %v4304_v47, 5  ;;  %v12358_v12 = vld [vmem:[%s14936_s17 + $0xa0] sm:$0xf]  ;;  %13299 = vmatpush3.bf16.msra.mxu1 %v14322_v3 }
 0x1eb   : > { %4002 = vst [vmem:[#allocation3 + $0x108] sm:$0xf] %v12357_v26  ;;  %v12400_v17 = vld [vmem:[%s14936_s17 + $0x9c] sm:$0xf]  ;;  %18345 = vst [vmem:[#allocation55_spill] sm:$0xff] %v16025_v51  ;;  %v4312_v61 = vrot.slane %v4310_v36, 5 }
 0x1ec   : > { %18346 = vst [vmem:[#allocation56_spill] sm:$0xff] %v16027_v30  ;;  %4495 = vst [vmem:[#allocation3 + $0xe8] sm:$0xf] %v4299_v48  ;;  %v4316_v29 = vrot.slane %v4314_v60, 4  ;;  %v12401_v55 = vld [vmem:[%s14936_s17 + $0xa0] sm:$0xf]  ;;  %v4307_v42 = vor.u32 %v4306_v11, %v4303_v63  ;;  %v13067_v30 = vpop.f32.mrf.mxu1  ;;  %5373 = vmatmul.mubr.bf16.gmra.mxu0 %v14285_v22 }
 0x1ed   : > { %4003 = vst [vmem:[#allocation3 + $0x114] sm:$0xf] %v12358_v12  ;;  %v4325_v54 = vshrl.u32 %v12400_v17, 16  ;;  %v12402_v8 = vld [vmem:[%s14936_s17 + $0xa4] sm:$0x1]  ;;  %v4328_v24 = vshll.u32 %v12400_v17, 16  ;;  %v16031_v12 = vpop.f32.mrf.mxu0  ;;  %v16033_v63 = vadd.f32 %v13067_v30, %v13066_v21  ;;  %5380 = vmatprep.mubr.bf16.mxu0 %v14286_v41 }
 0x1ee   : > { %v4334_v47 = vshll.u32 %v12401_v55, 16  ;;  %v4338_v32 = vshrl.u32 %v12401_v55, 16  ;;  %v14323_v26 = vld [vmem:[#allocation8 + $0xb8] sm:$0xff]   ;;  %v4317_v59 = vor.u32 %v4316_v29, %v4312_v61  ;;  %v4322_v7 = vrot.slane %v4320_v37, 5  ;;  %18347 = vst [vmem:[#allocation57_spill] sm:$0xff] %v16031_v12  ;;  %v16035_v11 = vpop.f32.mrf.mxu1 }
 0x1ef   : > { %v4327_v40 = vrot.slane %v4325_v54, 4  ;;  %v4344_v51 = vshll.u32 %v12402_v8, 16  ;;  %v4308_v1 = vrot.slane %v4307_v42, 4  ;;  %v4330_v48 = vrot.slane %v4328_v24, 5  ;;  %13850 = vmatprep.subr.bf16.mxu0 %v14323_v26  ;;  %v14305_v54 = vld [vmem:[#allocation3 + $0x128] ss:$12 sps:$4 sm:$0xff]  }
 0x1f0   : > { %v4336_v36 = vrot.slane %v4334_v47, 5  ;;  %v4340_v60 = vrot.slane %v4338_v32, 4  ;;  %v4318_v3 = vrot.slane %v4317_v59, 4  ;;  %13851 = vmatpush3.bf16.msra.mxu0 %v14323_v26  ;;  %v14306_v59 = vld [vmem:[#allocation3 + $0x140] ss:$12 sps:$4 sm:$0xff]   ;;  %13842 = vmatprep.mubr.bf16.mxu1 %v14305_v54  ;;  %v16044_v24 = vpop.f32.mrf.mxu1  ;;  %v14324_v47 = vld [vmem:[#allocation8 + $0x70] sm:$0xff]  }
 0x1f1   : > { %v4313_v37 = vsel %vm14971_vm5, %v4308_v1, %v4312_v61  ;;  %v4331_v17 = vor.u32 %v4330_v48, %v4327_v40  ;;  %v4346_v55 = vrot.slane %v4344_v51, 5  ;;  %v12359_v21 = vld [vmem:[%s14936_s17 + $0xa8] sm:$0xf]  ;;  %v14288_v22 = vld [vmem:[#allocation3 + $0xa8] ss:$12 sps:$4 sm:$0xff]   ;;  %v12984_v61 = vpop.f32.mrf.mxu0  ;;  %13843 = vmatmul.mubr.bf16.gmra.mxu1 %v14306_v59  ;;  %13300 = vmatprep.subr.bf16.mxu1 %v14324_v47 }
 0x1f2   : > { %v4341_v29 = vor.u32 %v4340_v60, %v4336_v36  ;;  %v4323_v32 = vsel %vm14971_vm5, %v4318_v3, %v4322_v7  ;;  %4496 = vst [vmem:[#allocation3 + $0xf4] sm:$0xf] %v4313_v37  ;;  %v14291_v41 = vld [vmem:[#allocation3 + $0xc4] ss:$12 sps:$4 sm:$0xff]   ;;  %4004 = vst [vmem:[#allocation3 + $0x120] sm:$0xf] %v12359_v21 }
 0x1f3   : > { %4497 = vst [vmem:[#allocation3 + $0x100] sm:$0xf] %v4323_v32  ;;  %v4332_v30 = vrot.slane %v4331_v17, 4  ;;  %v12360_v42 = vld [vmem:[%s14936_s17 + $0xac] sm:$0xf]  ;;  %v12985_v60 = vpop.f32.mrf.mxu0 }
 0x1f4   : > { %v4342_v51 = vrot.slane %v4341_v29, 4  ;;  %v12403_v8 = vld [vmem:[%s14936_s17 + $0xa8] sm:$0xf]  ;;  %4005 = vst [vmem:[#allocation3 + $0x12c] sm:$0xf] %v12360_v42  ;;  %v16055_v42 = vadd.f32 %v12985_v60, %v12984_v61  ;;  %5381 = vmatmul.mubr.bf16.gmra.mxu0 %v14288_v22 }
 0x1f5   : > { %v4337_v26 = vsel %vm14971_vm5, %v4332_v30, %v4336_v36  ;;  %v12404_v7 = vld [vmem:[%s14936_s17 + $0xac] sm:$0xf]  ;;  %v12405_v40 = vld [vmem:[%s14936_s17 + $0xb0] sm:$0x1]  ;;  %v4349_v1 = vshrl.u32 %v12403_v8, 16  ;;  %v4352_v48 = vshll.u32 %v12403_v8, 16  ;;  %v16057_v8 = vpop.f32.mrf.mxu0  ;;  %5388 = vmatprep.mubr.bf16.mxu0 %v14291_v41 }
 0x1f6   : > { %v4347_v3 = vsel %vm14971_vm5, %v4342_v51, %v4346_v55  ;;  %4498 = vst [vmem:[#allocation3 + $0x10c] sm:$0xf] %v4337_v26  ;;  %v4358_v37 = vshll.u32 %v12404_v7, 16  ;;  %v4362_v17 = vshrl.u32 %v12404_v7, 16  ;;  %v4368_v29 = vshll.u32 %v12405_v40, 16  ;;  %v14325_v32 = vld [vmem:[#allocation8 + $0x30] sm:$0xff]   ;;  %v13072_v40 = vpop.f32.mrf.mxu1 }
 0x1f7   : > { %v12361_v54 = vld [vmem:[%s14936_s17 + $0xb4] sm:$0xf]  ;;  %4499 = vst [vmem:[#allocation3 + $0x118] sm:$0xf] %v4347_v3  ;;  %v4351_v36 = vrot.slane %v4349_v1, 4  ;;  %v4354_v59 = vrot.slane %v4352_v48, 5  ;;  %13301 = vmatpush3.bf16.msra.mxu1 %v14325_v32 }
 0x1f8   : > { %v12362_v21 = vld [vmem:[%s14936_s17 + $0xb8] sm:$0xf]  ;;  %4006 = vst [vmem:[#allocation3 + $0x138] sm:$0xf] %v12361_v54  ;;  %v12406_v30 = vld [vmem:[%s14936_s17 + $0xb4] sm:$0xf]  ;;  %v16061_v54 = vpop.f32.mrf.mxu0  ;;  %v13073_v22 = vpop.f32.mrf.mxu1 }
 0x1f9   : > { %18348 = vst [vmem:[#allocation58_spill] sm:$0xff] %v16055_v42  ;;  %18349 = vst [vmem:[#allocation59_spill] sm:$0xff] %v16057_v8  ;;  %v4360_v55 = vrot.slane %v4358_v37, 5  ;;  %v4364_v51 = vrot.slane %v4362_v17, 4  ;;  %v12407_v26 = vld [vmem:[%s14936_s17 + $0xb8] sm:$0xf]  ;;  %v4355_v47 = vor.u32 %v4354_v59, %v4351_v36  ;;  %v16063_v41 = vadd.f32 %v13073_v22, %v13072_v40 }
 0x1fa   : > { %4007 = vst [vmem:[#allocation3 + $0x144] sm:$0xf] %v12362_v21  ;;  %v4373_v7 = vshrl.u32 %v12406_v30, 16  ;;  %v12408_v1 = vld [vmem:[%s14936_s17 + $0xbc] sm:$0x1]  ;;  %v4376_v48 = vshll.u32 %v12406_v30, 16  ;;  %v16065_v36 = vpop.f32.mrf.mxu1 }
 0x1fb   : > { %v4382_v3 = vshll.u32 %v12407_v26, 16  ;;  %v4386_v12 = vshrl.u32 %v12407_v26, 16  ;;  %18350 = vst [vmem:[#allocation60_spill] sm:$0xff] %v16061_v54  ;;  %v14293_v61 = vld [vmem:[#allocation3 + $0xc0] ss:$12 sps:$4 sm:$0xff]   ;;  %v4365_v60 = vor.u32 %v4364_v51, %v4360_v55  ;;  %v4370_v42 = vrot.slane %v4368_v29, 5  ;;  %v12990_v26 = vpop.f32.mrf.mxu0 }
 0x1fc   : > { %v4375_v8 = vrot.slane %v4373_v7, 4  ;;  %v14294_v37 = vld [vmem:[#allocation3 + $0xdc] ss:$12 sps:$4 sm:$0xff]   ;;  %v4356_v17 = vrot.slane %v4355_v47, 4  ;;  %v4378_v21 = vrot.slane %v4376_v48, 5  ;;  %v4392_v32 = vshll.u32 %v12408_v1, 16  ;;  %v16071_v40 = vpop.f32.mrf.mxu1  ;;  %5389 = vmatmul.mubr.bf16.gmra.mxu0 %v14293_v61 }
 0x1fd   : > { %v4384_v4 = vrot.slane %v4382_v3, 5  ;;  %v4388_v34 = vrot.slane %v4386_v12, 4  ;;  %v4366_v53 = vrot.slane %v4365_v60, 4  ;;  %v14313_v59 = vld [vmem:[#allocation3 + $0x158] ss:$12 sps:$4 sm:$0xff]   ;;  %v12991_v3 = vpop.f32.mrf.mxu0  ;;  %5396 = vmatprep.mubr.bf16.mxu0 %v14294_v37 }
 0x1fe   : > { %v4361_v30 = vsel %vm14971_vm5, %v4356_v17, %v4360_v55  ;;  %v4379_v29 = vor.u32 %v4378_v21, %v4375_v8  ;;  %v4394_v7 = vrot.slane %v4392_v32, 5  ;;  %13846 = vmatprep.mubr.bf16.mxu1 %v14313_v59  ;;  %v14314_v48 = vld [vmem:[#allocation3 + $0x170] ss:$12 sps:$4 sm:$0xff]   ;;  %v12363_v55 = vld [vmem:[%s14936_s17 + $0xc0] sm:$0xf]  ;;  %v16077_v22 = vadd.f32 %v12991_v3, %v12990_v26 }
 0x1ff   : > { %v4389_v51 = vor.u32 %v4388_v34, %v4384_v4  ;;  %v4371_v12 = vsel %vm14971_vm5, %v4366_v53, %v4370_v42  ;;  %4500 = vst [vmem:[#allocation3 + $0x124] sm:$0xf] %v4361_v30  ;;  %v12364_v34 = vld [vmem:[%s14936_s17 + $0xc4] sm:$0xf]  ;;  %4008 = vst [vmem:[#allocation3 + $0x150] sm:$0xf] %v12363_v55  ;;  %13847 = vmatmul.mubr.bf16.gmra.mxu1 %v14314_v48  ;;  %v16084_v32 = vpop.f32.mrf.mxu0 }
 0x200   : > { %4501 = vst [vmem:[#allocation3 + $0x130] sm:$0xf] %v4371_v12  ;;  %v4380_v47 = vrot.slane %v4379_v29, 4  ;;  %v12409_v8 = vld [vmem:[%s14936_s17 + $0xc0] sm:$0xf]  ;;  %18351 = vst [vmem:[#allocation61_spill] sm:$0xff] %v16077_v22 }
 0x201   : > { %v4390_v1 = vrot.slane %v4389_v51, 4  ;;  %v12410_v60 = vld [vmem:[%s14936_s17 + $0xc4] sm:$0xf]  ;;  %4009 = vst [vmem:[#allocation3 + $0x15c] sm:$0xf] %v12364_v34  ;;  %v4397_v21 = vshrl.u32 %v12409_v8, 16  ;;  %v13078_v51 = vpop.f32.mrf.mxu1 }
 0x202   : > { %v4385_v53 = vsel %vm14971_vm5, %v4380_v47, %v4384_v4  ;;  %v12411_v17 = vld [vmem:[%s14936_s17 + $0xc8] sm:$0x1]  ;;  %v4400_v61 = vshll.u32 %v12409_v8, 16  ;;  %18352 = vst [vmem:[#allocation62_spill] sm:$0xff] %v16084_v32  ;;  %v12365_v59 = vld [vmem:[%s14936_s17 + $0xcc] sm:$0xf]  ;;  %v16090_v8 = vpop.f32.mrf.mxu0 }
 0x203   : > { %v4395_v42 = vsel %vm14971_vm5, %v4390_v1, %v4394_v7  ;;  %v14296_v30 = vld [vmem:[#allocation3 + $0xd8] ss:$12 sps:$4 sm:$0xff]   ;;  %4502 = vst [vmem:[#allocation3 + $0x13c] sm:$0xf] %v4385_v53  ;;  %v4406_v37 = vshll.u32 %v12410_v60, 16  ;;  %v4410_v4 = vshrl.u32 %v12410_v60, 16  ;;  %v13079_v34 = vpop.f32.mrf.mxu1 }
 0x204   : > { %4503 = vst [vmem:[#allocation3 + $0x148] sm:$0xf] %v4395_v42  ;;  %v4416_v29 = vshll.u32 %v12411_v17, 16  ;;  %v12366_v26 = vld [vmem:[%s14936_s17 + $0xd0] sm:$0xf]  ;;  %v4399_v12 = vrot.slane %v4397_v21, 4  ;;  %v16093_v32 = vadd.f32 %v13079_v34, %v13078_v51  ;;  %5397 = vmatmul.mubr.bf16.gmra.mxu0 %v14296_v30 }
 0x205   : > { %4010 = vst [vmem:[#allocation3 + $0x168] sm:$0xf] %v12365_v59  ;;  %v4402_v7 = vrot.slane %v4400_v61, 5  ;;  %4011 = vst [vmem:[#allocation3 + $0x174] sm:$0xf] %v12366_v26  ;;  %v4408_v55 = vrot.slane %v4406_v37, 5  ;;  %v16095_v59 = vpop.f32.mrf.mxu1 }
 0x206   : > { %v12412_v47 = vld [vmem:[%s14936_s17 + $0xcc] sm:$0xf]  ;;  %v12413_v1 = vld [vmem:[%s14936_s17 + $0xd0] sm:$0xf]  ;;  %v4412_v3 = vrot.slane %v4410_v4, 4  ;;  %18353 = vst [vmem:[#allocation63_spill] sm:$0xff] %v16090_v8  ;;  %v12996_v8 = vpop.f32.mrf.mxu0 }
 0x207   : > { %v14299_v48 = vld [vmem:[#allocation3 + $0xf4] ss:$12 sps:$4 sm:$0xff]   ;;  %v12414_v53 = vld [vmem:[%s14936_s17 + $0xd4] sm:$0x1]  ;;  %v4403_v42 = vor.u32 %v4402_v7, %v4399_v12  ;;  %v4421_v60 = vshrl.u32 %v12412_v47, 16  ;;  %v4424_v17 = vshll.u32 %v12412_v47, 16  ;;  %v16099_v12 = vpop.f32.mrf.mxu1 }
 0x208   : > { %v4413_v22 = vor.u32 %v4412_v3, %v4408_v55  ;;  %v4418_v54 = vrot.slane %v4416_v29, 5  ;;  %v4430_v21 = vshll.u32 %v12413_v1, 16  ;;  %v4434_v31 = vshrl.u32 %v12413_v1, 16  ;;  %5404 = vmatprep.mubr.bf16.mxu0 %v14299_v48  ;;  %v14301_v47 = vld [vmem:[#allocation3 + $0xf0] ss:$12 sps:$4 sm:$0xff]   ;;  %v12997_v34 = vpop.f32.mrf.mxu0 }
 0x209   : > { %v4404_v61 = vrot.slane %v4403_v42, 4  ;;  %v4423_v26 = vrot.slane %v4421_v60, 4  ;;  %v4426_v27 = vrot.slane %v4424_v17, 5  ;;  %v4440_v20 = vshll.u32 %v12414_v53, 16  ;;  %v14302_v1 = vld [vmem:[#allocation3 + $0x10c] ss:$12 sps:$4 sm:$0xff]  }
 0x20a   : > { %v4414_v37 = vrot.slane %v4413_v22, 4  ;;  %v4432_v4 = vrot.slane %v4430_v21, 5  ;;  %v4436_v29 = vrot.slane %v4434_v31, 4  ;;  %v16103_v42 = vadd.f32 %v12997_v34, %v12996_v8  ;;  %v16105_v48 = vpop.f32.mrf.mxu0  ;;  %v13084_v31 = vpop.f32.mrf.mxu1  ;;  %v373_v60 = vld [vmem:[#allocation2 + $0xc] sm:$0x1] }
 0x20b   : > { %v4409_v51 = vsel %vm14971_vm5, %v4404_v61, %v4408_v55  ;;  %v4427_v7 = vor.u32 %v4426_v27, %v4423_v26  ;;  %v4442_v53 = vrot.slane %v4440_v20, 5  ;;  %v14307_v34 = vld [vmem:[#allocation3 + $0x124] ss:$12 sps:$4 sm:$0xff]  }
 0x20c   : > { %v4419_v3 = vsel %vm14971_vm5, %v4414_v37, %v4418_v54  ;;  %4504 = vst [vmem:[#allocation3 + $0x154] sm:$0xf] %v4409_v51  ;;  %v4437_v30 = vor.u32 %v4436_v29, %v4432_v4  ;;  %v16109_v17 = vpop.f32.mrf.mxu0  ;;  %v374_v54 = vsel %vm15826_vm8, 0, %v373_v60  ;;  %v13085_v20 = vpop.f32.mrf.mxu1  ;;  %5405 = vmatmul.mubr.bf16.gmra.mxu0 %v14301_v47  ;;  %v14304_v51 = vld [vmem:[#allocation3 + $0x108] ss:$12 sps:$4 sm:$0xff]   ;;  %v12911_v29 = vadd.f32 %v15536_v33, %v15523_v19 }
 0x20d   : > { %4505 = vst [vmem:[#allocation3 + $0x160] sm:$0xf] %v4419_v3  ;;  %v4428_v22 = vrot.slane %v4427_v7, 4  ;;  %375 = vst [vmem:[#allocation2 + $0xc] sm:$0x1] %v374_v54  ;;  %v16115_v8 = vadd.f32 %v13085_v20, %v13084_v31  ;;  %5412 = vmatprep.mubr.bf16.mxu0 %v14302_v1  ;;  %v13053_v3 = vadd.f32 %v15964_v6, %v15959_v46  ;;  %v14330_v31 = vld [vmem:[#allocation8 + $0x20] sm:$0xff]  }
 0x20e   : > { %v4438_v27 = vrot.slane %v4437_v30, 4  ;;  %v13772_v61 = vpop.f32.mrf.mxu0  ;;  %v16117_v26 = vpop.f32.mrf.mxu1  ;;  %v14327_v30 = vld [vmem:[#allocation8 + $0x28] sm:$0xff]   ;;  %v13047_v19 = vadd.f32 %v15935_v16, %v15927_v23  ;;  %v2029_v60 = vadd.f32 %v12911_v29, %v15552_v57  ;;  %v376_v16 = vld [vmem:[#allocation2 + $0x18] sm:$0x1] }
 0x20f   : > { %v4433_v55 = vsel %vm14971_vm5, %v4428_v22, %v4432_v4  ;;  %v3733_v37 = vadd.f32 %v13772_v61, %v15954_v44  ;;  %v14326_v4 = vld [vmem:[#allocation8 + $0x68] sm:$0xff]   ;;  %v429_v44 = vld [vmem:[#allocation2 + $0x14] sm:$0x1]  ;;  %v377_v57 = vsel %vm15826_vm8, 0, %v376_v16  ;;  %v12935_v16 = vadd.f32 %v15758_v13, %v15739_v38  ;;  %v18354_v38 = vld [vmem:[#allocation21_spill] sm:$0xff] }
 0x210   : > { %4506 = vst [vmem:[#allocation3 + $0x16c] sm:$0xf] %v4433_v55  ;;  %v4443_v21 = vsel %vm14971_vm5, %v4438_v27, %v4442_v53  ;;  %v3724_v7 = vpop.f32.mrf.mxu0  ;;  %v16124_v47 = vpop.f32.mrf.mxu1  ;;  %13302 = vmatprep.subr.bf16.mxu1 %v14326_v4  ;;  %v430_v55 = vsel %vm15834_vm10, 0, %v429_v44  ;;  %378 = vst [vmem:[#allocation2 + $0x18] sm:$0x1] %v377_v57 }
 0x211   : > { %4507 = vst [vmem:[#allocation3 + $0x178] sm:$0xf] %v4443_v21  ;;  %v16127_v22 = vadd.f32 %v3733_v37, %v15566_v15  ;;  %v3725_v1 = vadd.f32 %v15922_v62, %v3724_v7  ;;  %13303 = vmatpush3.bf16.msra.mxu1 %v14327_v30  ;;  %431 = vst [vmem:[#allocation2 + $0x14] sm:$0x1] %v430_v55  ;;  %v14329_v15 = vld [vmem:[#allocation8 + $0x60] sm:$0xff]   ;;  %v14328_v62 = vld [vmem:[#allocation8 + $0xb0] sm:$0xff]   ;;  %v13065_v7 = vadd.f32 %v16015_v39, %v16010_v18 }
 0x212   : > { %v13773_v53 = vpop.f32.mrf.mxu0  ;;  %v13090_v33 = vpop.f32.mrf.mxu1  ;;  %13304 = vmatprep.subr.bf16.mxu1 %v14329_v15  ;;  %13852 = vmatprep.subr.bf16.mxu0 %v14328_v62  ;;  %v14310_v30 = vld [vmem:[#allocation3 + $0x13c] ss:$12 sps:$4 sm:$0xff]  }
 0x213   : > { %v16135_v46 = vadd.f32 %v3725_v1, %v15519_v14  ;;  %v3736_v6 = vadd.f32 %v13773_v53, %v13053_v3  ;;  %13853 = vmatpush3.bf16.msra.mxu0 %v14328_v62  ;;  %v14309_v1 = vld [vmem:[#allocation3 + $0x120] ss:$12 sps:$4 sm:$0xff]   ;;  %v14331_v55 = vld [vmem:[#allocation8 + $0x58] sm:$0xff]  }
 0x214   : > { %v3727_v27 = vpop.f32.mrf.mxu0  ;;  %v13091_v54 = vpop.f32.mrf.mxu1  ;;  %5413 = vmatmul.mubr.bf16.gmra.mxu0 %v14304_v51  ;;  %v12923_v51 = vadd.f32 %v15659_v0, %v15647_v43  ;;  %v13059_v43 = vadd.f32 %v15989_v2, %v15979_v56  ;;  %v14333_v39 = vld [vmem:[#allocation8 + $0xa8] sm:$0xff]   ;;  %v14334_v2 = vld [vmem:[#allocation8 + $0x50] sm:$0xff]  }
 0x215   : > { %v16139_v21 = vadd.f32 %v3736_v6, %v15589_v35  ;;  %v3728_v20 = vadd.f32 %v13047_v19, %v3727_v27  ;;  %v16141_v23 = vadd.f32 %v13091_v54, %v13090_v33  ;;  %5420 = vmatprep.mubr.bf16.mxu0 %v14307_v34  ;;  %13305 = vmatpush3.bf16.msra.mxu1 %v14330_v31  ;;  %v432_v34 = vld [vmem:[#allocation2 + $0x20] sm:$0x1]  ;;  %v379_v56 = vld [vmem:[#allocation2 + $0x24] sm:$0x1]  ;;  %v14312_v54 = vld [vmem:[#allocation3 + $0x138] ss:$12 sps:$4 sm:$0xff]  }
 0x216   : > { %v13776_v14 = vpop.f32.mrf.mxu0  ;;  %v16143_v61 = vpop.f32.mrf.mxu1  ;;  %v433_v53 = vsel %vm15834_vm10, 0, %v432_v34  ;;  %13306 = vmatprep.subr.bf16.mxu1 %v14331_v55  ;;  %13854 = vmatprep.subr.bf16.mxu0 %v14333_v39  ;;  %v380_v31 = vsel %vm15826_vm8, 0, %v379_v56  ;;  %v14338_v34 = vld [vmem:[#allocation8 + $0x8] sm:$0xff]  }
 0x217   : > { %v16145_v37 = vadd.f32 %v3728_v20, %v2029_v60  ;;  %v3749_v4 = vadd.f32 %v13776_v14, %v16003_v49  ;;  %434 = vst [vmem:[#allocation2 + $0x20] sm:$0x1] %v433_v53  ;;  %13855 = vmatpush3.bf16.msra.mxu0 %v14333_v39  ;;  %v14336_v60 = vld [vmem:[#allocation8 + $0xa0] sm:$0xff]   ;;  %381 = vst [vmem:[#allocation2 + $0x24] sm:$0x1] %v380_v31  ;;  %v18355_v53 = vld [vmem:[#allocation16_spill] sm:$0xff] }
 0x218   : > { %v3740_v35 = vpop.f32.mrf.mxu0  ;;  %v16154_v29 = vpop.f32.mrf.mxu1  ;;  %13856 = vmatprep.subr.bf16.mxu0 %v14336_v60  ;;  %v2061_v55 = vadd.f32 %v12935_v16, %v18355_v53  ;;  %v14341_v39 = vld [vmem:[#allocation8 + $0x90] sm:$0xff]   ;;  %v14318_v56 = vld [vmem:[#allocation3 + $0x16c] ss:$12 sps:$4 sm:$0xff]  }
 0x219   : > { %v16157_v3 = vadd.f32 %v3749_v4, %v15689_v50  ;;  %v3741_v49 = vadd.f32 %v15973_v25, %v3740_v35  ;;  %v14332_v50 = vld [vmem:[#allocation8 + $0x18] sm:$0xff]   ;;  %v2045_v25 = vadd.f32 %v12923_v51, %v15613_v10  ;;  %v14335_v10 = vld [vmem:[#allocation8 + $0x10] sm:$0xff]   ;;  %v13077_v4 = vadd.f32 %v16071_v40, %v16065_v36  ;;  %v18358_v31 = vld [vmem:[#allocation40_spill] sm:$0xff] }
 0x21a   : > { %v13777_v44 = vpop.f32.mrf.mxu0  ;;  %13307 = vmatpush3.bf16.msra.mxu1 %v14332_v50  ;;  %v435_v40 = vld [vmem:[#allocation2 + $0x2c] sm:$0x1]  ;;  %v14340_v50 = vld [vmem:[#allocation8 + $0x40] sm:$0xff]  }
 0x21b   : > { %v16165_v0 = vadd.f32 %v3741_v49, %v15628_v28  ;;  %v3752_v18 = vadd.f32 %v13777_v44, %v13065_v7  ;;  %13308 = vmatprep.subr.bf16.mxu1 %v14334_v2  ;;  %v14337_v7 = vld [vmem:[#allocation8 + $0x48] sm:$0xff]   ;;  %13857 = vmatpush3.bf16.msra.mxu0 %v14336_v60  ;;  %v14343_v44 = vld [vmem:[#allocation3 + $0x4] ss:$12 sps:$4 sm:$0xff]  }
 0x21c   : > { %v3743_v19 = vpop.f32.mrf.mxu0  ;;  %v13096_v33 = vpop.f32.mrf.mxu1  ;;  %5421 = vmatmul.mubr.bf16.gmra.mxu0 %v14309_v1  ;;  %v14339_v1 = vld [vmem:[#allocation8 + $0x98] sm:$0xff]   ;;  %7793 = vmatprep.mubr.bf16.mxu1 %v14343_v44  ;;  %v18360_v16 = vld [vmem:[#allocation17_spill] sm:$0xff] }
 0x21d   : > { %v16169_v6 = vadd.f32 %v3752_v18, %v15699_v9  ;;  %v3744_v15 = vadd.f32 %v13059_v43, %v3743_v19  ;;  %5428 = vmatprep.mubr.bf16.mxu0 %v14310_v30  ;;  %v13071_v30 = vadd.f32 %v16044_v24, %v16035_v11  ;;  %13858 = vmatprep.subr.bf16.mxu0 %v14339_v1  ;;  %v18356_v18 = vld [vmem:[#allocation26_spill] sm:$0xff]  ;;  %v14342_v19 = vld [vmem:[#allocation8] sm:$0xff]  }
 0x21e   : > { %v13097_v28 = vpop.f32.mrf.mxu1  ;;  %v13780_v62 = vpop.f32.mrf.mxu0  ;;  %13309 = vmatpush3.bf16.msra.mxu1 %v14335_v10 }
 0x21f   : > { %v16171_v27 = vadd.f32 %v3744_v15, %v2045_v25  ;;  %v16175_v9 = vadd.f32 %v13097_v28, %v13096_v33  ;;  %v3765_v20 = vadd.f32 %v13780_v62, %v16063_v41  ;;  %v14315_v41 = vld [vmem:[#allocation3 + $0x154] ss:$12 sps:$4 sm:$0xff]   ;;  %13310 = vmatprep.subr.bf16.mxu1 %v14337_v7  ;;  %13859 = vmatpush3.bf16.msra.mxu0 %v14339_v1  ;;  %v14317_v25 = vld [vmem:[#allocation3 + $0x150] ss:$12 sps:$4 sm:$0xff]   ;;  %v382_v15 = vld [vmem:[#allocation2 + $0x30] sm:$0x1] }
 0x220   : > { %v3756_v14 = vpop.f32.mrf.mxu0  ;;  %v16182_v57 = vpop.f32.mrf.mxu1  ;;  %v383_v2 = vsel %vm15826_vm8, 0, %v382_v15  ;;  %13860 = vmatprep.subr.bf16.mxu0 %v14341_v39  ;;  %v18357_v62 = vld [vmem:[#allocation38_spill] sm:$0xff] }
 0x221   : > { %v16185_v35 = vadd.f32 %v3765_v20, %v15779_v5  ;;  %v3757_v51 = vadd.f32 %v16033_v63, %v3756_v14  ;;  %v436_v63 = vsel %vm15834_vm10, 0, %v435_v40  ;;  %384 = vst [vmem:[#allocation2 + $0x30] sm:$0x1] %v383_v2  ;;  %v12953_v10 = vadd.f32 %v18358_v31, %v18357_v62  ;;  %v438_v20 = vld [vmem:[#allocation2 + $0x38] sm:$0x1]  ;;  %v18359_v14 = vld [vmem:[#allocation36_spill] sm:$0xff] }
 0x222   : > { %v13781_v49 = vpop.f32.mrf.mxu0  ;;  %13311 = vmatpush3.bf16.msra.mxu1 %v14338_v34  ;;  %v16196_v43 = vpop.f32.mrf.mxu1  ;;  %437 = vst [vmem:[#allocation2 + $0x2c] sm:$0x1] %v436_v63  ;;  %v18361_v34 = vld [vmem:[#allocation32_spill] sm:$0xff]  ;;  %v18362_v1 = vld [vmem:[#allocation34_spill] sm:$0xff] }
 0x223   : > { %v16191_v13 = vadd.f32 %v3757_v51, %v18354_v38  ;;  %v3768_v36 = vadd.f32 %v13781_v49, %v13077_v4  ;;  %13312 = vmatprep.subr.bf16.mxu1 %v14340_v50  ;;  %13861 = vmatpush3.bf16.msra.mxu0 %v14341_v39  ;;  %v2082_v4 = vadd.f32 %v18360_v16, %v18359_v14  ;;  %v14320_v63 = vld [vmem:[#allocation3 + $0x168] ss:$12 sps:$4 sm:$0xff]   ;;  %v441_v62 = vld [vmem:[#allocation2 + $0x44] sm:$0x1] }
 0x224   : > { %v3759_v5 = vpop.f32.mrf.mxu0  ;;  %5429 = vmatmul.mubr.bf16.gmra.mxu0 %v14312_v54  ;;  %v13089_v38 = vadd.f32 %v16124_v47, %v16117_v26  ;;  %v7249_v47 = vld [vmem:[#allocation3] sm:$0xff]  ;;  %v14348_v31 = vld [vmem:[#allocation3 + $0x8] ss:$12 sps:$4 sm:$0xff]  }
 0x225   : > { %v16199_v11 = vadd.f32 %v3768_v36, %v18356_v18  ;;  %v3760_v24 = vadd.f32 %v13071_v30, %v3759_v5  ;;  %5436 = vmatprep.mubr.bf16.mxu0 %v14315_v41  ;;  %v439_v41 = vsel %vm15834_vm10, 0, %v438_v20  ;;  %v12947_v30 = vadd.f32 %v18362_v1, %v18361_v34  ;;  %v388_v20 = vld [vmem:[#allocation2 + $0x48] sm:$0x1]  ;;  %v18368_v34 = vld [vmem:[#allocation46_spill] sm:$0xff]  ;;  %v18369_v1 = vld [vmem:[#allocation48_spill] sm:$0xff] }
 0x226   : > { %13313 = vmatpush3.bf16.msra.mxu1 %v14342_v19  ;;  %440 = vst [vmem:[#allocation2 + $0x38] sm:$0x1] %v439_v41  ;;  %v13083_v18 = vadd.f32 %v16099_v12, %v16095_v59  ;;  %v7251_v19 = vld [vmem:[#allocation3 + $0xc] sm:$0xff]  ;;  %v442_v12 = vsel %vm15834_vm10, 0, %v441_v62 }
 0x227   : > { %v16201_v33 = vadd.f32 %v3760_v24, %v2061_v55  ;;  %v385_v55 = vld [vmem:[#allocation2 + $0x3c] sm:$0x1]  ;;  %v18364_v24 = vld [vmem:[#allocation29_spill] sm:$0xff]  ;;  %443 = vst [vmem:[#allocation2 + $0x44] sm:$0x1] %v442_v12  ;;  %v18367_v41 = vld [vmem:[#allocation20_spill] sm:$0xff] }
 0x228   : > { %v13102_v28 = vpop.f32.mrf.mxu1  ;;  %v13784_v54 = vpop.f32.mrf.mxu0  ;;  %v386_v26 = vsel %vm15826_vm8, 0, %v385_v55  ;;  %v18374_v12 = vld [vmem:[#allocation23_spill] sm:$0xff] }
 0x229   : > { %v3781_v7 = vadd.f32 %v13784_v54, %v16115_v8  ;;  %v18363_v8 = vld [vmem:[#allocation18_spill] sm:$0xff]  ;;  %387 = vst [vmem:[#allocation2 + $0x3c] sm:$0x1] %v386_v26  ;;  %v14345_v54 = vld [vmem:[#allocation8 + $0x88] sm:$0xff]  }
 0x22a   : > { %v13103_v60 = vpop.f32.mrf.mxu1  ;;  %v3772_v49 = vpop.f32.mrf.mxu0  ;;  %v2085_v5 = vadd.f32 %v18363_v8, %v12953_v10  ;;  %v12601_v10 = vcombine.low %v7249_v47, %v7251_v19  ;;  %13862 = vmatprep.subr.bf16.mxu0 %v14345_v54  ;;  %v18372_v19 = vld [vmem:[#allocation22_spill] sm:$0xff] }
 0x22b   : > { %v16209_v51 = vadd.f32 %v13103_v60, %v13102_v28  ;;  %v16220_v40 = vadd.f32 %v3781_v7, %v2082_v4  ;;  %v3773_v44 = vadd.f32 %v16093_v32, %v3772_v49  ;;  %v18365_v32 = vld [vmem:[#allocation19_spill] sm:$0xff]  ;;  %v389_v4 = vsel %vm15826_vm8, 0, %v388_v20  ;;  %13863 = vmatpush3.bf16.msra.mxu0 %v14345_v54 }
 0x22c   : > { %5437 = vmatmul.mubr.bf16.gmra.mxu0 %v14317_v25  ;;  %v16218_v36 = vpop.f32.mrf.mxu1  ;;  %v13785_v53 = vpop.f32.mrf.mxu0  ;;  %v2077_v15 = vadd.f32 %v12947_v30, %v18365_v32  ;;  %7794 = vmatmul.mubr.bf16.vlgmr.msra.gmra.mxu1 %v12601_v10  ;;  %v18366_v7 = vld [vmem:[#allocation47_spill] sm:$0xff]  ;;  %v12965_v30 = vadd.f32 %v18369_v1, %v18368_v34  ;;  %390 = vst [vmem:[#allocation2 + $0x48] sm:$0x1] %v389_v4  ;;  %v18373_v32 = vld [vmem:[#allocation44_spill] sm:$0xff] }
 0x22d   : > { %5444 = vmatprep.mubr.bf16.mxu0 %v14318_v56  ;;  %v16227_v50 = vadd.f32 %v3773_v44, %v18364_v24  ;;  %v3784_v39 = vadd.f32 %v13785_v53, %v13089_v38  ;;  %v2098_v49 = vadd.f32 %v18367_v41, %v18366_v7  ;;  %v18371_v53 = vld [vmem:[#allocation45_spill] sm:$0xff]  ;;  %v18378_v41 = vld [vmem:[#allocation54_spill] sm:$0xff] }
 0x22e   : > { %v3775_v25 = vpop.f32.mrf.mxu0  ;;  %v16232_v56 = vpop.f32.mrf.mxu1  ;;  %v18377_v7 = vld [vmem:[#allocation53_spill] sm:$0xff] }
 0x22f   : > { %v16234_v2 = vadd.f32 %v3784_v39, %v2085_v5  ;;  %v3776_v28 = vadd.f32 %v13083_v18, %v3775_v25  ;;  %v14346_v5 = vld [vmem:[#allocation8 + $0x80] sm:$0xff]   ;;  %v13101_v18 = vadd.f32 %v16196_v43, %v16182_v57  ;;  %v2101_v25 = vadd.f32 %v18372_v19, %v12965_v30  ;;  %v18379_v30 = vld [vmem:[#allocation25_spill] sm:$0xff] }
 0x230   : > { %13864 = vmatprep.subr.bf16.mxu0 %v14346_v5 }
 0x231   : > { %v16236_v59 = vadd.f32 %v3776_v28, %v2077_v15  ;;  %13865 = vmatpush3.bf16.msra.mxu0 %v14346_v5 }
 0x232   : > { %v13788_v16 = vpop.f32.mrf.mxu0 }
 0x233   : > { %v3797_v44 = vadd.f32 %v13788_v16, %v16175_v9  ;;  %v13095_v9 = vadd.f32 %v16154_v29, %v16143_v61  ;;  %v18376_v16 = vld [vmem:[#allocation24_spill] sm:$0xff] }
 0x234   : > { %5445 = vmatmul.mubr.bf16.gmra.mxu0 %v14320_v63  ;;  %v13108_v60 = vpop.f32.mrf.mxu1  ;;  %v3788_v8 = vpop.f32.mrf.mxu0  ;;  %v18370_v63 = vld [vmem:[#allocation43_spill] sm:$0xff] }
 0x235   : > { %13866 = vmatprep.mubr.bf16.mxu0 %v14348_v31  ;;  %v12959_v55 = vadd.f32 %v18371_v53, %v18370_v63  ;;  %v16251_v39 = vadd.f32 %v3797_v44, %v2098_v49  ;;  %v3789_v26 = vadd.f32 %v16141_v23, %v3788_v8  ;;  %v12977_v49 = vadd.f32 %v18378_v41, %v18377_v7  ;;  %v18380_v44 = vld [vmem:[#allocation49_spill] sm:$0xff]  ;;  %v18381_v63 = vld [vmem:[#allocation50_spill] sm:$0xff]  ;;  %v18382_v53 = vld [vmem:[#allocation51_spill] sm:$0xff] }
 0x236   : > { %v13109_v14 = vpop.f32.mrf.mxu1  ;;  %v13789_v47 = vpop.f32.mrf.mxu0  ;;  %v2106_v8 = vadd.f32 %v18380_v44, %v18379_v30  ;;  %v18385_v41 = vld [vmem:[#allocation31_spill] sm:$0xff]  ;;  %v18387_v30 = vld [vmem:[#allocation56_spill] sm:$0xff]  ;;  %v18388_v44 = vld [vmem:[#allocation57_spill] sm:$0xff] }
 0x237   : > { %v13110_v38 = vadd.f32 %v13109_v14, %v13108_v60  ;;  %v16258_v15 = vadd.f32 %v3789_v26, %v18373_v32  ;;  %v3800_v28 = vadd.f32 %v13789_v47, %v13101_v18  ;;  %v2093_v57 = vadd.f32 %v12959_v55, %v18374_v12  ;;  %v444_v60 = vld [vmem:[#allocation2 + $0x50] sm:$0x1]  ;;  %v18375_v14 = vld [vmem:[#allocation52_spill] sm:$0xff]  ;;  %v391_v12 = vld [vmem:[#allocation2 + $0x54] sm:$0x1] }
 0x238   : > { %v13111_v24 = vpop.f32.mrf.mxu1  ;;  %v3791_v62 = vpop.f32.mrf.mxu0  ;;  %v445_v54 = vsel %vm15834_vm10, 0, %v444_v60  ;;  %v2114_v4 = vadd.f32 %v18376_v16, %v18375_v14  ;;  %v12971_v55 = vadd.f32 %v18382_v53, %v18381_v63  ;;  %v18389_v53 = vld [vmem:[#allocation58_spill] sm:$0xff] }
 0x239   : > { %v16261_v31 = vadd.f32 %v3800_v28, %v2101_v25  ;;  %v3792_v10 = vadd.f32 %v13095_v9, %v3791_v62  ;;  %446 = vst [vmem:[#allocation2 + $0x50] sm:$0x1] %v445_v54  ;;  %v18383_v9 = vld [vmem:[#allocation27_spill] sm:$0xff]  ;;  %v13107_v28 = vadd.f32 %v16232_v56, %v16218_v36 }
 0x23a   : > { %v13112_v43 = vpop.f32.mrf.mxu1  ;;  %v2117_v32 = vadd.f32 %v18383_v9, %v12977_v49  ;;  %v18386_v49 = vld [vmem:[#allocation55_spill] sm:$0xff] }
 0x23b   : > { %v16263_v23 = vadd.f32 %v3792_v10, %v2093_v57  ;;  %v13113_v18 = vadd.f32 %v13112_v43, %v13111_v24  ;;  %v392_v10 = vsel %vm15826_vm8, 0, %v391_v12  ;;  %v18384_v24 = vld [vmem:[#allocation28_spill] sm:$0xff] }
 0x23c   : > { %v2109_v43 = vadd.f32 %v12971_v55, %v18384_v24  ;;  %393 = vst [vmem:[#allocation2 + $0x54] sm:$0x1] %v392_v10  ;;  %v18390_v55 = vld [vmem:[#allocation30_spill] sm:$0xff] }
 0x23e   : > { %v13792_v29 = vpop.f32.mrf.mxu0 }
 0x23f   : > { %v3813_v1 = vadd.f32 %v13792_v29, %v13110_v38  ;;  %v447_v29 = vld [vmem:[#allocation2 + $0x5c] sm:$0x1] }
 0x240   : > { %v13114_v20 = vpop.f32.mrf.mxu1  ;;  %v3804_v5 = vpop.f32.mrf.mxu0  ;;  %v448_v36 = vsel %vm15834_vm10, 0, %v447_v29 }
 0x241   : > { %v16275_v47 = vadd.f32 %v3813_v1, %v2114_v4  ;;  %v3805_v19 = vadd.f32 %v16209_v51, %v3804_v5  ;;  %449 = vst [vmem:[#allocation2 + $0x5c] sm:$0x1] %v448_v36  ;;  %v2122_v1 = vadd.f32 %v18386_v49, %v18385_v41 }
 0x242   : > { %v13115_v61 = vpop.f32.mrf.mxu1  ;;  %v13793_v25 = vpop.f32.mrf.mxu0 }
 0x243   : > { %v13116_v34 = vadd.f32 %v13115_v61, %v13114_v20  ;;  %v16281_v38 = vadd.f32 %v3805_v19, %v2106_v8  ;;  %v3816_v62 = vadd.f32 %v13793_v25, %v13113_v18  ;;  %v14347_v61 = vld [vmem:[#allocation8 + $0x178] sm:$0xff]   ;;  %v12983_v8 = vadd.f32 %v18388_v44, %v18387_v30  ;;  %v18391_v19 = vld [vmem:[#allocation59_spill] sm:$0xff]  ;;  %v18392_v25 = vld [vmem:[#allocation60_spill] sm:$0xff] }
 0x244   : > { %v13117_v26 = vpop.f32.mrf.mxu1  ;;  %v3807_v57 = vpop.f32.mrf.mxu0  ;;  %13898 = vmatprep.subr.bf16.mxu1 %v14347_v61  ;;  %v2130_v18 = vadd.f32 %v18390_v55, %v18389_v53  ;;  %v12989_v9 = vadd.f32 %v18392_v25, %v18391_v19  ;;  %v18395_v44 = vld [vmem:[#allocation39_spill] sm:$0xff]  ;;  %v450_v19 = vld [vmem:[#allocation2 + $0x68] sm:$0x1] }
 0x245   : > { %v16286_v54 = vadd.f32 %v3816_v62, %v2117_v32  ;;  %v3808_v51 = vadd.f32 %v13107_v28, %v3807_v57  ;;  %13899 = vmatpush3.bf16.msra.mxu1 %v14347_v61  ;;  %v18393_v61 = vld [vmem:[#allocation35_spill] sm:$0xff] }
 0x246   : > { %v13118_v60 = vpop.f32.mrf.mxu1  ;;  %v2125_v29 = vadd.f32 %v12983_v8, %v18393_v61  ;;  %v18396_v8 = vld [vmem:[#allocation61_spill] sm:$0xff]  ;;  %v18398_v53 = vld [vmem:[#allocation63_spill] sm:$0xff] }
 0x247   : > { %v16288_v20 = vadd.f32 %v3808_v51, %v2109_v43  ;;  %v13119_v62 = vadd.f32 %v13118_v60, %v13117_v26  ;;  %v394_v51 = vld [vmem:[#allocation2 + $0x60] sm:$0x1] }
 0x248   : > { %v395_v36 = vsel %vm15826_vm8, 0, %v394_v51 }
 0x249   : > { %396 = vst [vmem:[#allocation2 + $0x60] sm:$0x1] %v395_v36 }
 0x24b   : > { %v13120_v56 = vpop.f32.mrf.mxu1  ;;  %v13796_v14 = vpop.f32.mrf.mxu0 }
 0x24d   : > { %v13121_v16 = vpop.f32.mrf.mxu1  ;;  %v3820_v7 = vpop.f32.mrf.mxu0 }
 0x24e   : > { %v13122_v4 = vadd.f32 %v13121_v16, %v13120_v56  ;;  %v3821_v63 = vadd.f32 %v13116_v34, %v3820_v7  ;;  %v18394_v56 = vld [vmem:[#allocation33_spill] sm:$0xff] }
 0x24f   : > { %v13123_v5 = vpop.f32.mrf.mxu1  ;;  %v13797_v28 = vpop.f32.mrf.mxu0  ;;  %v2133_v16 = vadd.f32 %v18394_v56, %v12989_v9 }
 0x250   : > { %v3829_v32 = vadd.f32 %v13796_v14, %v13122_v4  ;;  %v16300_v57 = vadd.f32 %v3821_v63, %v2122_v1  ;;  %v18397_v63 = vld [vmem:[#allocation62_spill] sm:$0xff] }
 0x251   : > { %v13124_v12 = vpop.f32.mrf.mxu1  ;;  %v3823_v43 = vpop.f32.mrf.mxu0  ;;  %v12995_v55 = vadd.f32 %v18398_v53, %v18397_v63 }
 0x252   : > { %v13125_v10 = vadd.f32 %v13124_v12, %v13123_v5  ;;  %v16302_v24 = vadd.f32 %v3829_v32, %v2130_v18  ;;  %v3824_v34 = vadd.f32 %v13119_v62, %v3823_v43  ;;  %v2138_v5 = vadd.f32 %v18396_v8, %v18395_v44 }
 0x253   : > { %v451_v32 = vsel %vm15834_vm10, 0, %v450_v19  ;;  %v14355_v19 = vld [vmem:[#allocation8 + $0x170] sm:$0xff]  }
 0x254   : > { %v3832_v7 = vadd.f32 %v13797_v28, %v13125_v10  ;;  %v16308_v14 = vadd.f32 %v3824_v34, %v2125_v29  ;;  %452 = vst [vmem:[#allocation2 + $0x68] sm:$0x1] %v451_v32  ;;  %v18399_v10 = vld [vmem:[#allocation42_spill] sm:$0xff]  ;;  %v397_v29 = vld [vmem:[#allocation2 + $0x6c] sm:$0x1]  ;;  %13900 = vmatprep.subr.bf16.mxu1 %v14355_v19 }
 0x255   : > { %v2141_v43 = vadd.f32 %v12995_v55, %v18399_v10  ;;  %v398_v36 = vsel %vm15826_vm8, 0, %v397_v29  ;;  %13901 = vmatpush3.bf16.msra.mxu1 %v14355_v19 }
 0x256   : > { %v16310_v26 = vadd.f32 %v3832_v7, %v2133_v16  ;;  %399 = vst [vmem:[#allocation2 + $0x6c] sm:$0x1] %v398_v36 }
 0x257   : > { %v13126_v60 = vpop.f32.mrf.mxu1  ;;  %v13800_v41 = vpop.f32.mrf.mxu0 }
 0x259   : > { %v13127_v4 = vpop.f32.mrf.mxu1  ;;  %v3836_v30 = vpop.f32.mrf.mxu0 }
 0x25a   : > { %v13128_v49 = vadd.f32 %v13127_v4, %v13126_v60  ;;  %v18401_v60 = vld [vmem:[#allocation37_spill] sm:$0xff] }
 0x25b   : > { %v13129_v1 = vpop.f32.mrf.mxu1  ;;  %v13801_v9 = vpop.f32.mrf.mxu0  ;;  %v2146_v4 = vadd.f32 %v18401_v60, %v16103_v42 }
 0x25c   : > { %v3837_v18 = vadd.f32 %v13128_v49, %v3836_v30  ;;  %v13001_v49 = vadd.f32 %v16109_v17, %v16105_v48 }
 0x25d   : > { %v13130_v25 = vpop.f32.mrf.mxu1  ;;  %v3839_v12 = vpop.f32.mrf.mxu0 }
 0x25e   : > { %v13131_v28 = vadd.f32 %v13130_v25, %v13129_v1  ;;  %v16318_v62 = vadd.f32 %v3837_v18, %v2138_v5  ;;  %v18403_v5 = vld [vmem:[#allocation41_spill] sm:$0xff]  ;;  %v453_v25 = vld [vmem:[#allocation2 + $0x74] sm:$0x1] }
 0x25f   : > { %v2149_v63 = vadd.f32 %v18403_v5, %v13001_v49  ;;  %v454_v32 = vsel %vm15834_vm10, 0, %v453_v25  ;;  %v456_v5 = vld [vmem:[#allocation2 + $0x80] sm:$0x1] }
 0x260   : > { %v3840_v51 = vadd.f32 %v13131_v28, %v3839_v12  ;;  %455 = vst [vmem:[#allocation2 + $0x74] sm:$0x1] %v454_v32  ;;  %v400_v28 = vld [vmem:[#allocation2 + $0x78] sm:$0x1] }
 0x262   : > { %v16321_v61 = vadd.f32 %v3840_v51, %v2141_v43  ;;  %v16341_v51 = vld [vmem:[%s18269_s3] ss:$0 sm:$0xff] }
 0x264   : > { %18400 = vst [vmem:[#allocation21_spill] sm:$0xff] %v16321_v61  ;;  %v13132_v34 = vpop.f32.mrf.mxu1  ;;  %v6323_v61 = vld [vmem:[#allocation2 + $0x2c] sm:$0x1] }
 0x266   : > { %v13133_v56 = vpop.f32.mrf.mxu1 }
 0x267   : > { %v13134_v16 = vadd.f32 %v13133_v56, %v13132_v34  ;;  %v16347_v56 = vld [vmem:[%s18270_s4] ss:$0 sm:$0xff] }
 0x268   : > { %v13135_v7 = vpop.f32.mrf.mxu1 }
 0x269   : > { %v3845_v1 = vadd.f32 %v13800_v41, %v13134_v16 }
 0x26a   : > { %v13136_v30 = vpop.f32.mrf.mxu1 }
 0x26b   : > { %v16329_v44 = vadd.f32 %v3845_v1, %v2146_v4  ;;  %v13137_v8 = vadd.f32 %v13136_v30, %v13135_v7 }
 0x26c   : > { %v13820_v18 = vpop.f32.mrf.mxu1 }
 0x26d   : > { %18402 = vst [vmem:[#allocation16_spill] sm:$0xff] %v16329_v44  ;;  %v3848_v53 = vadd.f32 %v13801_v9, %v13137_v8  ;;  %v401_v9 = vsel %vm15826_vm8, 0, %v400_v28 }
 0x26e   : > { %v5487_v48 = vpop.f32.mrf.mxu1  ;;  %402 = vst [vmem:[#allocation2 + $0x78] sm:$0x1] %v401_v9 }
 0x26f   : > { %v16332_v55 = vadd.f32 %v3848_v53, %v2149_v63 }
 0x270   : > { %v13821_v10 = vpop.f32.mrf.mxu1 }
 0x271   : > { %18404 = vst [vmem:[#allocation26_spill] sm:$0xff] %v16332_v55 }
 0x272   : > { %v5490_v16 = vpop.f32.mrf.mxu1 }
 0x273   : > { %v13178_v42 = vpop.f32.mrf.mxu0 }
 0x275   : > { %v13179_v17 = vpop.f32.mrf.mxu0 }
 0x276   : > { %v13180_v41 = vadd.f32 %v13179_v17, %v13178_v42  ;;  %v16356_v17 = vpop.f32.mrf.mxu1 }
 0x277   : > { %v13181_v12 = vpop.f32.mrf.mxu0 }
 0x278   : > { %v5488_v43 = vadd.f32 %v13180_v41, %v5487_v48 }
 0x279   : > { %v13182_v29 = vpop.f32.mrf.mxu0 }
 0x27a   : > { %v5646_v34 = vadd.f32 %v5488_v43, %v16135_v46  ;;  %v13183_v36 = vadd.f32 %v13182_v29, %v13181_v12  ;;  %v457_v46 = vsel %vm15834_vm10, 0, %v456_v5 }
 0x27b   : > { %458 = vst [vmem:[#allocation2 + $0x80] sm:$0x1] %v457_v46 }
 0x27c   : > { %v5749_v7 = vmul.f32 %v16341_v51, %v5646_v34  ;;  %v5491_v60 = vadd.f32 %v13183_v36, %v5490_v16  ;;  %v5503_v16 = vpop.f32.mrf.mxu1 }
 0x27e   : > { %v5788_v4 = vadd.f32 %v16347_v56, %v5749_v7  ;;  %v5647_v49 = vadd.f32 %v5491_v60, %v16145_v37 }
 0x280   : > { %v5820_v1 = vmax.f32 %v5788_v4, 0.0  ;;  %v5750_v30 = vmul.f32 %v16341_v51, %v5647_v49  ;;  %v6305_v4 = vld [vmem:[#allocation2 + $0xc] sm:$0xf] }
 0x282   : > { %v5852_v63 = vmin.f32 %v5820_v1, 20.0  ;;  %v5789_v53 = vadd.f32 %v16347_v56, %v5750_v30  ;;  %v403_v1 = vld [vmem:[#allocation2 + $0x84] sm:$0x1] }
 0x284   : > { %v13184_v8 = vpop.f32.mrf.mxu0  ;;  %v12857_v32 = vpack.c.bf16 %v5852_v63, %v5852_v63  ;;  %v5821_v42 = vmax.f32 %v5789_v53, 0.0  ;;  %v404_v53 = vsel %vm15826_vm8, 0, %v403_v1 }
 0x285   : > { %405 = vst [vmem:[#allocation2 + $0x84] sm:$0x1] %v404_v53 }
 0x286   : > { %v13185_v19 = vpop.f32.mrf.mxu0  ;;  %v5983_v41 = vshrl.u32 %v12857_v32, 16  ;;  %v5853_v28 = vmin.f32 %v5821_v42, 20.0  ;;  %v5986_v34 = vshll.u32 %v12857_v32, 16  ;;  %v16371_v42 = vpop.f32.mrf.mxu1 }
 0x287   : > { %v13186_v25 = vadd.f32 %v13185_v19, %v13184_v8 }
 0x288   : > { %v13187_v48 = vpop.f32.mrf.mxu0  ;;  %v5985_v29 = vrot.slane %v5983_v41, 7  ;;  %v12858_v36 = vpack.c.bf16 %v5853_v28, %v5853_v28 }
 0x289   : > { %v5496_v37 = vadd.f32 %v13820_v18, %v13186_v25 }
 0x28a   : > { %v13188_v12 = vpop.f32.mrf.mxu0  ;;  %v5988_v30 = vor.u32 %v5986_v34, %v5985_v29  ;;  %v5991_v8 = vshrl.u32 %v12858_v36, 16  ;;  %v5994_v32 = vshll.u32 %v12858_v36, 16 }
 0x28b   : > { %v5648_v9 = vadd.f32 %v5496_v37, %v16127_v22  ;;  %v13189_v43 = vadd.f32 %v13188_v12, %v13187_v48  ;;  %v5989_v12 = vrot.slane %v5985_v29, 4 }
 0x28c   : > { %v13190_v7 = vpop.f32.mrf.mxu0  ;;  %v6306_v19 = vsel %vm16360_vm12, %v5988_v30, %v6305_v4  ;;  %v5993_v25 = vrot.slane %v5991_v8, 7  ;;  %v5506_v30 = vpop.f32.mrf.mxu1 }
 0x28d   : > { %v5751_v18 = vmul.f32 %v16341_v51, %v5648_v9  ;;  %v5499_v49 = vadd.f32 %v13821_v10, %v13189_v43  ;;  %6307 = vst [vmem:[#allocation2 + $0xc] sm:$0xf] %v6306_v19 }
 0x28e   : > { %v13191_v22 = vpop.f32.mrf.mxu0  ;;  %v5996_v9 = vor.u32 %v5994_v32, %v5993_v25  ;;  %v5998_v43 = vrot.slane %v5993_v25, 4 }
 0x28f   : > { %v5790_v5 = vadd.f32 %v16347_v56, %v5751_v18  ;;  %v5649_v46 = vadd.f32 %v5499_v49, %v16139_v21  ;;  %v13192_v63 = vadd.f32 %v13191_v22, %v13190_v7  ;;  %v6309_v21 = vld [vmem:[#allocation2 + $0x14] sm:$0x1] }
 0x290   : > { %v13193_v10 = vpop.f32.mrf.mxu0  ;;  %v5997_v49 = vsel %vm16374_vm14, %v5989_v12, %v5996_v9  ;;  %v6310_v1 = vsel %vm15826_vm8, %v5998_v43, %v6309_v21  ;;  %v16391_v9 = vpop.f32.mrf.mxu1 }
 0x291   : > { %v5822_v37 = vmax.f32 %v5790_v5, 0.0  ;;  %v5752_v41 = vmul.f32 %v16341_v51, %v5649_v46  ;;  %v5504_v28 = vadd.f32 %v13192_v63, %v5503_v16  ;;  %6308 = vst [vmem:[#allocation2 + $0x10] sm:$0xf] %v5997_v49  ;;  %6311 = vst [vmem:[#allocation2 + $0x14] sm:$0x1] %v6310_v1 }
 0x292   : > { %v13194_v34 = vpop.f32.mrf.mxu0 }
 0x293   : > { %v5854_v36 = vmin.f32 %v5822_v37, 20.0  ;;  %v5791_v7 = vadd.f32 %v16347_v56, %v5752_v41  ;;  %v5650_v4 = vadd.f32 %v5504_v28, %v16165_v0  ;;  %v13195_v18 = vadd.f32 %v13194_v34, %v13193_v10  ;;  %v14362_v34 = vld [vmem:[#allocation8 + $0x168] sm:$0xff]  }
 0x294   : > { %v13196_v8 = vpop.f32.mrf.mxu0  ;;  %v16387_v19 = vld [vmem:[#allocation2 + $0xc] sm:$0xe]  ;;  %13902 = vmatprep.subr.bf16.mxu1 %v14362_v34 }
 0x295   : > { %v12859_v29 = vpack.c.bf16 %v5854_v36, %v5854_v36  ;;  %v5823_v16 = vmax.f32 %v5791_v7, 0.0  ;;  %v5753_v22 = vmul.f32 %v16341_v51, %v5650_v4  ;;  %v5507_v5 = vadd.f32 %v13195_v18, %v5506_v30  ;;  %v8115_v21 = vld [vmem:[#allocation2 + $0xc] sm:$0xf]  ;;  %v6312_v36 = vld [vmem:[#allocation2 + $0x18] sm:$0xf]  ;;  %13903 = vmatpush3.bf16.msra.mxu1 %v14362_v34 }
 0x296   : > { %v13197_v46 = vpop.f32.mrf.mxu0  ;;  %8147 = vst [vmem:[#allocation3] sm:$0xf] %v8115_v21  ;;  %v16393_v43 = vld [vmem:[#allocation2 + $0xc] sm:$0xf] }
 0x297   : > { %v6000_v63 = vshrl.u32 %v12859_v29, 16  ;;  %v5855_v53 = vmin.f32 %v5823_v16, 20.0  ;;  %v5792_v0 = vadd.f32 %v16347_v56, %v5753_v22  ;;  %v5651_v25 = vadd.f32 %v5507_v5, %v16171_v27  ;;  %v6419_v1 = vld [vmem:[#allocation2 + $0xc] sm:$0xf] }
 0x298   : > { %v13198_v32 = vadd.f32 %v13197_v46, %v13196_v8  ;;  %v13199_v10 = vpop.f32.mrf.mxu0  ;;  %v6003_v28 = vshll.u32 %v12859_v29, 16  ;;  %v8228_v49 = vshrl.u32 %v16393_v43, 16  ;;  %v8231_v16 = vshll.u32 %v16393_v43, 16  ;;  %6451 = vst [vmem:[#allocation3 + $0x18] sm:$0xf] %v6419_v1 }
 0x299   : > { %v6002_v41 = vrot.slane %v6000_v63, 7  ;;  %v12860_v12 = vpack.c.bf16 %v5855_v53, %v5855_v53  ;;  %v5824_v7 = vmax.f32 %v5792_v0, 0.0  ;;  %v5754_v4 = vmul.f32 %v16341_v51, %v5651_v25  ;;  %v16399_v22 = vld [vmem:[#allocation2 + $0x10] sm:$0xf]  ;;  %v16403_v46 = vld [vmem:[#allocation2 + $0x14] sm:$0x1] }
 0x29a   : > { %v5512_v27 = vadd.f32 %v16356_v17, %v13198_v32  ;;  %v13200_v18 = vpop.f32.mrf.mxu0  ;;  %v16401_v5 = vld [vmem:[#allocation2 + $0x10] sm:$0xf]  ;;  %v6567_v25 = vshrl.u32 %v16399_v22, 16  ;;  %v8230_v34 = vrot.slane %v8228_v49, 4 }
 0x29b   : > { %v6005_v30 = vor.u32 %v6003_v28, %v6002_v41  ;;  %v6006_v8 = vrot.slane %v6002_v41, 4  ;;  %v6008_v29 = vshrl.u32 %v12860_v12, 16  ;;  %v5793_v63 = vadd.f32 %v16347_v56, %v5754_v4  ;;  %v5519_v28 = vpop.f32.mrf.mxu1  ;;  %v8116_v43 = vld [vmem:[#allocation2 + $0x10] sm:$0xf] }
 0x29c   : > { %v5652_v17 = vadd.f32 %v5512_v27, %v16157_v3  ;;  %v13201_v53 = vadd.f32 %v13200_v18, %v13199_v10  ;;  %v13202_v0 = vpop.f32.mrf.mxu0  ;;  %v6011_v41 = vshll.u32 %v12860_v12, 16  ;;  %v5856_v37 = vmin.f32 %v5824_v7, 20.0  ;;  %8148 = vst [vmem:[#allocation3 + $0xc] sm:$0xf] %v8116_v43  ;;  %v6316_v27 = vld [vmem:[#allocation2 + $0x20] sm:$0x1] }
 0x29d   : > { %v6313_v21 = vsel %vm16360_vm12, %v6005_v30, %v6312_v36  ;;  %v6010_v1 = vrot.slane %v6008_v29, 7  ;;  %v5825_v55 = vmax.f32 %v5793_v63, 0.0  ;;  %v16412_v10 = vrot.slane %v6567_v25, 4  ;;  %v6420_v29 = vld [vmem:[#allocation2 + $0x10] sm:$0xf] }
 0x29e   : > { %6314 = vst [vmem:[#allocation2 + $0x18] sm:$0xf] %v6313_v21  ;;  %v5755_v4 = vmul.f32 %v16341_v51, %v5652_v17  ;;  %v13203_v3 = vpop.f32.mrf.mxu0  ;;  %v5515_v18 = vadd.f32 %v16371_v42, %v13201_v53  ;;  %v12861_v30 = vpack.c.bf16 %v5856_v37, %v5856_v37  ;;  %v16418_v17 = vpop.f32.mrf.mxu1  ;;  %v16420_v43 = vld [vmem:[#allocation2 + $0x10] sm:$0xf]  ;;  %6452 = vst [vmem:[#allocation3 + $0x24] sm:$0xf] %v6420_v29 }
 0x29f   : > { %v13204_v32 = vadd.f32 %v13203_v3, %v13202_v0  ;;  %v6013_v36 = vor.u32 %v6011_v41, %v6010_v1  ;;  %v6015_v12 = vrot.slane %v6010_v1, 4  ;;  %v5857_v44 = vmin.f32 %v5825_v55, 20.0 }
 0x2a0   : > { %v13205_v21 = vpop.f32.mrf.mxu0  ;;  %v5794_v7 = vadd.f32 %v16347_v56, %v5755_v4  ;;  %v5653_v63 = vadd.f32 %v5515_v18, %v16169_v6  ;;  %v6017_v55 = vshrl.u32 %v12861_v30, 16  ;;  %v6020_v53 = vshll.u32 %v12861_v30, 16  ;;  %v6319_v18 = vld [vmem:[#allocation2 + $0x24] sm:$0xf]  ;;  %v5522_v29 = vpop.f32.mrf.mxu1 }
 0x2a1   : > { %v5520_v25 = vadd.f32 %v13204_v32, %v5519_v28  ;;  %v6014_v42 = vsel %vm16374_vm14, %v6006_v8, %v6013_v36  ;;  %v6317_v37 = vsel %vm15826_vm8, %v6015_v12, %v6316_v27  ;;  %v12862_v41 = vpack.c.bf16 %v5857_v44, %v5857_v44 }
 0x2a2   : > { %v13206_v0 = vpop.f32.mrf.mxu0  ;;  %6315 = vst [vmem:[#allocation2 + $0x1c] sm:$0xf] %v6014_v42  ;;  %6318 = vst [vmem:[#allocation2 + $0x20] sm:$0x1] %v6317_v37  ;;  %v5826_v6 = vmax.f32 %v5794_v7, 0.0  ;;  %v5756_v1 = vmul.f32 %v16341_v51, %v5653_v63  ;;  %v6019_v28 = vrot.slane %v6017_v55, 7 }
 0x2a3   : > { %v5654_v32 = vadd.f32 %v5520_v25, %v16191_v13  ;;  %v13207_v49 = vadd.f32 %v13206_v0, %v13205_v21  ;;  %v8233_v3 = vrot.slane %v8231_v16, 5  ;;  %v8237_v8 = vshll.u32 %v16420_v43, 16 }
 0x2a4   : > { %v13208_v4 = vpop.f32.mrf.mxu0  ;;  %v6025_v36 = vshrl.u32 %v12862_v41, 16  ;;  %v6028_v27 = vshll.u32 %v12862_v41, 16  ;;  %v5858_v12 = vmin.f32 %v5826_v6, 20.0  ;;  %v5795_v30 = vadd.f32 %v16347_v56, %v5756_v1 }
 0x2a5   : > { %v6022_v42 = vor.u32 %v6020_v53, %v6019_v28  ;;  %v6023_v44 = vrot.slane %v6019_v28, 4  ;;  %v5757_v7 = vmul.f32 %v16341_v51, %v5654_v32  ;;  %v5523_v63 = vadd.f32 %v13207_v49, %v5522_v29  ;;  %v6421_v16 = vld [vmem:[#allocation2 + $0x18] sm:$0xf] }
 0x2a6   : > { %v13209_v37 = vpop.f32.mrf.mxu0  ;;  %v6027_v13 = vrot.slane %v6025_v36, 7  ;;  %v12863_v25 = vpack.c.bf16 %v5858_v12, %v5858_v12  ;;  %v5827_v21 = vmax.f32 %v5795_v30, 0.0  ;;  %v8234_v53 = vor.u32 %v8233_v3, %v8230_v34  ;;  %6453 = vst [vmem:[#allocation3 + $0x30] sm:$0xf] %v6421_v16 }
 0x2a7   : > { %v13210_v55 = vadd.f32 %v13209_v37, %v13208_v4  ;;  %v6320_v0 = vsel %vm16360_vm12, %v6022_v42, %v6319_v18  ;;  %v5796_v41 = vadd.f32 %v16347_v56, %v5757_v7  ;;  %v5655_v6 = vadd.f32 %v5523_v63, %v16201_v33 }
 0x2a8   : > { %v13211_v1 = vpop.f32.mrf.mxu0  ;;  %6321 = vst [vmem:[#allocation2 + $0x24] sm:$0xf] %v6320_v0  ;;  %v6030_v32 = vor.u32 %v6028_v27, %v6027_v13  ;;  %v6032_v28 = vrot.slane %v6027_v13, 4  ;;  %v6034_v49 = vshrl.u32 %v12863_v25, 16  ;;  %v6037_v36 = vshll.u32 %v12863_v25, 16 }
 0x2a9   : > { %v5859_v12 = vmin.f32 %v5827_v21, 20.0  ;;  %v5828_v30 = vmax.f32 %v5796_v41, 0.0  ;;  %v5758_v4 = vmul.f32 %v16341_v51, %v5655_v6  ;;  %v5528_v29 = vadd.f32 %v16391_v9, %v13210_v55  ;;  %v6326_v27 = vld [vmem:[#allocation2 + $0x30] sm:$0xf]  ;;  %v8181_v55 = vld [vmem:[#allocation2 + $0x14] sm:$0x1] }
 0x2aa   : > { %v13212_v18 = vpop.f32.mrf.mxu0  ;;  %v6031_v42 = vsel %vm16374_vm14, %v6023_v44, %v6030_v32  ;;  %v6324_v33 = vsel %vm15826_vm8, %v6032_v28, %v6323_v61  ;;  %v6036_v34 = vrot.slane %v6034_v49, 7  ;;  %v8235_v3 = vrot.slane %v8234_v53, 4  ;;  %v6422_v53 = vld [vmem:[#allocation2 + $0x1c] sm:$0xf] }
 0x2ab   : > { %6322 = vst [vmem:[#allocation2 + $0x28] sm:$0xf] %v6031_v42  ;;  %6325 = vst [vmem:[#allocation2 + $0x2c] sm:$0x1] %v6324_v33  ;;  %v12864_v7 = vpack.c.bf16 %v5859_v12, %v5859_v12  ;;  %v5860_v63 = vmin.f32 %v5828_v30, 20.0  ;;  %v5797_v37 = vadd.f32 %v16347_v56, %v5758_v4  ;;  %v5656_v13 = vadd.f32 %v5528_v29, %v16185_v35 }
 0x2ac   : > { %v13214_v25 = vpop.f32.mrf.mxu0  ;;  %v6039_v9 = vor.u32 %v6037_v36, %v6036_v34  ;;  %v6040_v21 = vrot.slane %v6036_v34, 4  ;;  %v8239_v16 = vrot.slane %v8237_v8, 5  ;;  %v8241_v44 = vshrl.u32 %v16420_v43, 16  ;;  %6454 = vst [vmem:[#allocation3 + $0x3c] sm:$0xf] %v6422_v53 }
 0x2ad   : > { %v6042_v0 = vshrl.u32 %v12864_v7, 16  ;;  %v6045_v61 = vshll.u32 %v12864_v7, 16  ;;  %v12865_v41 = vpack.c.bf16 %v5860_v63, %v5860_v63  ;;  %v5829_v6 = vmax.f32 %v5797_v37, 0.0  ;;  %v6330_v4 = vld [vmem:[#allocation2 + $0x38] sm:$0x1] }
 0x2ae   : > { %v6327_v32 = vsel %vm16360_vm12, %v6039_v9, %v6326_v27  ;;  %v5759_v28 = vmul.f32 %v16341_v51, %v5656_v13  ;;  %v8240_v35 = vsel %vm14971_vm5, %v8235_v3, %v8239_v16  ;;  %v8243_v49 = vrot.slane %v8241_v44, 4  ;;  %v13215_v30 = vpop.f32.mrf.mxu0  ;;  %v6333_v44 = vld [vmem:[#allocation2 + $0x3c] sm:$0xf] }
 0x2af   : > { %6328 = vst [vmem:[#allocation2 + $0x30] sm:$0xf] %v6327_v32  ;;  %v6044_v36 = vrot.slane %v6042_v0, 7  ;;  %v6051_v8 = vshrl.u32 %v12865_v41, 16  ;;  %v6054_v12 = vshll.u32 %v12865_v41, 16  ;;  %v5861_v43 = vmin.f32 %v5829_v6, 20.0  ;;  %v16452_v6 = vpop.f32.mrf.mxu1 }
 0x2b0   : > { %8643 = vst [vmem:[#allocation3 + $0x4] sm:$0xf] %v8240_v35  ;;  %v5798_v29 = vadd.f32 %v16347_v56, %v5759_v28  ;;  %v8244_v42 = vor.u32 %v8243_v49, %v8239_v16  ;;  %v8247_v33 = vshll.u32 %v8181_v55, 16  ;;  %v13213_v34 = vadd.f32 %v13212_v18, %v13211_v1  ;;  %v6423_v3 = vld [vmem:[#allocation2 + $0x24] sm:$0xf] }
 0x2b1   : > { %v6047_v27 = vor.u32 %v6045_v61, %v6044_v36  ;;  %v6049_v7 = vrot.slane %v6044_v36, 4  ;;  %v6053_v63 = vrot.slane %v6051_v8, 7  ;;  %v12866_v37 = vpack.c.bf16 %v5861_v43, %v5861_v43  ;;  %6455 = vst [vmem:[#allocation3 + $0x48] sm:$0xf] %v6423_v3  ;;  %v16459_v61 = vpop.f32.mrf.mxu0  ;;  %v8675_v32 = vld [vmem:[#allocation2 + $0xc] sm:$0xe] }
 0x2b2   : > { %v18409_v13 = vrot.slane %v16401_v5, 5  ;;  %v5830_v0 = vmax.f32 %v5798_v29, 0.0  ;;  %v8245_v41 = vrot.slane %v8244_v42, 4  ;;  %v5531_v53 = vadd.f32 %v16418_v17, %v13213_v34  ;;  %v8676_v28 = vld [vmem:[#allocation2 + $0x10] sm:$0xf] }
 0x2b3   : > { %v6048_v55 = vsel %vm16374_vm14, %v6040_v21, %v6047_v27  ;;  %v6331_v1 = vsel %vm15826_vm8, %v6049_v7, %v6330_v4  ;;  %v6056_v18 = vor.u32 %v6054_v12, %v6053_v63  ;;  %v8249_v16 = vrot.slane %v8247_v33, 5  ;;  %v8677_v17 = vld [vmem:[#allocation2 + $0x14] sm:$0x1]  ;;  %v5535_v33 = vpop.f32.mrf.mxu1  ;;  %v6337_v7 = vld [vmem:[#allocation2 + $0x44] sm:$0x1] }
 0x2b4   : > { %v7084_v9 = vrot.slane %v18409_v13, 4  ;;  %6329 = vst [vmem:[#allocation2 + $0x34] sm:$0xf] %v6048_v55  ;;  %6332 = vst [vmem:[#allocation2 + $0x38] sm:$0x1] %v6331_v1  ;;  %v6057_v35 = vrot.slane %v6053_v63, 4  ;;  %v5657_v12 = vadd.f32 %v5531_v53, %v16199_v11  ;;  %v13216_v4 = vadd.f32 %v13215_v30, %v13214_v25  ;;  %v13218_v25 = vpop.f32.mrf.mxu0 }
 0x2b5   : > { %v6059_v49 = vshrl.u32 %v12866_v37, 16  ;;  %v6062_v36 = vshll.u32 %v12866_v37, 16  ;;  %v5862_v8 = vmin.f32 %v5830_v0, 20.0  ;;  %v6334_v43 = vsel %vm16360_vm12, %v6056_v18, %v6333_v44  ;;  %v6424_v30 = vld [vmem:[#allocation2 + $0x28] sm:$0xf] }
 0x2b6   : > { %v8250_v21 = vsel %vm14971_vm5, %v8245_v41, %v8249_v16  ;;  %6335 = vst [vmem:[#allocation2 + $0x3c] sm:$0xf] %v6334_v43  ;;  %v12673_v34 = vrot.slane %v8675_v32, 9  ;;  %v8773_v27 = vrot.slane %v8676_v28, 5  ;;  %v5760_v63 = vmul.f32 %v16341_v51, %v5657_v12  ;;  %v8678_v18 = vld [vmem:[#allocation2 + $0x18] sm:$0xe] }
 0x2b7   : > { %v6061_v29 = vrot.slane %v6059_v49, 7  ;;  %v12867_v42 = vpack.c.bf16 %v5862_v8, %v5862_v8  ;;  %8644 = vst [vmem:[#allocation3 + $0x10] sm:$0xf] %v8250_v21  ;;  %v5536_v37 = vadd.f32 %v13216_v4, %v5535_v33  ;;  %v8776_v3 = vrot.slane %v8677_v17, 5  ;;  %6456 = vst [vmem:[#allocation3 + $0x54] sm:$0xf] %v6424_v30  ;;  %v16483_v21 = vpop.f32.mrf.mxu1 }
 0x2b8   : > { %v18410_v44 = vrot.slane %v16387_v19, 9  ;;  %v5799_v16 = vadd.f32 %v16347_v56, %v5760_v63  ;;  %v8774_v5 = vsel %vm14960_vm4, %v12673_v34, %v8773_v27  ;;  %v8775_v19 = vrot.slane %v8773_v27, 4  ;;  %v8679_v28 = vld [vmem:[#allocation2 + $0x1c] sm:$0xf]  ;;  %v8680_v49 = vld [vmem:[#allocation2 + $0x20] sm:$0x1]  ;;  %v13220_v34 = vpop.f32.mrf.mxu0 }
 0x2b9   : > { %v6064_v41 = vor.u32 %v6062_v36, %v6061_v29  ;;  %v6066_v53 = vrot.slane %v6061_v29, 4  ;;  %v6068_v55 = vshrl.u32 %v12867_v42, 16  ;;  %v6071_v1 = vshll.u32 %v12867_v42, 16  ;;  %v6484_v8 = vld [vmem:[#allocation2 + $0xc] sm:$0xf] }
 0x2ba   : > { %v7083_v11 = vsel %vm14960_vm4, %v18410_v44, %v18409_v13  ;;  %v5658_v32 = vadd.f32 %v5536_v37, %v16227_v50  ;;  %8915 = vst [vmem:[#allocation3 + $0x8] sm:$0xf] %v8774_v5  ;;  %v18412_v50 = vrot.slane %v16403_v46, 5  ;;  %v6340_v4 = vld [vmem:[#allocation2 + $0x48] sm:$0xf]  ;;  %v5831_v29 = vmax.f32 %v5799_v16, 0.0 }
 0x2bb   : > { %7219 = vst [vmem:[#allocation3 + $0x20] sm:$0xf] %v7083_v11  ;;  %v6065_v36 = vsel %vm16374_vm14, %v6057_v35, %v6064_v41  ;;  %v6338_v17 = vsel %vm15826_vm8, %v6066_v53, %v6337_v7  ;;  %v16481_v43 = vrot.slane %v6068_v55, 7  ;;  %v8777_v35 = vsel %vm14960_vm4, %v8775_v19, %v8776_v3  ;;  %v6486_v11 = vld [vmem:[#allocation2 + $0x14] sm:$0x1]  ;;  %v5538_v41 = vpop.f32.mrf.mxu1 }
 0x2bc   : > { %v7086_v12 = vsel %vm14960_vm4, %v7084_v9, %v18412_v50  ;;  %6336 = vst [vmem:[#allocation2 + $0x40] sm:$0xf] %v6065_v36  ;;  %6339 = vst [vmem:[#allocation2 + $0x44] sm:$0x1] %v6338_v17  ;;  %v5761_v42 = vmul.f32 %v16341_v51, %v5658_v32  ;;  %v12674_v33 = vrot.slane %v8678_v18, 9  ;;  %v8780_v46 = vrot.slane %v8679_v28, 5  ;;  %v13221_v28 = vpop.f32.mrf.mxu0 }
 0x2bd   : > { %7220 = vst [vmem:[#allocation3 + $0x2c] sm:$0xf] %v7086_v12  ;;  %v6073_v27 = vor.u32 %v6071_v1, %v16481_v43  ;;  %v6074_v7 = vrot.slane %v16481_v43, 4  ;;  %8916 = vst [vmem:[#allocation3 + $0x14] sm:$0xf] %v8777_v35  ;;  %v8783_v63 = vrot.slane %v8680_v49, 5  ;;  %v13219_v44 = vadd.f32 %v13218_v25, %v16459_v61 }
 0x2be   : > { %v14369_v9 = vld [vmem:[#allocation8 + $0x160] sm:$0xff]   ;;  %v5863_v37 = vmin.f32 %v5831_v29, 20.0  ;;  %v5800_v13 = vadd.f32 %v16347_v56, %v5761_v42  ;;  %v6554_v30 = vshrl.u32 %v6484_v8, 16  ;;  %v8781_v53 = vsel %vm14960_vm4, %v12674_v33, %v8780_v46  ;;  %v6425_v29 = vld [vmem:[#allocation2 + $0x30] sm:$0xf] }
 0x2bf   : > { %v6341_v3 = vsel %vm16360_vm12, %v6073_v27, %v6340_v4  ;;  %v8782_v55 = vrot.slane %v8780_v46, 4  ;;  %v6557_v1 = vshll.u32 %v6484_v8, 16  ;;  %13904 = vmatprep.subr.bf16.mxu1 %v14369_v9  ;;  %v5539_v32 = vadd.f32 %v13219_v44, %v5538_v41  ;;  %v8182_v19 = vld [vmem:[#allocation2 + $0x18] sm:$0xf]  ;;  %v8183_v17 = vld [vmem:[#allocation2 + $0x1c] sm:$0xf] }
 0x2c0   : > { %6342 = vst [vmem:[#allocation2 + $0x48] sm:$0xf] %v6341_v3  ;;  %v12868_v18 = vpack.c.bf16 %v5863_v37, %v5863_v37  ;;  %v5832_v16 = vmax.f32 %v5800_v13, 0.0  ;;  %v6556_v5 = vrot.slane %v6554_v30, 4  ;;  %13905 = vmatpush3.bf16.msra.mxu1 %v14369_v9  ;;  %v6563_v49 = vshll.u32 %v16399_v22, 16 }
 0x2c1   : > { %v8784_v61 = vsel %vm14960_vm4, %v8782_v55, %v8783_v63  ;;  %v6559_v25 = vrot.slane %v6557_v1, 5  ;;  %v6573_v36 = vshll.u32 %v6486_v11, 16  ;;  %v5659_v4 = vadd.f32 %v5539_v32, %v16236_v59  ;;  %6457 = vst [vmem:[#allocation3 + $0x60] sm:$0xf] %v6425_v29  ;;  %v6344_v37 = vld [vmem:[#allocation2 + $0x50] sm:$0x1] }
 0x2c2   : > { %v6076_v50 = vshrl.u32 %v12868_v18, 16  ;;  %v6079_v12 = vshll.u32 %v12868_v18, 16  ;;  %v5864_v8 = vmin.f32 %v5832_v16, 20.0  ;;  %v6565_v33 = vrot.slane %v6563_v49, 5  ;;  %v6426_v3 = vld [vmem:[#allocation2 + $0x34] sm:$0xf] }
 0x2c3   : > { %v6560_v35 = vor.u32 %v6559_v25, %v6556_v5  ;;  %v6575_v27 = vrot.slane %v6573_v36, 5  ;;  %v13222_v46 = vadd.f32 %v13221_v28, %v13220_v34  ;;  %v5762_v22 = vmul.f32 %v16341_v51, %v5659_v4  ;;  %6458 = vst [vmem:[#allocation3 + $0x6c] sm:$0xf] %v6426_v3  ;;  %v8184_v32 = vld [vmem:[#allocation2 + $0x20] sm:$0x1] }
 0x2c4   : > { %v14349_v42 = vld [vmem:[#allocation3 + $0x20] ss:$12 sps:$4 sm:$0xff]   ;;  %v6078_v9 = vrot.slane %v6076_v50, 7  ;;  %v12869_v63 = vpack.c.bf16 %v5864_v8, %v5864_v8  ;;  %v8252_v13 = vshrl.u32 %v8182_v19, 16  ;;  %v6570_v11 = vor.u32 %v16412_v10, %v6565_v33  ;;  %v13223_v8 = vpop.f32.mrf.mxu0  ;;  %v6984_v4 = vld [vmem:[#allocation2 + $0x1c] sm:$0xf] }
 0x2c5   : > { %8917 = vst [vmem:[#allocation3 + $0x20] sm:$0xf] %v8781_v53  ;;  %8918 = vst [vmem:[#allocation3 + $0x2c] sm:$0xf] %v8784_v61  ;;  %13867 = vmatmul.mubr.bf16.vlgmr.msra.gmra.mxu0 %v14349_v42  ;;  %v6561_v44 = vrot.slane %v6560_v35, 4  ;;  %v8255_v59 = vshll.u32 %v8182_v19, 16  ;;  %v5801_v18 = vadd.f32 %v16347_v56, %v5762_v22 }
 0x2c6   : > { %v8261_v30 = vshll.u32 %v8183_v17, 16  ;;  %v6081_v41 = vor.u32 %v6079_v12, %v6078_v9  ;;  %v6083_v55 = vrot.slane %v6078_v9, 4  ;;  %v6085_v1 = vshrl.u32 %v12869_v63, 16  ;;  %v6347_v61 = vld [vmem:[#allocation2 + $0x54] sm:$0xf] }
 0x2c7   : > { %v6088_v34 = vshll.u32 %v12869_v63, 16  ;;  %v6566_v53 = vsel %vm14971_vm5, %v6561_v44, %v6565_v33  ;;  %v6571_v16 = vrot.slane %v6570_v11, 4  ;;  %v8254_v5 = vrot.slane %v8252_v13, 4  ;;  %v6983_v49 = vld [vmem:[#allocation2 + $0x18] sm:$0xe] }
 0x2c8   : > { %v6082_v10 = vsel %vm16374_vm14, %v6074_v7, %v6081_v41  ;;  %v6345_v19 = vsel %vm15826_vm8, %v6083_v55, %v6344_v37  ;;  %v16515_v28 = vrot.slane %v6085_v1, 7  ;;  %6947 = vst [vmem:[#allocation3 + $0x1c] sm:$0xf] %v6566_v53  ;;  %v8257_v25 = vrot.slane %v8255_v59, 5  ;;  %v6985_v33 = vld [vmem:[#allocation2 + $0x20] sm:$0x1] }
 0x2c9   : > { %6343 = vst [vmem:[#allocation2 + $0x4c] sm:$0xf] %v6082_v10  ;;  %6346 = vst [vmem:[#allocation2 + $0x50] sm:$0x1] %v6345_v19  ;;  %v5833_v36 = vmax.f32 %v5801_v18, 0.0  ;;  %v6576_v50 = vsel %vm14971_vm5, %v6571_v16, %v6575_v27  ;;  %v8263_v12 = vrot.slane %v8261_v30, 5  ;;  %v5544_v63 = vadd.f32 %v16452_v6, %v13222_v46  ;;  %v13224_v18 = vpop.f32.mrf.mxu0 }
 0x2ca   : > { %v8265_v43 = vshrl.u32 %v8183_v17, 16  ;;  %v6090_v7 = vor.u32 %v6088_v34, %v16515_v28  ;;  %v6091_v29 = vrot.slane %v16515_v28, 4  ;;  %6948 = vst [vmem:[#allocation3 + $0x28] sm:$0xf] %v6576_v50  ;;  %v8258_v42 = vor.u32 %v8257_v25, %v8254_v5  ;;  %v8681_v13 = vld [vmem:[#allocation2 + $0x24] sm:$0xe] }
 0x2cb   : > { %v8271_v35 = vshll.u32 %v8184_v32, 16  ;;  %v5865_v9 = vmin.f32 %v5833_v36, 20.0  ;;  %v12587_v22 = vrot.slane %v6983_v49, 9  ;;  %v7089_v11 = vrot.slane %v6984_v4, 5  ;;  %v16524_v59 = vld [vmem:[#allocation2 + $0x18] sm:$0xf] }
 0x2cc   : > { %v8267_v37 = vrot.slane %v8265_v43, 4  ;;  %v6348_v27 = vsel %vm16360_vm12, %v6090_v7, %v6347_v61  ;;  %v8259_v17 = vrot.slane %v8258_v42, 4  ;;  %v5660_v41 = vadd.f32 %v5544_v63, %v16220_v40  ;;  %v8682_v1 = vld [vmem:[#allocation2 + $0x28] sm:$0xf]  ;;  %v8683_v34 = vld [vmem:[#allocation2 + $0x2c] sm:$0x1]  ;;  %v16537_v63 = vpop.f32.mrf.mxu0 }
 0x2cd   : > { %v8273_v44 = vrot.slane %v8271_v35, 5  ;;  %6349 = vst [vmem:[#allocation2 + $0x54] sm:$0xf] %v6348_v27  ;;  %v12870_v30 = vpack.c.bf16 %v5865_v9, %v5865_v9  ;;  %v7092_v55 = vrot.slane %v6985_v33, 5  ;;  %v7090_v46 = vsel %vm14960_vm4, %v12587_v22, %v7089_v11  ;;  %v6427_v32 = vld [vmem:[#allocation2 + $0x3c] sm:$0xf] }
 0x2ce   : > { %v8268_v3 = vor.u32 %v8267_v37, %v8263_v12  ;;  %v8264_v6 = vsel %vm14971_vm5, %v8259_v17, %v8263_v12  ;;  %v7091_v53 = vrot.slane %v7089_v11, 4  ;;  %v12675_v16 = vrot.slane %v8681_v13, 9  ;;  %v6428_v5 = vld [vmem:[#allocation2 + $0x40] sm:$0xf]  ;;  %v8117_v61 = vld [vmem:[#allocation2 + $0x18] sm:$0xf] }
 0x2cf   : > { %v6093_v10 = vshrl.u32 %v12870_v30, 16  ;;  %v6096_v19 = vshll.u32 %v12870_v30, 16  ;;  %v5763_v40 = vmul.f32 %v16341_v51, %v5660_v41  ;;  %7221 = vst [vmem:[#allocation3 + $0x38] sm:$0xf] %v7090_v46  ;;  %6459 = vst [vmem:[#allocation3 + $0x78] sm:$0xf] %v6427_v32  ;;  %v13225_v43 = vadd.f32 %v13224_v18, %v13223_v8 }
 0x2d0   : > { %v8269_v25 = vrot.slane %v8268_v3, 4  ;;  %6460 = vst [vmem:[#allocation3 + $0x84] sm:$0xf] %v6428_v5  ;;  %v8118_v49 = vld [vmem:[#allocation2 + $0x1c] sm:$0xf]  ;;  %v7093_v36 = vsel %vm14960_vm4, %v7091_v53, %v7092_v55  ;;  %v8787_v50 = vrot.slane %v8682_v1, 5 }
 0x2d1   : > { %v8790_v12 = vrot.slane %v8683_v34, 5  ;;  %v6488_v4 = vld [vmem:[#allocation2 + $0x1c] sm:$0xf]  ;;  %v6095_v7 = vrot.slane %v6093_v10, 7  ;;  %v7253_v42 = vld [vmem:[#allocation3 + $0x18] sm:$0xff]  ;;  %v5802_v37 = vadd.f32 %v16347_v56, %v5763_v40  ;;  %v6578_v22 = vshrl.u32 %v16524_v59, 16  ;;  %v13227_v10 = vpop.f32.mrf.mxu0 }
 0x2d2   : > { %v7255_v35 = vld [vmem:[#allocation3 + $0x24] sm:$0xff]  ;;  %v8274_v9 = vsel %vm14971_vm5, %v8269_v25, %v8273_v44  ;;  %7222 = vst [vmem:[#allocation3 + $0x44] sm:$0xf] %v7093_v36  ;;  %8149 = vst [vmem:[#allocation3 + $0x18] sm:$0xf] %v8117_v61  ;;  %v8788_v27 = vsel %vm14960_vm4, %v12675_v16, %v8787_v50  ;;  %v8789_v17 = vrot.slane %v8787_v50, 4  ;;  %v5547_v11 = vadd.f32 %v16483_v21, %v13225_v43 }
 0x2d3   : > { %v14350_v33 = vld [vmem:[#allocation3 + $0x1c] ss:$12 sps:$4 sm:$0xff]   ;;  %v6351_v13 = vld [vmem:[#allocation2 + $0x5c] sm:$0x1]  ;;  %8150 = vst [vmem:[#allocation3 + $0x24] sm:$0xf] %v8118_v49  ;;  %v12604_v8 = vcombine.low %v7253_v42, %v7255_v35  ;;  %v6098_v44 = vor.u32 %v6096_v19, %v6095_v7 }
 0x2d4   : > { %8645 = vst [vmem:[#allocation3 + $0x1c] sm:$0xf] %v8264_v6  ;;  %8646 = vst [vmem:[#allocation3 + $0x28] sm:$0xf] %v8274_v9  ;;  %v6100_v30 = vrot.slane %v6095_v7, 4  ;;  %7801 = vmatprep.mubr.bf16.mxu1 %v14350_v33  ;;  %v5834_v3 = vmax.f32 %v5802_v37, 0.0  ;;  %v8791_v1 = vsel %vm14960_vm4, %v8789_v17, %v8790_v12  ;;  %v5661_v34 = vadd.f32 %v5547_v11, %v16234_v2  ;;  %v16557_v9 = vpop.f32.mrf.mxu0 }
 0x2d5   : > { %v6489_v41 = vld [vmem:[#allocation2 + $0x20] sm:$0x1]  ;;  %v6580_v55 = vrot.slane %v6578_v22, 4  ;;  %7802 = vmatmul.mubr.bf16.gmra.mxu1 %v12604_v8  ;;  %v6581_v18 = vshll.u32 %v16524_v59, 16  ;;  %v6587_v6 = vshll.u32 %v6488_v4, 16  ;;  %v6099_v21 = vsel %vm16374_vm14, %v6091_v29, %v6098_v44  ;;  %v16554_v29 = vpop.f32.mrf.mxu1 }
 0x2d6   : > { %v8185_v46 = vld [vmem:[#allocation2 + $0x24] sm:$0xf]  ;;  %v6352_v53 = vsel %vm15826_vm8, %v6100_v30, %v6351_v13  ;;  %v5866_v16 = vmin.f32 %v5834_v3, 20.0  ;;  %v6591_v32 = vshrl.u32 %v6488_v4, 16  ;;  %v8186_v5 = vld [vmem:[#allocation2 + $0x28] sm:$0xf]  ;;  %v5764_v2 = vmul.f32 %v16341_v51, %v5661_v34 }
 0x2d7   : > { %6350 = vst [vmem:[#allocation2 + $0x58] sm:$0xf] %v6099_v21  ;;  %6353 = vst [vmem:[#allocation2 + $0x5c] sm:$0x1] %v6352_v53  ;;  %v6583_v19 = vrot.slane %v6581_v18, 5  ;;  %v6589_v59 = vrot.slane %v6587_v6, 5  ;;  %v13228_v34 = vadd.f32 %v13227_v10, %v16537_v63 }
 0x2d8   : > { %v6597_v61 = vshll.u32 %v6489_v41, 16  ;;  %v12871_v25 = vpack.c.bf16 %v5866_v16, %v5866_v16  ;;  %v6593_v40 = vrot.slane %v6591_v32, 4  ;;  %v8187_v28 = vld [vmem:[#allocation2 + $0x2c] sm:$0x1]  ;;  %v8276_v49 = vshrl.u32 %v8185_v46, 16  ;;  %v13230_v32 = vpop.f32.mrf.mxu0 }
 0x2d9   : > { %v8279_v36 = vshll.u32 %v8185_v46, 16  ;;  %v14352_v50 = vld [vmem:[#allocation3 + $0x38] ss:$12 sps:$4 sm:$0xff]   ;;  %v5803_v12 = vadd.f32 %v16347_v56, %v5764_v2  ;;  %v6584_v43 = vor.u32 %v6583_v19, %v6580_v55  ;;  %v8285_v7 = vshll.u32 %v8186_v5, 16  ;;  %v6354_v37 = vld [vmem:[#allocation2 + $0x60] sm:$0xf] }
 0x2da   : > { %v6599_v4 = vrot.slane %v6597_v61, 5  ;;  %v6102_v42 = vshrl.u32 %v12871_v25, 16  ;;  %v6105_v35 = vshll.u32 %v12871_v25, 16  ;;  %8919 = vst [vmem:[#allocation3 + $0x38] sm:$0xf] %v8788_v27  ;;  %v6594_v51 = vor.u32 %v6593_v40, %v6589_v59  ;;  %13870 = vmatprep.mubr.bf16.mxu0 %v14352_v50  ;;  %v5551_v27 = vpop.f32.mrf.mxu1 }
 0x2db   : > { %8920 = vst [vmem:[#allocation3 + $0x44] sm:$0xf] %v8791_v1  ;;  %v8278_v33 = vrot.slane %v8276_v49, 4  ;;  %v5835_v22 = vmax.f32 %v5803_v12, 0.0  ;;  %v6585_v13 = vrot.slane %v6584_v43, 4  ;;  %v8281_v8 = vrot.slane %v8279_v36, 5 }
 0x2dc   : > { %v16559_v17 = vrot.slane %v8285_v7, 5  ;;  %v16561_v11 = vrot.slane %v6102_v42, 7  ;;  %v6595_v56 = vrot.slane %v6594_v51, 4  ;;  %v8289_v44 = vshrl.u32 %v8186_v5, 16  ;;  %v6986_v3 = vld [vmem:[#allocation2 + $0x24] sm:$0xe]  ;;  %v16573_v43 = vpop.f32.mrf.mxu1 }
 0x2dd   : > { %v8295_v30 = vshll.u32 %v8187_v28, 16  ;;  %v5867_v41 = vmin.f32 %v5835_v22, 20.0  ;;  %v6590_v55 = vsel %vm14971_vm5, %v6585_v13, %v6589_v59  ;;  %v8282_v1 = vor.u32 %v8281_v8, %v8278_v33  ;;  %v6987_v18 = vld [vmem:[#allocation2 + $0x28] sm:$0xf]  ;;  %v6988_v61 = vld [vmem:[#allocation2 + $0x2c] sm:$0x1]  ;;  %v16581_v13 = vpop.f32.mrf.mxu0 }
 0x2de   : > { %v6429_v6 = vld [vmem:[#allocation2 + $0x48] sm:$0xf]  ;;  %v6107_v46 = vor.u32 %v6105_v35, %v16561_v11  ;;  %v6108_v21 = vrot.slane %v16561_v11, 4  ;;  %v6600_v53 = vsel %vm14971_vm5, %v6595_v56, %v6599_v4  ;;  %6949 = vst [vmem:[#allocation3 + $0x34] sm:$0xf] %v6590_v55  ;;  %v8291_v16 = vrot.slane %v8289_v44, 4 }
 0x2df   : > { %6461 = vst [vmem:[#allocation3 + $0x90] sm:$0xf] %v6429_v6  ;;  %v12872_v5 = vpack.c.bf16 %v5867_v41, %v5867_v41  ;;  %6950 = vst [vmem:[#allocation3 + $0x40] sm:$0xf] %v6600_v53  ;;  %v8283_v2 = vrot.slane %v8282_v1, 4  ;;  %v8297_v19 = vrot.slane %v8295_v30, 5  ;;  %v5552_v59 = vadd.f32 %v13228_v34, %v5551_v27 }
 0x2e0   : > { %v6430_v63 = vld [vmem:[#allocation2 + $0x4c] sm:$0xf]  ;;  %v6355_v10 = vsel %vm16360_vm12, %v6107_v46, %v6354_v37  ;;  %v8292_v25 = vor.u32 %v8291_v16, %v16559_v17  ;;  %v12588_v40 = vrot.slane %v6986_v3, 9  ;;  %v7096_v28 = vrot.slane %v6987_v18, 5  ;;  %v8684_v49 = vld [vmem:[#allocation2 + $0x30] sm:$0xe] }
 0x2e1   : > { %v8685_v36 = vld [vmem:[#allocation2 + $0x34] sm:$0xf]  ;;  %6462 = vst [vmem:[#allocation3 + $0x9c] sm:$0xf] %v6430_v63  ;;  %6356 = vst [vmem:[#allocation2 + $0x60] sm:$0xf] %v6355_v10  ;;  %v8288_v4 = vsel %vm14971_vm5, %v8283_v2, %v16559_v17  ;;  %v5662_v7 = vadd.f32 %v5552_v59, %v16258_v15  ;;  %v13231_v34 = vadd.f32 %v13230_v32, %v16557_v9 }
 0x2e2   : > { %v6110_v50 = vshrl.u32 %v12872_v5, 16  ;;  %v6113_v12 = vshll.u32 %v12872_v5, 16  ;;  %v8686_v42 = vld [vmem:[#allocation2 + $0x38] sm:$0x1]  ;;  %v6358_v35 = vld [vmem:[#allocation2 + $0x68] sm:$0x1]  ;;  %v7097_v33 = vsel %vm14960_vm4, %v12588_v40, %v7096_v28  ;;  %v5554_v5 = vpop.f32.mrf.mxu1  ;;  %v13233_v40 = vpop.f32.mrf.mxu0 }
 0x2e3   : > { %v8293_v51 = vrot.slane %v8292_v25, 4  ;;  %v7098_v37 = vrot.slane %v7096_v28, 4  ;;  %v7099_v22 = vrot.slane %v6988_v61, 5  ;;  %v16586_v56 = vld [vmem:[%s18269_s3] ss:$0 sm:$0xff]  ;;  %v12676_v15 = vrot.slane %v8684_v49, 9 }
 0x2e4   : > { %v6112_v8 = vrot.slane %v6110_v50, 7  ;;  %v5765_v17 = vmul.f32 %v16586_v56, %v5662_v7  ;;  %7223 = vst [vmem:[#allocation3 + $0x50] sm:$0xf] %v7097_v33  ;;  %v8794_v44 = vrot.slane %v8685_v36, 5  ;;  %v6490_v30 = vld [vmem:[#allocation2 + $0x24] sm:$0xf]  ;;  %v5555_v32 = vadd.f32 %v13231_v34, %v5554_v5 }
 0x2e5   : > { %v8119_v3 = vld [vmem:[#allocation2 + $0x24] sm:$0xf]  ;;  %v8120_v41 = vld [vmem:[#allocation2 + $0x28] sm:$0xf]  ;;  %v8298_v27 = vsel %vm14971_vm5, %v8293_v51, %v8297_v19  ;;  %v7100_v55 = vsel %vm14960_vm4, %v7098_v37, %v7099_v22  ;;  %v8797_v1 = vrot.slane %v8686_v42, 5  ;;  %v6602_v10 = vshrl.u32 %v6490_v30, 16 }
 0x2e6   : > { %v6115_v18 = vor.u32 %v6113_v12, %v6112_v8  ;;  %v6117_v6 = vrot.slane %v6112_v8, 4  ;;  %v7257_v46 = vld [vmem:[#allocation3 + $0x30] sm:$0xff]  ;;  %v16597_v53 = vld [vmem:[%s18270_s4] ss:$0 sm:$0xff]  ;;  %7224 = vst [vmem:[#allocation3 + $0x5c] sm:$0xf] %v7100_v55  ;;  %v8795_v2 = vsel %vm14960_vm4, %v12676_v15, %v8794_v44  ;;  %v5663_v42 = vadd.f32 %v5555_v32, %v16263_v23 }
 0x2e7   : > { %v5804_v16 = vadd.f32 %v16597_v53, %v5765_v17  ;;  %v6491_v19 = vld [vmem:[#allocation2 + $0x28] sm:$0xf]  ;;  %v6492_v59 = vld [vmem:[#allocation2 + $0x2c] sm:$0x1]  ;;  %v7259_v61 = vld [vmem:[#allocation3 + $0x3c] sm:$0xff]  ;;  %v8796_v9 = vrot.slane %v8794_v44, 4 }
 0x2e8   : > { %v14353_v63 = vld [vmem:[#allocation3 + $0x34] ss:$12 sps:$4 sm:$0xff]   ;;  %v6605_v25 = vshll.u32 %v6490_v30, 16  ;;  %v6116_v28 = vsel %vm16374_vm14, %v6108_v21, %v6115_v18  ;;  %v6359_v49 = vsel %vm15826_vm8, %v6117_v6, %v6358_v35  ;;  %8151 = vst [vmem:[#allocation3 + $0x30] sm:$0xf] %v8119_v3  ;;  %v12607_v50 = vcombine.low %v7257_v46, %v7259_v61  ;;  %v14376_v7 = vld [vmem:[#allocation8 + $0x158] sm:$0xff]  }
 0x2e9   : > { %8152 = vst [vmem:[#allocation3 + $0x3c] sm:$0xf] %v8120_v41  ;;  %8647 = vst [vmem:[#allocation3 + $0x34] sm:$0xf] %v8288_v4  ;;  %v5836_v36 = vmax.f32 %v5804_v16, 0.0  ;;  %7809 = vmatprep.mubr.bf16.mxu1 %v14353_v63  ;;  %v8798_v11 = vsel %vm14960_vm4, %v8796_v9, %v8797_v1  ;;  %v6604_v21 = vrot.slane %v6602_v10, 4  ;;  %13906 = vmatprep.subr.bf16.mxu1 %v14376_v7  ;;  %v16612_v41 = vpop.f32.mrf.mxu0 }
 0x2ea   : > { %8648 = vst [vmem:[#allocation3 + $0x40] sm:$0xf] %v8298_v27  ;;  %v8188_v12 = vld [vmem:[#allocation2 + $0x30] sm:$0xf]  ;;  %6357 = vst [vmem:[#allocation2 + $0x64] sm:$0xf] %v6116_v28  ;;  %7810 = vmatmul.mubr.bf16.gmra.mxu1 %v12607_v50  ;;  %v5766_v17 = vmul.f32 %v16586_v56, %v5663_v42 }
 0x2eb   : > { %6360 = vst [vmem:[#allocation2 + $0x68] sm:$0x1] %v6359_v49  ;;  %v6607_v51 = vrot.slane %v6605_v25, 5  ;;  %v6431_v33 = vld [vmem:[#allocation2 + $0x54] sm:$0xf]  ;;  %v5868_v35 = vmin.f32 %v5836_v36, 20.0  ;;  %13907 = vmatpush3.bf16.msra.mxu1 %v14376_v7  ;;  %v13236_v50 = vpop.f32.mrf.mxu0 }
 0x2ec   : > { %v6611_v37 = vshll.u32 %v6491_v19, 16  ;;  %v6615_v4 = vshrl.u32 %v6491_v19, 16  ;;  %v6621_v22 = vshll.u32 %v6492_v59, 16  ;;  %v6432_v8 = vld [vmem:[#allocation2 + $0x58] sm:$0xf]  ;;  %v8300_v30 = vshrl.u32 %v8188_v12, 16 }
 0x2ed   : > { %6463 = vst [vmem:[#allocation3 + $0xa8] sm:$0xf] %v6431_v33  ;;  %v6608_v15 = vor.u32 %v6607_v51, %v6604_v21  ;;  %v8189_v44 = vld [vmem:[#allocation2 + $0x34] sm:$0xf]  ;;  %v8303_v3 = vshll.u32 %v8188_v12, 16  ;;  %v12873_v23 = vpack.c.bf16 %v5868_v35, %v5868_v35  ;;  %v5805_v46 = vadd.f32 %v16597_v53, %v5766_v17 }
 0x2ee   : > { %6464 = vst [vmem:[#allocation3 + $0xb4] sm:$0xf] %v6432_v8  ;;  %v6613_v27 = vrot.slane %v6611_v37, 5  ;;  %v6617_v55 = vrot.slane %v6615_v4, 4  ;;  %v6623_v1 = vrot.slane %v6621_v22, 5  ;;  %v14377_v18 = vld [vmem:[#allocation8 + $0x138] sm:$0xff]   ;;  %v13234_v19 = vadd.f32 %v13233_v40, %v16581_v13 }
 0x2ef   : > { %v8190_v34 = vld [vmem:[#allocation2 + $0x38] sm:$0x1]  ;;  %v14356_v6 = vld [vmem:[#allocation3 + $0x50] ss:$12 sps:$4 sm:$0xff]   ;;  %v6609_v16 = vrot.slane %v6608_v15, 4  ;;  %v8302_v5 = vrot.slane %v8300_v30, 4  ;;  %13434 = vmatprep.subr.bf16.mxu0 %v14377_v18 }
 0x2f0   : > { %v6119_v59 = vshrl.u32 %v12873_v23, 16  ;;  %v6122_v61 = vshll.u32 %v12873_v23, 16  ;;  %8921 = vst [vmem:[#allocation3 + $0x50] sm:$0xf] %v8795_v2  ;;  %8922 = vst [vmem:[#allocation3 + $0x5c] sm:$0xf] %v8798_v11  ;;  %v6618_v63 = vor.u32 %v6617_v55, %v6613_v27  ;;  %13871 = vmatmul.mubr.bf16.gmra.mxu0 %v14356_v6  ;;  %v5560_v51 = vadd.f32 %v16554_v29, %v13234_v19  ;;  %v16629_v23 = vpop.f32.mrf.mxu0 }
 0x2f1   : > { %v8305_v9 = vrot.slane %v8303_v3, 5  ;;  %v14379_v32 = vld [vmem:[#allocation8 + $0xf8] sm:$0xff]   ;;  %v6361_v10 = vld [vmem:[#allocation2 + $0x6c] sm:$0xf]  ;;  %v5837_v25 = vmax.f32 %v5805_v46, 0.0  ;;  %v6614_v28 = vsel %vm14971_vm5, %v6609_v16, %v6613_v27  ;;  %v8309_v49 = vshll.u32 %v8189_v44, 16 }
 0x2f2   : > { %v8313_v36 = vshrl.u32 %v8189_v44, 16  ;;  %v16618_v12 = vrot.slane %v6119_v59, 7  ;;  %v6619_v13 = vrot.slane %v6618_v63, 4  ;;  %6951 = vst [vmem:[#allocation3 + $0x4c] sm:$0xf] %v6614_v28  ;;  %v8319_v2 = vshll.u32 %v8190_v34, 16  ;;  %13435 = vmatpush3.bf16.msra.mxu0 %v14379_v32 }
 0x2f3   : > { %v8306_v40 = vor.u32 %v8305_v9, %v8302_v5  ;;  %v6989_v7 = vld [vmem:[#allocation2 + $0x30] sm:$0xe]  ;;  %v5869_v11 = vmin.f32 %v5837_v25, 20.0  ;;  %v16620_v42 = vrot.slane %v8309_v49, 5  ;;  %v6990_v33 = vld [vmem:[#allocation2 + $0x34] sm:$0xf]  ;;  %v5664_v44 = vadd.f32 %v5560_v51, %v16251_v39 }
 0x2f4   : > { %v8315_v21 = vrot.slane %v8313_v36, 4  ;;  %v6124_v35 = vor.u32 %v6122_v61, %v16618_v12  ;;  %v6125_v37 = vrot.slane %v16618_v12, 4  ;;  %v6624_v4 = vsel %vm14971_vm5, %v6619_v13, %v6623_v1  ;;  %v6991_v30 = vld [vmem:[#allocation2 + $0x38] sm:$0x1]  ;;  %v8687_v3 = vld [vmem:[#allocation2 + $0x3c] sm:$0xe]  ;;  %v16642_v36 = vpop.f32.mrf.mxu0 }
 0x2f5   : > { %v8307_v22 = vrot.slane %v8306_v40, 4  ;;  %v12874_v8 = vpack.c.bf16 %v5869_v11, %v5869_v11  ;;  %6952 = vst [vmem:[#allocation3 + $0x58] sm:$0xf] %v6624_v4  ;;  %v8321_v15 = vrot.slane %v8319_v2, 5  ;;  %v12589_v55 = vrot.slane %v6989_v7, 9 }
 0x2f6   : > { %v8316_v17 = vor.u32 %v8315_v21, %v16620_v42  ;;  %v6362_v29 = vsel %vm16360_vm12, %v6124_v35, %v6361_v10  ;;  %v7103_v1 = vrot.slane %v6990_v33, 5  ;;  %v8688_v34 = vld [vmem:[#allocation2 + $0x40] sm:$0xf]  ;;  %v8689_v18 = vld [vmem:[#allocation2 + $0x44] sm:$0x1]  ;;  %v5767_v39 = vmul.f32 %v16586_v56, %v5664_v44 }
 0x2f7   : > { %v8312_v27 = vsel %vm14971_vm5, %v8307_v22, %v16620_v42  ;;  %6363 = vst [vmem:[#allocation2 + $0x6c] sm:$0xf] %v6362_v29  ;;  %v6127_v6 = vshrl.u32 %v12874_v8, 16  ;;  %v6130_v46 = vshll.u32 %v12874_v8, 16  ;;  %v6493_v5 = vld [vmem:[#allocation2 + $0x30] sm:$0xf]  ;;  %v13237_v7 = vadd.f32 %v13236_v50, %v16612_v41 }
 0x2f8   : > { %v8317_v16 = vrot.slane %v8316_v17, 4  ;;  %v7104_v19 = vsel %vm14960_vm4, %v12589_v55, %v7103_v1  ;;  %v7105_v59 = vrot.slane %v7103_v1, 4  ;;  %v7106_v61 = vrot.slane %v6991_v30, 5  ;;  %v6365_v32 = vld [vmem:[#allocation2 + $0x74] sm:$0x1] }
 0x2f9   : > { %v12677_v63 = vrot.slane %v8687_v3, 9  ;;  %v6129_v9 = vrot.slane %v6127_v6, 7  ;;  %v5806_v25 = vadd.f32 %v16597_v53, %v5767_v39  ;;  %7225 = vst [vmem:[#allocation3 + $0x68] sm:$0xf] %v7104_v19  ;;  %v8801_v28 = vrot.slane %v8688_v34, 5  ;;  %v7261_v4 = vld [vmem:[#allocation3 + $0x48] sm:$0xff] }
 0x2fa   : > { %v8322_v10 = vsel %vm14971_vm5, %v8317_v16, %v8321_v15  ;;  %v6494_v49 = vld [vmem:[#allocation2 + $0x34] sm:$0xf]  ;;  %v8121_v12 = vld [vmem:[#allocation2 + $0x30] sm:$0xf]  ;;  %v7107_v40 = vsel %vm14960_vm4, %v7105_v59, %v7106_v61  ;;  %v8804_v2 = vrot.slane %v8689_v18, 5  ;;  %v6626_v42 = vshrl.u32 %v6493_v5, 16  ;;  %v16654_v18 = vpop.f32.mrf.mxu0 }
 0x2fb   : > { %v8122_v13 = vld [vmem:[#allocation2 + $0x34] sm:$0xf]  ;;  %v6495_v11 = vld [vmem:[#allocation2 + $0x38] sm:$0x1]  ;;  %v6433_v21 = vld [vmem:[#allocation2 + $0x60] sm:$0xf]  ;;  %v6132_v33 = vor.u32 %v6130_v46, %v6129_v9  ;;  %v8802_v8 = vsel %vm14960_vm4, %v12677_v63, %v8801_v28  ;;  %v5563_v41 = vadd.f32 %v16573_v43, %v13237_v7 }
 0x2fc   : > { %v6434_v51 = vld [vmem:[#allocation2 + $0x64] sm:$0xf]  ;;  %v6134_v35 = vrot.slane %v6129_v9, 4  ;;  %v5838_v22 = vmax.f32 %v5806_v25, 0.0  ;;  %7226 = vst [vmem:[#allocation3 + $0x74] sm:$0xf] %v7107_v40 }
 0x2fd   : > { %v8191_v17 = vld [vmem:[#allocation2 + $0x3c] sm:$0xf]  ;;  %6465 = vst [vmem:[#allocation3 + $0xc0] sm:$0xf] %v6433_v21  ;;  %6466 = vst [vmem:[#allocation3 + $0xcc] sm:$0xf] %v6434_v51  ;;  %v6133_v29 = vsel %vm16374_vm14, %v6125_v37, %v6132_v33  ;;  %v5665_v37 = vadd.f32 %v5563_v41, %v16261_v31  ;;  %v13240_v51 = vadd.f32 %v16642_v36, %v16629_v23 }
 0x2fe   : > { %v7263_v15 = vld [vmem:[#allocation3 + $0x54] sm:$0xff]  ;;  %v8803_v30 = vrot.slane %v8801_v28, 4  ;;  %v6628_v50 = vrot.slane %v6626_v42, 4  ;;  %v6629_v3 = vshll.u32 %v6493_v5, 16  ;;  %v6366_v55 = vsel %vm15826_vm8, %v6134_v35, %v6365_v32  ;;  %8153 = vst [vmem:[#allocation3 + $0x48] sm:$0xf] %v8121_v12  ;;  %v16660_v12 = vpop.f32.mrf.mxu1 }
 0x2ff   : > { %v14357_v44 = vld [vmem:[#allocation3 + $0x4c] ss:$12 sps:$4 sm:$0xff]   ;;  %8154 = vst [vmem:[#allocation3 + $0x54] sm:$0xf] %v8122_v13  ;;  %v5870_v1 = vmin.f32 %v5838_v22, 20.0  ;;  %v12610_v34 = vcombine.low %v7261_v4, %v7263_v15  ;;  %v14382_v6 = vld [vmem:[#allocation8 + $0x130] sm:$0xff]   ;;  %v5768_v61 = vmul.f32 %v16586_v56, %v5665_v37 }
 0x300   : > { %8649 = vst [vmem:[#allocation3 + $0x4c] sm:$0xf] %v8312_v27  ;;  %8650 = vst [vmem:[#allocation3 + $0x58] sm:$0xf] %v8322_v10  ;;  %7817 = vmatprep.mubr.bf16.mxu1 %v14357_v44  ;;  %v8805_v43 = vsel %vm14960_vm4, %v8803_v30, %v8804_v2  ;;  %v6631_v46 = vrot.slane %v6629_v3, 5  ;;  %v6635_v16 = vshll.u32 %v6494_v49, 16  ;;  %13436 = vmatprep.subr.bf16.mxu0 %v14382_v6  ;;  %v16662_v2 = vpop.f32.mrf.mxu0 }
 0x301   : > { %6364 = vst [vmem:[#allocation2 + $0x70] sm:$0xf] %v6133_v29  ;;  %6367 = vst [vmem:[#allocation2 + $0x74] sm:$0x1] %v6366_v55  ;;  %v12875_v39 = vpack.c.bf16 %v5870_v1, %v5870_v1  ;;  %7818 = vmatmul.mubr.bf16.gmra.mxu1 %v12610_v34  ;;  %v6639_v5 = vshrl.u32 %v6494_v49, 16  ;;  %v6645_v27 = vshll.u32 %v6495_v11, 16  ;;  %v5807_v11 = vadd.f32 %v16597_v53, %v5768_v61 }
 0x302   : > { %v8324_v19 = vshrl.u32 %v8191_v17, 16  ;;  %v14384_v59 = vld [vmem:[#allocation8 + $0xf0] sm:$0xff]   ;;  %v6632_v63 = vor.u32 %v6631_v46, %v6628_v50  ;;  %v6637_v9 = vrot.slane %v6635_v16, 5  ;;  %v8192_v32 = vld [vmem:[#allocation2 + $0x40] sm:$0xf]  ;;  %v8327_v10 = vshll.u32 %v8191_v17, 16  ;;  %v16673_v6 = vpop.f32.mrf.mxu0 }
 0x303   : > { %v6136_v25 = vshrl.u32 %v12875_v39, 16  ;;  %v6139_v28 = vshll.u32 %v12875_v39, 16  ;;  %v6641_v31 = vrot.slane %v6639_v5, 4  ;;  %v6647_v13 = vrot.slane %v6645_v27, 5  ;;  %v8193_v40 = vld [vmem:[#allocation2 + $0x44] sm:$0x1]  ;;  %13437 = vmatpush3.bf16.msra.mxu0 %v14384_v59 }
 0x304   : > { %v6368_v49 = vld [vmem:[#allocation2 + $0x78] sm:$0xf]  ;;  %v14359_v7 = vld [vmem:[#allocation3 + $0x68] ss:$12 sps:$4 sm:$0xff]   ;;  %v6633_v42 = vrot.slane %v6632_v63, 4  ;;  %v8326_v21 = vrot.slane %v8324_v19, 4 }
 0x305   : > { %v16667_v33 = vrot.slane %v6136_v25, 7  ;;  %8923 = vst [vmem:[#allocation3 + $0x68] sm:$0xf] %v8802_v8  ;;  %8924 = vst [vmem:[#allocation3 + $0x74] sm:$0xf] %v8805_v43  ;;  %v6642_v35 = vor.u32 %v6641_v31, %v6637_v9  ;;  %v8329_v4 = vrot.slane %v8327_v10, 5  ;;  %13874 = vmatprep.mubr.bf16.mxu0 %v14359_v7  ;;  %v5567_v8 = vpop.f32.mrf.mxu1 }
 0x306   : > { %v8333_v22 = vshll.u32 %v8192_v32, 16  ;;  %v6435_v17 = vld [vmem:[#allocation2 + $0x6c] sm:$0xf]  ;;  %v5839_v15 = vmax.f32 %v5807_v11, 0.0  ;;  %v6638_v44 = vsel %vm14971_vm5, %v6633_v42, %v6637_v9  ;;  %v8337_v30 = vshrl.u32 %v8192_v32, 16  ;;  %v14388_v61 = vld [vmem:[#allocation8 + $0x128] sm:$0xff]   ;;  %v16693_v42 = vpop.f32.mrf.mxu0 }
 0x307   : > { %v8343_v41 = vshll.u32 %v8193_v40, 16  ;;  %v6992_v50 = vld [vmem:[#allocation2 + $0x3c] sm:$0xe]  ;;  %6467 = vst [vmem:[#allocation3 + $0xd8] sm:$0xf] %v6435_v17  ;;  %v14387_v3 = vld [vmem:[#allocation8 + $0x150] sm:$0xff]   ;;  %v6141_v23 = vor.u32 %v6139_v28, %v16667_v33  ;;  %v8330_v55 = vor.u32 %v8329_v4, %v8326_v21  ;;  %v5568_v59 = vadd.f32 %v13240_v51, %v5567_v8  ;;  %v16686_v31 = vpop.f32.mrf.mxu1  ;;  %13438 = vmatprep.subr.bf16.mxu0 %v14388_v61 }
 0x308   : > { %v6142_v36 = vrot.slane %v16667_v33, 4  ;;  %v6643_v29 = vrot.slane %v6642_v35, 4  ;;  %6953 = vst [vmem:[#allocation3 + $0x64] sm:$0xf] %v6638_v44  ;;  %v6993_v1 = vld [vmem:[#allocation2 + $0x40] sm:$0xf]  ;;  %13908 = vmatprep.subr.bf16.mxu1 %v14387_v3 }
 0x309   : > { %v6994_v34 = vld [vmem:[#allocation2 + $0x44] sm:$0x1]  ;;  %v5871_v43 = vmin.f32 %v5839_v15, 20.0  ;;  %v16675_v37 = vrot.slane %v8333_v22, 5  ;;  %v8339_v46 = vrot.slane %v8337_v30, 4  ;;  %v16677_v16 = vrot.slane %v8343_v41, 5  ;;  %13909 = vmatpush3.bf16.msra.mxu1 %v14387_v3 }
 0x30a   : > { %v8690_v39 = vld [vmem:[#allocation2 + $0x48] sm:$0xe]  ;;  %v6369_v5 = vsel %vm16360_vm12, %v6141_v23, %v6368_v49  ;;  %v6648_v27 = vsel %vm14971_vm5, %v6643_v29, %v6647_v13  ;;  %v16683_v19 = vrot.slane %v8330_v55, 4  ;;  %v12590_v32 = vrot.slane %v6992_v50, 9  ;;  %v8691_v25 = vld [vmem:[#allocation2 + $0x4c] sm:$0xf] }
 0x30b   : > { %6370 = vst [vmem:[#allocation2 + $0x78] sm:$0xf] %v6369_v5  ;;  %v12876_v63 = vpack.c.bf16 %v5871_v43, %v5871_v43  ;;  %6954 = vst [vmem:[#allocation3 + $0x70] sm:$0xf] %v6648_v27  ;;  %v8340_v9 = vor.u32 %v8339_v46, %v16675_v37  ;;  %v7110_v10 = vrot.slane %v6993_v1, 5  ;;  %v5666_v40 = vadd.f32 %v5568_v59, %v16281_v38  ;;  %v14390_v17 = vld [vmem:[#allocation8 + $0xe8] sm:$0xff]   ;;  %v5570_v46 = vpop.f32.mrf.mxu1 }
 0x30c   : > { %v8692_v28 = vld [vmem:[#allocation2 + $0x50] sm:$0x1]  ;;  %v8336_v13 = vsel %vm14971_vm5, %v16683_v19, %v16675_v37  ;;  %v7113_v49 = vrot.slane %v6994_v34, 5  ;;  %v12678_v7 = vrot.slane %v8690_v39, 9  ;;  %v459_v11 = vld [vmem:[#allocation2 + $0x8c] sm:$0x1]  ;;  %v13243_v29 = vadd.f32 %v16662_v2, %v16654_v18  ;;  %13439 = vmatpush3.bf16.msra.mxu0 %v14390_v17  ;;  %v13247_v18 = vpop.f32.mrf.mxu0 }
 0x30d   : > { %v6436_v21 = vld [vmem:[#allocation2 + $0x70] sm:$0xf]  ;;  %v6144_v51 = vshrl.u32 %v12876_v63, 16  ;;  %v6147_v35 = vshll.u32 %v12876_v63, 16  ;;  %v8341_v4 = vrot.slane %v8340_v9, 4  ;;  %v7111_v22 = vsel %vm14960_vm4, %v12590_v32, %v7110_v10 }
 0x30e   : > { %6468 = vst [vmem:[#allocation3 + $0xe4] sm:$0xf] %v6436_v21  ;;  %v5769_v15 = vmul.f32 %v16586_v56, %v5666_v40  ;;  %v7112_v44 = vrot.slane %v7110_v10, 4  ;;  %7227 = vst [vmem:[#allocation3 + $0x80] sm:$0xf] %v7111_v22  ;;  %v8808_v38 = vrot.slane %v8691_v25, 5  ;;  %v5571_v63 = vadd.f32 %v13243_v29, %v5570_v46 }
 0x30f   : > { %v8811_v30 = vrot.slane %v8692_v28, 5  ;;  %v6496_v41 = vld [vmem:[#allocation2 + $0x3c] sm:$0xf]  ;;  %v6146_v50 = vrot.slane %v6144_v51, 7  ;;  %v6372_v3 = vld [vmem:[#allocation2 + $0x80] sm:$0x1]  ;;  %v8346_v23 = vsel %vm14971_vm5, %v8341_v4, %v16677_v16 }
 0x310   : > { %v460_v8 = vsel %vm15834_vm10, 0, %v459_v11  ;;  %v6497_v55 = vld [vmem:[#allocation2 + $0x40] sm:$0xf]  ;;  %v7265_v1 = vld [vmem:[#allocation3 + $0x60] sm:$0xff]  ;;  %v5808_v37 = vadd.f32 %v16597_v53, %v5769_v15  ;;  %v7114_v39 = vsel %vm14960_vm4, %v7112_v44, %v7113_v49  ;;  %v8809_v16 = vsel %vm14960_vm4, %v12678_v7, %v8808_v38  ;;  %v6498_v27 = vld [vmem:[#allocation2 + $0x44] sm:$0x1] }
 0x311   : > { %v8123_v34 = vld [vmem:[#allocation2 + $0x3c] sm:$0xf]  ;;  %v8124_v43 = vld [vmem:[#allocation2 + $0x40] sm:$0xf]  ;;  %v8810_v5 = vrot.slane %v8808_v38, 4  ;;  %v6149_v59 = vor.u32 %v6147_v35, %v6146_v50  ;;  %v6151_v61 = vrot.slane %v6146_v50, 4  ;;  %v5667_v4 = vadd.f32 %v5571_v63, %v16288_v20  ;;  %v13248_v38 = vpop.f32.mrf.mxu0 }
 0x312   : > { %461 = vst [vmem:[#allocation2 + $0x8c] sm:$0x1] %v460_v8  ;;  %v16710_v19 = vld [vmem:[#allocation2 + $0x48] sm:$0xf]  ;;  %v16712_v2 = vld [vmem:[#allocation3] ss:$12 sps:$4 sm:$0xff]  }
 0x313   : > { %7228 = vst [vmem:[#allocation3 + $0x8c] sm:$0xf] %v7114_v39  ;;  %v6650_v9 = vshrl.u32 %v6496_v41, 16  ;;  %v9878_v32 = vld [vmem:[#allocation2 + $0x18] sm:$0xf]  ;;  %v7267_v25 = vld [vmem:[#allocation3 + $0x6c] sm:$0xff]  ;;  %v8812_v49 = vsel %vm14960_vm4, %v8810_v5, %v8811_v30  ;;  %v6150_v21 = vsel %vm16374_vm14, %v6142_v36, %v6149_v59  ;;  %v6373_v51 = vsel %vm15826_vm8, %v6151_v61, %v6372_v3  ;;  %v16731_v61 = vpop.f32.mrf.mxu0 }
 0x314   : > { %v9879_v10 = vld [vmem:[#allocation2 + $0x1c] sm:$0xf]  ;;  %v5840_v40 = vmax.f32 %v5808_v37, 0.0  ;;  %v6653_v7 = vshll.u32 %v6496_v41, 16  ;;  %v6659_v11 = vshll.u32 %v6497_v55, 16  ;;  %v12613_v35 = vcombine.low %v7265_v1, %v7267_v25 }
 0x315   : > { %v14360_v28 = vld [vmem:[#allocation3 + $0x64] ss:$12 sps:$4 sm:$0xff]   ;;  %9910 = vst [vmem:[#allocation3] sm:$0xf] %v9878_v32  ;;  %9911 = vst [vmem:[#allocation3 + $0xc] sm:$0xf] %v9879_v10  ;;  %v5770_v36 = vmul.f32 %v16586_v56, %v5667_v4  ;;  %v16729_v59 = vadd.f32 %v13248_v38, %v13247_v18 }
 0x316   : > { %8155 = vst [vmem:[#allocation3 + $0x60] sm:$0xf] %v8123_v34  ;;  %8156 = vst [vmem:[#allocation3 + $0x6c] sm:$0xf] %v8124_v43  ;;  %v8195_v22 = vld [vmem:[#allocation2 + $0x4c] sm:$0xf]  ;;  %7825 = vmatprep.mubr.bf16.mxu1 %v14360_v28 }
 0x317   : > { %8651 = vst [vmem:[#allocation3 + $0x64] sm:$0xf] %v8336_v13  ;;  %8652 = vst [vmem:[#allocation3 + $0x70] sm:$0xf] %v8346_v23  ;;  %v5872_v17 = vmin.f32 %v5840_v40, 20.0  ;;  %v6652_v15 = vrot.slane %v6650_v9, 4  ;;  %7826 = vmatmul.mubr.bf16.gmra.mxu1 %v12613_v35  ;;  %v5809_v29 = vadd.f32 %v16597_v53, %v5770_v36 }
 0x318   : > { %6371 = vst [vmem:[#allocation2 + $0x7c] sm:$0xf] %v6150_v21  ;;  %6374 = vst [vmem:[#allocation2 + $0x80] sm:$0x1] %v6373_v51  ;;  %v6655_v33 = vrot.slane %v6653_v7, 5  ;;  %v6661_v44 = vrot.slane %v6659_v11, 5 }
 0x319   : > { %v6663_v30 = vshrl.u32 %v6497_v55, 16  ;;  %v6669_v41 = vshll.u32 %v6498_v27, 16  ;;  %v8348_v13 = vshrl.u32 %v16710_v19, 16  ;;  %v12877_v50 = vpack.c.bf16 %v5872_v17, %v5872_v17  ;;  %v6437_v8 = vld [vmem:[#allocation2 + $0x78] sm:$0xf] }
 0x31a   : > { %v6656_v3 = vor.u32 %v6655_v33, %v6652_v15  ;;  %v8351_v20 = vshll.u32 %v16710_v19, 16  ;;  %v8357_v23 = vshll.u32 %v8195_v22, 16  ;;  %v8196_v43 = vld [vmem:[#allocation2 + $0x50] sm:$0x1]  ;;  %6469 = vst [vmem:[#allocation3 + $0xf0] sm:$0xf] %v6437_v8  ;;  %v13246_v27 = vadd.f32 %v16693_v42, %v16673_v6  ;;  %v16743_v33 = vpop.f32.mrf.mxu0 }
 0x31b   : > { %v6665_v1 = vrot.slane %v6663_v30, 4  ;;  %v6671_v34 = vrot.slane %v6669_v41, 5  ;;  %v8350_v37 = vrot.slane %v8348_v13, 4  ;;  %v14393_v46 = vld [vmem:[#allocation8 + $0x120] sm:$0xff]   ;;  %v6153_v39 = vshrl.u32 %v12877_v50, 16 }
 0x31c   : > { %v6156_v5 = vshll.u32 %v12877_v50, 16  ;;  %v14363_v55 = vld [vmem:[#allocation3 + $0x80] ss:$12 sps:$4 sm:$0xff]   ;;  %v5841_v63 = vmax.f32 %v5809_v29, 0.0  ;;  %v6657_v9 = vrot.slane %v6656_v3, 4  ;;  %v8353_v10 = vrot.slane %v8351_v20, 5  ;;  %13440 = vmatprep.subr.bf16.mxu0 %v14393_v46 }
 0x31d   : > { %v6375_v19 = vld [vmem:[#allocation2 + $0x84] sm:$0xf]  ;;  %8925 = vst [vmem:[#allocation3 + $0x80] sm:$0xf] %v8809_v16  ;;  %8926 = vst [vmem:[#allocation3 + $0x8c] sm:$0xf] %v8812_v49  ;;  %v6666_v32 = vor.u32 %v6665_v1, %v6661_v44  ;;  %13875 = vmatmul.mubr.bf16.gmra.mxu0 %v14363_v55  ;;  %v5576_v20 = vadd.f32 %v16660_v12, %v13246_v27  ;;  %v16762_v12 = vpop.f32.mrf.mxu0 }
 0x31e   : > { %v14395_v25 = vld [vmem:[#allocation8 + $0xe0] sm:$0xff]   ;;  %v16733_v28 = vrot.slane %v6153_v39, 7  ;;  %v16735_v40 = vrot.slane %v8357_v23, 5  ;;  %v8361_v7 = vshrl.u32 %v8195_v22, 16  ;;  %v8367_v6 = vshll.u32 %v8196_v43, 16 }
 0x31f   : > { %v406_v42 = vld [vmem:[#allocation2 + $0x90] sm:$0x1]  ;;  %v5873_v18 = vmin.f32 %v5841_v63, 20.0  ;;  %v6662_v11 = vsel %vm14971_vm5, %v6657_v9, %v6661_v44  ;;  %v6667_v16 = vrot.slane %v6666_v32, 4  ;;  %v8354_v49 = vor.u32 %v8353_v10, %v8350_v37  ;;  %v6995_v21 = vld [vmem:[#allocation2 + $0x48] sm:$0xe]  ;;  %13441 = vmatpush3.bf16.msra.mxu0 %v14395_v25 }
 0x320   : > { %v6996_v51 = vld [vmem:[#allocation2 + $0x4c] sm:$0xf]  ;;  %v6158_v35 = vor.u32 %v6156_v5, %v16733_v28  ;;  %v6159_v4 = vrot.slane %v16733_v28, 4  ;;  %6955 = vst [vmem:[#allocation3 + $0x7c] sm:$0xf] %v6662_v11  ;;  %v8363_v17 = vrot.slane %v8361_v7, 4  ;;  %v5668_v5 = vadd.f32 %v5576_v20, %v16275_v47 }
 0x321   : > { %v16741_v15 = vrot.slane %v8367_v6, 5  ;;  %v6997_v22 = vld [vmem:[#allocation2 + $0x50] sm:$0x1]  ;;  %v12878_v38 = vpack.c.bf16 %v5873_v18, %v5873_v18  ;;  %v6672_v44 = vsel %vm14971_vm5, %v6667_v16, %v6671_v34  ;;  %v16747_v36 = vrot.slane %v8354_v49, 4  ;;  %v8693_v41 = vld [vmem:[#allocation2 + $0x54] sm:$0xe] }
 0x322   : > { %v407_v30 = vsel %vm15826_vm8, 0, %v406_v42  ;;  %v462_v13 = vld [vmem:[#allocation2 + $0x98] sm:$0x1]  ;;  %v6376_v50 = vsel %vm16360_vm12, %v6158_v35, %v6375_v19  ;;  %6956 = vst [vmem:[#allocation3 + $0x88] sm:$0xf] %v6672_v44  ;;  %v8364_v3 = vor.u32 %v8363_v17, %v16735_v40  ;;  %v12591_v23 = vrot.slane %v6995_v21, 9 }
 0x323   : > { %408 = vst [vmem:[#allocation2 + $0x90] sm:$0x1] %v407_v30  ;;  %v8694_v8 = vld [vmem:[#allocation2 + $0x58] sm:$0xf]  ;;  %v16755_v29 = vld [vmem:[#allocation2 + $0x5c] sm:$0x1]  ;;  %v8360_v43 = vsel %vm14971_vm5, %v16747_v36, %v16735_v40  ;;  %v5771_v7 = vmul.f32 %v16586_v56, %v5668_v5  ;;  %v5579_v36 = vadd.f32 %v16686_v31, %v16729_v59  ;;  %v13252_v31 = vadd.f32 %v16743_v33, %v16731_v61 }
 0x324   : > { %6377 = vst [vmem:[#allocation2 + $0x84] sm:$0xf] %v6376_v50  ;;  %v6161_v1 = vshrl.u32 %v12878_v38, 16  ;;  %v6164_v34 = vshll.u32 %v12878_v38, 16  ;;  %v7117_v37 = vrot.slane %v6996_v51, 5  ;;  %v8365_v39 = vrot.slane %v8364_v3, 4 }
 0x325   : > { %v6438_v46 = vld [vmem:[#allocation2 + $0x7c] sm:$0xf]  ;;  %v7120_v55 = vrot.slane %v6997_v22, 5  ;;  %v12679_v19 = vrot.slane %v8693_v41, 9  ;;  %v8815_v32 = vrot.slane %v8694_v8, 5  ;;  %v8818_v47 = vrot.slane %v16755_v29, 5  ;;  %v16782_v41 = vpop.f32.mrf.mxu0 }
 0x326   : > { %6470 = vst [vmem:[#allocation3 + $0xfc] sm:$0xf] %v6438_v46  ;;  %v6163_v27 = vrot.slane %v6161_v1, 7  ;;  %v7118_v63 = vsel %vm14960_vm4, %v12591_v23, %v7117_v37  ;;  %v7119_v9 = vrot.slane %v7117_v37, 4  ;;  %v6499_v10 = vld [vmem:[#allocation2 + $0x48] sm:$0xf]  ;;  %v8370_v40 = vsel %vm14971_vm5, %v8365_v39, %v16741_v15 }
 0x327   : > { %v6379_v25 = vld [vmem:[#allocation2 + $0x8c] sm:$0x1]  ;;  %7229 = vst [vmem:[#allocation3 + $0x98] sm:$0xf] %v7118_v63  ;;  %v463_v6 = vsel %vm15834_vm10, 0, %v462_v13  ;;  %v14398_v18 = vld [vmem:[#allocation8 + $0x148] sm:$0xff]   ;;  %v16777_v17 = vsel %vm14960_vm4, %v12679_v19, %v8815_v32  ;;  %v5810_v38 = vadd.f32 %v16597_v53, %v5771_v7 }
 0x328   : > { %v6500_v42 = vld [vmem:[#allocation2 + $0x4c] sm:$0xf]  ;;  %v14399_v11 = vld [vmem:[#allocation8 + $0x118] sm:$0xff]   ;;  %v6166_v16 = vor.u32 %v6164_v34, %v6163_v27  ;;  %v6168_v49 = vrot.slane %v6163_v27, 4  ;;  %v8125_v21 = vld [vmem:[#allocation2 + $0x48] sm:$0xf]  ;;  %v7121_v35 = vsel %vm14960_vm4, %v7119_v9, %v7120_v55  ;;  %13910 = vmatprep.subr.bf16.mxu1 %v14398_v18  ;;  %v5669_v34 = vadd.f32 %v5579_v36, %v16286_v54  ;;  %v16798_v27 = vpop.f32.mrf.mxu0 }
 0x329   : > { %v8126_v51 = vld [vmem:[#allocation2 + $0x4c] sm:$0xf]  ;;  %464 = vst [vmem:[#allocation2 + $0x98] sm:$0x1] %v463_v6  ;;  %v6501_v15 = vld [vmem:[#allocation2 + $0x50] sm:$0x1]  ;;  %13442 = vmatprep.subr.bf16.mxu0 %v14399_v11  ;;  %13911 = vmatpush3.bf16.msra.mxu1 %v14398_v18 }
 0x32a   : > { %v8197_v22 = vld [vmem:[#allocation2 + $0x54] sm:$0xf]  ;;  %7230 = vst [vmem:[#allocation3 + $0xa4] sm:$0xf] %v7121_v35  ;;  %v8817_v44 = vrot.slane %v8815_v32, 4  ;;  %v6674_v30 = vshrl.u32 %v6499_v10, 16  ;;  %v6167_v50 = vsel %vm16374_vm14, %v6159_v4, %v6166_v16  ;;  %v6380_v3 = vsel %vm15826_vm8, %v6168_v49, %v6379_v25  ;;  %v16792_v4 = vpop.f32.mrf.mxu1 }
 0x32b   : > { %v14401_v13 = vld [vmem:[#allocation8 + $0xd8] sm:$0xff]   ;;  %v7271_v23 = vld [vmem:[#allocation3 + $0x84] sm:$0xff]  ;;  %v6677_v29 = vshll.u32 %v6499_v10, 16  ;;  %6378 = vst [vmem:[#allocation2 + $0x88] sm:$0xf] %v6167_v50  ;;  %v5842_v59 = vmax.f32 %v5810_v38, 0.0 }
 0x32c   : > { %v7269_v20 = vld [vmem:[#allocation3 + $0x78] sm:$0xff]  ;;  %6381 = vst [vmem:[#allocation2 + $0x8c] sm:$0x1] %v6380_v3  ;;  %8158 = vst [vmem:[#allocation3 + $0x84] sm:$0xf] %v8126_v51  ;;  %v8819_v1 = vsel %vm14960_vm4, %v8817_v44, %v8818_v47  ;;  %13443 = vmatpush3.bf16.msra.mxu0 %v14401_v13  ;;  %v6676_v37 = vrot.slane %v6674_v30, 4 }
 0x32d   : > { %v14364_v8 = vld [vmem:[#allocation3 + $0x7c] ss:$12 sps:$4 sm:$0xff]   ;;  %8157 = vst [vmem:[#allocation3 + $0x78] sm:$0xf] %v8125_v21  ;;  %v12616_v28 = vcombine.low %v7269_v20, %v7271_v23  ;;  %v6679_v61 = vrot.slane %v6677_v29, 5  ;;  %v6683_v33 = vshll.u32 %v6500_v42, 16 }
 0x32e   : > { %8653 = vst [vmem:[#allocation3 + $0x7c] sm:$0xf] %v8360_v43  ;;  %8654 = vst [vmem:[#allocation3 + $0x88] sm:$0xf] %v8370_v40  ;;  %7833 = vmatprep.mubr.bf16.mxu1 %v14364_v8  ;;  %v6687_v46 = vshrl.u32 %v6500_v42, 16  ;;  %v5874_v39 = vmin.f32 %v5842_v59, 20.0  ;;  %v5772_v43 = vmul.f32 %v16586_v56, %v5669_v34  ;;  %v5583_v40 = vpop.f32.mrf.mxu1 }
 0x32f   : > { %7834 = vmatmul.mubr.bf16.gmra.mxu1 %v12616_v28  ;;  %v6693_v5 = vshll.u32 %v6501_v15, 16  ;;  %v8198_v55 = vld [vmem:[#allocation2 + $0x58] sm:$0xf]  ;;  %v8372_v19 = vshrl.u32 %v8197_v22, 16  ;;  %v6680_v63 = vor.u32 %v6679_v61, %v6676_v37  ;;  %v6685_v9 = vrot.slane %v6683_v33, 5  ;;  %v14404_v34 = vld [vmem:[#allocation8 + $0x110] sm:$0xff]  }
 0x330   : > { %v6689_v32 = vrot.slane %v6687_v46, 4  ;;  %v8375_v10 = vshll.u32 %v8197_v22, 16  ;;  %v12879_v54 = vpack.c.bf16 %v5874_v39, %v5874_v39  ;;  %v5811_v25 = vadd.f32 %v16597_v53, %v5772_v43  ;;  %v8199_v47 = vld [vmem:[#allocation2 + $0x5c] sm:$0x1]  ;;  %v6439_v42 = vld [vmem:[#allocation2 + $0x84] sm:$0xf]  ;;  %v16802_v53 = vpop.f32.mrf.mxu0  ;;  %13444 = vmatprep.subr.bf16.mxu0 %v14404_v34 }
 0x331   : > { %v6695_v7 = vrot.slane %v6693_v5, 5  ;;  %v8374_v6 = vrot.slane %v8372_v19, 4  ;;  %v14366_v18 = vld [vmem:[#allocation3 + $0x98] ss:$12 sps:$4 sm:$0xff]   ;;  %v6681_v11 = vrot.slane %v6680_v63, 4  ;;  %v5584_v49 = vadd.f32 %v13252_v31, %v5583_v40 }
 0x332   : > { %v6690_v56 = vor.u32 %v6689_v32, %v6685_v9  ;;  %v8377_v16 = vrot.slane %v8375_v10, 5  ;;  %6471 = vst [vmem:[#allocation3 + $0x108] sm:$0xf] %v6439_v42  ;;  %v6170_v21 = vshrl.u32 %v12879_v54, 16  ;;  %v6173_v51 = vshll.u32 %v12879_v54, 16  ;;  %13878 = vmatprep.mubr.bf16.mxu0 %v14366_v18  ;;  %v13259_v5 = vpop.f32.mrf.mxu0  ;;  %v14406_v54 = vld [vmem:[#allocation8 + $0xd0] sm:$0xff]  }
 0x333   : > { %8927 = vst [vmem:[#allocation3 + $0x98] sm:$0xf] %v16777_v17  ;;  %8928 = vst [vmem:[#allocation3 + $0xa4] sm:$0xf] %v8819_v1  ;;  %v5843_v35 = vmax.f32 %v5811_v25, 0.0  ;;  %v8381_v15 = vshll.u32 %v8198_v55, 16  ;;  %v6686_v38 = vsel %vm14971_vm5, %v6681_v11, %v6685_v9  ;;  %v5670_v63 = vadd.f32 %v5584_v49, %v16300_v57  ;;  %13445 = vmatpush3.bf16.msra.mxu0 %v14406_v54  ;;  %v16834_v49 = vpop.f32.mrf.mxu1 }
 0x334   : > { %v409_v22 = vld [vmem:[#allocation2 + $0x9c] sm:$0x1]  ;;  %v6691_v44 = vrot.slane %v6690_v56, 4  ;;  %v8378_v36 = vor.u32 %v8377_v16, %v8374_v6  ;;  %v8385_v30 = vshrl.u32 %v8198_v55, 16  ;;  %v6998_v13 = vld [vmem:[#allocation2 + $0x54] sm:$0xe] }
 0x335   : > { %v6999_v50 = vld [vmem:[#allocation2 + $0x58] sm:$0xf]  ;;  %v16806_v3 = vrot.slane %v6170_v21, 7  ;;  %v5875_v20 = vmin.f32 %v5843_v35, 20.0  ;;  %6957 = vst [vmem:[#allocation3 + $0x94] sm:$0xf] %v6686_v38 }
 0x336   : > { %v16808_v17 = vrot.slane %v8381_v15, 5  ;;  %v8391_v23 = vshll.u32 %v8199_v47, 16  ;;  %v7000_v8 = vld [vmem:[#allocation2 + $0x5c] sm:$0x1]  ;;  %v6382_v29 = vld [vmem:[#allocation2 + $0x90] sm:$0xf]  ;;  %v6696_v31 = vsel %vm14971_vm5, %v6691_v44, %v6695_v7 }
 0x337   : > { %v16812_v59 = vrot.slane %v8378_v36, 4  ;;  %v8387_v28 = vrot.slane %v8385_v30, 4  ;;  %v410_v1 = vsel %vm15826_vm8, 0, %v409_v22  ;;  %v6175_v37 = vor.u32 %v6173_v51, %v16806_v3  ;;  %6958 = vst [vmem:[#allocation3 + $0xa0] sm:$0xf] %v6696_v31  ;;  %v13260_v22 = vpop.f32.mrf.mxu0  ;;  %v14410_v54 = vld [vmem:[#allocation8 + $0x108] sm:$0xff]  }
 0x338   : > { %v6176_v61 = vrot.slane %v16806_v3, 4  ;;  %v12880_v33 = vpack.c.bf16 %v5875_v20, %v5875_v20  ;;  %v16818_v46 = vrot.slane %v8391_v23, 5  ;;  %411 = vst [vmem:[#allocation2 + $0x9c] sm:$0x1] %v410_v1  ;;  %v8696_v39 = vld [vmem:[#allocation2 + $0x60] sm:$0xe]  ;;  %13446 = vmatprep.subr.bf16.mxu0 %v14410_v54 }
 0x339   : > { %v465_v43 = vld [vmem:[#allocation2 + $0xa4] sm:$0x1]  ;;  %v8384_v55 = vsel %vm14971_vm5, %v16812_v59, %v16808_v17  ;;  %v8388_v19 = vor.u32 %v8387_v28, %v16808_v17  ;;  %v12592_v9 = vrot.slane %v6998_v13, 9  ;;  %v6440_v10 = vld [vmem:[#allocation2 + $0x88] sm:$0xf]  ;;  %v6383_v25 = vsel %vm16360_vm12, %v6175_v37, %v6382_v29 }
 0x33a   : > { %v8697_v32 = vld [vmem:[#allocation2 + $0x64] sm:$0xf]  ;;  %v6178_v40 = vshrl.u32 %v12880_v33, 16  ;;  %v6181_v7 = vshll.u32 %v12880_v33, 16  ;;  %v7124_v47 = vrot.slane %v6999_v50, 5  ;;  %v7127_v11 = vrot.slane %v7000_v8, 5 }
 0x33b   : > { %v8698_v6 = vld [vmem:[#allocation2 + $0x68] sm:$0x1]  ;;  %6472 = vst [vmem:[#allocation3 + $0x114] sm:$0xf] %v6440_v10  ;;  %6384 = vst [vmem:[#allocation2 + $0x90] sm:$0xf] %v6383_v25  ;;  %v13255_v33 = vadd.f32 %v16782_v41, %v16762_v12 }
 0x33c   : > { %v8389_v42 = vrot.slane %v8388_v19, 4  ;;  %v16831_v18 = vld [vmem:[%s18269_s3] ss:$0 sm:$0xff]  ;;  %v12680_v56 = vrot.slane %v8696_v39, 9  ;;  %v6180_v16 = vrot.slane %v6178_v40, 7  ;;  %v7125_v21 = vsel %vm14960_vm4, %v12592_v9, %v7124_v47  ;;  %v7273_v28 = vld [vmem:[#allocation3 + $0x90] sm:$0xff] }
 0x33d   : > { %v5773_v57 = vmul.f32 %v16831_v18, %v5670_v63  ;;  %v7126_v51 = vrot.slane %v7124_v47, 4  ;;  %v8822_v35 = vrot.slane %v8697_v32, 5  ;;  %v6502_v15 = vld [vmem:[#allocation2 + $0x54] sm:$0xf]  ;;  %v6386_v38 = vld [vmem:[#allocation2 + $0x98] sm:$0x1]  ;;  %v13258_v39 = vadd.f32 %v16802_v53, %v16798_v27  ;;  %v5586_v32 = vpop.f32.mrf.mxu1 }
 0x33e   : > { %v8127_v44 = vld [vmem:[#allocation2 + $0x54] sm:$0xf]  ;;  %v8128_v36 = vld [vmem:[#allocation2 + $0x58] sm:$0xf]  ;;  %v8394_v30 = vsel %vm14971_vm5, %v8389_v42, %v16818_v46  ;;  %v16844_v13 = vld [vmem:[%s18270_s4] ss:$0 sm:$0xff]  ;;  %v6183_v23 = vor.u32 %v6181_v7, %v6180_v16  ;;  %v5587_v41 = vadd.f32 %v13255_v33, %v5586_v32  ;;  %v16865_v7 = vpop.f32.mrf.mxu0 }
 0x33f   : > { %v5812_v50 = vadd.f32 %v16844_v13, %v5773_v57  ;;  %7231 = vst [vmem:[#allocation3 + $0xb0] sm:$0xf] %v7125_v21  ;;  %v8825_v3 = vrot.slane %v8698_v6, 5  ;;  %v466_v20 = vsel %vm15834_vm10, 0, %v465_v43  ;;  %v6503_v17 = vld [vmem:[#allocation2 + $0x58] sm:$0xf]  ;;  %v7128_v29 = vsel %vm14960_vm4, %v7126_v51, %v7127_v11 }
 0x340   : > { %v6185_v8 = vrot.slane %v6180_v16, 4  ;;  %v8823_v31 = vsel %vm14960_vm4, %v12680_v56, %v8822_v35  ;;  %467 = vst [vmem:[#allocation2 + $0xa4] sm:$0x1] %v466_v20  ;;  %v6504_v59 = vld [vmem:[#allocation2 + $0x5c] sm:$0x1]  ;;  %v7275_v1 = vld [vmem:[#allocation3 + $0x9c] sm:$0xff]  ;;  %v16857_v43 = vadd.f32 %v13260_v22, %v13259_v5  ;;  %v6184_v19 = vsel %vm16374_vm14, %v6176_v61, %v6183_v23 }
 0x341   : > { %v14367_v34 = vld [vmem:[#allocation3 + $0x94] ss:$12 sps:$4 sm:$0xff]   ;;  %v5844_v37 = vmax.f32 %v5812_v50, 0.0  ;;  %7232 = vst [vmem:[#allocation3 + $0xbc] sm:$0xf] %v7128_v29  ;;  %v12619_v9 = vcombine.low %v7273_v28, %v7275_v1  ;;  %v8824_v10 = vrot.slane %v8822_v35, 4  ;;  %v5671_v6 = vadd.f32 %v5587_v41, %v16308_v14 }
 0x342   : > { %v8200_v46 = vld [vmem:[#allocation2 + $0x60] sm:$0xf]  ;;  %v6387_v63 = vsel %vm15826_vm8, %v6185_v8, %v6386_v38  ;;  %8159 = vst [vmem:[#allocation3 + $0x90] sm:$0xf] %v8127_v44  ;;  %8160 = vst [vmem:[#allocation3 + $0x9c] sm:$0xf] %v8128_v36  ;;  %7841 = vmatprep.mubr.bf16.mxu1 %v14367_v34  ;;  %v5592_v20 = vadd.f32 %v16792_v4, %v13258_v39 }
 0x343   : > { %8655 = vst [vmem:[#allocation3 + $0x94] sm:$0xf] %v8384_v55  ;;  %8656 = vst [vmem:[#allocation3 + $0xa0] sm:$0xf] %v8394_v30  ;;  %v5876_v12 = vmin.f32 %v5844_v37, 20.0  ;;  %v6698_v27 = vshrl.u32 %v6502_v15, 16  ;;  %7842 = vmatmul.mubr.bf16.gmra.mxu1 %v12619_v9  ;;  %v8826_v61 = vsel %vm14960_vm4, %v8824_v10, %v8825_v3  ;;  %v5774_v22 = vmul.f32 %v16831_v18, %v5671_v6 }
 0x344   : > { %6385 = vst [vmem:[#allocation2 + $0x94] sm:$0xf] %v6184_v19  ;;  %6388 = vst [vmem:[#allocation2 + $0x98] sm:$0x1] %v6387_v63  ;;  %v6701_v53 = vshll.u32 %v6502_v15, 16  ;;  %v14409_v5 = vld [vmem:[#allocation8 + $0x140] sm:$0xff]  }
 0x345   : > { %v6707_v25 = vshll.u32 %v6503_v17, 16  ;;  %v6711_v40 = vshrl.u32 %v6503_v17, 16  ;;  %v6717_v55 = vshll.u32 %v6504_v59, 16  ;;  %v12881_v47 = vpack.c.bf16 %v5876_v12, %v5876_v12  ;;  %v8201_v11 = vld [vmem:[#allocation2 + $0x64] sm:$0xf]  ;;  %13912 = vmatprep.subr.bf16.mxu1 %v14409_v5  ;;  %v16870_v17 = vpop.f32.mrf.mxu0 }
 0x346   : > { %v6700_v42 = vrot.slane %v6698_v27, 4  ;;  %v6703_v57 = vrot.slane %v6701_v53, 5  ;;  %v8396_v51 = vshrl.u32 %v8200_v46, 16  ;;  %13913 = vmatpush3.bf16.msra.mxu1 %v14409_v5  ;;  %v8202_v44 = vld [vmem:[#allocation2 + $0x68] sm:$0x1]  ;;  %v8399_v14 = vshll.u32 %v8200_v46, 16 }
 0x347   : > { %v6709_v56 = vrot.slane %v6707_v25, 5  ;;  %v6713_v16 = vrot.slane %v6711_v40, 4  ;;  %v6719_v21 = vrot.slane %v6717_v55, 5  ;;  %v6187_v35 = vshrl.u32 %v12881_v47, 16  ;;  %v412_v3 = vld [vmem:[#allocation2 + $0xa8] sm:$0x1]  ;;  %v16883_v54 = vpop.f32.mrf.mxu0 }
 0x348   : > { %v6190_v15 = vshll.u32 %v12881_v47, 16  ;;  %v6704_v38 = vor.u32 %v6703_v57, %v6700_v42  ;;  %v14370_v36 = vld [vmem:[#allocation3 + $0xb0] ss:$12 sps:$4 sm:$0xff]   ;;  %v8398_v50 = vrot.slane %v8396_v51, 4  ;;  %v5813_v8 = vadd.f32 %v16844_v13, %v5774_v22  ;;  %v6441_v28 = vld [vmem:[#allocation2 + $0x90] sm:$0xf] }
 0x349   : > { %v6714_v30 = vor.u32 %v6713_v16, %v6709_v56  ;;  %v16872_v23 = vrot.slane %v6187_v35, 7  ;;  %8929 = vst [vmem:[#allocation3 + $0xb0] sm:$0xf] %v8823_v31  ;;  %8930 = vst [vmem:[#allocation3 + $0xbc] sm:$0xf] %v8826_v61  ;;  %v8405_v59 = vshll.u32 %v8201_v11, 16  ;;  %13879 = vmatmul.mubr.bf16.gmra.mxu0 %v14370_v36  ;;  %v5672_v57 = vadd.f32 %v5592_v20, %v16302_v24 }
 0x34a   : > { %v6705_v29 = vrot.slane %v6704_v38, 4  ;;  %v14412_v1 = vld [vmem:[#allocation8 + $0xc8] sm:$0xff]   ;;  %v6389_v34 = vld [vmem:[#allocation2 + $0x9c] sm:$0xf]  ;;  %v8401_v33 = vrot.slane %v8399_v14, 5  ;;  %v8409_v46 = vshrl.u32 %v8201_v11, 16 }
 0x34b   : > { %v6715_v37 = vrot.slane %v6714_v30, 4  ;;  %v8415_v19 = vshll.u32 %v8202_v44, 16  ;;  %6473 = vst [vmem:[#allocation3 + $0x120] sm:$0xf] %v6441_v28  ;;  %v6192_v4 = vor.u32 %v6190_v15, %v16872_v23  ;;  %v6193_v39 = vrot.slane %v16872_v23, 4  ;;  %13447 = vmatpush3.bf16.msra.mxu0 %v14412_v1 }
 0x34c   : > { %v5845_v63 = vmax.f32 %v5813_v8, 0.0  ;;  %v6710_v31 = vsel %vm14971_vm5, %v6705_v29, %v6709_v56  ;;  %v7001_v9 = vld [vmem:[#allocation2 + $0x60] sm:$0xe]  ;;  %v7002_v32 = vld [vmem:[#allocation2 + $0x64] sm:$0xf]  ;;  %v8402_v12 = vor.u32 %v8401_v33, %v8398_v50  ;;  %v16881_v41 = vrot.slane %v8405_v59, 5  ;;  %v16895_v50 = vpop.f32.mrf.mxu0 }
 0x34d   : > { %v6720_v10 = vsel %vm14971_vm5, %v6715_v37, %v6719_v21  ;;  %6959 = vst [vmem:[#allocation3 + $0xac] sm:$0xf] %v6710_v31  ;;  %v8411_v27 = vrot.slane %v8409_v46, 4  ;;  %v7003_v53 = vld [vmem:[#allocation2 + $0x68] sm:$0x1]  ;;  %v6390_v61 = vsel %vm16360_vm12, %v6192_v4, %v6389_v34  ;;  %v8417_v40 = vrot.slane %v8415_v19, 5 }
 0x34e   : > { %v8699_v5 = vld [vmem:[#allocation2 + $0x6c] sm:$0xe]  ;;  %v5877_v25 = vmin.f32 %v5845_v63, 20.0  ;;  %6960 = vst [vmem:[#allocation3 + $0xb8] sm:$0xf] %v6720_v10  ;;  %v413_v55 = vsel %vm15826_vm8, 0, %v412_v3  ;;  %v5775_v38 = vmul.f32 %v16831_v18, %v5672_v57 }
 0x34f   : > { %v8700_v47 = vld [vmem:[#allocation2 + $0x70] sm:$0xf]  ;;  %6391 = vst [vmem:[#allocation2 + $0x9c] sm:$0xf] %v6390_v61  ;;  %v8403_v6 = vrot.slane %v8402_v12, 4  ;;  %v8412_v42 = vor.u32 %v8411_v27, %v16881_v41  ;;  %v12593_v11 = vrot.slane %v7001_v9, 9 }
 0x350   : > { %414 = vst [vmem:[#allocation2 + $0xa8] sm:$0x1] %v413_v55  ;;  %v6442_v56 = vld [vmem:[#allocation2 + $0x94] sm:$0xf]  ;;  %v12882_v16 = vpack.c.bf16 %v5877_v25, %v5877_v25  ;;  %v7131_v21 = vrot.slane %v7002_v32, 5  ;;  %v7134_v51 = vrot.slane %v7003_v53, 5  ;;  %v5814_v34 = vadd.f32 %v16844_v13, %v5775_v38  ;;  %v13268_v25 = vpop.f32.mrf.mxu0 }
 0x351   : > { %v12681_v35 = vrot.slane %v8699_v5, 9  ;;  %6474 = vst [vmem:[#allocation3 + $0x12c] sm:$0xf] %v6442_v56  ;;  %v8408_v15 = vsel %vm14971_vm5, %v8403_v6, %v16881_v41  ;;  %v8413_v22 = vrot.slane %v8412_v42, 4  ;;  %v8701_v44 = vld [vmem:[#allocation2 + $0x74] sm:$0x1]  ;;  %v5595_v53 = vadd.f32 %v16834_v49, %v16857_v43 }
 0x352   : > { %v8829_v36 = vrot.slane %v8700_v47, 5  ;;  %v468_v30 = vld [vmem:[#allocation2 + $0xb0] sm:$0x1]  ;;  %v6195_v24 = vshrl.u32 %v12882_v16, 16  ;;  %v6198_v14 = vshll.u32 %v12882_v16, 16  ;;  %v7132_v3 = vsel %vm14960_vm4, %v12593_v11, %v7131_v21  ;;  %v14418_v29 = vld [vmem:[#allocation8 + $0x100] sm:$0xff]  }
 0x353   : > { %v7133_v20 = vrot.slane %v7131_v21, 4  ;;  %v6505_v8 = vld [vmem:[#allocation2 + $0x60] sm:$0xf]  ;;  %v8130_v28 = vld [vmem:[#allocation2 + $0x64] sm:$0xf]  ;;  %v8418_v1 = vsel %vm14971_vm5, %v8413_v22, %v8417_v40  ;;  %v14419_v19 = vld [vmem:[#allocation8 + $0xc0] sm:$0xff]   ;;  %13448 = vmatprep.subr.bf16.mxu0 %v14418_v29  ;;  %v5673_v11 = vadd.f32 %v5595_v53, %v16310_v26 }
 0x354   : > { %v8129_v59 = vld [vmem:[#allocation2 + $0x60] sm:$0xf]  ;;  %7233 = vst [vmem:[#allocation3 + $0xc8] sm:$0xf] %v7132_v3  ;;  %v16904_v37 = vsel %vm14960_vm4, %v12681_v35, %v8829_v36  ;;  %v8831_v33 = vrot.slane %v8829_v36, 4  ;;  %v6197_v4 = vrot.slane %v6195_v24, 7  ;;  %13449 = vmatpush3.bf16.msra.mxu0 %v14419_v19  ;;  %v13269_v36 = vpop.f32.mrf.mxu0 }
 0x355   : > { %v6506_v46 = vld [vmem:[#allocation2 + $0x64] sm:$0xf]  ;;  %v7135_v9 = vsel %vm14960_vm4, %v7133_v20, %v7134_v51  ;;  %v8832_v32 = vrot.slane %v8701_v44, 5  ;;  %v469_v10 = vsel %vm15834_vm10, 0, %v468_v30  ;;  %v7279_v12 = vld [vmem:[#allocation3 + $0xb4] sm:$0xff]  ;;  %v5846_v27 = vmax.f32 %v5814_v34, 0.0 }
 0x356   : > { %v6393_v63 = vld [vmem:[#allocation2 + $0xa4] sm:$0x1]  ;;  %7234 = vst [vmem:[#allocation3 + $0xd4] sm:$0xf] %v7135_v9  ;;  %470 = vst [vmem:[#allocation2 + $0xb0] sm:$0x1] %v469_v10  ;;  %v6200_v40 = vor.u32 %v6198_v14, %v6197_v4  ;;  %v5776_v22 = vmul.f32 %v16831_v18, %v5673_v11  ;;  %v16933_v9 = vadd.f32 %v13269_v36, %v13268_v25 }
 0x357   : > { %v7277_v31 = vld [vmem:[#allocation3 + $0xa8] sm:$0xff]  ;;  %v6722_v5 = vshrl.u32 %v6505_v8, 16  ;;  %v6725_v61 = vshll.u32 %v6505_v8, 16  ;;  %v6202_v55 = vrot.slane %v6197_v4, 4  ;;  %8162 = vst [vmem:[#allocation3 + $0xb4] sm:$0xf] %v8130_v28  ;;  %v8833_v6 = vsel %vm14960_vm4, %v8831_v33, %v8832_v32 }
 0x358   : > { %v14371_v41 = vld [vmem:[#allocation3 + $0xac] ss:$12 sps:$4 sm:$0xff]   ;;  %8161 = vst [vmem:[#allocation3 + $0xa8] sm:$0xf] %v8129_v59  ;;  %v12622_v47 = vcombine.low %v7277_v31, %v7279_v12  ;;  %v6507_v42 = vld [vmem:[#allocation2 + $0x68] sm:$0x1]  ;;  %v6201_v16 = vsel %vm16374_vm14, %v6193_v39, %v6200_v40  ;;  %v16922_v59 = vpop.f32.mrf.mxu1  ;;  %v5815_v28 = vadd.f32 %v16844_v13, %v5776_v22  ;;  %v16931_v31 = vadd.f32 %v16895_v50, %v16883_v54 }
 0x359   : > { %8657 = vst [vmem:[#allocation3 + $0xac] sm:$0xf] %v8408_v15  ;;  %8658 = vst [vmem:[#allocation3 + $0xb8] sm:$0xf] %v8418_v1  ;;  %7849 = vmatprep.mubr.bf16.mxu1 %v14371_v41  ;;  %v5878_v57 = vmin.f32 %v5846_v27, 20.0  ;;  %v6724_v49 = vrot.slane %v6722_v5, 4  ;;  %v6394_v21 = vsel %vm15826_vm8, %v6202_v55, %v6393_v63  ;;  %v13264_v63 = vadd.f32 %v16870_v17, %v16865_v7 }
 0x35a   : > { %v6727_v43 = vrot.slane %v6725_v61, 5  ;;  %v8203_v56 = vld [vmem:[#allocation2 + $0x6c] sm:$0xf]  ;;  %7850 = vmatmul.mubr.bf16.gmra.mxu1 %v12622_v47  ;;  %v6731_v51 = vshll.u32 %v6506_v46, 16  ;;  %v6735_v35 = vshrl.u32 %v6506_v46, 16  ;;  %v6741_v38 = vshll.u32 %v6507_v42, 16  ;;  %v5599_v25 = vpop.f32.mrf.mxu1 }
 0x35b   : > { %6392 = vst [vmem:[#allocation2 + $0xa0] sm:$0xf] %v6201_v16  ;;  %6395 = vst [vmem:[#allocation2 + $0xa4] sm:$0x1] %v6394_v21  ;;  %v12883_v15 = vpack.c.bf16 %v5878_v57, %v5878_v57  ;;  %v8204_v44 = vld [vmem:[#allocation2 + $0x70] sm:$0xf] }
 0x35c   : > { %v6728_v26 = vor.u32 %v6727_v43, %v6724_v49  ;;  %v6443_v30 = vld [vmem:[#allocation2 + $0x9c] sm:$0xf]  ;;  %v9880_v23 = vld [vmem:[#allocation2 + $0x24] sm:$0xf]  ;;  %v9881_v24 = vld [vmem:[#allocation2 + $0x28] sm:$0xf] }
 0x35d   : > { %v6733_v14 = vrot.slane %v6731_v51, 5  ;;  %v6737_v39 = vrot.slane %v6735_v35, 4  ;;  %v8420_v3 = vshrl.u32 %v8203_v56, 16  ;;  %v8423_v20 = vshll.u32 %v8203_v56, 16  ;;  %6475 = vst [vmem:[#allocation3 + $0x138] sm:$0xf] %v6443_v30 }
 0x35e   : > { %v6204_v8 = vshrl.u32 %v12883_v15, 16  ;;  %v6207_v29 = vshll.u32 %v12883_v15, 16  ;;  %v6729_v1 = vrot.slane %v6728_v26, 4  ;;  %v16925_v34 = vld [vmem:[#allocation3 + $0x1c] ss:$12 sps:$4 sm:$0xff]   ;;  %v5847_v10 = vmax.f32 %v5815_v28, 0.0 }
 0x35f   : > { %v14424_v33 = vld [vmem:[#allocation8 + $0x1f8] sm:$0xff]   ;;  %v14373_v46 = vld [vmem:[#allocation3 + $0xc8] ss:$12 sps:$4 sm:$0xff]   ;;  %v6738_v19 = vor.u32 %v6737_v39, %v6733_v14  ;;  %9912 = vst [vmem:[#allocation3 + $0x18] sm:$0xf] %v9880_v23  ;;  %v6743_v41 = vrot.slane %v6741_v38, 5  ;;  %v5600_v38 = vadd.f32 %v13264_v63, %v5599_v25 }
 0x360   : > { %v415_v4 = vld [vmem:[#allocation2 + $0xb4] sm:$0x1]  ;;  %9913 = vst [vmem:[#allocation3 + $0x24] sm:$0xf] %v9881_v24  ;;  %v16935_v32 = vrot.slane %v6204_v8, 7  ;;  %v6734_v12 = vsel %vm14971_vm5, %v6729_v1, %v6733_v14  ;;  %13570 = vmatprep.subr.bf16.mxu1 %v14424_v33  ;;  %13882 = vmatprep.mubr.bf16.mxu0 %v14373_v46  ;;  %v8422_v54 = vrot.slane %v8420_v3, 4  ;;  %v16950_v24 = vpop.f32.mrf.mxu1 }
 0x361   : > { %8931 = vst [vmem:[#allocation3 + $0xc8] sm:$0xf] %v16904_v37  ;;  %8932 = vst [vmem:[#allocation3 + $0xd4] sm:$0xf] %v8833_v6  ;;  %v8205_v27 = vld [vmem:[#allocation2 + $0x74] sm:$0x1]  ;;  %v5674_v8 = vadd.f32 %v5600_v38, %v16318_v62 }
 0x362   : > { %v6396_v7 = vld [vmem:[#allocation2 + $0xa8] sm:$0xf]  ;;  %v6739_v17 = vrot.slane %v6738_v19, 4  ;;  %6961 = vst [vmem:[#allocation3 + $0xc4] sm:$0xf] %v6734_v12  ;;  %v8425_v50 = vrot.slane %v8423_v20, 5  ;;  %v6209_v5 = vor.u32 %v6207_v29, %v16935_v32 }
 0x363   : > { %v8429_v53 = vshll.u32 %v8204_v44, 16  ;;  %v6210_v61 = vrot.slane %v16935_v32, 4  ;;  %v5879_v37 = vmin.f32 %v5847_v10, 20.0  ;;  %v8433_v40 = vshrl.u32 %v8204_v44, 16  ;;  %v7004_v55 = vld [vmem:[#allocation2 + $0x6c] sm:$0xe] }
 0x364   : > { %v14427_v47 = vld [vmem:[#allocation8 + $0x238] sm:$0xff]   ;;  %v6744_v6 = vsel %vm14971_vm5, %v6739_v17, %v6743_v41  ;;  %v8426_v42 = vor.u32 %v8425_v50, %v8422_v54  ;;  %v8439_v11 = vshll.u32 %v8205_v27, 16  ;;  %v6397_v43 = vsel %vm16360_vm12, %v6209_v5, %v6396_v7  ;;  %v8702_v35 = vld [vmem:[#allocation2 + $0x78] sm:$0xe]  ;;  %v471_v15 = vld [vmem:[#allocation2 + $0xbc] sm:$0x1]  ;;  %v5602_v5 = vpop.f32.mrf.mxu1 }
 0x365   : > { %v16944_v57 = vrot.slane %v8429_v53, 5  ;;  %v7005_v49 = vld [vmem:[#allocation2 + $0x70] sm:$0xf]  ;;  %v12884_v56 = vpack.c.bf16 %v5879_v37, %v5879_v37  ;;  %6962 = vst [vmem:[#allocation3 + $0xd0] sm:$0xf] %v6744_v6  ;;  %v8435_v16 = vrot.slane %v8433_v40, 4  ;;  %13946 = vmatprep.subr.bf16.mxu0 %v14427_v47  ;;  %v5777_v27 = vmul.f32 %v16831_v18, %v5674_v8 }
 0x366   : > { %v416_v21 = vsel %vm15826_vm8, 0, %v415_v4  ;;  %v7006_v51 = vld [vmem:[#allocation2 + $0x74] sm:$0x1]  ;;  %6398 = vst [vmem:[#allocation2 + $0xa8] sm:$0xf] %v6397_v43  ;;  %v8427_v22 = vrot.slane %v8426_v42, 4 }
 0x367   : > { %v8441_v26 = vrot.slane %v8439_v11, 5  ;;  %417 = vst [vmem:[#allocation2 + $0xb4] sm:$0x1] %v416_v21  ;;  %v12594_v44 = vrot.slane %v7004_v55, 9  ;;  %v8703_v36 = vld [vmem:[#allocation2 + $0x7c] sm:$0xf]  ;;  %v8436_v14 = vor.u32 %v8435_v16, %v16944_v57  ;;  %v5816_v42 = vadd.f32 %v16844_v13, %v5777_v27 }
 0x368   : > { %v6212_v30 = vshrl.u32 %v12884_v56, 16  ;;  %v6215_v23 = vshll.u32 %v12884_v56, 16  ;;  %v7138_v39 = vrot.slane %v7005_v49, 5  ;;  %v8704_v3 = vld [vmem:[#allocation2 + $0x80] sm:$0x1]  ;;  %v8432_v20 = vsel %vm14971_vm5, %v8427_v22, %v16944_v57  ;;  %v18413_v32 = vld [vmem:[#allocation21_spill] sm:$0xff] }
 0x369   : > { %v7141_v29 = vrot.slane %v7006_v51, 5  ;;  %v12682_v28 = vrot.slane %v8702_v35, 9  ;;  %v6444_v1 = vld [vmem:[#allocation2 + $0xa0] sm:$0xf]  ;;  %v8437_v46 = vrot.slane %v8436_v14, 4  ;;  %v8836_v7 = vrot.slane %v8703_v36, 5 }
 0x36a   : > { %v6214_v33 = vrot.slane %v6212_v30, 7  ;;  %v7139_v19 = vsel %vm14960_vm4, %v12594_v44, %v7138_v39  ;;  %v7140_v4 = vrot.slane %v7138_v39, 4  ;;  %v6508_v63 = vld [vmem:[#allocation2 + $0x6c] sm:$0xf]  ;;  %6476 = vst [vmem:[#allocation3 + $0x144] sm:$0xf] %v6444_v1  ;;  %v5603_v49 = vadd.f32 %v16931_v31, %v5602_v5 }
 0x36b   : > { %v6400_v10 = vld [vmem:[#allocation2 + $0xb0] sm:$0x1]  ;;  %v8131_v12 = vld [vmem:[#allocation2 + $0x6c] sm:$0xf]  ;;  %7235 = vst [vmem:[#allocation3 + $0xe0] sm:$0xf] %v7139_v19  ;;  %v8442_v53 = vsel %vm14971_vm5, %v8437_v46, %v8441_v26  ;;  %v8837_v57 = vsel %vm14960_vm4, %v12682_v28, %v8836_v7  ;;  %v5608_v27 = vadd.f32 %v16922_v59, %v16933_v9 }
 0x36c   : > { %v8132_v41 = vld [vmem:[#allocation2 + $0x70] sm:$0xf]  ;;  %v8839_v17 = vrot.slane %v8704_v3, 5  ;;  %v472_v62 = vsel %vm15834_vm10, 0, %v471_v15  ;;  %v6217_v54 = vor.u32 %v6215_v23, %v6214_v33  ;;  %v6219_v50 = vrot.slane %v6214_v33, 4  ;;  %v7281_v55 = vld [vmem:[#allocation3 + $0xc0] sm:$0xff] }
 0x36d   : > { %v7142_v37 = vsel %vm14960_vm4, %v7140_v4, %v7141_v29  ;;  %473 = vst [vmem:[#allocation2 + $0xbc] sm:$0x1] %v472_v62  ;;  %v6509_v25 = vld [vmem:[#allocation2 + $0x70] sm:$0xf]  ;;  %v6510_v40 = vld [vmem:[#allocation2 + $0x74] sm:$0x1]  ;;  %v5675_v15 = vadd.f32 %v5603_v49, %v18413_v32 }
 0x36e   : > { %v7283_v47 = vld [vmem:[#allocation3 + $0xcc] sm:$0xff]  ;;  %7236 = vst [vmem:[#allocation3 + $0xec] sm:$0xf] %v7142_v37  ;;  %v8838_v11 = vrot.slane %v8836_v7, 4  ;;  %v6218_v43 = vsel %vm16374_vm14, %v6210_v61, %v6217_v54  ;;  %v6401_v56 = vsel %vm15826_vm8, %v6219_v50, %v6400_v10  ;;  %8163 = vst [vmem:[#allocation3 + $0xc0] sm:$0xf] %v8131_v12 }
 0x36f   : > { %v14374_v6 = vld [vmem:[#allocation3 + $0xc4] ss:$12 sps:$4 sm:$0xff]   ;;  %8164 = vst [vmem:[#allocation3 + $0xcc] sm:$0xf] %v8132_v41  ;;  %v12625_v16 = vcombine.low %v7281_v55, %v7283_v47  ;;  %v6746_v21 = vshrl.u32 %v6508_v63, 16  ;;  %v5848_v35 = vmax.f32 %v5816_v42, 0.0  ;;  %v5778_v23 = vmul.f32 %v16831_v18, %v5675_v15 }
 0x370   : > { %8659 = vst [vmem:[#allocation3 + $0xc4] sm:$0xf] %v8432_v20  ;;  %8660 = vst [vmem:[#allocation3 + $0xd0] sm:$0xf] %v8442_v53  ;;  %v8206_v51 = vld [vmem:[#allocation2 + $0x78] sm:$0xf]  ;;  %7857 = vmatprep.mubr.bf16.mxu1 %v14374_v6  ;;  %v8840_v31 = vsel %vm14960_vm4, %v8838_v11, %v8839_v17 }
 0x371   : > { %6399 = vst [vmem:[#allocation2 + $0xac] sm:$0xf] %v6218_v43  ;;  %6402 = vst [vmem:[#allocation2 + $0xb0] sm:$0x1] %v6401_v56  ;;  %v6749_v61 = vshll.u32 %v6508_v63, 16  ;;  %7858 = vmatmul.mubr.bf16.gmra.mxu1 %v12625_v16  ;;  %v6748_v22 = vrot.slane %v6746_v21, 4  ;;  %v5817_v33 = vadd.f32 %v16844_v13, %v5778_v23  ;;  %v13271_v16 = vpop.f32.mrf.mxu0 }
 0x372   : > { %v6755_v26 = vshll.u32 %v6509_v25, 16  ;;  %v6759_v38 = vshrl.u32 %v6509_v25, 16  ;;  %v6765_v44 = vshll.u32 %v6510_v40, 16  ;;  %v8207_v36 = vld [vmem:[#allocation2 + $0x7c] sm:$0xf]  ;;  %v5880_v30 = vmin.f32 %v5848_v35, 20.0 }
 0x373   : > { %v6751_v14 = vrot.slane %v6749_v61, 5  ;;  %v8444_v39 = vshrl.u32 %v8206_v51, 16  ;;  %v6445_v3 = vld [vmem:[#allocation2 + $0xa8] sm:$0xf]  ;;  %v8447_v28 = vshll.u32 %v8206_v51, 16  ;;  %v8453_v41 = vshll.u32 %v8207_v36, 16 }
 0x374   : > { %v6757_v20 = vrot.slane %v6755_v26, 5  ;;  %v6761_v8 = vrot.slane %v6759_v38, 4  ;;  %v6767_v29 = vrot.slane %v6765_v44, 5  ;;  %6477 = vst [vmem:[#allocation3 + $0x150] sm:$0xf] %v6445_v3  ;;  %v12885_v1 = vpack.c.bf16 %v5880_v30, %v5880_v30  ;;  %v18414_v32 = vld [vmem:[#allocation16_spill] sm:$0xff] }
 0x375   : > { %v6752_v46 = vor.u32 %v6751_v14, %v6748_v22  ;;  %v8208_v19 = vld [vmem:[#allocation2 + $0x80] sm:$0x1]  ;;  %v8446_v4 = vrot.slane %v8444_v39, 4  ;;  %v14378_v63 = vld [vmem:[#allocation3 + $0xe0] ss:$12 sps:$4 sm:$0xff]   ;;  %v8449_v12 = vrot.slane %v8447_v28, 5  ;;  %v5676_v15 = vadd.f32 %v5608_v27, %v18414_v32 }
 0x376   : > { %v6762_v10 = vor.u32 %v6761_v8, %v6757_v20  ;;  %v6221_v7 = vshrl.u32 %v12885_v1, 16  ;;  %v6224_v17 = vshll.u32 %v12885_v1, 16  ;;  %8933 = vst [vmem:[#allocation3 + $0xe0] sm:$0xf] %v8837_v57  ;;  %8934 = vst [vmem:[#allocation3 + $0xec] sm:$0xf] %v8840_v31  ;;  %13883 = vmatmul.mubr.bf16.gmra.mxu0 %v14378_v63 }
 0x377   : > { %v5849_v62 = vmax.f32 %v5817_v33, 0.0  ;;  %v6753_v54 = vrot.slane %v6752_v46, 4  ;;  %v418_v50 = vld [vmem:[#allocation2 + $0xc0] sm:$0x1]  ;;  %v8450_v5 = vor.u32 %v8449_v12, %v8446_v4  ;;  %v16983_v37 = vrot.slane %v8453_v41, 5  ;;  %v13272_v46 = vpop.f32.mrf.mxu0 }
 0x378   : > { %v6763_v53 = vrot.slane %v6762_v10, 4  ;;  %v8457_v25 = vshrl.u32 %v8207_v36, 16  ;;  %v16985_v40 = vrot.slane %v6221_v7, 7  ;;  %v8463_v59 = vshll.u32 %v8208_v19, 16  ;;  %v7007_v9 = vld [vmem:[#allocation2 + $0x78] sm:$0xe] }
 0x379   : > { %v5881_v55 = vmin.f32 %v5849_v62, 20.0  ;;  %v6758_v47 = vsel %vm14971_vm5, %v6753_v54, %v6757_v20  ;;  %v6403_v6 = vld [vmem:[#allocation2 + $0xb4] sm:$0xf]  ;;  %v419_v11 = vsel %vm15826_vm8, 0, %v418_v50  ;;  %v7008_v49 = vld [vmem:[#allocation2 + $0x7c] sm:$0xf]  ;;  %v5779_v39 = vmul.f32 %v16831_v18, %v5676_v15 }
 0x37a   : > { %v6768_v42 = vsel %vm14971_vm5, %v6763_v53, %v6767_v29  ;;  %6963 = vst [vmem:[#allocation3 + $0xdc] sm:$0xf] %v6758_v47  ;;  %v8459_v57 = vrot.slane %v8457_v25, 4  ;;  %v6226_v43 = vor.u32 %v6224_v17, %v16985_v40  ;;  %420 = vst [vmem:[#allocation2 + $0xc0] sm:$0x1] %v419_v11  ;;  %v8451_v51 = vrot.slane %v8450_v5, 4 }
 0x37b   : > { %v12886_v56 = vpack.c.bf16 %v5881_v55, %v5881_v55  ;;  %6964 = vst [vmem:[#allocation3 + $0xe8] sm:$0xf] %v6768_v42  ;;  %v7009_v21 = vld [vmem:[#allocation2 + $0x80] sm:$0x1]  ;;  %v8465_v31 = vrot.slane %v8463_v59, 5  ;;  %v12595_v44 = vrot.slane %v7007_v9, 9  ;;  %v5818_v27 = vadd.f32 %v16844_v13, %v5779_v39 }
 0x37c   : > { %v8460_v35 = vor.u32 %v8459_v57, %v16983_v37  ;;  %v16996_v61 = vld [vmem:[#allocation2 + $0x88] sm:$0xf]  ;;  %v6404_v26 = vsel %vm16360_vm12, %v6226_v43, %v6403_v6  ;;  %v7145_v36 = vrot.slane %v7008_v49, 5  ;;  %v6446_v30 = vld [vmem:[#allocation2 + $0xac] sm:$0xf]  ;;  %v7148_v3 = vrot.slane %v7009_v21, 5 }
 0x37d   : > { %v474_v22 = vld [vmem:[#allocation2 + $0xc8] sm:$0x1]  ;;  %v6229_v38 = vshrl.u32 %v12886_v56, 16  ;;  %6405 = vst [vmem:[#allocation2 + $0xb4] sm:$0xf] %v6404_v26  ;;  %v6232_v23 = vshll.u32 %v12886_v56, 16  ;;  %v8456_v59 = vsel %vm14971_vm5, %v8451_v51, %v16983_v37  ;;  %v13273_v42 = vadd.f32 %v13272_v46, %v13271_v16 }
 0x37e   : > { %v8461_v14 = vrot.slane %v8460_v35, 4  ;;  %v17001_v20 = vld [vmem:[#allocation2 + $0x84] sm:$0xe]  ;;  %6478 = vst [vmem:[#allocation3 + $0x15c] sm:$0xf] %v6446_v30  ;;  %v7146_v29 = vsel %vm14960_vm4, %v12595_v44, %v7145_v36  ;;  %v7147_v28 = vrot.slane %v7145_v36, 4 }
 0x37f   : > { %v6231_v8 = vrot.slane %v6229_v38, 7  ;;  %v8707_v1 = vld [vmem:[#allocation2 + $0x8c] sm:$0x1]  ;;  %v8843_v33 = vrot.slane %v16996_v61, 5  ;;  %v6511_v19 = vld [vmem:[#allocation2 + $0x78] sm:$0xf]  ;;  %v5611_v21 = vadd.f32 %v16950_v24, %v13273_v42 }
 0x380   : > { %v6227_v4 = vrot.slane %v16985_v40, 4  ;;  %v6407_v63 = vld [vmem:[#allocation2 + $0xbc] sm:$0x1]  ;;  %v8133_v10 = vld [vmem:[#allocation2 + $0x78] sm:$0xf]  ;;  %v8466_v41 = vsel %vm14971_vm5, %v8461_v14, %v8465_v31  ;;  %v475_v7 = vsel %vm15834_vm10, 0, %v474_v22  ;;  %v7149_v50 = vsel %vm14960_vm4, %v7147_v28, %v7148_v3 }
 0x381   : > { %v8134_v12 = vld [vmem:[#allocation2 + $0x7c] sm:$0xf]  ;;  %7237 = vst [vmem:[#allocation3 + $0xf8] sm:$0xf] %v7146_v29  ;;  %v6234_v62 = vor.u32 %v6232_v23, %v6231_v8  ;;  %v6236_v54 = vrot.slane %v6231_v8, 4  ;;  %v12683_v53 = vrot.slane %v17001_v20, 9 }
 0x382   : > { %v6512_v17 = vld [vmem:[#allocation2 + $0x7c] sm:$0xf]  ;;  %476 = vst [vmem:[#allocation2 + $0xc8] sm:$0x1] %v475_v7  ;;  %v6513_v5 = vld [vmem:[#allocation2 + $0x80] sm:$0x1] }
 0x383   : > { %v17015_v25 = vld [vmem:[#allocation3 + $0x34] ss:$12 sps:$4 sm:$0xff]   ;;  %v7285_v40 = vld [vmem:[#allocation3 + $0xd8] sm:$0xff]  ;;  %v7287_v55 = vld [vmem:[#allocation3 + $0xe4] sm:$0xff]  ;;  %v5850_v9 = vmax.f32 %v5818_v27, 0.0  ;;  %v8846_v6 = vrot.slane %v8707_v1, 5  ;;  %v6235_v57 = vsel %vm16374_vm14, %v6227_v4, %v6234_v62  ;;  %v6408_v11 = vsel %vm15826_vm8, %v6236_v54, %v6407_v63 }
 0x384   : > { %v14380_v47 = vld [vmem:[#allocation3 + $0xdc] ss:$12 sps:$4 sm:$0xff]   ;;  %7238 = vst [vmem:[#allocation3 + $0x104] sm:$0xf] %v7149_v50  ;;  %8165 = vst [vmem:[#allocation3 + $0xd8] sm:$0xf] %v8133_v10  ;;  %v12628_v49 = vcombine.low %v7285_v40, %v7287_v55  ;;  %v8844_v63 = vsel %vm14960_vm4, %v12683_v53, %v8843_v33 }
 0x385   : > { %8166 = vst [vmem:[#allocation3 + $0xe4] sm:$0xf] %v8134_v12  ;;  %8661 = vst [vmem:[#allocation3 + $0xdc] sm:$0xf] %v8456_v59  ;;  %v8845_v43 = vrot.slane %v8843_v33, 4  ;;  %7865 = vmatprep.mubr.bf16.mxu1 %v14380_v47  ;;  %v5882_v16 = vmin.f32 %v5850_v9, 20.0 }
 0x386   : > { %8662 = vst [vmem:[#allocation3 + $0xe8] sm:$0xf] %v8466_v41  ;;  %v9882_v56 = vld [vmem:[#allocation2 + $0x30] sm:$0xf]  ;;  %v9883_v37 = vld [vmem:[#allocation2 + $0x34] sm:$0xf]  ;;  %7866 = vmatmul.mubr.bf16.gmra.mxu1 %v12628_v49 }
 0x387   : > { %6406 = vst [vmem:[#allocation2 + $0xb8] sm:$0xf] %v6235_v57  ;;  %6409 = vst [vmem:[#allocation2 + $0xbc] sm:$0x1] %v6408_v11  ;;  %v6770_v51 = vshrl.u32 %v6511_v19, 16  ;;  %v6773_v35 = vshll.u32 %v6511_v19, 16  ;;  %v8847_v32 = vsel %vm14960_vm4, %v8845_v43, %v8846_v6  ;;  %v12887_v38 = vpack.c.bf16 %v5882_v16, %v5882_v16 }
 0x388   : > { %v8209_v31 = vld [vmem:[#allocation2 + $0x84] sm:$0xf]  ;;  %9914 = vst [vmem:[#allocation3 + $0x30] sm:$0xf] %v9882_v56  ;;  %9915 = vst [vmem:[#allocation3 + $0x3c] sm:$0xf] %v9883_v37 }
 0x389   : > { %v6779_v15 = vshll.u32 %v6512_v17, 16  ;;  %v6783_v22 = vshrl.u32 %v6512_v17, 16  ;;  %v6789_v26 = vshll.u32 %v6513_v5, 16  ;;  %v18415_v44 = vld [vmem:[#allocation26_spill] sm:$0xff]  ;;  %v6772_v30 = vrot.slane %v6770_v51, 4 }
 0x38a   : > { %v5677_v36 = vadd.f32 %v5611_v21, %v18415_v44  ;;  %v6775_v23 = vrot.slane %v6773_v35, 5  ;;  %v8210_v14 = vld [vmem:[#allocation2 + $0x88] sm:$0xf]  ;;  %v8468_v20 = vshrl.u32 %v8209_v31, 16  ;;  %v6238_v29 = vshrl.u32 %v12887_v38, 16 }
 0x38b   : > { %v6781_v39 = vrot.slane %v6779_v15, 5  ;;  %v6785_v24 = vrot.slane %v6783_v22, 4  ;;  %v6791_v3 = vrot.slane %v6789_v26, 5  ;;  %v17030_v8 = vld [vmem:[#allocation2 + $0x28] sm:$0xf]  ;;  %v6241_v28 = vshll.u32 %v12887_v38, 16 }
 0x38c   : > { %v5780_v1 = vmul.f32 %v16831_v18, %v5677_v36  ;;  %v6776_v46 = vor.u32 %v6775_v23, %v6772_v30  ;;  %v8211_v19 = vld [vmem:[#allocation2 + $0x8c] sm:$0x1]  ;;  %v14383_v4 = vld [vmem:[#allocation3 + $0xf8] ss:$12 sps:$4 sm:$0xff]   ;;  %v8470_v12 = vrot.slane %v8468_v20, 4  ;;  %v8471_v41 = vshll.u32 %v8209_v31, 16 }
 0x38d   : > { %v6786_v10 = vor.u32 %v6785_v24, %v6781_v39  ;;  %v17037_v27 = vrot.slane %v6238_v29, 7  ;;  %8935 = vst [vmem:[#allocation3 + $0xf8] sm:$0xf] %v8844_v63  ;;  %8936 = vst [vmem:[#allocation3 + $0x104] sm:$0xf] %v8847_v32  ;;  %v8477_v62 = vshll.u32 %v8210_v14, 16  ;;  %13886 = vmatprep.mubr.bf16.mxu0 %v14383_v4 }
 0x38e   : > { %v5819_v7 = vadd.f32 %v16844_v13, %v5780_v1  ;;  %v6777_v17 = vrot.slane %v6776_v46, 4  ;;  %v6447_v18 = vld [vmem:[#allocation2 + $0xb4] sm:$0xf]  ;;  %v6410_v54 = vld [vmem:[#allocation2 + $0xc0] sm:$0xf]  ;;  %v8473_v5 = vrot.slane %v8471_v41, 5 }
 0x38f   : > { %v6787_v50 = vrot.slane %v6786_v10, 4  ;;  %v8481_v61 = vshrl.u32 %v8210_v14, 16  ;;  %v8487_v40 = vshll.u32 %v8211_v19, 16  ;;  %6479 = vst [vmem:[#allocation3 + $0x168] sm:$0xf] %v6447_v18  ;;  %v6243_v53 = vor.u32 %v6241_v28, %v17037_v27  ;;  %v17061_v20 = vld [vmem:[#allocation3 + $0x24] sm:$0xff] }
 0x390   : > { %v5851_v55 = vmax.f32 %v5819_v7, 0.0  ;;  %v6782_v47 = vsel %vm14971_vm5, %v6777_v17, %v6781_v39  ;;  %v7010_v59 = vld [vmem:[#allocation2 + $0x84] sm:$0xe]  ;;  %v7011_v13 = vld [vmem:[#allocation2 + $0x88] sm:$0xf]  ;;  %v8474_v6 = vor.u32 %v8473_v5, %v8470_v12  ;;  %v8479_v42 = vrot.slane %v8477_v62, 5 }
 0x391   : > { %v6792_v9 = vsel %vm14971_vm5, %v6787_v50, %v6791_v3  ;;  %6965 = vst [vmem:[#allocation3 + $0xf4] sm:$0xf] %v6782_v47  ;;  %v8483_v57 = vrot.slane %v8481_v61, 4  ;;  %v7012_v11 = vld [vmem:[#allocation2 + $0x8c] sm:$0x1]  ;;  %v6244_v43 = vrot.slane %v17037_v27, 4  ;;  %v6411_v56 = vsel %vm16360_vm12, %v6243_v53, %v6410_v54 }
 0x392   : > { %v17046_v49 = vld [vmem:[#allocation2 + $0x94] sm:$0xf]  ;;  %v5883_v37 = vmin.f32 %v5851_v55, 20.0  ;;  %6966 = vst [vmem:[#allocation3 + $0x100] sm:$0xf] %v6792_v9  ;;  %v8489_v35 = vrot.slane %v8487_v40, 5 }
 0x393   : > { %v17051_v16 = vld [vmem:[#allocation2 + $0x90] sm:$0xe]  ;;  %v6514_v21 = vld [vmem:[#allocation2 + $0x84] sm:$0xf]  ;;  %6412 = vst [vmem:[#allocation2 + $0xc0] sm:$0xf] %v6411_v56  ;;  %v8484_v51 = vor.u32 %v8483_v57, %v8479_v42 }
 0x394   : > { %v12596_v31 = vrot.slane %v7010_v59, 9  ;;  %v7152_v32 = vrot.slane %v7011_v13, 5  ;;  %v8710_v15 = vld [vmem:[#allocation2 + $0x98] sm:$0x1]  ;;  %v6515_v22 = vld [vmem:[#allocation2 + $0x88] sm:$0xf]  ;;  %v12888_v26 = vpack.c.bf16 %v5883_v37, %v5883_v37 }
 0x395   : > { %v8475_v38 = vrot.slane %v8474_v6, 4  ;;  %v7155_v44 = vrot.slane %v7012_v11, 5  ;;  %v8850_v36 = vrot.slane %v17046_v49, 5  ;;  %v17054_v30 = vld [vmem:[#allocation2 + $0x8c] sm:$0x1]  ;;  %v8485_v23 = vrot.slane %v8484_v51, 4 }
 0x396   : > { %v6448_v60 = vld [vmem:[#allocation2 + $0xb8] sm:$0xf]  ;;  %v7153_v14 = vsel %vm14960_vm4, %v12596_v31, %v7152_v32  ;;  %v7154_v39 = vrot.slane %v7152_v32, 4  ;;  %v12684_v24 = vrot.slane %v17051_v16, 9  ;;  %v17059_v3 = vld [vmem:[#allocation3 + $0x18] sm:$0xff]  ;;  %v6246_v29 = vshrl.u32 %v12888_v26, 16 }
 0x397   : > { %6480 = vst [vmem:[#allocation3 + $0x174] sm:$0xf] %v6448_v60  ;;  %v6249_v28 = vshll.u32 %v12888_v26, 16  ;;  %7239 = vst [vmem:[#allocation3 + $0x110] sm:$0xf] %v7153_v14  ;;  %v8852_v1 = vrot.slane %v8850_v36, 4  ;;  %v8490_v12 = vsel %vm14971_vm5, %v8485_v23, %v8489_v35  ;;  %v8480_v55 = vsel %vm14971_vm5, %v8475_v38, %v8479_v42 }
 0x398   : > { %v8853_v46 = vrot.slane %v8710_v15, 5  ;;  %v8212_v19 = vld [vmem:[#allocation2 + $0x90] sm:$0xf]  ;;  %v6414_v4 = vld [vmem:[#allocation2 + $0xc8] sm:$0x1]  ;;  %v7156_v41 = vsel %vm14960_vm4, %v7154_v39, %v7155_v44  ;;  %v6794_v7 = vshrl.u32 %v6514_v21, 16 }
 0x399   : > { %v8135_v63 = vld [vmem:[#allocation2 + $0x84] sm:$0xf]  ;;  %v8136_v10 = vld [vmem:[#allocation2 + $0x88] sm:$0xf]  ;;  %v6797_v17 = vshll.u32 %v6514_v21, 16  ;;  %v6248_v18 = vrot.slane %v6246_v29, 7 }
 0x39a   : > { %v8213_v62 = vld [vmem:[#allocation2 + $0x94] sm:$0xf]  ;;  %v7289_v54 = vld [vmem:[#allocation3 + $0xf0] sm:$0xff]  ;;  %7240 = vst [vmem:[#allocation3 + $0x11c] sm:$0xf] %v7156_v41  ;;  %v6803_v50 = vshll.u32 %v6515_v22, 16  ;;  %v8854_v56 = vsel %vm14960_vm4, %v8852_v1, %v8853_v46 }
 0x39b   : > { %v6807_v5 = vshrl.u32 %v6515_v22, 16  ;;  %v7291_v40 = vld [vmem:[#allocation3 + $0xfc] sm:$0xff]  ;;  %v6796_v47 = vrot.slane %v6794_v7, 4  ;;  %v6799_v59 = vrot.slane %v6797_v17, 5  ;;  %v6813_v13 = vshll.u32 %v17054_v30, 16  ;;  %v17084_v44 = vld [vmem:[#allocation3 + $0x30] sm:$0xff] }
 0x39c   : > { %v14385_v53 = vld [vmem:[#allocation3 + $0xf4] ss:$12 sps:$4 sm:$0xff]   ;;  %v6251_v9 = vor.u32 %v6249_v28, %v6248_v18  ;;  %v6253_v6 = vrot.slane %v6248_v18, 4  ;;  %8167 = vst [vmem:[#allocation3 + $0xf0] sm:$0xf] %v8135_v63  ;;  %v12631_v57 = vcombine.low %v7289_v54, %v7291_v40  ;;  %v6805_v11 = vrot.slane %v6803_v50, 5 }
 0x39d   : > { %8168 = vst [vmem:[#allocation3 + $0xfc] sm:$0xf] %v8136_v10  ;;  %8663 = vst [vmem:[#allocation3 + $0xf4] sm:$0xf] %v8480_v55  ;;  %7873 = vmatprep.mubr.bf16.mxu1 %v14385_v53  ;;  %v6800_v37 = vor.u32 %v6799_v59, %v6796_v47  ;;  %v6809_v21 = vrot.slane %v6807_v5, 4  ;;  %v8492_v42 = vshrl.u32 %v8212_v19, 16  ;;  %v8851_v63 = vsel %vm14960_vm4, %v12684_v24, %v8850_v36 }
 0x39e   : > { %8664 = vst [vmem:[#allocation3 + $0x100] sm:$0xf] %v8490_v12  ;;  %v8214_v51 = vld [vmem:[#allocation2 + $0x98] sm:$0x1]  ;;  %v7013_v35 = vld [vmem:[#allocation2 + $0x90] sm:$0xe]  ;;  %v6252_v32 = vsel %vm16374_vm14, %v6244_v43, %v6251_v9  ;;  %v6415_v15 = vsel %vm15826_vm8, %v6253_v6, %v6414_v4  ;;  %7874 = vmatmul.mubr.bf16.gmra.mxu1 %v12631_v57 }
 0x39f   : > { %v7014_v31 = vld [vmem:[#allocation2 + $0x94] sm:$0xf]  ;;  %v8495_v22 = vshll.u32 %v8212_v19, 16  ;;  %v8501_v26 = vshll.u32 %v8213_v62, 16  ;;  %v17082_v38 = vld [vmem:[#allocation2 + $0xa0] sm:$0xf]  ;;  %v6810_v60 = vor.u32 %v6809_v21, %v6805_v11 }
 0x3a0   : > { %6413 = vst [vmem:[#allocation2 + $0xc4] sm:$0xf] %v6252_v32  ;;  %6416 = vst [vmem:[#allocation2 + $0xc8] sm:$0x1] %v6415_v15  ;;  %v6801_v30 = vrot.slane %v6800_v37, 4  ;;  %v8494_v23 = vrot.slane %v8492_v42, 4 }
 0x3a1   : > { %v8505_v14 = vshrl.u32 %v8213_v62, 16  ;;  %v7015_v27 = vld [vmem:[#allocation2 + $0x98] sm:$0x1]  ;;  %v6815_v48 = vrot.slane %v6813_v13, 5  ;;  %v8497_v43 = vrot.slane %v8495_v22, 5  ;;  %v17088_v29 = vrot.slane %v8501_v26, 5 }
 0x3a2   : > { %v17086_v39 = vld [vmem:[#allocation3 + $0x3c] sm:$0xff]  ;;  %v8511_v28 = vshll.u32 %v8214_v51, 16  ;;  %v6517_v1 = vld [vmem:[#allocation2 + $0x90] sm:$0xf]  ;;  %v17090_v46 = vld [vmem:[#allocation3 + $0x48] sm:$0xff]  ;;  %v6806_v10 = vsel %vm14971_vm5, %v6801_v30, %v6805_v11  ;;  %v6811_v12 = vrot.slane %v6810_v60, 4 }
 0x3a3   : > { %v17092_v19 = vld [vmem:[#allocation3 + $0x54] sm:$0xff]  ;;  %v14389_v4 = vld [vmem:[#allocation3 + $0x110] ss:$12 sps:$4 sm:$0xff]   ;;  %v8507_v41 = vrot.slane %v8505_v14, 4  ;;  %6967 = vst [vmem:[#allocation3 + $0x10c] sm:$0xf] %v6806_v10  ;;  %v8498_v7 = vor.u32 %v8497_v43, %v8494_v23 }
 0x3a4   : > { %8937 = vst [vmem:[#allocation3 + $0x110] sm:$0xf] %v8851_v63  ;;  %8938 = vst [vmem:[#allocation3 + $0x11c] sm:$0xf] %v8854_v56  ;;  %v12597_v17 = vrot.slane %v7013_v35, 9  ;;  %v7159_v62 = vrot.slane %v7014_v31, 5  ;;  %13887 = vmatmul.mubr.bf16.gmra.mxu0 %v14389_v4  ;;  %v6816_v16 = vsel %vm14971_vm5, %v6811_v12, %v6815_v48 }
 0x3a5   : > { %v17102_v18 = vld [vmem:[#allocation2 + $0x9c] sm:$0xe]  ;;  %v6518_v54 = vld [vmem:[#allocation2 + $0x94] sm:$0xf]  ;;  %v8508_v36 = vor.u32 %v8507_v41, %v17088_v29  ;;  %v8713_v24 = vld [vmem:[#allocation2 + $0xa4] sm:$0x1] }
 0x3a6   : > { %v8857_v50 = vrot.slane %v17082_v38, 5  ;;  %v6519_v5 = vld [vmem:[#allocation2 + $0x98] sm:$0x1]  ;;  %6968 = vst [vmem:[#allocation3 + $0x118] sm:$0xf] %v6816_v16  ;;  %v8513_v53 = vrot.slane %v8511_v28, 5  ;;  %v7160_v55 = vsel %vm14960_vm4, %v12597_v17, %v7159_v62 }
 0x3a7   : > { %v7161_v47 = vrot.slane %v7159_v62, 4  ;;  %v7162_v59 = vrot.slane %v7015_v27, 5  ;;  %v8499_v13 = vrot.slane %v8498_v7, 4  ;;  %v8509_v9 = vrot.slane %v8508_v36, 4  ;;  %7241 = vst [vmem:[#allocation3 + $0x128] sm:$0xf] %v7160_v55 }
 0x3a8   : > { %v12685_v6 = vrot.slane %v17102_v18, 9  ;;  %v6818_v57 = vshrl.u32 %v6517_v1, 16  ;;  %v8215_v11 = vld [vmem:[#allocation2 + $0x9c] sm:$0xf]  ;;  %v8860_v37 = vrot.slane %v8713_v24, 5  ;;  %v6821_v21 = vshll.u32 %v6517_v1, 16 }
 0x3a9   : > { %v7163_v56 = vsel %vm14960_vm4, %v7161_v47, %v7162_v59  ;;  %v6827_v51 = vshll.u32 %v6518_v54, 16  ;;  %v8216_v42 = vld [vmem:[#allocation2 + $0xa0] sm:$0xf]  ;;  %v8514_v35 = vsel %vm14971_vm5, %v8509_v9, %v8513_v53  ;;  %v8859_v31 = vrot.slane %v8857_v50, 4  ;;  %v8217_v22 = vld [vmem:[#allocation2 + $0xa4] sm:$0x1] }
 0x3aa   : > { %7242 = vst [vmem:[#allocation3 + $0x134] sm:$0xf] %v7163_v56  ;;  %v6820_v32 = vrot.slane %v6818_v57, 4  ;;  %v6831_v15 = vshrl.u32 %v6518_v54, 16  ;;  %v6823_v26 = vrot.slane %v6821_v21, 5  ;;  %v6837_v60 = vshll.u32 %v6519_v5, 16 }
 0x3ab   : > { %v6829_v30 = vrot.slane %v6827_v51, 5  ;;  %v8516_v23 = vshrl.u32 %v8215_v11, 16  ;;  %v7016_v14 = vld [vmem:[#allocation2 + $0x9c] sm:$0xe]  ;;  %v8137_v27 = vld [vmem:[#allocation2 + $0x90] sm:$0xf]  ;;  %v8504_v12 = vsel %vm14971_vm5, %v8499_v13, %v17088_v29  ;;  %v8861_v59 = vsel %vm14960_vm4, %v8859_v31, %v8860_v37 }
 0x3ac   : > { %v8138_v48 = vld [vmem:[#allocation2 + $0x94] sm:$0xf]  ;;  %v6833_v43 = vrot.slane %v6831_v15, 4  ;;  %v8519_v28 = vshll.u32 %v8215_v11, 16  ;;  %v8525_v1 = vshll.u32 %v8216_v42, 16  ;;  %v8529_v4 = vshrl.u32 %v8216_v42, 16 }
 0x3ad   : > { %v7017_v63 = vld [vmem:[#allocation2 + $0xa0] sm:$0xf]  ;;  %v6824_v41 = vor.u32 %v6823_v26, %v6820_v32  ;;  %v17124_v7 = vrot.slane %v8516_v23, 4  ;;  %v8535_v17 = vshll.u32 %v8217_v22, 16  ;;  %v17126_v62 = vld [vmem:[#allocation3 + $0x60] sm:$0xff]  ;;  %v17128_v18 = vld [vmem:[#allocation3 + $0x6c] sm:$0xff]  ;;  %v8858_v37 = vsel %vm14960_vm4, %v12685_v6, %v8857_v50 }
 0x3ae   : > { %v7293_v10 = vld [vmem:[#allocation3 + $0x108] sm:$0xff]  ;;  %v7295_v54 = vld [vmem:[#allocation3 + $0x114] sm:$0xff]  ;;  %v6834_v36 = vor.u32 %v6833_v43, %v6829_v30  ;;  %v8521_v24 = vrot.slane %v8519_v28, 5  ;;  %v17130_v5 = vrot.slane %v8525_v1, 5  ;;  %v8531_v53 = vrot.slane %v8529_v4, 4 }
 0x3af   : > { %v14391_v16 = vld [vmem:[#allocation3 + $0x10c] ss:$12 sps:$4 sm:$0xff]   ;;  %v6520_v47 = vld [vmem:[#allocation2 + $0x9c] sm:$0xf]  ;;  %8169 = vst [vmem:[#allocation3 + $0x108] sm:$0xf] %v8137_v27  ;;  %v12634_v29 = vcombine.low %v7293_v10, %v7295_v54 }
 0x3b0   : > { %v7018_v55 = vld [vmem:[#allocation2 + $0xa4] sm:$0x1]  ;;  %8170 = vst [vmem:[#allocation3 + $0x114] sm:$0xf] %v8138_v48  ;;  %8665 = vst [vmem:[#allocation3 + $0x10c] sm:$0xf] %v8504_v12  ;;  %7881 = vmatprep.mubr.bf16.mxu1 %v14391_v16  ;;  %v8532_v51 = vor.u32 %v8531_v53, %v17130_v5  ;;  %v8522_v22 = vor.u32 %v8521_v24, %v17124_v7 }
 0x3b1   : > { %8666 = vst [vmem:[#allocation3 + $0x118] sm:$0xf] %v8514_v35  ;;  %v6825_v13 = vrot.slane %v6824_v41, 4  ;;  %v6839_v9 = vrot.slane %v6837_v60, 5  ;;  %v6521_v57 = vld [vmem:[#allocation2 + $0xa0] sm:$0xf]  ;;  %7882 = vmatmul.mubr.bf16.gmra.mxu1 %v12634_v29 }
 0x3b2   : > { %v17134_v11 = vld [vmem:[#allocation3 + $0x78] sm:$0xff]  ;;  %v17136_v56 = vld [vmem:[#allocation3 + $0x84] sm:$0xff]  ;;  %v6835_v21 = vrot.slane %v6834_v36, 4  ;;  %v12598_v42 = vrot.slane %v7016_v14, 9  ;;  %v7166_v32 = vrot.slane %v7017_v63, 5  ;;  %v8537_v38 = vrot.slane %v8535_v17, 5 }
 0x3b3   : > { %v17139_v15 = vld [vmem:[#allocation2 + $0xac] sm:$0xf]  ;;  %v6830_v31 = vsel %vm14971_vm5, %v6825_v13, %v6829_v30  ;;  %v17148_v26 = vld [vmem:[#allocation2 + $0xa8] sm:$0xe]  ;;  %v6522_v60 = vld [vmem:[#allocation2 + $0xa4] sm:$0x1] }
 0x3b4   : > { %v14394_v35 = vld [vmem:[#allocation3 + $0x128] ss:$12 sps:$4 sm:$0xff]   ;;  %v6840_v14 = vsel %vm14971_vm5, %v6835_v21, %v6839_v9  ;;  %6969 = vst [vmem:[#allocation3 + $0x124] sm:$0xf] %v6830_v31  ;;  %v7167_v50 = vsel %vm14960_vm4, %v12598_v42, %v7166_v32  ;;  %v8716_v6 = vld [vmem:[#allocation2 + $0xb0] sm:$0x1] }
 0x3b5   : > { %8939 = vst [vmem:[#allocation3 + $0x128] sm:$0xf] %v8858_v37  ;;  %8940 = vst [vmem:[#allocation3 + $0x134] sm:$0xf] %v8861_v59  ;;  %v8218_v30 = vld [vmem:[#allocation2 + $0xa8] sm:$0xf]  ;;  %13890 = vmatprep.mubr.bf16.mxu0 %v14394_v35 }
 0x3b6   : > { %v17156_v27 = vld [vmem:[#allocation3 + $0x4c] ss:$12 sps:$4 sm:$0xff]   ;;  %v9884_v48 = vld [vmem:[#allocation2 + $0x3c] sm:$0xf]  ;;  %6970 = vst [vmem:[#allocation3 + $0x130] sm:$0xf] %v6840_v14 }
 0x3b7   : > { %v7168_v28 = vrot.slane %v7166_v32, 4  ;;  %v7169_v1 = vrot.slane %v7018_v55, 5  ;;  %7243 = vst [vmem:[#allocation3 + $0x140] sm:$0xf] %v7167_v50  ;;  %v8864_v4 = vrot.slane %v17139_v15, 5  ;;  %v6842_v63 = vshrl.u32 %v6520_v47, 16 }
 0x3b8   : > { %v9885_v10 = vld [vmem:[#allocation2 + $0x40] sm:$0xf]  ;;  %9916 = vst [vmem:[#allocation3 + $0x48] sm:$0xf] %v9884_v48  ;;  %v8533_v12 = vrot.slane %v8532_v51, 4  ;;  %v12686_v41 = vrot.slane %v17148_v26, 9 }
 0x3b9   : > { %v6845_v7 = vshll.u32 %v6520_v47, 16  ;;  %v6851_v17 = vshll.u32 %v6521_v57, 16  ;;  %v8219_v54 = vld [vmem:[#allocation2 + $0xac] sm:$0xf]  ;;  %9917 = vst [vmem:[#allocation3 + $0x54] sm:$0xf] %v9885_v10  ;;  %v7170_v36 = vsel %vm14960_vm4, %v7168_v28, %v7169_v1 }
 0x3ba   : > { %v8523_v16 = vrot.slane %v8522_v22, 4  ;;  %v8866_v24 = vrot.slane %v8864_v4, 4  ;;  %v6844_v53 = vrot.slane %v6842_v63, 4  ;;  %7244 = vst [vmem:[#allocation3 + $0x14c] sm:$0xf] %v7170_v36  ;;  %v6855_v59 = vshrl.u32 %v6521_v57, 16  ;;  %v13314_v57 = vpop.f32.mrf.mxu1 }
 0x3bb   : > { %v6847_v55 = vrot.slane %v6845_v7, 5  ;;  %v6853_v29 = vrot.slane %v6851_v17, 5  ;;  %v6861_v13 = vshll.u32 %v6522_v60, 16  ;;  %v8867_v9 = vrot.slane %v8716_v6, 5  ;;  %v17166_v21 = vld [vmem:[#allocation2 + $0xb0] sm:$0x1] }
 0x3bc   : > { %v8540_v47 = vshrl.u32 %v8218_v30, 16  ;;  %v8543_v51 = vshll.u32 %v8218_v30, 16  ;;  %v8549_v42 = vshll.u32 %v8219_v54, 16  ;;  %v7019_v32 = vld [vmem:[#allocation2 + $0xa8] sm:$0xe]  ;;  %v8538_v31 = vsel %vm14971_vm5, %v8533_v12, %v8537_v38  ;;  %v7297_v60 = vld [vmem:[#allocation3 + $0x120] sm:$0xff] }
 0x3bd   : > { %v8139_v35 = vld [vmem:[#allocation2 + $0x9c] sm:$0xf]  ;;  %v8140_v37 = vld [vmem:[#allocation2 + $0xa0] sm:$0xf]  ;;  %v6848_v22 = vor.u32 %v6847_v55, %v6844_v53  ;;  %v6857_v26 = vrot.slane %v6855_v59, 4  ;;  %v8553_v14 = vshrl.u32 %v8219_v54, 16  ;;  %v8528_v38 = vsel %vm14971_vm5, %v8523_v16, %v17130_v5 }
 0x3be   : > { %v7020_v50 = vld [vmem:[#allocation2 + $0xac] sm:$0xf]  ;;  %v6863_v6 = vrot.slane %v6861_v13, 5  ;;  %v8542_v28 = vrot.slane %v8540_v47, 4  ;;  %v8545_v1 = vrot.slane %v8543_v51, 5  ;;  %v17172_v63 = vrot.slane %v8549_v42, 5 }
 0x3bf   : > { %v17170_v48 = vld [vmem:[#allocation3 + $0x90] sm:$0xff]  ;;  %v7021_v30 = vld [vmem:[#allocation2 + $0xb0] sm:$0x1]  ;;  %v17174_v10 = vld [vmem:[#allocation3 + $0x9c] sm:$0xff]  ;;  %v8868_v12 = vsel %vm14960_vm4, %v8866_v24, %v8867_v9  ;;  %v6849_v54 = vrot.slane %v6848_v22, 4  ;;  %v6858_v36 = vor.u32 %v6857_v26, %v6853_v29  ;;  %v8555_v59 = vrot.slane %v8553_v14, 4 }
 0x3c0   : > { %v7299_v7 = vld [vmem:[#allocation3 + $0x12c] sm:$0xff]  ;;  %8171 = vst [vmem:[#allocation3 + $0x120] sm:$0xf] %v8139_v35  ;;  %v8546_v55 = vor.u32 %v8545_v1, %v8542_v28  ;;  %v8559_v13 = vshll.u32 %v17166_v21, 16  ;;  %v17182_v47 = vld [vmem:[#allocation2 + $0xb8] sm:$0xf]  ;;  %v13315_v35 = vpop.f32.mrf.mxu1 }
 0x3c1   : > { %v14396_v17 = vld [vmem:[#allocation3 + $0x124] ss:$12 sps:$4 sm:$0xff]   ;;  %8172 = vst [vmem:[#allocation3 + $0x12c] sm:$0xf] %v8140_v37  ;;  %v12637_v53 = vcombine.low %v7297_v60, %v7299_v7  ;;  %v6524_v42 = vld [vmem:[#allocation2 + $0xac] sm:$0xf]  ;;  %v6854_v5 = vsel %vm14971_vm5, %v6849_v54, %v6853_v29  ;;  %v8556_v21 = vor.u32 %v8555_v59, %v17172_v63  ;;  %v17195_v14 = vadd.f32 %v13315_v35, %v13314_v57 }
 0x3c2   : > { %8667 = vst [vmem:[#allocation3 + $0x124] sm:$0xf] %v8528_v38  ;;  %8668 = vst [vmem:[#allocation3 + $0x130] sm:$0xf] %v8538_v31  ;;  %v6523_v51 = vld [vmem:[#allocation2 + $0xa8] sm:$0xf]  ;;  %7889 = vmatprep.mubr.bf16.mxu1 %v14396_v17  ;;  %v8865_v31 = vsel %vm14960_vm4, %v12686_v41, %v8864_v4  ;;  %v17204_v38 = vpop.f32.mrf.mxu0 }
 0x3c3   : > { %v6859_v16 = vrot.slane %v6858_v36, 4  ;;  %v12599_v24 = vrot.slane %v7019_v32, 9  ;;  %v7173_v9 = vrot.slane %v7020_v50, 5  ;;  %7890 = vmatmul.mubr.bf16.gmra.mxu1 %v12637_v53  ;;  %v14400_v37 = vld [vmem:[#allocation3 + $0x140] ss:$12 sps:$4 sm:$0xff]   ;;  %v7176_v41 = vrot.slane %v7021_v30, 5 }
 0x3c4   : > { %6971 = vst [vmem:[#allocation3 + $0x13c] sm:$0xf] %v6854_v5  ;;  %v17191_v22 = vld [vmem:[#allocation2 + $0xb4] sm:$0xe]  ;;  %v6525_v26 = vld [vmem:[#allocation2 + $0xb0] sm:$0x1]  ;;  %13891 = vmatmul.mubr.bf16.gmra.mxu0 %v14400_v37 }
 0x3c5   : > { %8941 = vst [vmem:[#allocation3 + $0x140] sm:$0xf] %v8865_v31  ;;  %8942 = vst [vmem:[#allocation3 + $0x14c] sm:$0xf] %v8868_v12  ;;  %v6864_v32 = vsel %vm14971_vm5, %v6859_v16, %v6863_v6  ;;  %v7174_v15 = vsel %vm14960_vm4, %v12599_v24, %v7173_v9  ;;  %v7175_v4 = vrot.slane %v7173_v9, 4  ;;  %v8547_v28 = vrot.slane %v8546_v55, 4  ;;  %v17213_v31 = vpop.f32.mrf.mxu1 }
 0x3c6   : > { %v8719_v50 = vld [vmem:[#allocation2 + $0xbc] sm:$0x1]  ;;  %v8221_v60 = vld [vmem:[#allocation2 + $0xb4] sm:$0xf]  ;;  %6972 = vst [vmem:[#allocation3 + $0x148] sm:$0xf] %v6864_v32 }
 0x3c7   : > { %v8557_v1 = vrot.slane %v8556_v21, 4  ;;  %v8561_v7 = vrot.slane %v8559_v13, 5  ;;  %7245 = vst [vmem:[#allocation3 + $0x158] sm:$0xf] %v7174_v15  ;;  %v8871_v57 = vrot.slane %v17182_v47, 5  ;;  %v7177_v6 = vsel %vm14960_vm4, %v7175_v4, %v7176_v41  ;;  %v7956_v4 = vpop.f32.mrf.mxu0 }
 0x3c8   : > { %v17202_v17 = vld [vmem:[#allocation2 + $0xb8] sm:$0xf]  ;;  %v6866_v12 = vshrl.u32 %v6523_v51, 16  ;;  %v6869_v54 = vshll.u32 %v6523_v51, 16  ;;  %v6875_v30 = vshll.u32 %v6524_v42, 16  ;;  %v12687_v53 = vrot.slane %v17191_v22, 9 }
 0x3c9   : > { %v8223_v36 = vld [vmem:[#allocation2 + $0xbc] sm:$0x1]  ;;  %7246 = vst [vmem:[#allocation3 + $0x164] sm:$0xf] %v7177_v6  ;;  %v8873_v55 = vrot.slane %v8871_v57, 4  ;;  %v8874_v59 = vrot.slane %v8719_v50, 5  ;;  %v8562_v51 = vsel %vm14971_vm5, %v8557_v1, %v8561_v7 }
 0x3ca   : > { %v6879_v13 = vshrl.u32 %v6524_v42, 16  ;;  %v17211_v5 = vld [vmem:[#allocation3 + $0x64] ss:$12 sps:$4 sm:$0xff]   ;;  %v6868_v16 = vrot.slane %v6866_v12, 4  ;;  %v6871_v24 = vrot.slane %v6869_v54, 5  ;;  %v6877_v9 = vrot.slane %v6875_v30, 5 }
 0x3cb   : > { %v6885_v35 = vshll.u32 %v6525_v26, 16  ;;  %v9886_v37 = vld [vmem:[#allocation2 + $0x48] sm:$0xf]  ;;  %v8564_v32 = vshrl.u32 %v8221_v60, 16  ;;  %v8567_v22 = vshll.u32 %v8221_v60, 16  ;;  %v8573_v12 = vshll.u32 %v17202_v17, 16 }
 0x3cc   : > { %v6881_v21 = vrot.slane %v6879_v13, 4  ;;  %v9887_v15 = vld [vmem:[#allocation2 + $0x4c] sm:$0xf]  ;;  %9918 = vst [vmem:[#allocation3 + $0x60] sm:$0xf] %v9886_v37  ;;  %v6872_v50 = vor.u32 %v6871_v24, %v6868_v16  ;;  %v8577_v26 = vshrl.u32 %v17202_v17, 16  ;;  %v8552_v16 = vsel %vm14971_vm5, %v8547_v28, %v17172_v63 }
 0x3cd   : > { %v8141_v41 = vld [vmem:[#allocation2 + $0xa8] sm:$0xf]  ;;  %v8142_v42 = vld [vmem:[#allocation2 + $0xac] sm:$0xf]  ;;  %v6887_v6 = vrot.slane %v6885_v35, 5  ;;  %v7301_v29 = vld [vmem:[#allocation3 + $0x138] sm:$0xff]  ;;  %v8875_v17 = vsel %vm14960_vm4, %v8873_v55, %v8874_v59  ;;  %v17224_v35 = vpop.f32.mrf.mxu1  ;;  %v8872_v55 = vsel %vm14960_vm4, %v12687_v53, %v8871_v57 }
 0x3ce   : > { %v7022_v54 = vld [vmem:[#allocation2 + $0xb4] sm:$0xe]  ;;  %v7023_v30 = vld [vmem:[#allocation2 + $0xb8] sm:$0xf]  ;;  %9919 = vst [vmem:[#allocation3 + $0x6c] sm:$0xf] %v9887_v15  ;;  %v6882_v43 = vor.u32 %v6881_v21, %v6877_v9  ;;  %v17227_v21 = vadd.f32 %v17195_v14, %v7956_v4 }
 0x3cf   : > { %v8566_v1 = vrot.slane %v8564_v32, 4  ;;  %v8569_v7 = vrot.slane %v8567_v22, 5  ;;  %v8583_v13 = vshll.u32 %v8223_v36, 16  ;;  %v7024_v60 = vld [vmem:[#allocation2 + $0xbc] sm:$0x1]  ;;  %v6873_v24 = vrot.slane %v6872_v50, 4 }
 0x3d0   : > { %v8720_v23 = vld [vmem:[#allocation2 + $0xc0] sm:$0xe]  ;;  %v8721_v37 = vld [vmem:[#allocation2 + $0xc4] sm:$0xf]  ;;  %8173 = vst [vmem:[#allocation3 + $0x138] sm:$0xf] %v8141_v41 }
 0x3d1   : > { %v7303_v40 = vld [vmem:[#allocation3 + $0x144] sm:$0xff]  ;;  %v6883_v32 = vrot.slane %v6882_v43, 4  ;;  %v8570_v22 = vor.u32 %v8569_v7, %v8566_v1  ;;  %v17229_v15 = vrot.slane %v8573_v12, 5  ;;  %v8722_v61 = vld [vmem:[#allocation2 + $0xc8] sm:$0x1]  ;;  %v6878_v14 = vsel %vm14971_vm5, %v6873_v24, %v6877_v9 }
 0x3d2   : > { %v14402_v49 = vld [vmem:[#allocation3 + $0x13c] ss:$12 sps:$4 sm:$0xff]   ;;  %8174 = vst [vmem:[#allocation3 + $0x144] sm:$0xf] %v8142_v42  ;;  %v12640_v36 = vcombine.low %v7301_v29, %v7303_v40  ;;  %v9942_v63 = vld [vmem:[#allocation2 + $0x18] sm:$0xf]  ;;  %v17239_v40 = vpop.f32.mrf.mxu1 }
 0x3d3   : > { %8669 = vst [vmem:[#allocation3 + $0x13c] sm:$0xf] %v8552_v16  ;;  %8670 = vst [vmem:[#allocation3 + $0x148] sm:$0xf] %v8562_v51  ;;  %7897 = vmatprep.mubr.bf16.mxu1 %v14402_v49  ;;  %v14405_v28 = vld [vmem:[#allocation3 + $0x158] ss:$12 sps:$4 sm:$0xff]   ;;  %v6888_v49 = vsel %vm14971_vm5, %v6883_v32, %v6887_v6 }
 0x3d4   : > { %v8579_v59 = vrot.slane %v8577_v26, 4  ;;  %v17237_v4 = vrot.slane %v8583_v13, 5  ;;  %7898 = vmatmul.mubr.bf16.gmra.mxu1 %v12640_v36  ;;  %8943 = vst [vmem:[#allocation3 + $0x158] sm:$0xf] %v8872_v55  ;;  %8944 = vst [vmem:[#allocation3 + $0x164] sm:$0xf] %v8875_v17  ;;  %13894 = vmatprep.mubr.bf16.mxu0 %v14405_v28 }
 0x3d5   : > { %6973 = vst [vmem:[#allocation3 + $0x154] sm:$0xf] %v6878_v14  ;;  %v8571_v43 = vrot.slane %v8570_v22, 4  ;;  %v12600_v47 = vrot.slane %v7022_v54, 9  ;;  %v7180_v29 = vrot.slane %v7023_v30, 5  ;;  %v7183_v53 = vrot.slane %v7024_v60, 5  ;;  %v17253_v60 = vpop.f32.mrf.mxu1 }
 0x3d6   : > { %6974 = vst [vmem:[#allocation3 + $0x160] sm:$0xf] %v6888_v49  ;;  %v8580_v57 = vor.u32 %v8579_v59, %v17229_v15  ;;  %v12688_v9 = vrot.slane %v8720_v23, 9  ;;  %v8878_v51 = vrot.slane %v8721_v37, 5  ;;  %v9943_v41 = vld [vmem:[#allocation2 + $0x1c] sm:$0xf] }
 0x3d7   : > { %v8576_v42 = vsel %vm14971_vm5, %v8571_v43, %v17229_v15  ;;  %v7181_v50 = vsel %vm14960_vm4, %v12600_v47, %v7180_v29  ;;  %v7182_v6 = vrot.slane %v7180_v29, 4  ;;  %v8881_v12 = vrot.slane %v8722_v61, 5  ;;  %v9944_v26 = vld [vmem:[#allocation2 + $0x20] sm:$0x1]  ;;  %v6526_v54 = vld [vmem:[#allocation2 + $0xb4] sm:$0xf] }
 0x3d8   : > { %v8581_v30 = vrot.slane %v8580_v57, 4  ;;  %7247 = vst [vmem:[#allocation3 + $0x170] sm:$0xf] %v7181_v50  ;;  %v17251_v1 = vsel %vm14960_vm4, %v12688_v9, %v8878_v51  ;;  %v8880_v23 = vrot.slane %v8878_v51, 4  ;;  %v9991_v7 = vshrl.u32 %v9942_v63, 16 }
 0x3d9   : > { %v6527_v13 = vld [vmem:[#allocation2 + $0xb8] sm:$0xf]  ;;  %v7184_v37 = vsel %vm14960_vm4, %v7182_v6, %v7183_v53  ;;  %v9994_v16 = vshll.u32 %v9942_v63, 16  ;;  %v10000_v17 = vshll.u32 %v9943_v41, 16  ;;  %v10004_v24 = vshrl.u32 %v9943_v41, 16 }
 0x3da   : > { %v8586_v61 = vsel %vm14971_vm5, %v8581_v30, %v17237_v4  ;;  %7248 = vst [vmem:[#allocation3 + $0x17c] sm:$0xf] %v7184_v37  ;;  %v8882_v36 = vsel %vm14960_vm4, %v8880_v23, %v8881_v12  ;;  %v9993_v32 = vrot.slane %v9991_v7, 4  ;;  %v10010_v22 = vshll.u32 %v9944_v26, 16  ;;  %v6528_v15 = vld [vmem:[#allocation2 + $0xbc] sm:$0x1]  ;;  %v17262_v4 = vpop.f32.mrf.mxu1 }
 0x3db   : > { %v8143_v28 = vld [vmem:[#allocation2 + $0xb4] sm:$0xf]  ;;  %v8144_v55 = vld [vmem:[#allocation2 + $0xb8] sm:$0xf]  ;;  %v9996_v14 = vrot.slane %v9994_v16, 5  ;;  %v10002_v59 = vrot.slane %v10000_v17, 5 }
 0x3dc   : > { %v10006_v49 = vrot.slane %v10004_v24, 4  ;;  %v6890_v43 = vshrl.u32 %v6526_v54, 16  ;;  %v8224_v63 = vld [vmem:[#allocation2 + $0xc0] sm:$0xf]  ;;  %v10012_v47 = vrot.slane %v10010_v22, 5  ;;  %v6893_v29 = vshll.u32 %v6526_v54, 16 }
 0x3dd   : > { %v6899_v57 = vshll.u32 %v6527_v13, 16  ;;  %v6903_v53 = vshrl.u32 %v6527_v13, 16  ;;  %v8225_v9 = vld [vmem:[#allocation2 + $0xc4] sm:$0xf]  ;;  %18416 = vst [vmem:[#allocation38_spill] sm:$0xff] %v17262_v4  ;;  %v7305_v51 = vld [vmem:[#allocation3 + $0x150] sm:$0xff]  ;;  %v9997_v6 = vor.u32 %v9996_v14, %v9993_v32 }
 0x3de   : > { %v7307_v41 = vld [vmem:[#allocation3 + $0x15c] sm:$0xff]  ;;  %v10007_v12 = vor.u32 %v10006_v49, %v10002_v59  ;;  %v6892_v26 = vrot.slane %v6890_v43, 4  ;;  %v6909_v30 = vshll.u32 %v6528_v15, 16  ;;  %8175 = vst [vmem:[#allocation3 + $0x150] sm:$0xf] %v8143_v28  ;;  %v6895_v7 = vrot.slane %v6893_v29, 5  ;;  %v17266_v49 = vpop.f32.mrf.mxu1 }
 0x3df   : > { %v14407_v50 = vld [vmem:[#allocation3 + $0x154] ss:$12 sps:$4 sm:$0xff]   ;;  %8176 = vst [vmem:[#allocation3 + $0x15c] sm:$0xf] %v8144_v55  ;;  %v12643_v23 = vcombine.low %v7305_v51, %v7307_v41  ;;  %v6901_v37 = vrot.slane %v6899_v57, 5  ;;  %v6905_v54 = vrot.slane %v6903_v53, 4 }
 0x3e0   : > { %8671 = vst [vmem:[#allocation3 + $0x154] sm:$0xf] %v8576_v42  ;;  %8672 = vst [vmem:[#allocation3 + $0x160] sm:$0xf] %v8586_v61  ;;  %v10438_v16 = vld [vmem:[#allocation2 + $0x18] sm:$0xe]  ;;  %7905 = vmatprep.mubr.bf16.mxu1 %v14407_v50  ;;  %v6896_v14 = vor.u32 %v6895_v7, %v6892_v26 }
 0x3e1   : > { %v10439_v13 = vld [vmem:[#allocation2 + $0x1c] sm:$0xf]  ;;  %v9998_v17 = vrot.slane %v9997_v6, 4  ;;  %v10008_v24 = vrot.slane %v10007_v12, 4  ;;  %v6911_v22 = vrot.slane %v6909_v30, 5  ;;  %v8588_v33 = vshrl.u32 %v8224_v63, 16  ;;  %7906 = vmatmul.mubr.bf16.gmra.mxu1 %v12643_v23 }
 0x3e2   : > { %v10440_v4 = vld [vmem:[#allocation2 + $0x20] sm:$0x1]  ;;  %v14415_v32 = vld [vmem:[#allocation3 + $0x4] ss:$12 sps:$4 sm:$0xff]   ;;  %v6906_v15 = vor.u32 %v6905_v54, %v6901_v37  ;;  %v8591_v55 = vshll.u32 %v8224_v63, 16  ;;  %v8597_v42 = vshll.u32 %v8225_v9, 16 }
 0x3e3   : > { %v8226_v28 = vld [vmem:[#allocation2 + $0xc8] sm:$0x1]  ;;  %v17264_v61 = vld [vmem:[#allocation3 + $0x7c] ss:$12 sps:$4 sm:$0xff]   ;;  %v10003_v29 = vsel %vm14971_vm5, %v9998_v17, %v10002_v59  ;;  %v10013_v57 = vsel %vm14971_vm5, %v10008_v24, %v10012_v47  ;;  %v8590_v53 = vrot.slane %v8588_v33, 4  ;;  %v8601_v51 = vshrl.u32 %v8225_v9, 16 }
 0x3e4   : > { %v14411_v43 = vld [vmem:[#allocation3 + $0x170] ss:$12 sps:$4 sm:$0xff]   ;;  %v17272_v41 = vld [vmem:[#allocation3 + $0x8] ss:$12 sps:$4 sm:$0xff]   ;;  %v9945_v50 = vld [vmem:[#allocation2 + $0x24] sm:$0xf] }
 0x3e5   : > { %v9946_v6 = vld [vmem:[#allocation2 + $0x28] sm:$0xf]  ;;  %8945 = vst [vmem:[#allocation3 + $0x170] sm:$0xf] %v17251_v1  ;;  %8946 = vst [vmem:[#allocation3 + $0x17c] sm:$0xf] %v8882_v36  ;;  %13895 = vmatmul.mubr.bf16.gmra.mxu0 %v14411_v43 }
 0x3e6   : > { %10406 = vst [vmem:[#allocation3 + $0x4] sm:$0xf] %v10003_v29  ;;  %10407 = vst [vmem:[#allocation3 + $0x10] sm:$0xf] %v10013_v57  ;;  %v6897_v63 = vrot.slane %v6896_v14, 4  ;;  %v6907_v12 = vrot.slane %v6906_v15, 4  ;;  %9491 = vmatprep.mubr.bf16.mxu0 %v14415_v32  ;;  %v17281_v15 = vpop.f32.mrf.mxu1 }
 0x3e7   : > { %v8593_v26 = vrot.slane %v8591_v55, 5  ;;  %v17275_v30 = vrot.slane %v8597_v42, 5  ;;  %v9888_v59 = vld [vmem:[#allocation2 + $0x54] sm:$0xf]  ;;  %v8603_v23 = vrot.slane %v8601_v51, 4  ;;  %v8607_v47 = vshll.u32 %v8226_v28, 16 }
 0x3e8   : > { %v12761_v33 = vrot.slane %v10438_v16, 9  ;;  %v10536_v9 = vrot.slane %v10439_v13, 5  ;;  %v9889_v7 = vld [vmem:[#allocation2 + $0x58] sm:$0xf]  ;;  %9920 = vst [vmem:[#allocation3 + $0x78] sm:$0xf] %v9888_v59  ;;  %v6902_v1 = vsel %vm14971_vm5, %v6897_v63, %v6901_v37  ;;  %v6912_v36 = vsel %vm14971_vm5, %v6907_v12, %v6911_v22 }
 0x3e9   : > { %v8594_v54 = vor.u32 %v8593_v26, %v8590_v53  ;;  %v10539_v17 = vrot.slane %v10440_v4, 5  ;;  %v9947_v24 = vld [vmem:[#allocation2 + $0x2c] sm:$0x1]  ;;  %v10441_v14 = vld [vmem:[#allocation2 + $0x24] sm:$0xe]  ;;  %v8604_v16 = vor.u32 %v8603_v23, %v17275_v30  ;;  %v8609_v13 = vrot.slane %v8607_v47, 5 }
 0x3ea   : > { %9921 = vst [vmem:[#allocation3 + $0x84] sm:$0xf] %v9889_v7  ;;  %6975 = vst [vmem:[#allocation3 + $0x16c] sm:$0xf] %v6902_v1  ;;  %v10537_v32 = vsel %vm14960_vm4, %v12761_v33, %v10536_v9  ;;  %v10538_v28 = vrot.slane %v10536_v9, 4  ;;  %v10015_v4 = vshrl.u32 %v9945_v50, 16  ;;  %v17301_v7 = vpop.f32.mrf.mxu1 }
 0x3eb   : > { %6976 = vst [vmem:[#allocation3 + $0x178] sm:$0xf] %v6912_v36  ;;  %v10443_v37 = vld [vmem:[#allocation2 + $0x2c] sm:$0x1]  ;;  %v17286_v55 = vld [vmem:[#allocation2 + $0x30] sm:$0xe] }
 0x3ec   : > { %v8595_v22 = vrot.slane %v8594_v54, 4  ;;  %10678 = vst [vmem:[#allocation3 + $0x8] sm:$0xf] %v10537_v32  ;;  %v10018_v42 = vshll.u32 %v9945_v50, 16  ;;  %v10024_v43 = vshll.u32 %v9946_v6, 16  ;;  %v8605_v57 = vrot.slane %v8604_v16, 4 }
 0x3ed   : > { %v10445_v29 = vld [vmem:[#allocation2 + $0x34] sm:$0xf]  ;;  %v10540_v53 = vsel %vm14960_vm4, %v10538_v28, %v10539_v17  ;;  %v10028_v51 = vshrl.u32 %v9946_v6, 16  ;;  %v10034_v63 = vshll.u32 %v9947_v24, 16  ;;  %v17290_v12 = vld [vmem:[#allocation3 + $0x20] ss:$12 sps:$4 sm:$0xff]   ;;  %9492 = vmatmul.mubr.bf16.vlgmr.msra.gmra.mxu0 %v16712_v2 }
 0x3ee   : > { %v17292_v26 = vld [vmem:[#allocation2 + $0x38] sm:$0x1]  ;;  %v8600_v59 = vsel %vm14971_vm5, %v8595_v22, %v17275_v30  ;;  %10679 = vst [vmem:[#allocation3 + $0x14] sm:$0xf] %v10540_v53  ;;  %v10017_v23 = vrot.slane %v10015_v4, 4  ;;  %v10020_v47 = vrot.slane %v10018_v42, 5  ;;  %v8610_v6 = vsel %vm14971_vm5, %v8605_v57, %v8609_v13  ;;  %9499 = vmatprep.mubr.bf16.mxu0 %v16925_v34 }
 0x3ef   : > { %v10026_v50 = vrot.slane %v10024_v43, 5  ;;  %v17297_v33 = vld [vmem:[#allocation2 + $0x30] sm:$0xf]  ;;  %v17299_v9 = vld [vmem:[#allocation8 + $0x230] sm:$0xff]   ;;  %v10030_v1 = vrot.slane %v10028_v51, 4  ;;  %v10036_v36 = vrot.slane %v10034_v63, 5 }
 0x3f0   : > { %v12762_v54 = vrot.slane %v10441_v14, 9  ;;  %v17305_v17 = vld [vmem:[#allocation3 + $0x38] ss:$12 sps:$4 sm:$0xff]   ;;  %v17307_v24 = vld [vmem:[#allocation2 + $0x34] sm:$0xf]  ;;  %v10021_v32 = vor.u32 %v10020_v47, %v10017_v23  ;;  %v18417_v28 = vrot.slane %v17030_v8, 5 }
 0x3f1   : > { %v8145_v30 = vld [vmem:[#allocation2 + $0xc0] sm:$0xf]  ;;  %v8146_v16 = vld [vmem:[#allocation2 + $0xc4] sm:$0xf]  ;;  %v10546_v4 = vrot.slane %v10443_v37, 5  ;;  %v12763_v42 = vrot.slane %v17286_v55, 9  ;;  %v10031_v13 = vor.u32 %v10030_v1, %v10026_v50 }
 0x3f2   : > { %v10545_v22 = vrot.slane %v18417_v28, 4  ;;  %v17312_v43 = vld [vmem:[#allocation2 + $0x38] sm:$0x1]  ;;  %v18418_v14 = vmov %v18417_v28  ;;  %v10550_v53 = vrot.slane %v10445_v29, 5  ;;  %v10553_v51 = vrot.slane %v17292_v26, 5  ;;  %v17324_v37 = vld [vmem:[#allocation8 + $0x228] sm:$0xff]  }
 0x3f3   : > { %v10544_v57 = vsel %vm14960_vm4, %v12762_v54, %v18418_v14  ;;  %v17320_v63 = vld [vmem:[#allocation2 + $0x3c] sm:$0xe]  ;;  %v17322_v23 = vld [vmem:[#allocation2 + $0x40] sm:$0xf]  ;;  %v7311_v47 = vld [vmem:[#allocation3 + $0x174] sm:$0xff]  ;;  %v10022_v2 = vrot.slane %v10021_v32, 4  ;;  %v17334_v54 = vadd.f32 %v17253_v60, %v17239_v40  ;;  %v17336_v14 = vpop.f32.mrf.mxu1 }
 0x3f4   : > { %v7309_v55 = vld [vmem:[#allocation3 + $0x168] sm:$0xff]  ;;  %v10547_v8 = vsel %vm14960_vm4, %v10545_v22, %v10546_v4  ;;  %10680 = vst [vmem:[#allocation3 + $0x20] sm:$0xf] %v10544_v57  ;;  %v14559_v1 = vld [vmem:[#allocation8 + $0x238] sm:$0xff]   ;;  %v10039_v29 = vshrl.u32 %v17297_v33, 16  ;;  %v10032_v32 = vrot.slane %v10031_v13, 4  ;;  %v10551_v22 = vsel %vm14960_vm4, %v12763_v42, %v10550_v53 }
 0x3f5   : > { %v14416_v28 = vld [vmem:[#allocation3 + $0x16c] ss:$12 sps:$4 sm:$0xff]   ;;  %13947 = vmatpush3.bf16.msra.mxu0 %v14559_v1  ;;  %8177 = vst [vmem:[#allocation3 + $0x168] sm:$0xf] %v8145_v30  ;;  %8178 = vst [vmem:[#allocation3 + $0x174] sm:$0xf] %v8146_v16  ;;  %v12646_v34 = vcombine.low %v7309_v55, %v7311_v47  ;;  %v10027_v40 = vsel %vm14971_vm5, %v10022_v2, %v10026_v50 }
 0x3f6   : > { %v17330_v26 = vld [vmem:[#allocation2 + $0x44] sm:$0x1]  ;;  %8673 = vst [vmem:[#allocation3 + $0x16c] sm:$0xf] %v8600_v59  ;;  %8674 = vst [vmem:[#allocation3 + $0x178] sm:$0xf] %v8610_v6  ;;  %13948 = vmatprep.subr.bf16.mxu0 %v17299_v9  ;;  %7913 = vmatprep.mubr.bf16.mxu1 %v14416_v28  ;;  %v10037_v42 = vsel %vm14971_vm5, %v10032_v32, %v10036_v36 }
 0x3f7   : > { %10681 = vst [vmem:[#allocation3 + $0x2c] sm:$0xf] %v10547_v8  ;;  %v10552_v4 = vrot.slane %v10550_v53, 4  ;;  %v10450_v57 = vld [vmem:[#allocation2 + $0x48] sm:$0xe]  ;;  %v10041_v60 = vrot.slane %v10039_v29, 4  ;;  %7914 = vmatmul.mubr.bf16.gmra.mxu1 %v12646_v34  ;;  %v17367_v29 = vpop.f32.mrf.mxu1 }
 0x3f8   : > { %v10451_v1 = vld [vmem:[#allocation2 + $0x4c] sm:$0xf]  ;;  %10682 = vst [vmem:[#allocation3 + $0x38] sm:$0xf] %v10551_v22  ;;  %v10042_v59 = vshll.u32 %v17297_v33, 16  ;;  %v10048_v6 = vshll.u32 %v17307_v24, 16  ;;  %13914 = vmatprep.mubr.bf16.mxu1 %v17272_v41 }
 0x3f9   : > { %v17345_v30 = vld [vmem:[#allocation3 + $0x50] ss:$12 sps:$4 sm:$0xff]   ;;  %v17347_v16 = vld [vmem:[#allocation2 + $0x50] sm:$0x1]  ;;  %10408 = vst [vmem:[#allocation3 + $0x1c] sm:$0xf] %v10027_v40  ;;  %v10554_v13 = vsel %vm14960_vm4, %v10552_v4, %v10553_v51  ;;  %13949 = vmatpush3.bf16.msra.mxu0 %v17299_v9 }
 0x3fa   : > { %v10052_v50 = vshrl.u32 %v17307_v24, 16  ;;  %v10058_v53 = vshll.u32 %v17312_v43, 16  ;;  %v9951_v55 = vld [vmem:[#allocation2 + $0x3c] sm:$0xf]  ;;  %v17355_v33 = vld [vmem:[#allocation3 + $0x94] ss:$12 sps:$4 sm:$0xff]   ;;  %13950 = vmatprep.subr.bf16.mxu0 %v17324_v37 }
 0x3fb   : > { %v17357_v47 = vld [vmem:[#allocation8 + $0x220] sm:$0xff]   ;;  %10409 = vst [vmem:[#allocation3 + $0x28] sm:$0xf] %v10037_v42  ;;  %10683 = vst [vmem:[#allocation3 + $0x44] sm:$0xf] %v10554_v13  ;;  %v10044_v28 = vrot.slane %v10042_v59, 5  ;;  %v18420_v13 = vcombine.low %v17059_v3, %v17061_v20 }
 0x3fc   : > { %v10050_v2 = vrot.slane %v10048_v6, 5  ;;  %v12764_v36 = vrot.slane %v17320_v63, 9  ;;  %v10557_v8 = vrot.slane %v17322_v23, 5  ;;  %v17362_v51 = vld [vmem:[#allocation3 + $0x68] ss:$12 sps:$4 sm:$0xff]   ;;  %18419 = vst [vmem:[#allocation40_spill] sm:$0xff] %v17367_v29 }
 0x3fd   : > { %v17364_v24 = vld [vmem:[#allocation2 + $0x40] sm:$0xf]  ;;  %v10054_v34 = vrot.slane %v10052_v50, 4  ;;  %v10060_v32 = vrot.slane %v10058_v53, 5  ;;  %v10560_v41 = vrot.slane %v17330_v26, 5  ;;  %v12765_v22 = vrot.slane %v10450_v57, 9  ;;  %9500 = vmatmul.mubr.bf16.gmra.mxu0 %v18420_v13 }
 0x3fe   : > { %v9890_v43 = vld [vmem:[#allocation2 + $0x60] sm:$0xf]  ;;  %v9891_v4 = vld [vmem:[#allocation2 + $0x64] sm:$0xf]  ;;  %v14426_v63 = vld [vmem:[#allocation8 + $0x1b8] sm:$0xff]   ;;  %v10045_v23 = vor.u32 %v10044_v28, %v10041_v60  ;;  %v10558_v40 = vsel %vm14960_vm4, %v12764_v36, %v10557_v8  ;;  %v10559_v59 = vrot.slane %v10557_v8, 4  ;;  %9507 = vmatprep.mubr.bf16.mxu0 %v17015_v25  ;;  %13951 = vmatpush3.bf16.msra.mxu0 %v17324_v37 }
 0x3ff   : > { %9922 = vst [vmem:[#allocation3 + $0x90] sm:$0xf] %v9890_v43  ;;  %v10564_v6 = vrot.slane %v10451_v1, 5  ;;  %v9953_v9 = vld [vmem:[#allocation2 + $0x44] sm:$0x1]  ;;  %v10055_v26 = vor.u32 %v10054_v34, %v10050_v2  ;;  %v14431_v57 = vld [vmem:[#allocation8 + $0x1f0] sm:$0xff]   ;;  %13952 = vmatprep.subr.bf16.mxu0 %v17357_v47  ;;  %13915 = vmatmul.mubr.bf16.vlgmr.msra.gmra.mxu1 %v17290_v12 }
 0x400   : > { %v17373_v42 = vld [vmem:[#allocation2 + $0x54] sm:$0xe]  ;;  %9923 = vst [vmem:[#allocation3 + $0x9c] sm:$0xf] %v9891_v4  ;;  %10684 = vst [vmem:[#allocation3 + $0x50] sm:$0xf] %v10558_v40  ;;  %v10561_v36 = vsel %vm14960_vm4, %v10559_v59, %v10560_v41  ;;  %13918 = vmatprep.mubr.bf16.mxu1 %v17305_v17  ;;  %13571 = vmatpush3.bf16.msra.mxu1 %v14426_v63 }
 0x401   : > { %v10567_v50 = vrot.slane %v17347_v16, 5  ;;  %v10063_v53 = vshrl.u32 %v9951_v55, 16  ;;  %v10066_v60 = vshll.u32 %v9951_v55, 16  ;;  %v10454_v28 = vld [vmem:[#allocation2 + $0x58] sm:$0xf]  ;;  %v10046_v1 = vrot.slane %v10045_v23, 4  ;;  %v17389_v16 = vpop.f32.mrf.mxu1  ;;  %13572 = vmatprep.subr.bf16.mxu1 %v14431_v57 }
 0x402   : > { %v17379_v43 = vld [vmem:[#allocation2 + $0x5c] sm:$0x1]  ;;  %v10565_v3 = vsel %vm14960_vm4, %v12765_v22, %v10564_v6  ;;  %v10566_v20 = vrot.slane %v10564_v6, 4  ;;  %v10456_v8 = vld [vmem:[#allocation2 + $0x60] sm:$0xe]  ;;  %v17387_v34 = vld [vmem:[#allocation8 + $0x218] sm:$0xff]   ;;  %13953 = vmatpush3.bf16.msra.mxu0 %v17357_v47  ;;  %v18421_v57 = vcombine.low %v17084_v44, %v17086_v39 }
 0x403   : > { %v10056_v55 = vrot.slane %v10055_v26, 4  ;;  %10685 = vst [vmem:[#allocation3 + $0x5c] sm:$0xf] %v10561_v36  ;;  %10686 = vst [vmem:[#allocation3 + $0x68] sm:$0xf] %v10565_v3  ;;  %v10065_v4 = vrot.slane %v10063_v53, 4  ;;  %v10051_v41 = vsel %vm14971_vm5, %v10046_v1, %v10050_v2  ;;  %13954 = vmatprep.subr.bf16.mxu0 %v17387_v34 }
 0x404   : > { %v10068_v25 = vrot.slane %v10066_v60, 5  ;;  %v10072_v23 = vshll.u32 %v17364_v24, 16  ;;  %v10457_v40 = vld [vmem:[#allocation2 + $0x64] sm:$0xf]  ;;  %v10568_v37 = vsel %vm14960_vm4, %v10566_v20, %v10567_v50  ;;  %v14433_v22 = vld [vmem:[#allocation8 + $0x1b0] sm:$0xff]   ;;  %v10076_v59 = vshrl.u32 %v17364_v24, 16 }
 0x405   : > { %v10082_v6 = vshll.u32 %v9953_v9, 16  ;;  %v17398_v13 = vld [vmem:[#allocation3 + $0x80] ss:$12 sps:$4 sm:$0xff]   ;;  %v17400_v26 = vld [vmem:[#allocation2 + $0x68] sm:$0x1]  ;;  %v10061_v60 = vsel %vm14971_vm5, %v10056_v55, %v10060_v32  ;;  %v12766_v50 = vrot.slane %v17373_v42, 9  ;;  %v17420_v42 = vpop.f32.mrf.mxu1  ;;  %9508 = vmatmul.mubr.bf16.gmra.mxu0 %v18421_v57  ;;  %13573 = vmatpush3.bf16.msra.mxu1 %v14433_v22 }
 0x406   : > { %v17402_v53 = vld [vmem:[#allocation2 + $0x48] sm:$0xf]  ;;  %10410 = vst [vmem:[#allocation3 + $0x34] sm:$0xf] %v10051_v41  ;;  %10687 = vst [vmem:[#allocation3 + $0x74] sm:$0xf] %v10568_v37  ;;  %v10069_v2 = vor.u32 %v10068_v25, %v10065_v4  ;;  %9515 = vmatprep.mubr.bf16.mxu0 %v17156_v27  ;;  %13955 = vmatpush3.bf16.msra.mxu0 %v17387_v34 }
 0x407   : > { %v10074_v1 = vrot.slane %v10072_v23, 5  ;;  %v14437_v36 = vld [vmem:[#allocation8 + $0x1e8] sm:$0xff]   ;;  %v17408_v24 = vld [vmem:[#allocation3 + $0x98] ss:$12 sps:$4 sm:$0xff]   ;;  %v17410_v9 = vld [vmem:[#allocation2 + $0x4c] sm:$0xf]  ;;  %v17456_v57 = vpop.f32.mrf.mxu1  ;;  %13919 = vmatmul.mubr.bf16.gmra.mxu1 %v17345_v30 }
 0x408   : > { %10411 = vst [vmem:[#allocation3 + $0x40] sm:$0xf] %v10061_v60  ;;  %v10078_v3 = vrot.slane %v10076_v59, 4  ;;  %v17413_v12 = vrot.slane %v10082_v6, 5  ;;  %v10571_v20 = vrot.slane %v10454_v28, 5  ;;  %v10574_v32 = vrot.slane %v17379_v43, 5  ;;  %13574 = vmatprep.subr.bf16.mxu1 %v14437_v36  ;;  %13922 = vmatprep.mubr.bf16.mxu1 %v17362_v51 }
 0x409   : > { %v17416_v55 = vld [vmem:[#allocation2 + $0x50] sm:$0x1]  ;;  %v17418_v4 = vld [vmem:[#allocation8 + $0x210] sm:$0xff]   ;;  %v10070_v25 = vrot.slane %v10069_v2, 4  ;;  %v12767_v23 = vrot.slane %v10456_v8, 9  ;;  %v10578_v41 = vrot.slane %v10457_v40, 5 }
 0x40a   : > { %v10581_v17 = vrot.slane %v17400_v26, 5  ;;  %v17423_v63 = vld [vmem:[#allocation2 + $0x6c] sm:$0xe]  ;;  %v10079_v37 = vor.u32 %v10078_v3, %v10074_v1  ;;  %v10572_v28 = vsel %vm14960_vm4, %v12766_v50, %v10571_v20  ;;  %v10573_v43 = vrot.slane %v10571_v20, 4  ;;  %v14439_v59 = vld [vmem:[#allocation8 + $0x1a8] sm:$0xff]   ;;  %v14444_v2 = vld [vmem:[#allocation8 + $0x1e0] sm:$0xff]   ;;  %13956 = vmatprep.subr.bf16.mxu0 %v17418_v4 }
 0x40b   : > { %v10087_v6 = vshrl.u32 %v17402_v53, 16  ;;  %v10460_v60 = vld [vmem:[#allocation2 + $0x70] sm:$0xf]  ;;  %v17429_v29 = vld [vmem:[#allocation2 + $0x74] sm:$0x1]  ;;  %v10075_v47 = vsel %vm14971_vm5, %v10070_v25, %v10074_v1  ;;  %v10579_v8 = vsel %vm14960_vm4, %v12767_v23, %v10578_v41  ;;  %v10580_v40 = vrot.slane %v10578_v41, 4  ;;  %13575 = vmatpush3.bf16.msra.mxu1 %v14439_v59  ;;  %13957 = vmatpush3.bf16.msra.mxu0 %v17418_v4 }
 0x40c   : > { %10688 = vst [vmem:[#allocation3 + $0x80] sm:$0xf] %v10572_v28  ;;  %v10090_v26 = vshll.u32 %v17402_v53, 16  ;;  %v17440_v50 = vld [vmem:[#allocation2 + $0x78] sm:$0xe]  ;;  %v10080_v44 = vrot.slane %v10079_v37, 4  ;;  %v10575_v39 = vsel %vm14960_vm4, %v10573_v43, %v10574_v32  ;;  %13576 = vmatprep.subr.bf16.mxu1 %v14444_v2 }
 0x40d   : > { %v17442_v3 = vld [vmem:[#allocation2 + $0x7c] sm:$0xf]  ;;  %v17444_v20 = vld [vmem:[#allocation3 + $0xac] ss:$12 sps:$4 sm:$0xff]   ;;  %10412 = vst [vmem:[#allocation3 + $0x4c] sm:$0xf] %v10075_v47  ;;  %v10582_v27 = vsel %vm14960_vm4, %v10580_v40, %v10581_v17 }
 0x40e   : > { %10690 = vst [vmem:[#allocation3 + $0x98] sm:$0xf] %v10579_v8  ;;  %v10089_v1 = vrot.slane %v10087_v6, 4  ;;  %v10096_v25 = vshll.u32 %v17410_v9, 16  ;;  %v17450_v53 = vld [vmem:[#allocation3 + $0xb0] ss:$12 sps:$4 sm:$0xff]   ;;  %v10085_v47 = vsel %vm14971_vm5, %v10080_v44, %v17413_v12 }
 0x40f   : > { %v17452_v23 = vld [vmem:[#allocation2 + $0x80] sm:$0x1]  ;;  %v17454_v41 = vld [vmem:[#allocation2 + $0x54] sm:$0xf]  ;;  %v9892_v28 = vld [vmem:[#allocation2 + $0x6c] sm:$0xf]  ;;  %13923 = vmatmul.mubr.bf16.gmra.mxu1 %v17398_v13 }
 0x410   : > { %18422 = vst [vmem:[#allocation36_spill] sm:$0xff] %v17456_v57  ;;  %v17458_v22 = vld [vmem:[#allocation8 + $0x208] sm:$0xff]   ;;  %10689 = vst [vmem:[#allocation3 + $0x8c] sm:$0xf] %v10575_v39  ;;  %v10092_v32 = vrot.slane %v10090_v26, 5  ;;  %v10100_v37 = vshrl.u32 %v17410_v9, 16  ;;  %13926 = vmatprep.mubr.bf16.mxu1 %v17408_v24 }
 0x411   : > { %v10106_v43 = vshll.u32 %v17416_v55, 16  ;;  %v9893_v6 = vld [vmem:[#allocation2 + $0x70] sm:$0xf]  ;;  %9924 = vst [vmem:[#allocation3 + $0xa8] sm:$0xf] %v9892_v28  ;;  %v10098_v8 = vrot.slane %v10096_v25, 5  ;;  %13958 = vmatprep.subr.bf16.mxu0 %v17458_v22 }
 0x412   : > { %10691 = vst [vmem:[#allocation3 + $0xa4] sm:$0xf] %v10582_v27  ;;  %v12768_v36 = vrot.slane %v17423_v63, 9  ;;  %v10585_v39 = vrot.slane %v10460_v60, 5  ;;  %v17469_v57 = vld [vmem:[#allocation3 + $0xc8] ss:$12 sps:$4 sm:$0xff]   ;;  %v10093_v34 = vor.u32 %v10092_v32, %v10089_v1  ;;  %v17481_v1 = vpop.f32.mrf.mxu1  ;;  %13959 = vmatpush3.bf16.msra.mxu0 %v17458_v22 }
 0x413   : > { %v17471_v17 = vld [vmem:[#allocation2 + $0x58] sm:$0xf]  ;;  %9925 = vst [vmem:[#allocation3 + $0xb4] sm:$0xf] %v9893_v6  ;;  %10413 = vst [vmem:[#allocation3 + $0x58] sm:$0xf] %v10085_v47 }
 0x414   : > { %v10102_v9 = vrot.slane %v10100_v37, 4  ;;  %v10108_v55 = vrot.slane %v10106_v43, 5  ;;  %v10588_v12 = vrot.slane %v17429_v29, 5  ;;  %v9959_v40 = vld [vmem:[#allocation2 + $0x5c] sm:$0x1]  ;;  %v10586_v63 = vsel %vm14960_vm4, %v12768_v36, %v10585_v39  ;;  %v14450_v37 = vld [vmem:[#allocation8 + $0x1d8] sm:$0xff]  }
 0x415   : > { %v10587_v60 = vrot.slane %v10585_v39, 4  ;;  %v12769_v26 = vrot.slane %v17440_v50, 9  ;;  %v10592_v44 = vrot.slane %v17442_v3, 5  ;;  %v14446_v25 = vld [vmem:[#allocation8 + $0x1a0] sm:$0xff]   ;;  %v10465_v30 = vld [vmem:[#allocation2 + $0x84] sm:$0xe]  ;;  %v18423_v36 = vcombine.low %v17090_v46, %v17092_v19 }
 0x416   : > { %v10466_v28 = vld [vmem:[#allocation2 + $0x88] sm:$0xf]  ;;  %v10094_v27 = vrot.slane %v10093_v34, 4  ;;  %v10103_v32 = vor.u32 %v10102_v9, %v10098_v8  ;;  %10692 = vst [vmem:[#allocation3 + $0xb0] sm:$0xf] %v10586_v63  ;;  %v10595_v51 = vrot.slane %v17452_v23, 5  ;;  %13577 = vmatpush3.bf16.msra.mxu1 %v14446_v25 }
 0x417   : > { %v10111_v29 = vshrl.u32 %v17454_v41, 16  ;;  %v17485_v59 = vld [vmem:[#allocation2 + $0x8c] sm:$0x1]  ;;  %v10589_v50 = vsel %vm14960_vm4, %v10587_v60, %v10588_v12  ;;  %v10593_v3 = vsel %vm14960_vm4, %v12769_v26, %v10592_v44  ;;  %v10594_v43 = vrot.slane %v10592_v44, 4  ;;  %v10468_v47 = vld [vmem:[#allocation2 + $0x90] sm:$0xe]  ;;  %9516 = vmatmul.mubr.bf16.gmra.mxu0 %v18423_v36  ;;  %v17508_v44 = vpop.f32.mrf.mxu1  ;;  %13578 = vmatprep.subr.bf16.mxu1 %v14450_v37 }
 0x418   : > { %v10114_v6 = vshll.u32 %v17454_v41, 16  ;;  %v10469_v2 = vld [vmem:[#allocation2 + $0x94] sm:$0xf]  ;;  %v14513_v23 = vld [vmem:[#allocation8 + $0x200] sm:$0xff]   ;;  %v10099_v4 = vsel %vm14971_vm5, %v10094_v27, %v10098_v8  ;;  %v10104_v39 = vrot.slane %v10103_v32, 4  ;;  %v10120_v9 = vshll.u32 %v17471_v17, 16  ;;  %9523 = vmatprep.mubr.bf16.mxu0 %v17211_v5  ;;  %13927 = vmatmul.mubr.bf16.gmra.mxu1 %v17450_v53 }
 0x419   : > { %10693 = vst [vmem:[#allocation3 + $0xbc] sm:$0xf] %v10589_v50  ;;  %10694 = vst [vmem:[#allocation3 + $0xc8] sm:$0xf] %v10593_v3  ;;  %v10113_v34 = vrot.slane %v10111_v29, 4  ;;  %v10596_v46 = vsel %vm14960_vm4, %v10594_v43, %v10595_v51  ;;  %v10124_v8 = vshrl.u32 %v17471_v17, 16  ;;  %13960 = vmatprep.subr.bf16.mxu0 %v14513_v23  ;;  %13930 = vmatprep.mubr.bf16.mxu1 %v17469_v57 }
 0x41a   : > { %v17500_v12 = vld [vmem:[#allocation3 + $0xe0] ss:$12 sps:$4 sm:$0xff]   ;;  %10414 = vst [vmem:[#allocation3 + $0x64] sm:$0xf] %v10099_v4  ;;  %v10116_v19 = vrot.slane %v10114_v6, 5  ;;  %v10130_v63 = vshll.u32 %v9959_v40, 16  ;;  %v10109_v27 = vsel %vm14971_vm5, %v10104_v39, %v10108_v55  ;;  %13961 = vmatpush3.bf16.msra.mxu0 %v14513_v23 }
 0x41b   : > { %v17502_v41 = vld [vmem:[#allocation2 + $0x98] sm:$0x1]  ;;  %v14452_v60 = vld [vmem:[#allocation8 + $0x198] sm:$0xff]   ;;  %v9960_v26 = vld [vmem:[#allocation2 + $0x60] sm:$0xf]  ;;  %v10122_v32 = vrot.slane %v10120_v9, 5 }
 0x41c   : > { %10695 = vst [vmem:[#allocation3 + $0xd4] sm:$0xf] %v10596_v46  ;;  %v12770_v29 = vrot.slane %v10465_v30, 9  ;;  %v10599_v5 = vrot.slane %v10466_v28, 5  ;;  %v17512_v50 = vld [vmem:[#allocation3 + $0xf8] ss:$12 sps:$4 sm:$0xff]   ;;  %v10117_v17 = vor.u32 %v10116_v19, %v10113_v34  ;;  %13579 = vmatpush3.bf16.msra.mxu1 %v14452_v60  ;;  %v17525_v19 = vpop.f32.mrf.mxu1 }
 0x41d   : > { %v17514_v51 = vld [vmem:[#allocation2 + $0x64] sm:$0xf]  ;;  %v14457_v25 = vld [vmem:[#allocation8 + $0x1d0] sm:$0xff]   ;;  %10415 = vst [vmem:[#allocation3 + $0x70] sm:$0xf] %v10109_v27  ;;  %v10126_v40 = vrot.slane %v10124_v8, 4 }
 0x41e   : > { %v10132_v3 = vrot.slane %v10130_v63, 5  ;;  %v10602_v43 = vrot.slane %v17485_v59, 5  ;;  %v9962_v6 = vld [vmem:[#allocation2 + $0x68] sm:$0x1]  ;;  %v10600_v55 = vsel %vm14960_vm4, %v12770_v29, %v10599_v5  ;;  %v10601_v30 = vrot.slane %v10599_v5, 4  ;;  %v14463_v13 = vld [vmem:[#allocation8 + $0x1c8] sm:$0xff]   ;;  %13580 = vmatprep.subr.bf16.mxu1 %v14457_v25 }
 0x41f   : > { %v12771_v28 = vrot.slane %v10468_v47, 9  ;;  %v10606_v37 = vrot.slane %v10469_v2, 5  ;;  %v10471_v36 = vld [vmem:[#allocation2 + $0x9c] sm:$0xe]  ;;  %v10472_v4 = vld [vmem:[#allocation2 + $0xa0] sm:$0xf]  ;;  %v10127_v34 = vor.u32 %v10126_v40, %v10122_v32  ;;  %v18424_v25 = vcombine.low %v17126_v62, %v17128_v18 }
 0x420   : > { %v14459_v39 = vld [vmem:[#allocation8 + $0x190] sm:$0xff]   ;;  %v10118_v22 = vrot.slane %v10117_v17, 4  ;;  %10696 = vst [vmem:[#allocation3 + $0xe0] sm:$0xf] %v10600_v55  ;;  %v10609_v59 = vrot.slane %v17502_v41, 5  ;;  %v10135_v9 = vshrl.u32 %v9960_v26, 16  ;;  %v10603_v47 = vsel %vm14960_vm4, %v10601_v30, %v10602_v43  ;;  %13931 = vmatmul.mubr.bf16.gmra.mxu1 %v17500_v12 }
 0x421   : > { %v17523_v46 = vld [vmem:[#allocation2 + $0xa4] sm:$0x1]  ;;  %v10607_v2 = vsel %vm14960_vm4, %v12771_v28, %v10606_v37  ;;  %v10608_v8 = vrot.slane %v10606_v37, 4  ;;  %v10138_v24 = vshll.u32 %v9960_v26, 16  ;;  %v10474_v63 = vld [vmem:[#allocation2 + $0xa8] sm:$0xe]  ;;  %9524 = vmatmul.mubr.bf16.gmra.mxu0 %v18424_v25  ;;  %13581 = vmatpush3.bf16.msra.mxu1 %v14459_v39 }
 0x422   : > { %v10475_v27 = vld [vmem:[#allocation2 + $0xac] sm:$0xf]  ;;  %v10123_v41 = vsel %vm14971_vm5, %v10118_v22, %v10122_v32  ;;  %v10128_v60 = vrot.slane %v10127_v34, 4  ;;  %10697 = vst [vmem:[#allocation3 + $0xec] sm:$0xf] %v10603_v47  ;;  %v10137_v29 = vrot.slane %v10135_v9, 4  ;;  %9531 = vmatprep.mubr.bf16.mxu0 %v17264_v61  ;;  %13582 = vmatprep.subr.bf16.mxu1 %v14463_v13 }
 0x423   : > { %10698 = vst [vmem:[#allocation3 + $0xf8] sm:$0xf] %v10607_v2  ;;  %v10144_v5 = vshll.u32 %v17514_v51, 16  ;;  %v17534_v17 = vld [vmem:[#allocation3 + $0x110] ss:$12 sps:$4 sm:$0xff]   ;;  %v14465_v26 = vld [vmem:[#allocation8 + $0x188] sm:$0xff]   ;;  %v10610_v23 = vsel %vm14960_vm4, %v10608_v8, %v10609_v59  ;;  %13934 = vmatprep.mubr.bf16.mxu1 %v17512_v50 }
 0x424   : > { %v17536_v40 = vld [vmem:[#allocation2 + $0xb0] sm:$0x1]  ;;  %v17538_v43 = vld [vmem:[#allocation2 + $0x6c] sm:$0xf]  ;;  %10416 = vst [vmem:[#allocation3 + $0x7c] sm:$0xf] %v10123_v41  ;;  %v10133_v37 = vsel %vm14971_vm5, %v10128_v60, %v10132_v3 }
 0x425   : > { %v10140_v32 = vrot.slane %v10138_v24, 5  ;;  %v10148_v55 = vshrl.u32 %v17514_v51, 16  ;;  %v10154_v30 = vshll.u32 %v9962_v6, 16  ;;  %v17546_v28 = vld [vmem:[#allocation3 + $0xc4] ss:$12 sps:$4 sm:$0xff]   ;;  %v10146_v22 = vrot.slane %v10144_v5, 5  ;;  %v17555_v51 = vpop.f32.mrf.mxu1  ;;  %13583 = vmatpush3.bf16.msra.mxu1 %v14465_v26 }
 0x426   : > { %10699 = vst [vmem:[#allocation3 + $0x104] sm:$0xf] %v10610_v23  ;;  %v12772_v34 = vrot.slane %v10471_v36, 9  ;;  %v10613_v62 = vrot.slane %v10472_v4, 5  ;;  %v17551_v18 = vld [vmem:[#allocation3 + $0x128] ss:$12 sps:$4 sm:$0xff]  }
 0x427   : > { %v17553_v9 = vld [vmem:[#allocation2 + $0x70] sm:$0xf]  ;;  %v9894_v59 = vld [vmem:[#allocation2 + $0x78] sm:$0xf]  ;;  %10417 = vst [vmem:[#allocation3 + $0x88] sm:$0xf] %v10133_v37  ;;  %v10141_v6 = vor.u32 %v10140_v32, %v10137_v29 }
 0x428   : > { %v14470_v47 = vld [vmem:[#allocation8 + $0x1c0] sm:$0xff]   ;;  %v10150_v2 = vrot.slane %v10148_v55, 4  ;;  %v10156_v61 = vrot.slane %v10154_v30, 5  ;;  %v10616_v8 = vrot.slane %v17523_v46, 5  ;;  %v9965_v3 = vld [vmem:[#allocation2 + $0x74] sm:$0x1]  ;;  %v10614_v36 = vsel %vm14960_vm4, %v12772_v34, %v10613_v62  ;;  %v17569_v34 = vpop.f32.mrf.mxu1  ;;  %13935 = vmatmul.mubr.bf16.gmra.mxu1 %v17534_v17 }
 0x429   : > { %v9895_v24 = vld [vmem:[#allocation2 + $0x7c] sm:$0xf]  ;;  %9926 = vst [vmem:[#allocation3 + $0xc0] sm:$0xf] %v9894_v59  ;;  %v10615_v4 = vrot.slane %v10613_v62, 4  ;;  %v12773_v39 = vrot.slane %v10474_v63, 9  ;;  %13584 = vmatprep.subr.bf16.mxu1 %v14470_v47  ;;  %13938 = vmatprep.mubr.bf16.mxu1 %v17551_v18 }
 0x42a   : > { %v10620_v41 = vrot.slane %v10475_v27, 5  ;;  %v10477_v60 = vld [vmem:[#allocation2 + $0xb4] sm:$0xe]  ;;  %v10478_v5 = vld [vmem:[#allocation2 + $0xb8] sm:$0xf]  ;;  %v10142_v29 = vrot.slane %v10141_v6, 4  ;;  %v10151_v25 = vor.u32 %v10150_v2, %v10146_v22 }
 0x42b   : > { %9927 = vst [vmem:[#allocation3 + $0xcc] sm:$0xf] %v9895_v24  ;;  %10700 = vst [vmem:[#allocation3 + $0x110] sm:$0xf] %v10614_v36  ;;  %v10623_v46 = vrot.slane %v17536_v40, 5  ;;  %v10159_v13 = vshrl.u32 %v17538_v43, 16  ;;  %v10617_v63 = vsel %vm14960_vm4, %v10615_v4, %v10616_v8 }
 0x42c   : > { %v10479_v23 = vld [vmem:[#allocation2 + $0xbc] sm:$0x1]  ;;  %v10621_v27 = vsel %vm14960_vm4, %v12773_v39, %v10620_v41  ;;  %v10622_v55 = vrot.slane %v10620_v41, 4  ;;  %v10162_v53 = vshll.u32 %v17538_v43, 16  ;;  %v10480_v30 = vld [vmem:[#allocation2 + $0xc0] sm:$0xe]  ;;  %v10147_v40 = vsel %vm14971_vm5, %v10142_v29, %v10146_v22 }
 0x42d   : > { %v14471_v32 = vld [vmem:[#allocation8 + $0x180] sm:$0xff]   ;;  %v10481_v37 = vld [vmem:[#allocation2 + $0xc4] sm:$0xf]  ;;  %v10152_v62 = vrot.slane %v10151_v25, 4  ;;  %10701 = vst [vmem:[#allocation3 + $0x11c] sm:$0xf] %v10617_v63  ;;  %v18425_v22 = vcombine.low %v17134_v11, %v17136_v56  ;;  %v17587_v11 = vpop.f32.mrf.mxu1 }
 0x42e   : > { %10702 = vst [vmem:[#allocation3 + $0x128] sm:$0xf] %v10621_v27  ;;  %v10161_v57 = vrot.slane %v10159_v13, 4  ;;  %v10168_v59 = vshll.u32 %v17553_v9, 16  ;;  %v17574_v6 = vld [vmem:[#allocation3 + $0x140] ss:$12 sps:$4 sm:$0xff]   ;;  %v10624_v43 = vsel %vm14960_vm4, %v10622_v55, %v10623_v46  ;;  %13585 = vmatpush3.bf16.msra.mxu1 %v14471_v32  ;;  %v17591_v55 = vpop.f32.mrf.mxu0 }
 0x42f   : > { %v10482_v2 = vld [vmem:[#allocation2 + $0xc8] sm:$0x1]  ;;  %v9966_v8 = vld [vmem:[#allocation2 + $0x78] sm:$0xf]  ;;  %10418 = vst [vmem:[#allocation3 + $0x94] sm:$0xf] %v10147_v40  ;;  %9532 = vmatmul.mubr.bf16.gmra.mxu0 %v18425_v22  ;;  %v10157_v4 = vsel %vm14971_vm5, %v10152_v62, %v10156_v61  ;;  %v17603_v22 = vpop.f32.mrf.mxu1 }
 0x430   : > { %v10164_v26 = vrot.slane %v10162_v53, 5  ;;  %v10172_v24 = vshrl.u32 %v17553_v9, 16  ;;  %v10178_v36 = vshll.u32 %v9965_v3, 16  ;;  %10703 = vst [vmem:[#allocation3 + $0x134] sm:$0xf] %v10624_v43  ;;  %v10170_v39 = vrot.slane %v10168_v59, 5  ;;  %9539 = vmatprep.mubr.bf16.mxu0 %v17355_v33  ;;  %v17607_v50 = vpop.f32.mrf.mxu0  ;;  %13939 = vmatmul.mubr.bf16.gmra.mxu1 %v17574_v6 }
 0x431   : > { %v12774_v41 = vrot.slane %v10477_v60, 9  ;;  %v10627_v29 = vrot.slane %v10478_v5, 5  ;;  %v17584_v47 = vld [vmem:[#allocation3 + $0x158] ss:$12 sps:$4 sm:$0xff]   ;;  %10419 = vst [vmem:[#allocation3 + $0xa0] sm:$0xf] %v10157_v4 }
 0x432   : > { %v9967_v25 = vld [vmem:[#allocation2 + $0x7c] sm:$0xf]  ;;  %v10165_v46 = vor.u32 %v10164_v26, %v10161_v57  ;;  %v10174_v9 = vrot.slane %v10172_v24, 4  ;;  %v10180_v3 = vrot.slane %v10178_v36, 5  ;;  %v10630_v13 = vrot.slane %v10479_v23, 5  ;;  %13942 = vmatprep.mubr.bf16.mxu1 %v17584_v47 }
 0x433   : > { %v9968_v63 = vld [vmem:[#allocation2 + $0x80] sm:$0x1]  ;;  %v10628_v56 = vsel %vm14960_vm4, %v12774_v41, %v10627_v29  ;;  %v10629_v61 = vrot.slane %v10627_v29, 4  ;;  %v12775_v60 = vrot.slane %v10480_v30, 9  ;;  %v10634_v5 = vrot.slane %v10481_v37, 5 }
 0x434   : > { %v477_v27 = vld [vmem:[#allocation2 + $0xd4] sm:$0x1]  ;;  %v10166_v53 = vrot.slane %v10165_v46, 4  ;;  %v10175_v33 = vor.u32 %v10174_v9, %v10170_v39  ;;  %10704 = vst [vmem:[#allocation3 + $0x140] sm:$0xf] %v10628_v56  ;;  %v10637_v40 = vrot.slane %v10482_v2, 5 }
 0x435   : > { %v10183_v62 = vshrl.u32 %v9966_v8, 16  ;;  %v10483_v57 = vld [vmem:[#allocation2 + $0xcc] sm:$0xe]  ;;  %v10631_v23 = vsel %vm14960_vm4, %v10629_v61, %v10630_v13  ;;  %v10635_v32 = vsel %vm14960_vm4, %v12775_v60, %v10634_v5  ;;  %v10636_v59 = vrot.slane %v10634_v5, 4  ;;  %v10484_v37 = vld [vmem:[#allocation2 + $0xd0] sm:$0xf] }
 0x436   : > { %v10186_v30 = vshll.u32 %v9966_v8, 16  ;;  %v17598_v43 = vld [vmem:[#allocation3 + $0xdc] ss:$12 sps:$4 sm:$0xff]   ;;  %v10171_v2 = vsel %vm14971_vm5, %v10166_v53, %v10170_v39  ;;  %v10176_v26 = vrot.slane %v10175_v33, 4  ;;  %10705 = vst [vmem:[#allocation3 + $0x14c] sm:$0xf] %v10631_v23  ;;  %v18426_v60 = vcombine.low %v17170_v48, %v17174_v10  ;;  %v17619_v23 = vpop.f32.mrf.mxu1 }
 0x437   : > { %10706 = vst [vmem:[#allocation3 + $0x158] sm:$0xf] %v10635_v32  ;;  %v10185_v12 = vrot.slane %v10183_v62, 4  ;;  %v10192_v24 = vshll.u32 %v9967_v25, 16  ;;  %v9896_v36 = vld [vmem:[#allocation2 + $0x84] sm:$0xf]  ;;  %v10638_v8 = vsel %vm14960_vm4, %v10636_v59, %v10637_v40 }
 0x438   : > { %10420 = vst [vmem:[#allocation3 + $0xac] sm:$0xf] %v10171_v2  ;;  %v10188_v4 = vrot.slane %v10186_v30, 5  ;;  %v10196_v41 = vshrl.u32 %v9967_v25, 16  ;;  %v10202_v29 = vshll.u32 %v9968_v63, 16  ;;  %v10181_v39 = vsel %vm14971_vm5, %v10176_v26, %v10180_v3  ;;  %9540 = vmatmul.mubr.bf16.gmra.mxu0 %v18426_v60  ;;  %v17616_v3 = vpop.f32.mrf.mxu0 }
 0x439   : > { %v9897_v46 = vld [vmem:[#allocation2 + $0x88] sm:$0xf]  ;;  %9928 = vst [vmem:[#allocation3 + $0xd8] sm:$0xf] %v9896_v36  ;;  %10707 = vst [vmem:[#allocation3 + $0x164] sm:$0xf] %v10638_v8  ;;  %9547 = vmatprep.mubr.bf16.mxu0 %v17444_v20 }
 0x43a   : > { %v10194_v9 = vrot.slane %v10192_v24, 5  ;;  %v478_v13 = vsel %vm15834_vm10, 0, %v477_v27  ;;  %v12776_v56 = vrot.slane %v10483_v57, 9  ;;  %9929 = vst [vmem:[#allocation3 + $0xe4] sm:$0xf] %v9897_v46  ;;  %v10189_v25 = vor.u32 %v10188_v4, %v10185_v12 }
 0x43b   : > { %v9969_v61 = vld [vmem:[#allocation2 + $0x84] sm:$0xf]  ;;  %10421 = vst [vmem:[#allocation3 + $0xb8] sm:$0xf] %v10181_v39  ;;  %v10198_v63 = vrot.slane %v10196_v41, 4  ;;  %v10204_v5 = vrot.slane %v10202_v29, 5  ;;  %v17630_v39 = vpop.f32.mrf.mxu0 }
 0x43c   : > { %479 = vst [vmem:[#allocation2 + $0xd4] sm:$0x1] %v478_v13  ;;  %v10641_v53 = vrot.slane %v10484_v37, 5  ;;  %v9970_v33 = vld [vmem:[#allocation2 + $0x88] sm:$0xf]  ;;  %v10207_v27 = vshrl.u32 %v9969_v61, 16 }
 0x43d   : > { %v9971_v58 = vld [vmem:[#allocation2 + $0x8c] sm:$0x1]  ;;  %v10210_v40 = vshll.u32 %v9969_v61, 16  ;;  %v10216_v62 = vshll.u32 %v9970_v33, 16  ;;  %v10220_v57 = vshrl.u32 %v9970_v33, 16  ;;  %v10190_v32 = vrot.slane %v10189_v25, 4 }
 0x43e   : > { %v10199_v59 = vor.u32 %v10198_v63, %v10194_v9  ;;  %v17621_v30 = vld [vmem:[#allocation3 + $0x170] ss:$12 sps:$4 sm:$0xff]   ;;  %v10642_v37 = vsel %vm14960_vm4, %v12776_v56, %v10641_v53  ;;  %v10643_v2 = vrot.slane %v10641_v53, 4  ;;  %v10209_v26 = vrot.slane %v10207_v27, 4  ;;  %v17625_v36 = vld [vmem:[#allocation3 + $0xf4] ss:$12 sps:$4 sm:$0xff]   ;;  %v17633_v63 = vpop.f32.mrf.mxu1 }
 0x43f   : > { %v8975_v48 = vld [vmem:[#allocation3 + $0xa8] sm:$0xff]  ;;  %10708 = vst [vmem:[#allocation3 + $0x170] sm:$0xf] %v10642_v37  ;;  %v10212_v20 = vrot.slane %v10210_v40, 5  ;;  %v10218_v12 = vrot.slane %v10216_v62, 5  ;;  %v10222_v24 = vrot.slane %v10220_v57, 4  ;;  %v10195_v8 = vsel %vm14971_vm5, %v10190_v32, %v10194_v9  ;;  %13943 = vmatmul.mubr.bf16.gmra.mxu1 %v17621_v30 }
 0x440   : > { %v10200_v4 = vrot.slane %v10199_v59, 4  ;;  %v10226_v41 = vshll.u32 %v9971_v58, 16  ;;  %v9898_v29 = vld [vmem:[#allocation2 + $0x90] sm:$0xf]  ;;  %v9899_v46 = vld [vmem:[#allocation2 + $0x94] sm:$0xf]  ;;  %v13349_v52 = vadd.f32 %v17633_v63, %v17619_v23 }
 0x441   : > { %10422 = vst [vmem:[#allocation3 + $0xc4] sm:$0xf] %v10195_v8  ;;  %v10213_v56 = vor.u32 %v10212_v20, %v10209_v26  ;;  %v10223_v61 = vor.u32 %v10222_v24, %v10218_v12  ;;  %9930 = vst [vmem:[#allocation3 + $0xf0] sm:$0xf] %v9898_v29  ;;  %v9972_v60 = vld [vmem:[#allocation2 + $0x90] sm:$0xf]  ;;  %v17637_v20 = vpop.f32.mrf.mxu0 }
 0x442   : > { %v8977_v10 = vld [vmem:[#allocation3 + $0xb4] sm:$0xff]  ;;  %9931 = vst [vmem:[#allocation3 + $0xfc] sm:$0xf] %v9899_v46  ;;  %v9973_v25 = vld [vmem:[#allocation2 + $0x94] sm:$0xf]  ;;  %v10205_v9 = vsel %vm14971_vm5, %v10200_v4, %v10204_v5  ;;  %v10228_v53 = vrot.slane %v10226_v41, 5  ;;  %v17646_v46 = vpop.f32.mrf.mxu1 }
 0x443   : > { %v12710_v13 = vcombine.low %v8975_v48, %v8977_v10  ;;  %v9974_v17 = vld [vmem:[#allocation2 + $0x98] sm:$0x1]  ;;  %v10231_v33 = vshrl.u32 %v9972_v60, 16  ;;  %v10234_v58 = vshll.u32 %v9972_v60, 16  ;;  %10423 = vst [vmem:[#allocation3 + $0xd0] sm:$0xf] %v10205_v9 }
 0x444   : > { %v10485_v27 = vld [vmem:[#allocation2 + $0xd4] sm:$0x1]  ;;  %v10214_v18 = vrot.slane %v10213_v56, 4  ;;  %v10224_v40 = vrot.slane %v10223_v61, 4  ;;  %v10240_v62 = vshll.u32 %v9973_v25, 16  ;;  %v10244_v57 = vshrl.u32 %v9973_v25, 16 }
 0x445   : > { %9548 = vmatmul.mubr.bf16.gmra.mxu0 %v12710_v13  ;;  %v10644_v32 = vrot.slane %v10485_v27, 5  ;;  %v10233_v59 = vrot.slane %v10231_v33, 4  ;;  %v10236_v37 = vrot.slane %v10234_v58, 5  ;;  %v10250_v26 = vshll.u32 %v9974_v17, 16  ;;  %18427 = vst [vmem:[#allocation17_spill] sm:$0xff] %v17637_v20 }
 0x446   : > { %9555 = vmatprep.mubr.bf16.mxu0 %v17546_v28  ;;  %v10219_v5 = vsel %vm14971_vm5, %v10214_v18, %v10218_v12  ;;  %v10229_v24 = vsel %vm14971_vm5, %v10224_v40, %v10228_v53  ;;  %v10242_v8 = vrot.slane %v10240_v62, 5  ;;  %v10246_v4 = vrot.slane %v10244_v57, 4  ;;  %v17644_v41 = vld [vmem:[#allocation3 + $0x10c] ss:$12 sps:$4 sm:$0xff]   ;;  %v9900_v29 = vld [vmem:[#allocation2 + $0x9c] sm:$0xf]  ;;  %v17654_v57 = vpop.f32.mrf.mxu1 }
 0x447   : > { %v10645_v13 = vsel %vm14960_vm4, %v10643_v2, %v10644_v32  ;;  %10424 = vst [vmem:[#allocation3 + $0xdc] sm:$0xf] %v10219_v5  ;;  %10425 = vst [vmem:[#allocation3 + $0xe8] sm:$0xf] %v10229_v24  ;;  %v10237_v56 = vor.u32 %v10236_v37, %v10233_v59  ;;  %v9901_v28 = vld [vmem:[#allocation2 + $0xa0] sm:$0xf]  ;;  %v17651_v2 = vpop.f32.mrf.mxu0 }
 0x448   : > { %v8979_v48 = vld [vmem:[#allocation3 + $0xc0] sm:$0xff]  ;;  %9932 = vst [vmem:[#allocation3 + $0x108] sm:$0xf] %v9900_v29  ;;  %10709 = vst [vmem:[#allocation3 + $0x17c] sm:$0xf] %v10645_v13  ;;  %v10247_v12 = vor.u32 %v10246_v4, %v10242_v8  ;;  %v10252_v18 = vrot.slane %v10250_v26, 5 }
 0x449   : > { %v9975_v61 = vld [vmem:[#allocation2 + $0x9c] sm:$0xf]  ;;  %9933 = vst [vmem:[#allocation3 + $0x114] sm:$0xf] %v9901_v28  ;;  %v9976_v60 = vld [vmem:[#allocation2 + $0xa0] sm:$0xf] }
 0x44a   : > { %v8981_v10 = vld [vmem:[#allocation3 + $0xcc] sm:$0xff]  ;;  %v10255_v17 = vshrl.u32 %v9975_v61, 16  ;;  %v10258_v9 = vshll.u32 %v9975_v61, 16  ;;  %v10238_v33 = vrot.slane %v10237_v56, 4  ;;  %v10264_v58 = vshll.u32 %v9976_v60, 16  ;;  %18428 = vst [vmem:[#allocation32_spill] sm:$0xff] %v17651_v2 }
 0x44b   : > { %v9977_v25 = vld [vmem:[#allocation2 + $0xa4] sm:$0x1]  ;;  %v12713_v53 = vcombine.low %v8979_v48, %v8981_v10  ;;  %v10268_v0 = vshrl.u32 %v9976_v60, 16  ;;  %v10248_v27 = vrot.slane %v10247_v12, 4  ;;  %v17658_v48 = vld [vmem:[#allocation3 + $0x124] ss:$12 sps:$4 sm:$0xff]   ;;  %v17660_v10 = vpop.f32.mrf.mxu0  ;;  %v17666_v61 = vadd.f32 %v17420_v42, %v17389_v16 }
 0x44c   : > { %v10257_v40 = vrot.slane %v10255_v17, 4  ;;  %v10260_v62 = vrot.slane %v10258_v9, 5  ;;  %v10243_v32 = vsel %vm14971_vm5, %v10238_v33, %v10242_v8  ;;  %v10266_v59 = vrot.slane %v10264_v58, 5  ;;  %v9902_v26 = vld [vmem:[#allocation2 + $0xa8] sm:$0xf] }
 0x44d   : > { %v10270_v37 = vrot.slane %v10268_v0, 4  ;;  %v10274_v6 = vshll.u32 %v9977_v25, 16  ;;  %v10253_v5 = vsel %vm14971_vm5, %v10248_v27, %v10252_v18  ;;  %10426 = vst [vmem:[#allocation3 + $0xf4] sm:$0xf] %v10243_v32  ;;  %v9903_v24 = vld [vmem:[#allocation2 + $0xac] sm:$0xf]  ;;  %9556 = vmatmul.mubr.bf16.gmra.mxu0 %v12713_v53  ;;  %v17669_v53 = vpop.f32.mrf.mxu1 }
 0x44e   : > { %v10261_v47 = vor.u32 %v10260_v62, %v10257_v40  ;;  %v9978_v4 = vld [vmem:[#allocation2 + $0xa8] sm:$0xf]  ;;  %10427 = vst [vmem:[#allocation3 + $0x100] sm:$0xf] %v10253_v5  ;;  %9934 = vst [vmem:[#allocation3 + $0x120] sm:$0xf] %v9902_v26  ;;  %9563 = vmatprep.mubr.bf16.mxu0 %v17598_v43  ;;  %v17671_v40 = vpop.f32.mrf.mxu0 }
 0x44f   : > { %v10271_v29 = vor.u32 %v10270_v37, %v10266_v59  ;;  %9935 = vst [vmem:[#allocation3 + $0x12c] sm:$0xf] %v9903_v24  ;;  %v9979_v8 = vld [vmem:[#allocation2 + $0xac] sm:$0xf]  ;;  %v9980_v13 = vld [vmem:[#allocation2 + $0xb0] sm:$0x1] }
 0x450   : > { %v10279_v56 = vshrl.u32 %v9978_v4, 16  ;;  %v10282_v28 = vshll.u32 %v9978_v4, 16  ;;  %v14474_v12 = vld [vmem:[#allocation3 + $0x4] ss:$12 sps:$4 sm:$0xff]   ;;  %v8983_v60 = vld [vmem:[#allocation3 + $0xd8] sm:$0xff]  ;;  %v10262_v25 = vrot.slane %v10261_v47, 4 }
 0x451   : > { %v10288_v17 = vshll.u32 %v9979_v8, 16  ;;  %v10292_v9 = vshrl.u32 %v9979_v8, 16  ;;  %v8985_v33 = vld [vmem:[#allocation3 + $0xe4] sm:$0xff]  ;;  %v10272_v58 = vrot.slane %v10271_v29, 4  ;;  %v10276_v0 = vrot.slane %v10274_v6, 5  ;;  %11254 = vmatprep.mubr.bf16.mxu1 %v14474_v12 }
 0x452   : > { %v10281_v27 = vrot.slane %v10279_v56, 4  ;;  %v10284_v18 = vrot.slane %v10282_v28, 5  ;;  %v10267_v16 = vsel %vm14971_vm5, %v10262_v25, %v10266_v59  ;;  %v10298_v32 = vshll.u32 %v9980_v13, 16  ;;  %v17675_v37 = vld [vmem:[#allocation3 + $0x13c] ss:$12 sps:$4 sm:$0xff]   ;;  %v17680_v56 = vpop.f32.mrf.mxu1 }
 0x453   : > { %v10290_v42 = vrot.slane %v10288_v17, 5  ;;  %v10294_v62 = vrot.slane %v10292_v9, 4  ;;  %v10277_v43 = vsel %vm14971_vm5, %v10272_v58, %v10276_v0  ;;  %10428 = vst [vmem:[#allocation3 + $0x10c] sm:$0xf] %v10267_v16  ;;  %v9904_v6 = vld [vmem:[#allocation2 + $0xb4] sm:$0xf]  ;;  %v12716_v24 = vcombine.low %v8983_v60, %v8985_v33  ;;  %v17682_v9 = vpop.f32.mrf.mxu0 }
 0x454   : > { %v10285_v5 = vor.u32 %v10284_v18, %v10281_v27  ;;  %v9905_v47 = vld [vmem:[#allocation2 + $0xb8] sm:$0xf]  ;;  %v9981_v26 = vld [vmem:[#allocation2 + $0xb4] sm:$0xf]  ;;  %10429 = vst [vmem:[#allocation3 + $0x118] sm:$0xf] %v10277_v43 }
 0x455   : > { %v10295_v4 = vor.u32 %v10294_v62, %v10290_v42  ;;  %9936 = vst [vmem:[#allocation3 + $0x138] sm:$0xf] %v9904_v6  ;;  %9937 = vst [vmem:[#allocation3 + $0x144] sm:$0xf] %v9905_v47  ;;  %v9982_v59 = vld [vmem:[#allocation2 + $0xb8] sm:$0xf]  ;;  %9564 = vmatmul.mubr.bf16.gmra.mxu0 %v12716_v24 }
 0x456   : > { %v9983_v29 = vld [vmem:[#allocation2 + $0xbc] sm:$0x1]  ;;  %v10303_v8 = vshrl.u32 %v9981_v26, 16  ;;  %v10306_v13 = vshll.u32 %v9981_v26, 16  ;;  %v10286_v30 = vrot.slane %v10285_v5, 4  ;;  %v10312_v28 = vshll.u32 %v9982_v59, 16  ;;  %9571 = vmatprep.mubr.bf16.mxu0 %v17625_v36 }
 0x457   : > { %v10316_v25 = vshrl.u32 %v9982_v59, 16  ;;  %v10322_v17 = vshll.u32 %v9983_v29, 16  ;;  %v10296_v58 = vrot.slane %v10295_v4, 4  ;;  %v10300_v0 = vrot.slane %v10298_v32, 5  ;;  %v14472_v33 = vld [vmem:[#allocation3] ss:$12 sps:$4 sm:$0xff]   ;;  %v17693_v59 = vpop.f32.mrf.mxu1 }
 0x458   : > { %v10305_v12 = vrot.slane %v10303_v8, 4  ;;  %v10308_v60 = vrot.slane %v10306_v13, 5  ;;  %v10291_v27 = vsel %vm14971_vm5, %v10286_v30, %v10290_v42  ;;  %v10314_v18 = vrot.slane %v10312_v28, 5  ;;  %v17686_v43 = vld [vmem:[#allocation3 + $0x154] ss:$12 sps:$4 sm:$0xff]   ;;  %v17695_v28 = vpop.f32.mrf.mxu0  ;;  %11255 = vmatmul.mubr.bf16.vlgmr.msra.gmra.mxu1 %v14472_v33 }
 0x459   : > { %v10318_v16 = vrot.slane %v10316_v25, 4  ;;  %v10324_v62 = vrot.slane %v10322_v17, 5  ;;  %v8987_v5 = vld [vmem:[#allocation3 + $0xf0] sm:$0xff]  ;;  %v8989_v6 = vld [vmem:[#allocation3 + $0xfc] sm:$0xff]  ;;  %v10301_v47 = vsel %vm14971_vm5, %v10296_v58, %v10300_v0  ;;  %10430 = vst [vmem:[#allocation3 + $0x124] sm:$0xf] %v10291_v27  ;;  %v13340_v26 = vadd.f32 %v17525_v19, %v17508_v44  ;;  %v13357_v19 = vpop.f32.mrf.mxu1 }
 0x45a   : > { %v10309_v32 = vor.u32 %v10308_v60, %v10305_v12  ;;  %v9906_v24 = vld [vmem:[#allocation2 + $0xc0] sm:$0xf]  ;;  %v9907_v4 = vld [vmem:[#allocation2 + $0xc4] sm:$0xf]  ;;  %10431 = vst [vmem:[#allocation3 + $0x130] sm:$0xf] %v10301_v47  ;;  %v13880_v47 = vpop.f32.mrf.mxu0  ;;  %v12719_v2 = vcombine.low %v8987_v5, %v8989_v6 }
 0x45b   : > { %v9984_v42 = vld [vmem:[#allocation2 + $0xc0] sm:$0xf]  ;;  %v10319_v29 = vor.u32 %v10318_v16, %v10314_v18  ;;  %9938 = vst [vmem:[#allocation3 + $0x150] sm:$0xf] %v9906_v24  ;;  %9939 = vst [vmem:[#allocation3 + $0x15c] sm:$0xf] %v9907_v4  ;;  %v17698_v16 = vadd.f32 %v13340_v26, %v17671_v40 }
 0x45c   : > { %v9985_v8 = vld [vmem:[#allocation2 + $0xc4] sm:$0xf]  ;;  %v9986_v13 = vld [vmem:[#allocation2 + $0xc8] sm:$0x1]  ;;  %v10327_v36 = vshrl.u32 %v9984_v42, 16  ;;  %v10330_v30 = vshll.u32 %v9984_v42, 16 }
 0x45d   : > { %v14479_v25 = vld [vmem:[#allocation3 + $0x1c] ss:$12 sps:$4 sm:$0xff]   ;;  %v10310_v17 = vrot.slane %v10309_v32, 4  ;;  %v10336_v58 = vshll.u32 %v9985_v8, 16  ;;  %v10340_v0 = vshrl.u32 %v9985_v8, 16  ;;  %v10346_v44 = vshll.u32 %v9986_v13, 16  ;;  %v13359_v32 = vpop.f32.mrf.mxu1  ;;  %9572 = vmatmul.mubr.bf16.gmra.mxu0 %v12719_v2 }
 0x45e   : > { %v10320_v12 = vrot.slane %v10319_v29, 4  ;;  %v10329_v60 = vrot.slane %v10327_v36, 4  ;;  %v10332_v27 = vrot.slane %v10330_v30, 5  ;;  %11262 = vmatprep.mubr.bf16.mxu1 %v14479_v25  ;;  %v421_v20 = vld [vmem:[#allocation2 + $0xcc] sm:$0x1]  ;;  %v13346_v29 = vadd.f32 %v17603_v22, %v17587_v11  ;;  %9579 = vmatprep.mubr.bf16.mxu0 %v17644_v41 }
 0x45f   : > { %v10315_v24 = vsel %vm14971_vm5, %v10310_v17, %v10314_v18  ;;  %v10338_v4 = vrot.slane %v10336_v58, 5  ;;  %v10342_v42 = vrot.slane %v10340_v0, 4  ;;  %v17706_v40 = vld [vmem:[#allocation3 + $0x16c] ss:$12 sps:$4 sm:$0xff]   ;;  %v10348_v18 = vrot.slane %v10346_v44, 5  ;;  %v8004_v17 = vpop.f32.mrf.mxu0  ;;  %v13360_v44 = vpop.f32.mrf.mxu1 }
 0x460   : > { %v10325_v8 = vsel %vm14971_vm5, %v10320_v12, %v10324_v62  ;;  %10432 = vst [vmem:[#allocation3 + $0x13c] sm:$0xf] %v10315_v24  ;;  %v10333_v33 = vor.u32 %v10332_v27, %v10329_v60  ;;  %v9909_v26 = vld [vmem:[#allocation2 + $0xd0] sm:$0xf]  ;;  %v422_v30 = vsel %vm15826_vm8, 0, %v421_v20  ;;  %v17711_v25 = vadd.f32 %v17660_v10, %v13346_v29  ;;  %v8991_v12 = vld [vmem:[#allocation3 + $0x108] sm:$0xff] }
 0x461   : > { %v9988_v13 = vld [vmem:[#allocation2 + $0xd0] sm:$0xf]  ;;  %10433 = vst [vmem:[#allocation3 + $0x148] sm:$0xf] %v10325_v8  ;;  %v10343_v36 = vor.u32 %v10342_v42, %v10338_v4  ;;  %9941 = vst [vmem:[#allocation3 + $0x174] sm:$0xf] %v9909_v26  ;;  %v13352_v20 = vadd.f32 %v17654_v57, %v17646_v46  ;;  %v17723_v42 = vadd.f32 %v17682_v9, %v13349_v52 }
 0x462   : > { %v9989_v5 = vld [vmem:[#allocation2 + $0xd4] sm:$0x1]  ;;  %v10360_v6 = vshll.u32 %v9988_v13, 16  ;;  %v10334_v62 = vrot.slane %v10333_v33, 4  ;;  %423 = vst [vmem:[#allocation2 + $0xcc] sm:$0x1] %v422_v30  ;;  %v13358_v57 = vadd.f32 %v13357_v19, %v17693_v59  ;;  %v13361_v8 = vadd.f32 %v13360_v44, %v13359_v32 }
 0x463   : > { %v10364_v11 = vshrl.u32 %v9988_v13, 16  ;;  %v10370_v22 = vshll.u32 %v9989_v5, 16  ;;  %v10344_v58 = vrot.slane %v10343_v36, 4  ;;  %v14477_v2 = vld [vmem:[#allocation3 + $0x18] ss:$12 sps:$4 sm:$0xff]   ;;  %v17725_v23 = vadd.f32 %v13352_v20, %v8004_v17  ;;  %v8997_v19 = vld [vmem:[#allocation3 + $0x12c] sm:$0xff] }
 0x464   : > { %v10362_v0 = vrot.slane %v10360_v6, 5  ;;  %v8993_v60 = vld [vmem:[#allocation3 + $0x114] sm:$0xff]  ;;  %v10339_v10 = vsel %vm14971_vm5, %v10334_v62, %v10338_v4  ;;  %11263 = vmatmul.mubr.bf16.gmra.mxu1 %v14477_v2  ;;  %v13881_v4 = vpop.f32.mrf.mxu0  ;;  %v17728_v26 = vadd.f32 %v13880_v47, %v13358_v57  ;;  %v14483_v6 = vld [vmem:[#allocation3 + $0x30] ss:$12 sps:$4 sm:$0xff]   ;;  %v8995_v59 = vld [vmem:[#allocation3 + $0x120] sm:$0xff] }
 0x465   : > { %v10366_v27 = vrot.slane %v10364_v11, 4  ;;  %v14485_v24 = vld [vmem:[#allocation3 + $0x34] ss:$12 sps:$4 sm:$0xff]   ;;  %v10349_v41 = vsel %vm14971_vm5, %v10344_v58, %v10348_v18  ;;  %10434 = vst [vmem:[#allocation3 + $0x154] sm:$0xf] %v10339_v10  ;;  %v10372_v46 = vrot.slane %v10370_v22, 5  ;;  %v12722_v33 = vcombine.low %v8991_v12, %v8993_v60  ;;  %v13362_v22 = vpop.f32.mrf.mxu1 }
 0x466   : > { %10435 = vst [vmem:[#allocation3 + $0x160] sm:$0xf] %v10349_v41  ;;  %11270 = vmatprep.mubr.bf16.mxu1 %v14485_v24  ;;  %v17730_v13 = vadd.f32 %v13881_v4, %v13361_v8  ;;  %v14490_v62 = vld [vmem:[#allocation3 + $0x4c] ss:$12 sps:$4 sm:$0xff]   ;;  %v12725_v17 = vcombine.low %v8995_v59, %v8997_v19  ;;  %v17737_v2 = vpop.f32.mrf.mxu0  ;;  %v14488_v60 = vld [vmem:[#allocation3 + $0x48] ss:$12 sps:$4 sm:$0xff]  }
 0x467   : > { %v10367_v63 = vor.u32 %v10366_v27, %v10362_v0  ;;  %9580 = vmatmul.mubr.bf16.gmra.mxu0 %v12722_v33  ;;  %v13363_v52 = vpop.f32.mrf.mxu1  ;;  %v14496_v41 = vld [vmem:[#allocation3 + $0x64] ss:$12 sps:$4 sm:$0xff]   ;;  %v14501_v33 = vld [vmem:[#allocation3 + $0x7c] ss:$12 sps:$4 sm:$0xff]   ;;  %v14507_v59 = vld [vmem:[#allocation3 + $0x94] ss:$12 sps:$4 sm:$0xff]  }
 0x468   : > { %9587 = vmatprep.mubr.bf16.mxu0 %v17658_v48  ;;  %v13364_v20 = vadd.f32 %v13363_v52, %v13362_v22  ;;  %v8999_v48 = vld [vmem:[#allocation3 + $0x138] sm:$0xff]  ;;  %v9001_v10 = vld [vmem:[#allocation3 + $0x144] sm:$0xff]  ;;  %v13884_v27 = vpop.f32.mrf.mxu0 }
 0x469   : > { %v10368_v29 = vrot.slane %v10367_v63, 4  ;;  %v9908_v36 = vld [vmem:[#allocation2 + $0xcc] sm:$0xf]  ;;  %v13365_v12 = vpop.f32.mrf.mxu1  ;;  %v12728_v45 = vcombine.low %v8999_v48, %v9001_v10  ;;  %v14512_v52 = vld [vmem:[#allocation3 + $0xac] ss:$12 sps:$4 sm:$0xff]  }
 0x46a   : > { %v9987_v9 = vld [vmem:[#allocation2 + $0xcc] sm:$0xf]  ;;  %9940 = vst [vmem:[#allocation3 + $0x168] sm:$0xf] %v9908_v36  ;;  %v8020_v63 = vpop.f32.mrf.mxu0 }
 0x46b   : > { %v10351_v18 = vshrl.u32 %v9987_v9, 16  ;;  %v10354_v30 = vshll.u32 %v9987_v9, 16  ;;  %v10373_v5 = vsel %vm14971_vm5, %v10368_v29, %v10372_v46  ;;  %v13366_v24 = vpop.f32.mrf.mxu1  ;;  %v17740_v46 = vadd.f32 %v13364_v20, %v8020_v63  ;;  %v14518_v20 = vld [vmem:[#allocation3 + $0x20] ss:$12 sps:$4 sm:$0xff]   ;;  %v14524_v63 = vld [vmem:[#allocation3 + $0x68] ss:$12 sps:$4 sm:$0xff]  }
 0x46c   : > { %10437 = vst [vmem:[#allocation3 + $0x178] sm:$0xf] %v10373_v5  ;;  %11271 = vmatmul.mubr.bf16.gmra.mxu1 %v14483_v6  ;;  %v13367_v57 = vadd.f32 %v13366_v24, %v13365_v12  ;;  %v9003_v29 = vld [vmem:[#allocation3 + $0x150] sm:$0xff]  ;;  %v14499_v5 = vld [vmem:[#allocation3 + $0x78] ss:$12 sps:$4 sm:$0xff]  }
 0x46d   : > { %v10353_v32 = vrot.slane %v10351_v18, 4  ;;  %v10356_v47 = vrot.slane %v10354_v30, 5  ;;  %11278 = vmatprep.mubr.bf16.mxu1 %v14490_v62  ;;  %v9005_v36 = vld [vmem:[#allocation3 + $0x15c] sm:$0xff]  ;;  %v13368_v18 = vpop.f32.mrf.mxu1  ;;  %v14510_v12 = vld [vmem:[#allocation3 + $0xa8] ss:$12 sps:$4 sm:$0xff]  }
 0x46e   : > { %v12731_v9 = vcombine.low %v9003_v29, %v9005_v36  ;;  %v14523_v24 = vld [vmem:[#allocation3 + $0x50] ss:$12 sps:$4 sm:$0xff]  }
 0x46f   : > { %v10357_v11 = vor.u32 %v10356_v47, %v10353_v32  ;;  %9588 = vmatmul.mubr.bf16.gmra.mxu0 %v12725_v17  ;;  %v13369_v30 = vpop.f32.mrf.mxu1  ;;  %v14514_v17 = vld [vmem:[#allocation3 + $0x8] ss:$12 sps:$4 sm:$0xff]  }
 0x470   : > { %9595 = vmatprep.mubr.bf16.mxu0 %v17675_v37  ;;  %v14494_v37 = vld [vmem:[#allocation3 + $0x60] ss:$12 sps:$4 sm:$0xff]   ;;  %v13370_v6 = vadd.f32 %v13369_v30, %v13368_v18  ;;  %v14522_v29 = vld [vmem:[#allocation3 + $0xdc] ss:$12 sps:$4 sm:$0xff]  }
 0x471   : > { %v10358_v58 = vrot.slane %v10357_v11, 4  ;;  %v14528_v18 = vld [vmem:[#allocation3 + $0x80] ss:$12 sps:$4 sm:$0xff]  }
 0x472   : > { %v17746_v47 = vadd.f32 %v13884_v27, %v13370_v6  ;;  %v14520_v6 = vld [vmem:[#allocation3 + $0xd8] ss:$12 sps:$4 sm:$0xff]  }
 0x473   : > { %v10363_v44 = vsel %vm14971_vm5, %v10358_v58, %v10362_v0  ;;  %v13885_v0 = vpop.f32.mrf.mxu0  ;;  %v9009_v32 = vld [vmem:[#allocation3 + $0x174] sm:$0xff] }
 0x474   : > { %10436 = vst [vmem:[#allocation3 + $0x16c] sm:$0xf] %v10363_v44  ;;  %11279 = vmatmul.mubr.bf16.gmra.mxu1 %v14488_v60  ;;  %v14519_v44 = vld [vmem:[#allocation3 + $0x38] ss:$12 sps:$4 sm:$0xff]  }
 0x475   : > { %11286 = vmatprep.mubr.bf16.mxu1 %v14496_v41  ;;  %v8023_v8 = vpop.f32.mrf.mxu0  ;;  %v14517_v60 = vld [vmem:[#allocation3 + $0xc4] ss:$12 sps:$4 sm:$0xff]  }
 0x476   : > { %v17743_v4 = vadd.f32 %v13367_v57, %v8023_v8 }
 0x477   : > { %9596 = vmatmul.mubr.bf16.gmra.mxu0 %v12728_v45  ;;  %v13888_v57 = vpop.f32.mrf.mxu0 }
 0x478   : > { %9603 = vmatprep.mubr.bf16.mxu0 %v17686_v43  ;;  %v13371_v43 = vpop.f32.mrf.mxu1 }
 0x47a   : > { %v13372_v62 = vpop.f32.mrf.mxu1 }
 0x47b   : > { %v9007_v19 = vld [vmem:[#allocation3 + $0x168] sm:$0xff]  ;;  %v13373_v22 = vadd.f32 %v13372_v62, %v13371_v43  ;;  %v14533_v62 = vld [vmem:[#allocation3 + $0xb0] ss:$12 sps:$4 sm:$0xff]  }
 0x47c   : > { %11287 = vmatmul.mubr.bf16.gmra.mxu1 %v14494_v37  ;;  %v12734_v11 = vcombine.low %v9007_v19, %v9009_v32  ;;  %v13374_v48 = vpop.f32.mrf.mxu1  ;;  %v14515_v37 = vld [vmem:[#allocation3 + $0xc0] ss:$12 sps:$4 sm:$0xff]  }
 0x47d   : > { %11294 = vmatprep.mubr.bf16.mxu1 %v14501_v33  ;;  %v17748_v58 = vadd.f32 %v13885_v0, %v13373_v22  ;;  %v8036_v0 = vpop.f32.mrf.mxu0  ;;  %v14527_v19 = vld [vmem:[#allocation3 + $0xf4] ss:$12 sps:$4 sm:$0xff]  }
 0x47e   : > { %v13375_v10 = vpop.f32.mrf.mxu1  ;;  %v14534_v22 = vld [vmem:[#allocation3 + $0xc8] ss:$12 sps:$4 sm:$0xff]  }
 0x47f   : > { %9604 = vmatmul.mubr.bf16.gmra.mxu0 %v12731_v9  ;;  %v13376_v27 = vadd.f32 %v13375_v10, %v13374_v48  ;;  %v13889_v36 = vpop.f32.mrf.mxu0  ;;  %v14538_v48 = vld [vmem:[#allocation3 + $0xe0] ss:$12 sps:$4 sm:$0xff]   ;;  %v14539_v10 = vld [vmem:[#allocation3 + $0xf8] ss:$12 sps:$4 sm:$0xff]  }
 0x480   : > { %9611 = vmatprep.mubr.bf16.mxu0 %v17706_v40  ;;  %v14505_v40 = vld [vmem:[#allocation3 + $0x90] ss:$12 sps:$4 sm:$0xff]   ;;  %v13377_v41 = vpop.f32.mrf.mxu1 }
 0x481   : > { %v17750_v33 = vadd.f32 %v13376_v27, %v8036_v0  ;;  %v8039_v9 = vpop.f32.mrf.mxu0  ;;  %v14537_v0 = vld [vmem:[#allocation3 + $0x124] ss:$12 sps:$4 sm:$0xff]  }
 0x482   : > { %v13378_v45 = vpop.f32.mrf.mxu1 }
 0x483   : > { %v13379_v8 = vadd.f32 %v13378_v45, %v13377_v41 }
 0x484   : > { %11295 = vmatmul.mubr.bf16.gmra.mxu1 %v14499_v5  ;;  %v14529_v5 = vld [vmem:[#allocation3 + $0x98] ss:$12 sps:$4 sm:$0xff]  }
 0x485   : > { %11302 = vmatprep.mubr.bf16.mxu1 %v14507_v59  ;;  %v17752_v30 = vadd.f32 %v13379_v8, %v8039_v9  ;;  %v13380_v59 = vpop.f32.mrf.mxu1  ;;  %v14543_v9 = vld [vmem:[#allocation3 + $0x110] ss:$12 sps:$4 sm:$0xff]  }
 0x487   : > { %9612 = vmatmul.mubr.bf16.gmra.mxu0 %v12734_v11  ;;  %v13381_v32 = vpop.f32.mrf.mxu1 }
 0x488   : > { %13962 = vmatprep.mubr.bf16.mxu0 %v14514_v17  ;;  %v13382_v43 = vadd.f32 %v13381_v32, %v13380_v59  ;;  %v14535_v59 = vld [vmem:[#allocation3 + $0x120] ss:$12 sps:$4 sm:$0xff]   ;;  %v14542_v32 = vld [vmem:[#allocation3 + $0x13c] ss:$12 sps:$4 sm:$0xff]  }
 0x489   : > { %v13383_v11 = vpop.f32.mrf.mxu1 }
 0x48a   : > { %v17754_v17 = vadd.f32 %v13888_v57, %v13382_v43 }
 0x48c   : > { %11303 = vmatmul.mubr.bf16.gmra.mxu1 %v14505_v40  ;;  %v13384_v40 = vpop.f32.mrf.mxu1 }
 0x48d   : > { %11310 = vmatprep.mubr.bf16.mxu1 %v14512_v52  ;;  %v13385_v52 = vadd.f32 %v13384_v40, %v13383_v11  ;;  %v14548_v11 = vld [vmem:[#allocation3 + $0x140] ss:$12 sps:$4 sm:$0xff]  }
 0x48f   : > { %13963 = vmatmul.mubr.bf16.vlgmr.msra.gmra.mxu0 %v14518_v20  ;;  %v14525_v20 = vld [vmem:[#allocation3 + $0xf0] ss:$12 sps:$4 sm:$0xff]  }
 0x490   : > { %13966 = vmatprep.mubr.bf16.mxu0 %v14519_v44  ;;  %v14532_v44 = vld [vmem:[#allocation3 + $0x10c] ss:$12 sps:$4 sm:$0xff]  }
 0x494   : > { %11311 = vmatmul.mubr.bf16.gmra.mxu1 %v14510_v12  ;;  %v17756_v12 = vadd.f32 %v13889_v36, %v13385_v52  ;;  %v14549_v52 = vld [vmem:[#allocation3 + $0x158] ss:$12 sps:$4 sm:$0xff]  }
 0x495   : > { %11318 = vmatprep.mubr.bf16.mxu1 %v14517_v60  ;;  %v13386_v60 = vpop.f32.mrf.mxu1 }
 0x497   : > { %13967 = vmatmul.mubr.bf16.gmra.mxu0 %v14523_v24  ;;  %v13387_v27 = vpop.f32.mrf.mxu1  ;;  %v13892_v24 = vpop.f32.mrf.mxu0 }
 0x498   : > { %13970 = vmatprep.mubr.bf16.mxu0 %v14524_v63  ;;  %v13388_v41 = vadd.f32 %v13387_v27, %v13386_v60  ;;  %v14530_v63 = vld [vmem:[#allocation3 + $0x108] ss:$12 sps:$4 sm:$0xff]   ;;  %v14550_v27 = vld [vmem:[#allocation3 + $0x170] ss:$12 sps:$4 sm:$0xff]  }
 0x499   : > { %v13389_v57 = vpop.f32.mrf.mxu1  ;;  %v8052_v45 = vpop.f32.mrf.mxu0  ;;  %v14547_v60 = vld [vmem:[#allocation3 + $0x154] ss:$12 sps:$4 sm:$0xff]  }
 0x49a   : > { %v17758_v8 = vadd.f32 %v13388_v41, %v8052_v45 }
 0x49c   : > { %11319 = vmatmul.mubr.bf16.gmra.mxu1 %v14515_v37  ;;  %v13390_v37 = vpop.f32.mrf.mxu1 }
 0x49d   : > { %11326 = vmatprep.mubr.bf16.mxu1 %v14522_v29  ;;  %v13893_v29 = vpop.f32.mrf.mxu0  ;;  %v13391_v36 = vadd.f32 %v13390_v37, %v13389_v57  ;;  %v14545_v37 = vld [vmem:[#allocation3 + $0x150] ss:$12 sps:$4 sm:$0xff]  }
 0x49f   : > { %13971 = vmatmul.mubr.bf16.gmra.mxu0 %v14528_v18  ;;  %v8055_v18 = vpop.f32.mrf.mxu0 }
 0x4a0   : > { %13974 = vmatprep.mubr.bf16.mxu0 %v14529_v5  ;;  %v14544_v5 = vld [vmem:[#allocation3 + $0x128] ss:$12 sps:$4 sm:$0xff]  }
 0x4a4   : > { %11327 = vmatmul.mubr.bf16.gmra.mxu1 %v14520_v6  ;;  %v17760_v6 = vadd.f32 %v13391_v36, %v8055_v18 }
 0x4a5   : > { %11334 = vmatprep.mubr.bf16.mxu1 %v14527_v19  ;;  %v13392_v19 = vpop.f32.mrf.mxu1  ;;  %v13896_v45 = vpop.f32.mrf.mxu0 }
 0x4a7   : > { %13975 = vmatmul.mubr.bf16.gmra.mxu0 %v14533_v62  ;;  %v13393_v43 = vpop.f32.mrf.mxu1  ;;  %v8068_v36 = vpop.f32.mrf.mxu0 }
 0x4a8   : > { %13978 = vmatprep.mubr.bf16.mxu0 %v14534_v22  ;;  %v13394_v62 = vadd.f32 %v13393_v43, %v13392_v19 }
 0x4a9   : > { %v13395_v22 = vpop.f32.mrf.mxu1 }
 0x4aa   : > { %v17762_v40 = vadd.f32 %v13892_v24, %v13394_v62  ;;  %v14553_v24 = vld [vmem:[#allocation3 + $0x16c] ss:$12 sps:$4 sm:$0xff]  }
 0x4ac   : > { %11335 = vmatmul.mubr.bf16.gmra.mxu1 %v14525_v20  ;;  %v13396_v20 = vpop.f32.mrf.mxu1 }
 0x4ad   : > { %11342 = vmatprep.mubr.bf16.mxu1 %v14532_v44  ;;  %v13397_v44 = vadd.f32 %v13396_v20, %v13395_v22 }
 0x4ae   : > { %v13398_v41 = vpop.f32.mrf.mxu1 }
 0x4af   : > { %13979 = vmatmul.mubr.bf16.gmra.mxu0 %v14538_v48  ;;  %v14540_v48 = vld [vmem:[#allocation3 + $0x138] ss:$12 sps:$4 sm:$0xff]  }
 0x4b0   : > { %13982 = vmatprep.mubr.bf16.mxu0 %v14539_v10  ;;  %v17764_v10 = vadd.f32 %v13893_v29, %v13397_v44 }
 0x4b4   : > { %11343 = vmatmul.mubr.bf16.gmra.mxu1 %v14530_v63  ;;  %v13399_v63 = vpop.f32.mrf.mxu1 }
 0x4b5   : > { %11350 = vmatprep.mubr.bf16.mxu1 %v14537_v0  ;;  %v13400_v57 = vadd.f32 %v13399_v63, %v13398_v41 }
 0x4b6   : > { %v13401_v0 = vpop.f32.mrf.mxu1 }
 0x4b7   : > { %13983 = vmatmul.mubr.bf16.gmra.mxu0 %v14543_v9  ;;  %v17766_v9 = vadd.f32 %v13400_v57, %v8068_v36 }
 0x4b8   : > { %13986 = vmatprep.mubr.bf16.mxu0 %v14544_v5  ;;  %v13402_v18 = vpop.f32.mrf.mxu1 }
 0x4b9   : > { %v13403_v5 = vadd.f32 %v13402_v18, %v13401_v0 }
 0x4ba   : > { %v13404_v22 = vpop.f32.mrf.mxu1 }
 0x4bc   : > { %11351 = vmatmul.mubr.bf16.gmra.mxu1 %v14535_v59  ;;  %v13897_v59 = vpop.f32.mrf.mxu0  ;;  %v13405_v20 = vpop.f32.mrf.mxu1 }
 0x4bd   : > { %11358 = vmatprep.mubr.bf16.mxu1 %v14542_v32  ;;  %v14551_v32 = vld [vmem:[#allocation3 + $0x168] ss:$12 sps:$4 sm:$0xff]  }
 0x4be   : > { %v8071_v29 = vpop.f32.mrf.mxu0 }
 0x4bf   : > { %13987 = vmatmul.mubr.bf16.gmra.mxu0 %v14548_v11  ;;  %v17768_v19 = vadd.f32 %v13403_v5, %v8071_v29  ;;  %v7965_v5 = vadd.f32 %v17204_v38, %v17334_v54 }
 0x4c0   : > { %13990 = vmatprep.mubr.bf16.mxu0 %v14549_v52  ;;  %v13450_v43 = vpop.f32.mrf.mxu0 }
 0x4c2   : > { %v13451_v62 = vpop.f32.mrf.mxu0 }
 0x4c3   : > { %v13452_v11 = vadd.f32 %v13451_v62, %v13450_v43 }
 0x4c4   : > { %11359 = vmatmul.mubr.bf16.gmra.mxu1 %v14540_v48  ;;  %v13453_v52 = vpop.f32.mrf.mxu0  ;;  %v13406_v48 = vadd.f32 %v13405_v20, %v13404_v22 }
 0x4c5   : > { %11366 = vmatprep.mubr.bf16.mxu1 %v14547_v60 }
 0x4c6   : > { %v13454_v44 = vpop.f32.mrf.mxu0  ;;  %v17770_v63 = vadd.f32 %v13896_v45, %v13406_v48  ;;  %v13319_v48 = vadd.f32 %v17224_v35, %v17213_v31 }
 0x4c7   : > { %13991 = vmatmul.mubr.bf16.gmra.mxu0 %v14550_v27  ;;  %v13455_v60 = vadd.f32 %v13454_v44, %v13453_v52  ;;  %v13407_v27 = vpop.f32.mrf.mxu1 }
 0x4c8   : > { %v13456_v41 = vpop.f32.mrf.mxu0 }
 0x4c9   : > { %v13408_v57 = vpop.f32.mrf.mxu1 }
 0x4ca   : > { %v13457_v0 = vpop.f32.mrf.mxu0 }
 0x4cb   : > { %v13916_v36 = vpop.f32.mrf.mxu1 }
 0x4cc   : > { %11367 = vmatmul.mubr.bf16.gmra.mxu1 %v14545_v37  ;;  %v13458_v37 = vadd.f32 %v13457_v0, %v13456_v41  ;;  %v13459_v18 = vpop.f32.mrf.mxu0 }
 0x4cd   : > { %11374 = vmatprep.mubr.bf16.mxu1 %v14553_v24  ;;  %v13409_v24 = vadd.f32 %v13408_v57, %v13407_v27  ;;  %v9654_v43 = vpop.f32.mrf.mxu1 }
 0x4ce   : > { %v13460_v62 = vpop.f32.mrf.mxu0  ;;  %v9655_v22 = vadd.f32 %v13452_v11, %v9654_v43 }
 0x4cf   : > { %v17774_v29 = vadd.f32 %v13897_v59, %v13409_v24  ;;  %v13461_v52 = vadd.f32 %v13460_v62, %v13459_v18  ;;  %v13917_v45 = vpop.f32.mrf.mxu1  ;;  %v7960_v59 = vadd.f32 %v13319_v48, %v17607_v50 }
 0x4d0   : > { %v13462_v44 = vpop.f32.mrf.mxu0  ;;  %v17781_v27 = vadd.f32 %v9655_v22, %v17227_v21 }
 0x4d1   : > { %v17783_v41 = vadd.f32 %v13917_v45, %v13461_v52  ;;  %v9657_v38 = vpop.f32.mrf.mxu1 }
 0x4d2   : > { %v13463_v54 = vpop.f32.mrf.mxu0  ;;  %v9658_v57 = vadd.f32 %v13455_v60, %v9657_v38  ;;  %v7981_v60 = vadd.f32 %v17616_v3, %v17666_v61 }
 0x4d3   : > { %v13464_v0 = vadd.f32 %v13463_v54, %v13462_v44  ;;  %v13920_v11 = vpop.f32.mrf.mxu1 }
 0x4d4   : > { %11375 = vmatmul.mubr.bf16.gmra.mxu1 %v14551_v32  ;;  %v9663_v32 = vadd.f32 %v13916_v36, %v13458_v37  ;;  %v13465_v24 = vpop.f32.mrf.mxu0  ;;  %v17786_v37 = vadd.f32 %v9658_v57, %v7960_v59 }
 0x4d5   : > { %v9670_v36 = vpop.f32.mrf.mxu1 }
 0x4d6   : > { %v17776_v20 = vadd.f32 %v9663_v32, %v7965_v5  ;;  %v13466_v18 = vpop.f32.mrf.mxu0  ;;  %v17788_v5 = vadd.f32 %v13464_v0, %v9670_v36 }
 0x4d7   : > { %v13467_v31 = vadd.f32 %v13466_v18, %v13465_v24  ;;  %v13921_v35 = vpop.f32.mrf.mxu1 }
 0x4d8   : > { %v13468_v21 = vpop.f32.mrf.mxu0 }
 0x4d9   : > { %v9673_v32 = vpop.f32.mrf.mxu1 }
 0x4da   : > { %v13469_v43 = vpop.f32.mrf.mxu0  ;;  %v17790_v62 = vadd.f32 %v13467_v31, %v9673_v32  ;;  %v13343_v32 = vadd.f32 %v17569_v34, %v17555_v51 }
 0x4db   : > { %v13470_v22 = vadd.f32 %v13469_v43, %v13468_v21  ;;  %v13924_v52 = vpop.f32.mrf.mxu1 }
 0x4dc   : > { %v13471_v50 = vpop.f32.mrf.mxu0 }
 0x4dd   : > { %v9679_v45 = vadd.f32 %v13920_v11, %v13470_v22  ;;  %v9686_v44 = vpop.f32.mrf.mxu1 }
 0x4de   : > { %v13472_v48 = vpop.f32.mrf.mxu0 }
 0x4df   : > { %v13473_v38 = vadd.f32 %v13472_v48, %v13471_v50  ;;  %v17794_v54 = vadd.f32 %v9679_v45, %v7981_v60  ;;  %v13925_v59 = vpop.f32.mrf.mxu1 }
 0x4e1   : > { %18429 = vst [vmem:[#allocation34_spill] sm:$0xff] %v17794_v54  ;;  %v13474_v57 = vpop.f32.mrf.mxu0  ;;  %v17796_v0 = vadd.f32 %v13921_v35, %v13473_v38  ;;  %v9689_v24 = vpop.f32.mrf.mxu1  ;;  %v7992_v35 = vadd.f32 %v13343_v32, %v17695_v28 }
 0x4e3   : > { %18430 = vst [vmem:[#allocation18_spill] sm:$0xff] %v17796_v0  ;;  %v13475_v36 = vpop.f32.mrf.mxu0  ;;  %v13928_v31 = vpop.f32.mrf.mxu1 }
 0x4e4   : > { %v13476_v18 = vadd.f32 %v13475_v36, %v13474_v57 }
 0x4e5   : > { %v13477_v21 = vpop.f32.mrf.mxu0  ;;  %v9702_v3 = vpop.f32.mrf.mxu1 }
 0x4e6   : > { %v9687_v43 = vadd.f32 %v13476_v18, %v9686_v44 }
 0x4e7   : > { %v13478_v61 = vpop.f32.mrf.mxu0  ;;  %v13929_v50 = vpop.f32.mrf.mxu1 }
 0x4e8   : > { %v13479_v11 = vadd.f32 %v13478_v61, %v13477_v21  ;;  %v17801_v22 = vadd.f32 %v9687_v43, %v17698_v16 }
 0x4e9   : > { %v9705_v48 = vpop.f32.mrf.mxu1 }
 0x4ea   : > { %18431 = vst [vmem:[#allocation29_spill] sm:$0xff] %v17801_v22  ;;  %v9690_v45 = vadd.f32 %v13479_v11, %v9689_v24 }
 0x4eb   : > { %v13932_v0 = vpop.f32.mrf.mxu1 }
 0x4ec   : > { %v17804_v36 = vadd.f32 %v9690_v45, %v7992_v35 }
 0x4ed   : > { %v9718_v34 = vpop.f32.mrf.mxu1 }
 0x4ef   : > { %v13480_v60 = vpop.f32.mrf.mxu0  ;;  %v13933_v16 = vpop.f32.mrf.mxu1 }
 0x4f1   : > { %v13481_v38 = vpop.f32.mrf.mxu0  ;;  %v9721_v22 = vpop.f32.mrf.mxu1 }
 0x4f2   : > { %v13482_v57 = vadd.f32 %v13481_v38, %v13480_v60 }
 0x4f3   : > { %v13483_v54 = vpop.f32.mrf.mxu0  ;;  %v17812_v11 = vpop.f32.mrf.mxu1 }
 0x4f4   : > { %v9695_v51 = vadd.f32 %v13924_v52, %v13482_v57  ;;  %v13355_v52 = vadd.f32 %v17680_v56, %v17669_v53 }
 0x4f5   : > { %v13484_v44 = vpop.f32.mrf.mxu0 }
 0x4f6   : > { %v13485_v18 = vadd.f32 %v13484_v44, %v13483_v54  ;;  %v17807_v21 = vadd.f32 %v9695_v51, %v17711_v25  ;;  %v9734_v54 = vpop.f32.mrf.mxu1  ;;  %v8008_v51 = vadd.f32 %v13355_v52, %v17737_v2 }
 0x4f8   : > { %v13486_v43 = vpop.f32.mrf.mxu0  ;;  %v9698_v61 = vadd.f32 %v13925_v59, %v13485_v18  ;;  %v17819_v59 = vpop.f32.mrf.mxu1 }
 0x4fa   : > { %v13487_v28 = vpop.f32.mrf.mxu0  ;;  %v17810_v32 = vadd.f32 %v9698_v61, %v17723_v42  ;;  %v9737_v44 = vpop.f32.mrf.mxu1 }
 0x4fb   : > { %v13488_v24 = vadd.f32 %v13487_v28, %v13486_v43 }
 0x4fc   : > { %v13489_v60 = vpop.f32.mrf.mxu0  ;;  %v17824_v28 = vpop.f32.mrf.mxu1 }
 0x4fd   : > { %v9703_v35 = vadd.f32 %v13488_v24, %v9702_v3 }
 0x4fe   : > { %v13490_v45 = vpop.f32.mrf.mxu0  ;;  %v17826_v3 = vpop.f32.mrf.mxu1 }
 0x4ff   : > { %v13491_v25 = vadd.f32 %v13490_v45, %v13489_v60  ;;  %v17817_v38 = vadd.f32 %v9703_v35, %v17725_v23 }
 0x500   : > { %v17831_v35 = vpop.f32.mrf.mxu1 }
 0x501   : > { %v9706_v42 = vadd.f32 %v13491_v25, %v9705_v48 }
 0x502   : > { %v17833_v52 = vpop.f32.mrf.mxu1 }
 0x503   : > { %v17822_v61 = vadd.f32 %v9706_v42, %v8008_v51 }
 0x504   : > { %v17838_v51 = vpop.f32.mrf.mxu1 }
 0x505   : > { %v13492_v57 = vpop.f32.mrf.mxu0  ;;  %18432 = vst [vmem:[#allocation19_spill] sm:$0xff] %v17822_v61 }
 0x507   : > { %v13493_v18 = vpop.f32.mrf.mxu0 }
 0x508   : > { %v13494_v43 = vadd.f32 %v13493_v18, %v13492_v57  ;;  %v17840_v18 = vpop.f32.mrf.mxu1 }
 0x509   : > { %v13495_v53 = vpop.f32.mrf.mxu0 }
 0x50a   : > { %v9711_v56 = vadd.f32 %v13928_v31, %v13494_v43 }
 0x50b   : > { %v13496_v24 = vpop.f32.mrf.mxu0 }
 0x50c   : > { %v13497_v23 = vadd.f32 %v13496_v24, %v13495_v53  ;;  %v17829_v60 = vadd.f32 %v9711_v56, %v17728_v26  ;;  %v17845_v56 = vpop.f32.mrf.mxu1 }
 0x50d   : > { %v13498_v2 = vpop.f32.mrf.mxu0 }
 0x50e   : > { %v9714_v48 = vadd.f32 %v13929_v50, %v13497_v23  ;;  %v17847_v23 = vpop.f32.mrf.mxu1 }
 0x50f   : > { %v13499_v45 = vpop.f32.mrf.mxu0 }
 0x510   : > { %v13500_v25 = vadd.f32 %v13499_v45, %v13498_v2  ;;  %v17836_v57 = vadd.f32 %v9714_v48, %v17730_v13 }
 0x511   : > { %v13501_v31 = vpop.f32.mrf.mxu0 }
 0x512   : > { %v9719_v42 = vadd.f32 %v13500_v25, %v9718_v34 }
 0x513   : > { %v13502_v43 = vpop.f32.mrf.mxu0 }
 0x514   : > { %v13503_v26 = vadd.f32 %v13502_v43, %v13501_v31  ;;  %v17843_v53 = vadd.f32 %v9719_v42, %v17740_v46 }
 0x515   : > { %v13504_v50 = vpop.f32.mrf.mxu0 }
 0x516   : > { %18433 = vst [vmem:[#allocation47_spill] sm:$0xff] %v17843_v53  ;;  %v9722_v24 = vadd.f32 %v13503_v26, %v9721_v22 }
 0x517   : > { %v13505_v2 = vpop.f32.mrf.mxu0 }
 0x518   : > { %v13506_v13 = vadd.f32 %v13505_v2, %v13504_v50  ;;  %v17850_v48 = vadd.f32 %v9722_v24, %v17743_v4  ;;  %v17852_v45 = vpop.f32.mrf.mxu1 }
 0x519   : > { %v13507_v34 = vpop.f32.mrf.mxu0 }
 0x51a   : > { %18434 = vst [vmem:[#allocation20_spill] sm:$0xff] %v17850_v48  ;;  %v9727_v25 = vadd.f32 %v13932_v0, %v13506_v13  ;;  %v17854_v61 = vpop.f32.mrf.mxu1 }
 0x51b   : > { %v13508_v31 = vpop.f32.mrf.mxu0 }
 0x51c   : > { %v13509_v46 = vadd.f32 %v13508_v31, %v13507_v34  ;;  %v17857_v42 = vadd.f32 %v9727_v25, %v17746_v47  ;;  %v17859_v43 = vpop.f32.mrf.mxu1 }
 0x51d   : > { %v13510_v22 = vpop.f32.mrf.mxu0 }
 0x51e   : > { %18435 = vst [vmem:[#allocation46_spill] sm:$0xff] %v17857_v42  ;;  %v9730_v26 = vadd.f32 %v13933_v16, %v13509_v46  ;;  %v17861_v53 = vpop.f32.mrf.mxu1 }
 0x51f   : > { %v13511_v50 = vpop.f32.mrf.mxu0 }
 0x520   : > { %v13512_v4 = vadd.f32 %v13511_v50, %v13510_v22  ;;  %v17864_v24 = vadd.f32 %v9730_v26, %v17748_v58 }
 0x521   : > { %v13513_v0 = vpop.f32.mrf.mxu0 }
 0x522   : > { %v9735_v13 = vadd.f32 %v13512_v4, %v9734_v54 }
 0x523   : > { %v13514_v34 = vpop.f32.mrf.mxu0 }
 0x524   : > { %v17866_v2 = vpop.f32.mrf.mxu1  ;;  %v13515_v47 = vadd.f32 %v13514_v34, %v13513_v0  ;;  %v17871_v25 = vadd.f32 %v9735_v13, %v17750_v33 }
 0x526   : > { %v17868_v48 = vpop.f32.mrf.mxu1  ;;  %18436 = vst [vmem:[#allocation48_spill] sm:$0xff] %v17871_v25  ;;  %v9738_v46 = vadd.f32 %v13515_v47, %v9737_v44 }
 0x527   : > { %v13516_v16 = vpop.f32.mrf.mxu0 }
 0x528   : > { %v17873_v31 = vpop.f32.mrf.mxu1  ;;  %v17878_v26 = vadd.f32 %v9738_v46, %v17752_v30 }
 0x529   : > { %v13517_v22 = vpop.f32.mrf.mxu0 }
 0x52a   : > { %v17875_v42 = vpop.f32.mrf.mxu1  ;;  %v13518_v58 = vadd.f32 %v13517_v22, %v13516_v16  ;;  %18437 = vst [vmem:[#allocation43_spill] sm:$0xff] %v17878_v26 }
 0x52b   : > { %v13519_v54 = vpop.f32.mrf.mxu0 }
 0x52c   : > { %v17880_v50 = vpop.f32.mrf.mxu1  ;;  %v9743_v4 = vadd.f32 %v17812_v11, %v13518_v58 }
 0x52d   : > { %v13520_v33 = vpop.f32.mrf.mxu0 }
 0x52e   : > { %v17883_v0 = vpop.f32.mrf.mxu1  ;;  %v13521_v13 = vadd.f32 %v13520_v33, %v13519_v54  ;;  %v17886_v34 = vadd.f32 %v9743_v4, %v17754_v17 }
 0x52f   : > { %v13522_v47 = vpop.f32.mrf.mxu0 }
 0x530   : > { %v17888_v44 = vpop.f32.mrf.mxu1  ;;  %v9746_v16 = vadd.f32 %v17819_v59, %v13521_v13 }
 0x531   : > { %v13523_v30 = vpop.f32.mrf.mxu0 }
 0x532   : > { %v17891_v22 = vpop.f32.mrf.mxu1  ;;  %v13524_v46 = vadd.f32 %v13523_v30, %v13522_v47  ;;  %v17894_v26 = vadd.f32 %v9746_v16, %v17756_v12 }
 0x533   : > { %v13525_v58 = vpop.f32.mrf.mxu0 }
 0x534   : > { %18438 = vst [vmem:[#allocation45_spill] sm:$0xff] %v17894_v26  ;;  %v17896_v11 = vpop.f32.mrf.mxu1  ;;  %v9751_v54 = vadd.f32 %v13524_v46, %v17826_v3 }
 0x535   : > { %v13526_v17 = vpop.f32.mrf.mxu0 }
 0x536   : > { %v17899_v33 = vpop.f32.mrf.mxu1  ;;  %v13527_v4 = vadd.f32 %v13526_v17, %v13525_v58  ;;  %v17902_v25 = vadd.f32 %v9751_v54, %v17758_v8 }
 0x537   : > { %v13528_v13 = vpop.f32.mrf.mxu0 }
 0x538   : > { %18439 = vst [vmem:[#allocation22_spill] sm:$0xff] %v17902_v25  ;;  %v17904_v59 = vpop.f32.mrf.mxu1  ;;  %v9754_v47 = vadd.f32 %v13527_v4, %v17833_v52 }
 0x539   : > { %v13529_v12 = vpop.f32.mrf.mxu0 }
 0x53a   : > { %v17907_v30 = vpop.f32.mrf.mxu1  ;;  %v13530_v16 = vadd.f32 %v13529_v12, %v13528_v13  ;;  %v17910_v26 = vadd.f32 %v9754_v47, %v17760_v6 }
 0x53b   : > { %v13531_v46 = vpop.f32.mrf.mxu0 }
 0x53c   : > { %18440 = vst [vmem:[#allocation44_spill] sm:$0xff] %v17910_v26  ;;  %v17912_v3 = vpop.f32.mrf.mxu1  ;;  %v9759_v58 = vadd.f32 %v17824_v28, %v13530_v16 }
 0x53d   : > { %v13532_v8 = vpop.f32.mrf.mxu0 }
 0x53e   : > { %v17915_v17 = vpop.f32.mrf.mxu1  ;;  %v13533_v54 = vadd.f32 %v13532_v8, %v13531_v46  ;;  %v17918_v25 = vadd.f32 %v9759_v58, %v17762_v40 }
 0x53f   : > { %v13534_v4 = vpop.f32.mrf.mxu0 }
 0x540   : > { %18441 = vst [vmem:[#allocation23_spill] sm:$0xff] %v17918_v25  ;;  %v17920_v52 = vpop.f32.mrf.mxu1  ;;  %v9762_v13 = vadd.f32 %v17831_v35, %v13533_v54 }
 0x541   : > { %v13535_v6 = vpop.f32.mrf.mxu0 }
 0x542   : > { %v17923_v12 = vpop.f32.mrf.mxu1  ;;  %v13536_v47 = vadd.f32 %v13535_v6, %v13534_v4  ;;  %v17926_v26 = vadd.f32 %v9762_v13, %v17764_v10 }
 0x543   : > { %v13537_v16 = vpop.f32.mrf.mxu0 }
 0x544   : > { %18442 = vst [vmem:[#allocation52_spill] sm:$0xff] %v17926_v26  ;;  %v17928_v28 = vpop.f32.mrf.mxu1  ;;  %v9767_v46 = vadd.f32 %v13536_v47, %v17840_v18 }
 0x545   : > { %v13538_v40 = vpop.f32.mrf.mxu0 }
 0x546   : > { %v17931_v8 = vpop.f32.mrf.mxu1  ;;  %v13539_v58 = vadd.f32 %v13538_v40, %v13537_v16  ;;  %v17934_v25 = vadd.f32 %v9767_v46, %v17766_v9  ;;  %v18444_v40 = vld [vmem:[#allocation38_spill] sm:$0xff] }
 0x547   : > { %v13540_v54 = vpop.f32.mrf.mxu0  ;;  %v13325_v9 = vadd.f32 %v17266_v49, %v18444_v40 }
 0x548   : > { %18443 = vst [vmem:[#allocation24_spill] sm:$0xff] %v17934_v25  ;;  %v17936_v35 = vpop.f32.mrf.mxu1  ;;  %v9770_v4 = vadd.f32 %v13539_v58, %v17847_v23  ;;  %v13594_v23 = vadd.f32 %v17868_v48, %v17866_v2  ;;  %v17967_v48 = vld [vmem:[%s18272_s6] ss:$0 sm:$0xff]  ;;  %v13597_v2 = vadd.f32 %v17875_v42, %v17873_v31 }
 0x549   : > { %v13541_v10 = vpop.f32.mrf.mxu0  ;;  %v7968_v49 = vadd.f32 %v17591_v55, %v13325_v9  ;;  %v13328_v55 = vadd.f32 %v17301_v7, %v17281_v15  ;;  %v17986_v42 = vld [vmem:[%s18273_s7] ss:$0 sm:$0xff] }
 0x54a   : > { %v17939_v6 = vpop.f32.mrf.mxu1  ;;  %v13542_v13 = vadd.f32 %v13541_v10, %v13540_v54  ;;  %v17942_v26 = vadd.f32 %v9770_v4, %v17768_v19  ;;  %v13588_v10 = vadd.f32 %v17854_v61, %v17852_v45  ;;  %v18445_v45 = vld [vmem:[#allocation40_spill] sm:$0xff] }
 0x54b   : > { %v13543_v47 = vpop.f32.mrf.mxu0  ;;  %v9816_v15 = vadd.f32 %v17783_v41, %v7968_v49  ;;  %v18447_v41 = vld [vmem:[#allocation32_spill] sm:$0xff] }
 0x54c   : > { %v17944_v18 = vpop.f32.mrf.mxu1  ;;  %v9775_v16 = vadd.f32 %v17838_v51, %v13542_v13 }
 0x54d   : > { %v13544_v25 = vpop.f32.mrf.mxu0 }
 0x54e   : > { %v17949_v46 = vpop.f32.mrf.mxu1  ;;  %v17954_v58 = vadd.f32 %v9775_v16, %v17770_v63  ;;  %v13545_v54 = vadd.f32 %v13544_v25, %v13543_v47  ;;  %v13331_v47 = vadd.f32 %v18445_v45, %v17336_v14  ;;  %v18446_v16 = vld [vmem:[#allocation36_spill] sm:$0xff]  ;;  %v13591_v14 = vadd.f32 %v17861_v53, %v17859_v43  ;;  %v11750_v43 = vld [vmem:[%s14861_s16] sm:$0xff] }
 0x54f   : > { %v13964_v4 = vpop.f32.mrf.mxu0  ;;  %v13337_v9 = vadd.f32 %v17481_v1, %v18446_v16 }
 0x550   : > { %v17956_v19 = vpop.f32.mrf.mxu1  ;;  %v9778_v51 = vadd.f32 %v17845_v56, %v13545_v54  ;;  %v11426_v13 = vadd.f32 %v13964_v4, %v13594_v23  ;;  %v11752_v54 = vld [vmem:[%s14861_s16 + $0x10] sm:$0xff]  ;;  %v7976_v49 = vadd.f32 %v13331_v47, %v18447_v41 }
 0x551   : > { %v11417_v63 = vpop.f32.mrf.mxu0 }
 0x552   : > { %v17962_v40 = vpop.f32.mrf.mxu1  ;;  %v17972_v25 = vadd.f32 %v9778_v51, %v17774_v29  ;;  %v11578_v61 = vadd.f32 %v11426_v13, %v17776_v20  ;;  %v11418_v56 = vadd.f32 %v13588_v10, %v11417_v63  ;;  %v13606_v10 = vadd.f32 %v17899_v33, %v17896_v11 }
 0x553   : > { %v13965_v29 = vpop.f32.mrf.mxu0 }
 0x554   : > { %v17981_v23 = vpop.f32.mrf.mxu1  ;;  %v11681_v20 = vmul.f32 %v17967_v48, %v11578_v61  ;;  %v11576_v31 = vadd.f32 %v11418_v56, %v17781_v27  ;;  %v11429_v7 = vadd.f32 %v13965_v29, %v13597_v2  ;;  %v7973_v27 = vadd.f32 %v13328_v55, %v17630_v39  ;;  %v18448_v2 = vld [vmem:[#allocation17_spill] sm:$0xff]  ;;  %v11753_v39 = vld [vmem:[%s14861_s16 + $0x18] sm:$0xff] }
 0x555   : > { %v11420_v4 = vpop.f32.mrf.mxu0  ;;  %v7984_v61 = vadd.f32 %v18448_v2, %v13337_v9 }
 0x556   : > { %v17993_v1 = vpop.f32.mrf.mxu1  ;;  %v11720_v51 = vadd.f32 %v17986_v42, %v11681_v20  ;;  %v11679_v13 = vmul.f32 %v17967_v48, %v11576_v31  ;;  %v11579_v63 = vadd.f32 %v11429_v7, %v9816_v15  ;;  %v11421_v56 = vadd.f32 %v13591_v14, %v11420_v4 }
 0x557   : > { %v13968_v45 = vpop.f32.mrf.mxu0  ;;  %v13600_v20 = vadd.f32 %v17883_v0, %v17880_v50  ;;  %v9817_v47 = vadd.f32 %v17788_v5, %v7973_v27  ;;  %v9818_v15 = vadd.f32 %v17790_v62, %v7976_v49  ;;  %v13609_v7 = vadd.f32 %v17907_v30, %v17904_v59  ;;  %v18449_v0 = vld [vmem:[#allocation34_spill] sm:$0xff]  ;;  %v11751_v59 = vld [vmem:[%s14861_s16 + $0x8] sm:$0xff] }
 0x558   : > { %v18003_v53 = vpop.f32.mrf.mxu1  ;;  %v11784_v16 = vadd.f32 %v11752_v54, %v11720_v51  ;;  %v11718_v11 = vadd.f32 %v17986_v42, %v11679_v13  ;;  %v11682_v33 = vmul.f32 %v17967_v48, %v11579_v63  ;;  %v11442_v29 = vadd.f32 %v13968_v45, %v13606_v10  ;;  %v18450_v5 = vld [vmem:[#allocation18_spill] sm:$0xff] }
 0x559   : > { %v11577_v55 = vadd.f32 %v11421_v56, %v17786_v37  ;;  %v11433_v9 = vpop.f32.mrf.mxu0  ;;  %v9820_v13 = vadd.f32 %v18450_v5, %v7984_v61  ;;  %v13603_v49 = vadd.f32 %v17891_v22, %v17888_v44  ;;  %v13618_v61 = vadd.f32 %v17931_v8, %v17928_v28  ;;  %v11756_v22 = vld [vmem:[%s14861_s16 + $0x30] sm:$0xff] }
 0x55a   : > { %v18010_v31 = vpop.f32.mrf.mxu1  ;;  %v11816_v14 = vmax.f32 %v11784_v16, 0.0  ;;  %v11782_v54 = vadd.f32 %v11750_v43, %v11718_v11  ;;  %v11721_v4 = vadd.f32 %v17986_v42, %v11682_v33  ;;  %v11582_v51 = vadd.f32 %v11442_v29, %v18449_v0 }
 0x55b   : > { %v11680_v50 = vmul.f32 %v17967_v48, %v11577_v55  ;;  %v11434_v37 = vadd.f32 %v13600_v20, %v11433_v9  ;;  %v13969_v63 = vpop.f32.mrf.mxu0 }
 0x55c   : > { %v18019_v10 = vpop.f32.mrf.mxu1  ;;  %v11848_v27 = vmin.f32 %v11816_v14, 20.0  ;;  %v11814_v62 = vmax.f32 %v11782_v54, 0.0  ;;  %v11785_v41 = vadd.f32 %v11753_v39, %v11721_v4  ;;  %v11445_v30 = vadd.f32 %v13969_v63, %v13609_v7  ;;  %v11754_v7 = vld [vmem:[%s14861_s16 + $0x20] sm:$0xff] }
 0x55d   : > { %v11719_v2 = vadd.f32 %v17986_v42, %v11680_v50  ;;  %v11685_v56 = vmul.f32 %v17967_v48, %v11582_v51  ;;  %v11580_v45 = vadd.f32 %v11434_v37, %v9817_v47  ;;  %v11436_v16 = vpop.f32.mrf.mxu0  ;;  %v13612_v47 = vadd.f32 %v17915_v17, %v17912_v3  ;;  %v11757_v37 = vld [vmem:[%s14861_s16 + $0x38] sm:$0xff] }
 0x55e   : > { %v18028_v43 = vpop.f32.mrf.mxu1  ;;  %11880 = vst [vmem:[%s18035_s21 + $0x10] sm:$0xff] %v11848_v27  ;;  %v11846_v11 = vmin.f32 %v11814_v62, 20.0  ;;  %v11817_v44 = vmax.f32 %v11785_v41, 0.0  ;;  %v11583_v33 = vadd.f32 %v11445_v30, %v9820_v13  ;;  %v11437_v28 = vadd.f32 %v13603_v49, %v11436_v16 }
 0x55f   : > { %v11783_v29 = vadd.f32 %v11751_v59, %v11719_v2  ;;  %v11724_v20 = vadd.f32 %v17986_v42, %v11685_v56  ;;  %v11683_v55 = vmul.f32 %v17967_v48, %v11580_v45  ;;  %v13972_v8 = vpop.f32.mrf.mxu0  ;;  %v13621_v63 = vadd.f32 %v17939_v6, %v17936_v35  ;;  %v11755_v56 = vld [vmem:[%s14861_s16 + $0x28] sm:$0xff]  ;;  %v18451_v6 = vld [vmem:[#allocation29_spill] sm:$0xff] }
 0x560   : > { %v18040_v39 = vpop.f32.mrf.mxu1  ;;  %11878 = vst [vmem:[%s18035_s21] sm:$0xff] %v11846_v11  ;;  %v11849_v9 = vmin.f32 %v11817_v44, 20.0  ;;  %v11686_v14 = vmul.f32 %v17967_v48, %v11583_v33  ;;  %v11458_v54 = vadd.f32 %v13972_v8, %v13618_v61  ;;  %v11581_v5 = vadd.f32 %v11437_v28, %v9818_v15  ;;  %v11760_v33 = vld [vmem:[%s14861_s16 + $0x50] sm:$0xff] }
 0x561   : > { %v11815_v4 = vmax.f32 %v11783_v29, 0.0  ;;  %v11788_v50 = vadd.f32 %v11756_v22, %v11724_v20  ;;  %v11722_v0 = vadd.f32 %v17986_v42, %v11683_v55  ;;  %v11449_v13 = vpop.f32.mrf.mxu0  ;;  %v13630_v20 = vadd.f32 %v17993_v1, %v17981_v23 }
 0x562   : > { %v18049_v51 = vpop.f32.mrf.mxu1  ;;  %11881 = vst [vmem:[%s18035_s21 + $0x18] sm:$0xff] %v11849_v9  ;;  %v11725_v3 = vadd.f32 %v17986_v42, %v11686_v14  ;;  %v11586_v17 = vadd.f32 %v11458_v54, %v17807_v21  ;;  %v11450_v27 = vadd.f32 %v13612_v47, %v11449_v13  ;;  %v11684_v49 = vmul.f32 %v17967_v48, %v11581_v5  ;;  %v11758_v9 = vld [vmem:[%s14861_s16 + $0x40] sm:$0xff] }
 0x563   : > { %v11847_v62 = vmin.f32 %v11815_v4, 20.0  ;;  %v11820_v41 = vmax.f32 %v11788_v50, 0.0  ;;  %v11786_v59 = vadd.f32 %v11754_v7, %v11722_v0  ;;  %v13973_v15 = vpop.f32.mrf.mxu0  ;;  %v13615_v21 = vadd.f32 %v17923_v12, %v17920_v52 }
 0x564   : > { %v18057_v30 = vpop.f32.mrf.mxu1  ;;  %v11789_v2 = vadd.f32 %v11757_v37, %v11725_v3  ;;  %v11689_v35 = vmul.f32 %v17967_v48, %v11586_v17  ;;  %v11584_v45 = vadd.f32 %v11450_v27, %v18451_v6  ;;  %v11461_v16 = vadd.f32 %v13973_v15, %v13621_v63 }
 0x565   : > { %11879 = vst [vmem:[%s18035_s21 + $0x8] sm:$0xff] %v11847_v62  ;;  %v11852_v61 = vmin.f32 %v11820_v41, 20.0  ;;  %v11818_v11 = vmax.f32 %v11786_v59, 0.0  ;;  %v11723_v44 = vadd.f32 %v17986_v42, %v11684_v49  ;;  %v11452_v29 = vpop.f32.mrf.mxu0  ;;  %v13624_v0 = vadd.f32 %v17949_v46, %v17944_v18  ;;  %v11761_v62 = vld [vmem:[%s14861_s16 + $0x58] sm:$0xff] }
 0x566   : > { %v13641_v22 = vpop.f32.mrf.mxu1  ;;  %v11821_v55 = vmax.f32 %v11789_v2, 0.0  ;;  %v11728_v28 = vadd.f32 %v17986_v42, %v11689_v35  ;;  %v11687_v8 = vmul.f32 %v17967_v48, %v11584_v45  ;;  %v11587_v7 = vadd.f32 %v11461_v16, %v17810_v32 }
 0x567   : > { %11884 = vst [vmem:[%s18035_s21 + $0x30] sm:$0xff] %v11852_v61  ;;  %v11850_v52 = vmin.f32 %v11818_v11, 20.0  ;;  %v11787_v12 = vadd.f32 %v11755_v56, %v11723_v44  ;;  %v11453_v14 = vadd.f32 %v13615_v21, %v11452_v29  ;;  %v13976_v54 = vpop.f32.mrf.mxu0  ;;  %v13633_v3 = vadd.f32 %v18010_v31, %v18003_v53  ;;  %v11759_v31 = vld [vmem:[%s14861_s16 + $0x48] sm:$0xff]  ;;  %v11764_v21 = vld [vmem:[%s14861_s16 + $0x70] sm:$0xff] }
 0x568   : > { %v18073_v47 = vpop.f32.mrf.mxu1  ;;  %v11853_v4 = vmin.f32 %v11821_v55, 20.0  ;;  %v11792_v23 = vadd.f32 %v11760_v33, %v11728_v28  ;;  %v11726_v1 = vadd.f32 %v17986_v42, %v11687_v8  ;;  %v11474_v50 = vadd.f32 %v13976_v54, %v13630_v20 }
 0x569   : > { %11882 = vst [vmem:[%s18035_s21 + $0x20] sm:$0xff] %v11850_v52  ;;  %v11819_v37 = vmax.f32 %v11787_v12, 0.0  ;;  %v11690_v13 = vmul.f32 %v17967_v48, %v11587_v7  ;;  %v11585_v63 = vadd.f32 %v11453_v14, %v17804_v36  ;;  %v11465_v32 = vpop.f32.mrf.mxu0  ;;  %v13642_v44 = vadd.f32 %v13641_v22, %v18057_v30  ;;  %v11762_v22 = vld [vmem:[%s14861_s16 + $0x60] sm:$0xff] }
 0x56a   : > { %v13644_v5 = vpop.f32.mrf.mxu1  ;;  %11885 = vst [vmem:[%s18035_s21 + $0x38] sm:$0xff] %v11853_v4  ;;  %v11824_v17 = vmax.f32 %v11792_v23, 0.0  ;;  %v11790_v27 = vadd.f32 %v11758_v9, %v11726_v1  ;;  %v11590_v41 = vadd.f32 %v11474_v50, %v17829_v60  ;;  %v11466_v49 = vadd.f32 %v13624_v0, %v11465_v32  ;;  %v11765_v4 = vld [vmem:[%s14861_s16 + $0x78] sm:$0xff]  ;;  %v18452_v23 = vld [vmem:[#allocation19_spill] sm:$0xff] }
 0x56b   : > { %v11851_v18 = vmin.f32 %v11819_v37, 20.0  ;;  %v11729_v46 = vadd.f32 %v17986_v42, %v11690_v13  ;;  %v11688_v36 = vmul.f32 %v17967_v48, %v11585_v63  ;;  %v13977_v15 = vpop.f32.mrf.mxu0  ;;  %v13627_v60 = vadd.f32 %v17962_v40, %v17956_v19  ;;  %v18453_v37 = vld [vmem:[#allocation46_spill] sm:$0xff] }
 0x56c   : > { %v18089_v59 = vpop.f32.mrf.mxu1  ;;  %v11856_v2 = vmin.f32 %v11824_v17, 20.0  ;;  %v11822_v53 = vmax.f32 %v11790_v27, 0.0  ;;  %v11693_v56 = vmul.f32 %v17967_v48, %v11590_v41  ;;  %v11477_v35 = vadd.f32 %v13977_v15, %v13633_v3 }
 0x56d   : > { %11883 = vst [vmem:[%s18035_s21 + $0x28] sm:$0xff] %v11851_v18  ;;  %v11793_v6 = vadd.f32 %v11761_v62, %v11729_v46  ;;  %v11727_v45 = vadd.f32 %v17986_v42, %v11688_v36  ;;  %v11588_v61 = vadd.f32 %v11466_v49, %v17817_v38  ;;  %v11468_v11 = vpop.f32.mrf.mxu0  ;;  %v13636_v38 = vadd.f32 %v18028_v43, %v18019_v10  ;;  %v11763_v46 = vld [vmem:[%s14861_s16 + $0x68] sm:$0xff] }
 0x56e   : > { %v18098_v16 = vpop.f32.mrf.mxu1  ;;  %11888 = vst [vmem:[%s18035_s21 + $0x50] sm:$0xff] %v11856_v2  ;;  %v11854_v33 = vmin.f32 %v11822_v53, 20.0  ;;  %v11732_v29 = vadd.f32 %v17986_v42, %v11693_v56  ;;  %v11591_v19 = vadd.f32 %v11477_v35, %v17836_v57  ;;  %v11469_v8 = vadd.f32 %v13627_v60, %v11468_v11  ;;  %v11768_v53 = vld [vmem:[%s14861_s16 + $0x90] sm:$0xff] }
 0x56f   : > { %v11825_v40 = vmax.f32 %v11793_v6, 0.0  ;;  %v11791_v20 = vadd.f32 %v11759_v31, %v11727_v45  ;;  %v11691_v28 = vmul.f32 %v17967_v48, %v11588_v61  ;;  %v13980_v52 = vpop.f32.mrf.mxu0  ;;  %v13645_v10 = vadd.f32 %v13644_v5, %v18073_v47  ;;  %v18454_v31 = vld [vmem:[#allocation47_spill] sm:$0xff] }
 0x570   : > { %v18106_v55 = vpop.f32.mrf.mxu1  ;;  %11886 = vst [vmem:[%s18035_s21 + $0x40] sm:$0xff] %v11854_v33  ;;  %v11796_v30 = vadd.f32 %v11764_v21, %v11732_v29  ;;  %v11694_v12 = vmul.f32 %v17967_v48, %v11591_v19  ;;  %v11490_v9 = vadd.f32 %v13980_v52, %v13642_v44  ;;  %v11589_v1 = vadd.f32 %v11469_v8, %v18452_v23 }
 0x571   : > { %v11857_v57 = vmin.f32 %v11825_v40, 20.0  ;;  %v11823_v7 = vmax.f32 %v11791_v20, 0.0  ;;  %v11730_v14 = vadd.f32 %v17986_v42, %v11691_v28  ;;  %v11481_v50 = vpop.f32.mrf.mxu0  ;;  %v13639_v36 = vadd.f32 %v18049_v51, %v18040_v39  ;;  %v11766_v40 = vld [vmem:[%s14861_s16 + $0x80] sm:$0xff] }
 0x572   : > { %v18115_v54 = vpop.f32.mrf.mxu1  ;;  %v11828_v43 = vmax.f32 %v11796_v30, 0.0  ;;  %v11733_v0 = vadd.f32 %v17986_v42, %v11694_v12  ;;  %v11594_v13 = vadd.f32 %v11490_v9, %v18453_v37  ;;  %v11692_v17 = vmul.f32 %v17967_v48, %v11589_v1  ;;  %v11769_v30 = vld [vmem:[%s14861_s16 + $0x98] sm:$0xff]  ;;  %v11767_v37 = vld [vmem:[%s14861_s16 + $0x88] sm:$0xff] }
 0x573   : > { %11889 = vst [vmem:[%s18035_s21 + $0x58] sm:$0xff] %v11857_v57  ;;  %v11855_v63 = vmin.f32 %v11823_v7, 20.0  ;;  %v11794_v32 = vadd.f32 %v11762_v22, %v11730_v14  ;;  %v11482_v27 = vadd.f32 %v13636_v38, %v11481_v50  ;;  %v13981_v62 = vpop.f32.mrf.mxu0  ;;  %v13648_v8 = vadd.f32 %v18098_v16, %v18089_v59  ;;  %v18455_v22 = vld [vmem:[#allocation20_spill] sm:$0xff] }
 0x574   : > { %v13652_v3 = vpop.f32.mrf.mxu1  ;;  %v11860_v41 = vmin.f32 %v11828_v43, 20.0  ;;  %v11797_v18 = vadd.f32 %v11765_v4, %v11733_v0  ;;  %v11697_v47 = vmul.f32 %v17967_v48, %v11594_v13  ;;  %v11493_v5 = vadd.f32 %v13981_v62, %v13645_v10  ;;  %v18456_v62 = vld [vmem:[#allocation48_spill] sm:$0xff] }
 0x575   : > { %11887 = vst [vmem:[%s18035_s21 + $0x48] sm:$0xff] %v11855_v63  ;;  %v11826_v49 = vmax.f32 %v11794_v32, 0.0  ;;  %v11731_v15 = vadd.f32 %v17986_v42, %v11692_v17  ;;  %v11592_v56 = vadd.f32 %v11482_v27, %v18454_v31  ;;  %v11484_v35 = vpop.f32.mrf.mxu0  ;;  %v13651_v32 = vadd.f32 %v18115_v54, %v18106_v55  ;;  %v11772_v27 = vld [vmem:[%s14861_s16 + $0xb0] sm:$0xff] }
 0x576   : > { %v13653_v2 = vpop.f32.mrf.mxu1  ;;  %11892 = vst [vmem:[%s18035_s21 + $0x70] sm:$0xff] %v11860_v41  ;;  %v11829_v60 = vmax.f32 %v11797_v18, 0.0  ;;  %v11736_v45 = vadd.f32 %v17986_v42, %v11697_v47  ;;  %v11595_v21 = vadd.f32 %v11493_v5, %v17864_v24  ;;  %v11485_v44 = vadd.f32 %v13639_v36, %v11484_v35  ;;  %v18457_v5 = vld [vmem:[#allocation45_spill] sm:$0xff] }
 0x577   : > { %v13654_v6 = vadd.f32 %v13653_v2, %v13652_v3  ;;  %v11858_v61 = vmin.f32 %v11826_v49, 20.0  ;;  %v11795_v39 = vadd.f32 %v11763_v46, %v11731_v15  ;;  %v11695_v11 = vmul.f32 %v17967_v48, %v11592_v56  ;;  %v13984_v33 = vpop.f32.mrf.mxu0 }
 0x578   : > { %v13655_v51 = vpop.f32.mrf.mxu1  ;;  %v11861_v29 = vmin.f32 %v11829_v60, 20.0  ;;  %v11800_v19 = vadd.f32 %v11768_v53, %v11736_v45  ;;  %v11698_v20 = vmul.f32 %v17967_v48, %v11595_v21  ;;  %v11593_v12 = vadd.f32 %v11485_v44, %v18455_v22  ;;  %v11770_v60 = vld [vmem:[%s14861_s16 + $0xa0] sm:$0xff]  ;;  %v11771_v22 = vld [vmem:[%s14861_s16 + $0xa8] sm:$0xff] }
 0x579   : > { %v11506_v28 = vadd.f32 %v13984_v33, %v13654_v6  ;;  %11890 = vst [vmem:[%s18035_s21 + $0x60] sm:$0xff] %v11858_v61  ;;  %v11827_v24 = vmax.f32 %v11795_v39, 0.0  ;;  %v11734_v52 = vadd.f32 %v17986_v42, %v11695_v11  ;;  %v11497_v9 = vpop.f32.mrf.mxu0  ;;  %v11773_v39 = vld [vmem:[%s14861_s16 + $0xb8] sm:$0xff] }
 0x57a   : > { %v13656_v38 = vpop.f32.mrf.mxu1  ;;  %11893 = vst [vmem:[%s18035_s21 + $0x78] sm:$0xff] %v11861_v29  ;;  %v11832_v57 = vmax.f32 %v11800_v19, 0.0  ;;  %v11737_v14 = vadd.f32 %v17986_v42, %v11698_v20  ;;  %v11696_v1 = vmul.f32 %v17967_v48, %v11593_v12  ;;  %v11498_v50 = vadd.f32 %v13648_v8, %v11497_v9  ;;  %v18459_v12 = vld [vmem:[#allocation22_spill] sm:$0xff] }
 0x57b   : > { %v13657_v7 = vadd.f32 %v13656_v38, %v13655_v51  ;;  %v11598_v4 = vadd.f32 %v11506_v28, %v17886_v34  ;;  %v11859_v23 = vmin.f32 %v11827_v24, 20.0  ;;  %v11798_v59 = vadd.f32 %v11766_v40, %v11734_v52  ;;  %v13985_v10 = vpop.f32.mrf.mxu0  ;;  %v18458_v51 = vld [vmem:[#allocation43_spill] sm:$0xff] }
 0x57c   : > { %v13658_v16 = vpop.f32.mrf.mxu1  ;;  %v11864_v43 = vmin.f32 %v11832_v57, 20.0  ;;  %v11801_v0 = vadd.f32 %v11769_v30, %v11737_v14  ;;  %v11735_v3 = vadd.f32 %v17986_v42, %v11696_v1  ;;  %v11596_v41 = vadd.f32 %v11498_v50, %v18456_v62 }
 0x57d   : > { %v11701_v13 = vmul.f32 %v17967_v48, %v11598_v4  ;;  %v11509_v63 = vadd.f32 %v13985_v10, %v13657_v7  ;;  %11891 = vst [vmem:[%s18035_s21 + $0x68] sm:$0xff] %v11859_v23  ;;  %v11830_v34 = vmax.f32 %v11798_v59, 0.0  ;;  %v11500_v18 = vpop.f32.mrf.mxu0 }
 0x57e   : > { %v13659_v17 = vpop.f32.mrf.mxu1  ;;  %11896 = vst [vmem:[%s18035_s21 + $0x90] sm:$0xff] %v11864_v43  ;;  %v11833_v46 = vmax.f32 %v11801_v0, 0.0  ;;  %v11799_v55 = vadd.f32 %v11767_v37, %v11735_v3  ;;  %v11699_v15 = vmul.f32 %v17967_v48, %v11596_v41  ;;  %v11501_v2 = vadd.f32 %v13651_v32, %v11500_v18  ;;  %v11774_v0 = vld [vmem:[%s14861_s16 + $0xc0] sm:$0xff] }
 0x57f   : > { %v11740_v47 = vadd.f32 %v17986_v42, %v11701_v13  ;;  %v11599_v36 = vadd.f32 %v11509_v63, %v18457_v5  ;;  %v11862_v49 = vmin.f32 %v11830_v34, 20.0  ;;  %v13988_v53 = vpop.f32.mrf.mxu0  ;;  %v13660_v56 = vadd.f32 %v13659_v17, %v13658_v16  ;;  %v18460_v34 = vld [vmem:[#allocation44_spill] sm:$0xff]  ;;  %v18461_v41 = vld [vmem:[#allocation23_spill] sm:$0xff] }
 0x580   : > { %v13661_v54 = vpop.f32.mrf.mxu1  ;;  %v11865_v31 = vmin.f32 %v11833_v46, 20.0  ;;  %v11831_v45 = vmax.f32 %v11799_v55, 0.0  ;;  %v11738_v21 = vadd.f32 %v17986_v42, %v11699_v15  ;;  %v11597_v11 = vadd.f32 %v11501_v2, %v18458_v51  ;;  %v11775_v55 = vld [vmem:[%s14861_s16 + $0xc8] sm:$0xff] }
 0x581   : > { %v11804_v35 = vadd.f32 %v11772_v27, %v11740_v47  ;;  %v11702_v6 = vmul.f32 %v17967_v48, %v11599_v36  ;;  %11894 = vst [vmem:[%s18035_s21 + $0x80] sm:$0xff] %v11862_v49  ;;  %v11513_v44 = vpop.f32.mrf.mxu0 }
 0x582   : > { %v13662_v61 = vpop.f32.mrf.mxu1  ;;  %11897 = vst [vmem:[%s18035_s21 + $0x98] sm:$0xff] %v11865_v31  ;;  %v11514_v19 = vadd.f32 %v13660_v56, %v11513_v44  ;;  %v11863_v40 = vmin.f32 %v11831_v45, 20.0  ;;  %v11802_v20 = vadd.f32 %v11770_v60, %v11738_v21  ;;  %v11700_v8 = vmul.f32 %v17967_v48, %v11597_v11  ;;  %v11776_v31 = vld [vmem:[%s14861_s16 + $0xd0] sm:$0xff]  ;;  %v18462_v45 = vld [vmem:[#allocation52_spill] sm:$0xff] }
 0x583   : > { %v11836_v33 = vmax.f32 %v11804_v35, 0.0  ;;  %v11741_v29 = vadd.f32 %v17986_v42, %v11702_v6  ;;  %v13989_v24 = vpop.f32.mrf.mxu0  ;;  %v13663_v38 = vadd.f32 %v13662_v61, %v13661_v54 }
 0x584   : > { %v13664_v28 = vpop.f32.mrf.mxu1  ;;  %v11600_v9 = vadd.f32 %v11514_v19, %v18459_v12  ;;  %11895 = vst [vmem:[%s18035_s21 + $0x88] sm:$0xff] %v11863_v40  ;;  %v11834_v57 = vmax.f32 %v11802_v20, 0.0  ;;  %v11739_v7 = vadd.f32 %v17986_v42, %v11700_v8 }
 0x585   : > { %v11868_v52 = vmin.f32 %v11836_v33, 20.0  ;;  %v11805_v30 = vadd.f32 %v11773_v39, %v11741_v29  ;;  %v11516_v4 = vpop.f32.mrf.mxu0  ;;  %v11777_v29 = vld [vmem:[%s14861_s16 + $0xd8] sm:$0xff] }
 0x586   : > { %v13665_v14 = vpop.f32.mrf.mxu1  ;;  %v11703_v16 = vmul.f32 %v17967_v48, %v11600_v9  ;;  %v11517_v1 = vadd.f32 %v13663_v38, %v11516_v4  ;;  %v11866_v50 = vmin.f32 %v11834_v57, 20.0  ;;  %v11803_v10 = vadd.f32 %v11771_v22, %v11739_v7  ;;  %v18463_v38 = vld [vmem:[#allocation24_spill] sm:$0xff] }
 0x587   : > { %11900 = vst [vmem:[%s18035_s21 + $0xb0] sm:$0xff] %v11868_v52  ;;  %v11837_v23 = vmax.f32 %v11805_v30, 0.0  ;;  %v13666_v59 = vadd.f32 %v13665_v14, %v13664_v28  ;;  %v13992_v37 = vpop.f32.mrf.mxu0 }
 0x588   : > { %v13667_v43 = vpop.f32.mrf.mxu1  ;;  %v11742_v32 = vadd.f32 %v17986_v42, %v11703_v16  ;;  %v11601_v3 = vadd.f32 %v11517_v1, %v18460_v34  ;;  %11898 = vst [vmem:[%s18035_s21 + $0xa0] sm:$0xff] %v11866_v50  ;;  %v11835_v17 = vmax.f32 %v11803_v10, 0.0 }
 0x589   : > { %v11869_v13 = vmin.f32 %v11837_v23, 20.0  ;;  %v11522_v63 = vadd.f32 %v13988_v53, %v13666_v59  ;;  %v11529_v62 = vpop.f32.mrf.mxu0  ;;  %v11778_v23 = vld [vmem:[%s14861_s16 + $0xe0] sm:$0xff] }
 0x58a   : > { %v13668_v27 = vpop.f32.mrf.mxu1  ;;  %v11806_v46 = vadd.f32 %v11774_v0, %v11742_v32  ;;  %v11704_v5 = vmul.f32 %v17967_v48, %v11601_v3  ;;  %v11867_v36 = vmin.f32 %v11835_v17, 20.0 }
 0x58b   : > { %11901 = vst [vmem:[%s18035_s21 + $0xb8] sm:$0xff] %v11869_v13  ;;  %v11602_v18 = vadd.f32 %v11522_v63, %v18461_v41  ;;  %v13669_v47 = vadd.f32 %v13668_v27, %v13667_v43  ;;  %v13993_v35 = vpop.f32.mrf.mxu0  ;;  %v11779_v63 = vld [vmem:[%s14861_s16 + $0xe8] sm:$0xff] }
 0x58c   : > { %v13670_v49 = vpop.f32.mrf.mxu1  ;;  %v11838_v15 = vmax.f32 %v11806_v46, 0.0  ;;  %v11743_v53 = vadd.f32 %v17986_v42, %v11704_v5  ;;  %11899 = vst [vmem:[%s18035_s21 + $0xa8] sm:$0xff] %v11867_v36 }
 0x58d   : > { %v11705_v54 = vmul.f32 %v17967_v48, %v11602_v18  ;;  %v11525_v2 = vadd.f32 %v13989_v24, %v13669_v47  ;;  %v11532_v20 = vpop.f32.mrf.mxu0 }
 0x58e   : > { %v13671_v56 = vpop.f32.mrf.mxu1  ;;  %v11870_v6 = vmin.f32 %v11838_v15, 20.0  ;;  %v11807_v61 = vadd.f32 %v11775_v55, %v11743_v53  ;;  %v11781_v55 = vld [vmem:[%s14861_s16 + $0xf8] sm:$0xff] }
 0x58f   : > { %v11744_v60 = vadd.f32 %v17986_v42, %v11705_v54  ;;  %v11603_v21 = vadd.f32 %v11525_v2, %v18462_v45  ;;  %v13672_v39 = vadd.f32 %v13671_v56, %v13670_v49 }
 0x590   : > { %v13673_v51 = vpop.f32.mrf.mxu1  ;;  %11902 = vst [vmem:[%s18035_s21 + $0xc0] sm:$0xff] %v11870_v6  ;;  %v11839_v33 = vmax.f32 %v11807_v61, 0.0 }
 0x591   : > { %v11808_v11 = vadd.f32 %v11776_v31, %v11744_v60  ;;  %v11706_v44 = vmul.f32 %v17967_v48, %v11603_v21  ;;  %v11530_v19 = vadd.f32 %v13672_v39, %v11529_v62 }
 0x592   : > { %v13674_v40 = vpop.f32.mrf.mxu1  ;;  %v11871_v24 = vmin.f32 %v11839_v33, 20.0 }
 0x593   : > { %v11840_v28 = vmax.f32 %v11808_v11, 0.0  ;;  %v11745_v8 = vadd.f32 %v17986_v42, %v11706_v44  ;;  %v13675_v52 = vadd.f32 %v13674_v40, %v13673_v51  ;;  %v11604_v30 = vadd.f32 %v11530_v19, %v18463_v38 }
 0x594   : > { %v13676_v22 = vpop.f32.mrf.mxu1  ;;  %11903 = vst [vmem:[%s18035_s21 + $0xc8] sm:$0xff] %v11871_v24 }
 0x595   : > { %v11872_v12 = vmin.f32 %v11840_v28, 20.0  ;;  %v11809_v9 = vadd.f32 %v11777_v29, %v11745_v8  ;;  %v11533_v57 = vadd.f32 %v13675_v52, %v11532_v20  ;;  %v11707_v7 = vmul.f32 %v17967_v48, %v11604_v30 }
 0x596   : > { %v13677_v14 = vpop.f32.mrf.mxu1 }
 0x597   : > { %11904 = vst [vmem:[%s18035_s21 + $0xd0] sm:$0xff] %v11872_v12  ;;  %v11841_v4 = vmax.f32 %v11809_v9, 0.0  ;;  %v11605_v59 = vadd.f32 %v11533_v57, %v17942_v26  ;;  %v13678_v16 = vadd.f32 %v13677_v14, %v13676_v22  ;;  %v11746_v1 = vadd.f32 %v17986_v42, %v11707_v7 }
 0x598   : > { %v13679_v50 = vpop.f32.mrf.mxu1 }
 0x599   : > { %v11873_v10 = vmin.f32 %v11841_v4, 20.0  ;;  %v11708_v43 = vmul.f32 %v17967_v48, %v11605_v59  ;;  %v11538_v0 = vadd.f32 %v13992_v37, %v13678_v16  ;;  %v11810_v13 = vadd.f32 %v11778_v23, %v11746_v1  ;;  %v11780_v37 = vld [vmem:[%s14861_s16 + $0xf0] sm:$0xff]  ;;  %s11911_s16 = scalar_lea.sflag [#allocation7], %s14855_s14 }
 0x59a   : > { %v13680_v32 = vpop.f32.mrf.mxu1 }
 0x59b   : > { %11905 = vst [vmem:[%s18035_s21 + $0xd8] sm:$0xff] %v11873_v10  ;;  %v11747_v34 = vadd.f32 %v17986_v42, %v11708_v43  ;;  %v11606_v3 = vadd.f32 %v11538_v0, %v17954_v58  ;;  %v13681_v26 = vadd.f32 %v13680_v32, %v13679_v50  ;;  %v11842_v17 = vmax.f32 %v11810_v13, 0.0 }
 0x59d   : > { %v11811_v27 = vadd.f32 %v11779_v63, %v11747_v34  ;;  %v11709_v62 = vmul.f32 %v17967_v48, %v11606_v3  ;;  %v11541_v41 = vadd.f32 %v13993_v35, %v13681_v26  ;;  %v11874_v18 = vmin.f32 %v11842_v17, 20.0 }
 0x59f   : > { %v11843_v46 = vmax.f32 %v11811_v27, 0.0  ;;  %v11748_v47 = vadd.f32 %v17986_v42, %v11709_v62  ;;  %v11607_v5 = vadd.f32 %v11541_v41, %v17972_v25  ;;  %11906 = vst [vmem:[%s18035_s21 + $0xe0] sm:$0xff] %v11874_v18 }
 0x5a1   : > { %v11875_v36 = vmin.f32 %v11843_v46, 20.0  ;;  %v11812_v58 = vadd.f32 %v11780_v37, %v11748_v47  ;;  %v11710_v49 = vmul.f32 %v17967_v48, %v11607_v5 }
 0x5a3   : > { %11907 = vst [vmem:[%s18035_s21 + $0xe8] sm:$0xff] %v11875_v36  ;;  %v11844_v54 = vmax.f32 %v11812_v58, 0.0  ;;  %v11749_v15 = vadd.f32 %v17986_v42, %v11710_v49 }
 0x5a5   : > { %v11876_v2 = vmin.f32 %v11844_v54, 20.0  ;;  %v11813_v53 = vadd.f32 %v11781_v55, %v11749_v15 }
 0x5a7   : > { %11908 = vst [vmem:[%s18035_s21 + $0xf0] sm:$0xff] %v11876_v2  ;;  %v11845_v31 = vmax.f32 %v11813_v53, 0.0 }
 0x5a9   : > { %v11877_v48 = vmin.f32 %v11845_v31, 20.0 }
 0x5ab   : > { %11909 = vst [vmem:[%s18035_s21 + $0xf8] sm:$0xff] %v11877_v48 }
 0x5ac   : > { %14627 = shalt.err (!%p14624_p5)
}
 0x5ad   : > { %s14628_s17 = scalar_lea.hbm %s18220_s23, 4096  ;;  %s14632_s15 = scalar_lea.hbm %s18274_s8, 8192 }
 0x5ae   : > { %p14629_p9 = scmp.ne.s32.totalorder %s18220_s23, %s14628_s17  ;;  %p14633_p6 = scmp.lt.s32.totalorder %s18220_s23, %s18274_s8 }
 0x5af   : > { %p14634_p8 = scmp.lt.s32.totalorder %s14632_s15, %s14628_s17 }
 0x5b0   : > { %p14630_p1 = pnand %p14629_p9, %p18464_p7 }
 0x5b1   : > { %p14635_p3 = por %p14634_p8, %p14633_p6 }
 0x5b2   : > { %p14631_p4 = pneg %p14630_p1 }
 0x5b4   : > { %p14636_p11 = pnand %p14635_p3, %p14631_p4 }
 0x5b6   : > { %14639 = shalt.err (!%p14636_p11)
}
 0x5b7   : > { %s14692_s24 = smov 128   ;;  %s14693_s13 = smov 8  }
 0x5b8   : > { %14001 = dma.vmem_to_hbm [thread:$0]  (%p18464_p7), %s18222_s22, 4096, %s18220_s23, %s11911_s16, %s14692_s24, %s14692_s24, %s14693_s13  }
 0x5b9 PF: > { %s11939_s18 = sand.u32 1, %s14670_s27   ;;  %p18465_p12 = scmp.ne.s32.totalorder %s18285_s12, 0 }
 0x5ba   : > { %p18466_p10 = scmp.ge.s32.totalorder %s14682_s30, 2  ;;  %s11940_s9 = scalar_lea.sflag [#allocation7], %s11939_s18 }
 0x5bc   : > { %p14012_p2 = pnand %p18466_p10, %p18465_p12 }
 0x5be   : > { %p14013_p13 = pneg %p14012_p2 }
 0x5c0   : > { %14665 = dma.done.wait (%p14013_p13), %s11940_s9, 4096  }
 0x5c1   : > { %14667 = vsyncadd (%p14013_p13), %s11940_s9, 4294963200  ;;  %s18467_s30 = sld [smem:[#allocation14_spill]]  ;;  %s18468_s27 = smov %s14674_s28 }
 0x5c2   : > { %s18469_s28 = smov %s14678_s29  ;;  %s18470_s29 = smov %s14810_s25 }
 0x5c7   : > { %p22_p0 = scmp.ge.s32.totalorder %s18467_s30, 4  }
 0x5c9   :  { %24 = sbr.rel (!%p22_p0) target bundleno = 8 (0x8), region = 109 }
 0x5ce   :  { %11945 = vsyncpa [#allocation6], 1 }
 0x5cf   :  { %11947 = vsyncpa [#allocation6 + $0x1], 1 }
 0x5d0   :  { %11948 = vsyncpa [#allocation9], 1 }
 0x5d1   :  { %11949 = vsyncpa [#allocation7], 1 }
 0x5d2   :  { %11951 = vsyncpa [#allocation7 + $0x1], 1 }

</bundles_post_ra>
